<compile_context>
chip_gen: v7x
topology: tpu7x:2x2x1
jax: 0.10.0
libtpu: 0.0.40
codegen_flags: <defaults>
</compile_context>

<pallas_src>
import jax
import jax.numpy as jnp
from jax import lax
from jax.experimental import pallas as pl
from jax.experimental.pallas import tpu as pltpu

# MXU / activation storage dtype (f32 accumulation everywhere). Set to
# jnp.float32 for bit-closer parity with the f32 PyTorch reference.
_MXU_DTYPE = jnp.bfloat16
_VMEM_LIMIT = 48 * 1024 * 1024  # < 64 MiB physical on v7x; raises scoped default


# ----------------------------- Conv3d kernel ---------------------------------

def _make_conv_kernel(H, W, cin, cout, with_stats, out_dtype, squeeze_out):
    """Build a conv kernel closure for one layer's static shapes/flags."""

    def kernel(x_ref, w_ref, *rest):
        if with_stats:
            o_ref, stats_ref, acc_ref = rest
        else:
            o_ref, acc_ref = rest
            stats_ref = None

        kd = pl.program_id(2)

        x = x_ref[0, 0]          # [H+2, W+2, cin]  (bf16, cast in wrapper)
        w = w_ref[0]             # [3, 3, cin, cout] (bf16, cast in wrapper)

        # Sum of the 9 (kh, kw) tap contributions for this kd, f32.
        contrib = None
        for kh in range(3):
            for kw in range(3):
                xs = x[kh:kh + H, kw:kw + W, :]            # [H, W, cin]
                wt = w[kh, kw]                             # [cin, cout]
                if cin == 1:
                    # conv1: lane-broadcast multiply on the VPU (f32 math);
                    # a K=1 GEMM would leave the MXU idle and be pure relayout.
                    c = xs.astype(jnp.float32) * wt.astype(jnp.float32)
                else:
                    c = jnp.dot(xs.reshape(H * W, cin), wt,
                                preferred_element_type=jnp.float32
                                ).reshape(H, W, cout)
                contrib = c if contrib is None else contrib + c

        @pl.when(kd == 0)
        def _():
            acc_ref[...] = contrib

        @pl.when(kd != 0)
        def _():
            acc_ref[...] += contrib

        @pl.when(kd == 2)
        def _():
            acc = acc_ref[...]                              # [H, W, cout] f32
            if with_stats:
                a2 = acc.reshape(H * W, cout)
                st = jnp.concatenate(
                    [jnp.sum(a2, axis=0, keepdims=True),
                     jnp.sum(a2 * a2, axis=0, keepdims=True)], axis=0)
                stats_ref[...] = st.reshape(1, 1, 2, cout)
            if squeeze_out:
                # Lane-dense store for Cout=1: output laid out [N, D, H, W].
                o_ref[...] = acc[:, :, 0].astype(out_dtype).reshape(1, 1, H, W)
            else:
                o_ref[...] = acc.astype(out_dtype).reshape(1, 1, H, W, cout)

    return kernel


def conv3d(x, w, *, out_dtype=_MXU_DTYPE, with_stats=False):
    """Conv3d(kernel=3, stride=1, padding=1, bias=False), channels-last.

    x: [N, D, H, W, Cin] (f32 or bf16)
    w: [Cout, Cin, 3, 3, 3] f32 (PyTorch layout)
    Returns y [N, D, H, W, Cout] in out_dtype, and (optionally) per-(n, d)
    BatchNorm partial stats [N, D, 2, Cout] f32 (sum; sum of squares).
    """
    N, D, H, W, cin = x.shape
    cout = w.shape[0]
    squeeze_out = (cout == 1)

    # bf16-early cast: activation is cast once (before padding), weights once.
    xp = jnp.pad(x.astype(_MXU_DTYPE),
                 ((0, 0), (1, 1), (1, 1), (1, 1), (0, 0)))
    wk = jnp.transpose(w, (2, 3, 4, 1, 0)).astype(_MXU_DTYPE)  # [3,3,3,ci,co]

    kernel = _make_conv_kernel(H, W, cin, cout, with_stats, out_dtype,
                               squeeze_out)

    if squeeze_out:
        y_shape = jax.ShapeDtypeStruct((N, D, H, W), out_dtype)
        y_spec = pl.BlockSpec((1, 1, H, W), lambda n, d, kd: (n, d, 0, 0))
    else:
        y_shape = jax.ShapeDtypeStruct((N, D, H, W, cout), out_dtype)
        y_spec = pl.BlockSpec((1, 1, H, W, cout),
                              lambda n, d, kd: (n, d, 0, 0, 0))

    if with_stats:
        out_shape = (y_shape, jax.ShapeDtypeStruct((N, D, 2, cout),
                                                   jnp.float32))
        out_specs = (y_spec, pl.BlockSpec((1, 1, 2, cout),
                                          lambda n, d, kd: (n, d, 0, 0)))
    else:
        out_shape = y_shape
        out_specs = y_spec

    res = pl.pallas_call(
        kernel,
        out_shape=out_shape,
        grid_spec=pltpu.PrefetchScalarGridSpec(
            num_scalar_prefetch=0,
            grid=(N, D, 3),                     # kd reduction axis last
            in_specs=[
                pl.BlockSpec((1, 1, H + 2, W + 2, cin),
                             lambda n, d, kd: (n, d + kd, 0, 0, 0)),
                pl.BlockSpec((1, 3, 3, cin, cout),
                             lambda n, d, kd: (kd, 0, 0, 0, 0)),
            ],
            out_specs=out_specs,
            scratch_shapes=[pltpu.VMEM((H, W, cout), jnp.float32)],
        ),
        compiler_params=pltpu.CompilerParams(
            dimension_semantics=("parallel", "parallel", "arbitrary"),
            vmem_limit_bytes=_VMEM_LIMIT),
    )(xp, wk)

    if with_stats:
        y, stats = res
    else:
        y, stats = res, None
    if squeeze_out:
        y = y[..., None]                        # back to [N, D, H, W, 1]
    return (y, stats) if with_stats else y


# ------------------------ BatchNorm3d + ReLU ----------------------------------

def _pick_row_tile(rows, row_bytes, target_bytes=4 << 20):
    """Largest row tile <= target that divides rows and obeys the sublane rule."""
    target = max(8, target_bytes // max(int(row_bytes), 1))
    if rows <= target:
        return rows
    t = min(target, rows)
    t -= t % 8
    while t >= 8:
        if rows % t == 0:
            return t
        t -= 8
    # TODO(synk): no multiple-of-8 divisor <= target; fall back to one block.
    return rows


def _bn_relu_kernel(x_ref, st_ref, o_ref):
    x = x_ref[...].astype(jnp.float32)          # f32 elementwise math (v5e)
    mean = st_ref[0:1, :]
    inv_std = st_ref[1:2, :]
    o_ref[...] = jnp.maximum((x - mean) * inv_std, 0.0).astype(o_ref.dtype)


def batchnorm_relu(y, partial_stats, *, out_dtype=_MXU_DTYPE, eps=1e-5):
    """BatchNorm3d(affine=False, track_running_stats=False) + ReLU.

    Batch statistics over (N, D, H, W) per channel, biased variance, eps=1e-5.
    y: [N, D, H, W, C]; partial_stats: [N, D, 2, C] (sum; sumsq from the conv
    epilogue). Returns same shape as y in out_dtype.
    Note: variance via E[x^2] - mean^2 in f32 (can cancel for huge M).
    """
    N, D, H, W, C = y.shape
    M = N * D * H * W

    s = jnp.sum(partial_stats, axis=(0, 1))     # [2, C], tiny XLA reduce
    mean = s[0] / M
    var = jnp.maximum(s[1] / M - mean * mean, 0.0)
    inv_std = lax.rsqrt(var + eps)

    # Lane-dense fold: pack k rows per vreg row so the last dim is >= 128.
    k = 1
    if C < 128 and (128 % C == 0) and (M % (128 // C) == 0):
        k = 128 // C
    rows, width = M // k, k * C
    y2 = y.reshape(rows, width)
    st = jnp.stack([jnp.tile(mean, k), jnp.tile(inv_std, k)], axis=0)  # [2, w]

    tr = _pick_row_tile(rows, width * jnp.dtype(y.dtype).itemsize)

    out = pl.pallas_call(
        _bn_relu_kernel,
        out_shape=jax.ShapeDtypeStruct((rows, width), out_dtype),
        grid_spec=pltpu.PrefetchScalarGridSpec(
            num_scalar_prefetch=0,
            grid=(rows // tr,),
            in_specs=[pl.BlockSpec((tr, width), lambda i: (i, 0)),
                      pl.BlockSpec((2, width), lambda i: (0, 0))],
            out_specs=pl.BlockSpec((tr, width), lambda i: (i, 0)),
        ),
        compiler_params=pltpu.CompilerParams(
            dimension_semantics=("parallel",),
            vmem_limit_bytes=_VMEM_LIMIT),
    )(y2, st)

    return out.reshape(N, D, H, W, C)


# ------------------------------- model ---------------------------------------

def _conv_bn_relu(w, x):
    """ConvBlock3D: Conv3d -> Dropout3d(p=0)=identity -> BN -> ReLU (mode=None)."""
    y, stats = conv3d(x, w, out_dtype=_MXU_DTYPE, with_stats=True)
    return batchnorm_relu(y, stats)


def convnet3d_forward(params, x_cl):
    """ConvNet3D forward, channels-last activations.

    x_cl: [N, D, H, W, Cin] -> [N, D, H, W, Cout] (f32).
    """
    h = _conv_bn_relu(params["conv1"], x_cl)           # conv1 -> bn1 -> relu
    for w in params["blocks"]:                         # (blocks-1) ConvBlock3D
        h = _conv_bn_relu(w, h)
    return conv3d(h, params["conv4"],                  # final conv, no bn/relu
                  out_dtype=jnp.float32, with_stats=False)


def _to_cl(t):     # [N, C, D, H, W] -> [N, D, H, W, C]
    return jnp.transpose(t, (0, 2, 3, 4, 1))


def _to_ncdhw(t):  # [N, D, H, W, C] -> [N, C, D, H, W]
    return jnp.transpose(t, (0, 4, 1, 2, 3))


def reconnet3d_forward(params, x, mode="dual"):
    """ReconNet3D forward. x: [N, C, D, H, W] (NCDHW, C=2 for dual/batch/channel)."""
    if mode == "dual":
        o1 = convnet3d_forward(params["IS1"], _to_cl(x[:, 0:1]))
        o2 = convnet3d_forward(params["IS2"], _to_cl(x[:, 1:2]))
        return jnp.concatenate([_to_ncdhw(o1), _to_ncdhw(o2)], axis=1)
    if mode == "batch":
        # Shared weights -> single batched pass (halves dispatch / weight DMA).
        n = x.shape[0]
        xb = jnp.concatenate([_to_cl(x[:, 0:1]), _to_cl(x[:, 1:2])], axis=0)
        ob = convnet3d_forward(params["IS1"], xb)
        return jnp.concatenate([_to_ncdhw(ob[:n]), _to_ncdhw(ob[n:])], axis=1)
    if mode in ("mag", "channel"):
        return _to_ncdhw(convnet3d_forward(params["IS1"], _to_cl(x)))
    raise ValueError(mode)


# ------------------------------- init ----------------------------------------

def init_convnet3d(key, in_ch=1, out_ch=1, features=64, blocks=3):
    n_convs = blocks + 1            # conv1, (blocks-1) ConvBlock3D, conv4
    keys = jax.random.split(key, n_convs)

    def conv_w(k, cout, cin):
        bound = (cin * 27) ** -0.5  # PyTorch default conv init bound
        return jax.random.uniform(k, (cout, cin, 3, 3, 3), jnp.float32,
                                  minval=-bound, maxval=bound)

    return {
        "conv1": conv_w(keys[0], features, in_ch),
        "blocks": [conv_w(keys[1 + i], features, features)
                   for i in range(blocks - 1)],
        "conv4": conv_w(keys[-1], out_ch, features),
    }


def init_reconnet3d(key, mode="dual", features=64, blocks=3):
    k1, k2 = jax.random.split(key)
    if mode == "dual":
        return {"IS1": init_convnet3d(k1, 1, 1, features, blocks),
                "IS2": init_convnet3d(k2, 1, 1, features, blocks)}
    if mode in ("mag", "batch"):
        return {"IS1": init_convnet3d(k1, 1, 1, features, blocks)}
    if mode == "channel":
        return {"IS1": init_convnet3d(k1, 2, 2, features, blocks)}
    raise ValueError(mode)


# ------------------------------- test -----------------------------------------

if __name__ == "__main__":
    key = jax.random.PRNGKey(0)
    kp, kx = jax.random.split(key)

    # Small shapes for the test (reference default is features=64, blocks=3).
    F = 8
    blocks = 2
    N, D, H, W = 1, 4, 16, 16

    params = init_reconnet3d(kp, mode="dual", features=F, blocks=blocks)
    x = jax.random.normal(kx, (N, 2, D, H, W), jnp.float32)

    fwd = jax.jit(lambda p, xx: reconnet3d_forward(p, xx, mode="dual"))
    out = jax.block_until_ready(fwd(params, x))

    assert out.shape == (N, 2, D, H, W), out.shape
    assert bool(jnp.all(jnp.isfinite(out)))
    print("KERNEL_OK")
</pallas_src>

<mosaic_0001>
module attributes {stable_mosaic.version = 11 : i64} {
  func.func @kernel(%arg0: i32, %arg1: i32, %arg2: i32, %arg3: memref<1x1x18x18x1xbf16, #tpu.memory_space<vmem>>, %arg4: memref<1x3x3x1x8xbf16, #tpu.memory_space<vmem>>, %arg5: memref<1x1x16x16x8xbf16, #tpu.memory_space<vmem>>, %arg6: memref<1x1x2x8xf32, #tpu.memory_space<vmem>>, %arg7: memref<16x16x8xf32, #tpu.memory_space<vmem>>) attributes {dimension_semantics = [#tpu.dimension_semantics<parallel>, #tpu.dimension_semantics<parallel>, #tpu.dimension_semantics<arbitrary>], iteration_bounds = array<i64: 1, 4, 3>, scalar_prefetch = 0 : i64, scratch_operands = 1 : i64, tpu.core_type = #tpu.core_type<tc>, window_params = [{transform_indices = @transform_0, window_bounds = array<i64: 1, 1, 18, 18, 1>}, {transform_indices = @transform_1, window_bounds = array<i64: 1, 3, 3, 1, 8>}, {transform_indices = @transform_2, window_bounds = array<i64: 1, 1, 16, 16, 8>}, {transform_indices = @transform_3, window_bounds = array<i64: 1, 1, 2, 8>}]} {
    %c0 = arith.constant 0 : index
    %c0_0 = arith.constant 0 : index
    %c0_1 = arith.constant 0 : index
    %c0_2 = arith.constant 0 : index
    %c0_3 = arith.constant 0 : index
    %0 = vector.load %arg3[%c0, %c0_0, %c0_1, %c0_2, %c0_3] : memref<1x1x18x18x1xbf16, #tpu.memory_space<vmem>>, vector<1x1x18x18x1xbf16>
    %1 = vector.shape_cast %0 : vector<1x1x18x18x1xbf16> to vector<18x18x1xbf16>
    %c0_4 = arith.constant 0 : index
    %c0_5 = arith.constant 0 : index
    %c0_6 = arith.constant 0 : index
    %c0_7 = arith.constant 0 : index
    %c0_8 = arith.constant 0 : index
    %2 = vector.load %arg4[%c0_4, %c0_5, %c0_6, %c0_7, %c0_8] : memref<1x3x3x1x8xbf16, #tpu.memory_space<vmem>>, vector<1x3x3x1x8xbf16>
    %3 = vector.shape_cast %2 : vector<1x3x3x1x8xbf16> to vector<3x3x1x8xbf16>
    %4 = vector.extract_strided_slice %1 {offsets = [0, 0, 0], sizes = [16, 16, 1], strides = [1, 1, 1]} : vector<18x18x1xbf16> to vector<16x16x1xbf16>
    %5 = vector.extract_strided_slice %3 {offsets = [0, 0, 0, 0], sizes = [1, 1, 1, 8], strides = [1, 1, 1, 1]} : vector<3x3x1x8xbf16> to vector<1x1x1x8xbf16>
    %6 = vector.shape_cast %5 : vector<1x1x1x8xbf16> to vector<1x8xbf16>
    %7 = arith.extf %4 : vector<16x16x1xbf16> to vector<16x16x1xf32>
    %8 = arith.extf %6 : vector<1x8xbf16> to vector<1x8xf32>
    %9 = vector.shape_cast %8 : vector<1x8xf32> to vector<1x1x8xf32>
    %10 = vector.broadcast %7 : vector<16x16x1xf32> to vector<16x16x8xf32>
    %11 = vector.broadcast %9 : vector<1x1x8xf32> to vector<16x16x8xf32>
    %12 = arith.mulf %10, %11 : vector<16x16x8xf32>
    %13 = vector.extract_strided_slice %1 {offsets = [0, 1, 0], sizes = [16, 16, 1], strides = [1, 1, 1]} : vector<18x18x1xbf16> to vector<16x16x1xbf16>
    %14 = vector.extract_strided_slice %3 {offsets = [0, 1, 0, 0], sizes = [1, 1, 1, 8], strides = [1, 1, 1, 1]} : vector<3x3x1x8xbf16> to vector<1x1x1x8xbf16>
    %15 = vector.shape_cast %14 : vector<1x1x1x8xbf16> to vector<1x8xbf16>
    %16 = arith.extf %13 : vector<16x16x1xbf16> to vector<16x16x1xf32>
    %17 = arith.extf %15 : vector<1x8xbf16> to vector<1x8xf32>
    %18 = vector.shape_cast %17 : vector<1x8xf32> to vector<1x1x8xf32>
    %19 = vector.broadcast %16 : vector<16x16x1xf32> to vector<16x16x8xf32>
    %20 = vector.broadcast %18 : vector<1x1x8xf32> to vector<16x16x8xf32>
    %21 = arith.mulf %19, %20 : vector<16x16x8xf32>
    %22 = arith.addf %12, %21 : vector<16x16x8xf32>
    %23 = vector.extract_strided_slice %1 {offsets = [0, 2, 0], sizes = [16, 16, 1], strides = [1, 1, 1]} : vector<18x18x1xbf16> to vector<16x16x1xbf16>
    %24 = vector.extract_strided_slice %3 {offsets = [0, 2, 0, 0], sizes = [1, 1, 1, 8], strides = [1, 1, 1, 1]} : vector<3x3x1x8xbf16> to vector<1x1x1x8xbf16>
    %25 = vector.shape_cast %24 : vector<1x1x1x8xbf16> to vector<1x8xbf16>
    %26 = arith.extf %23 : vector<16x16x1xbf16> to vector<16x16x1xf32>
    %27 = arith.extf %25 : vector<1x8xbf16> to vector<1x8xf32>
    %28 = vector.shape_cast %27 : vector<1x8xf32> to vector<1x1x8xf32>
    %29 = vector.broadcast %26 : vector<16x16x1xf32> to vector<16x16x8xf32>
    %30 = vector.broadcast %28 : vector<1x1x8xf32> to vector<16x16x8xf32>
    %31 = arith.mulf %29, %30 : vector<16x16x8xf32>
    %32 = arith.addf %22, %31 : vector<16x16x8xf32>
    %33 = vector.extract_strided_slice %1 {offsets = [1, 0, 0], sizes = [16, 16, 1], strides = [1, 1, 1]} : vector<18x18x1xbf16> to vector<16x16x1xbf16>
    %34 = vector.extract_strided_slice %3 {offsets = [1, 0, 0, 0], sizes = [1, 1, 1, 8], strides = [1, 1, 1, 1]} : vector<3x3x1x8xbf16> to vector<1x1x1x8xbf16>
    %35 = vector.shape_cast %34 : vector<1x1x1x8xbf16> to vector<1x8xbf16>
    %36 = arith.extf %33 : vector<16x16x1xbf16> to vector<16x16x1xf32>
    %37 = arith.extf %35 : vector<1x8xbf16> to vector<1x8xf32>
    %38 = vector.shape_cast %37 : vector<1x8xf32> to vector<1x1x8xf32>
    %39 = vector.broadcast %36 : vector<16x16x1xf32> to vector<16x16x8xf32>
    %40 = vector.broadcast %38 : vector<1x1x8xf32> to vector<16x16x8xf32>
    %41 = arith.mulf %39, %40 : vector<16x16x8xf32>
    %42 = arith.addf %32, %41 : vector<16x16x8xf32>
    %43 = vector.extract_strided_slice %1 {offsets = [1, 1, 0], sizes = [16, 16, 1], strides = [1, 1, 1]} : vector<18x18x1xbf16> to vector<16x16x1xbf16>
    %44 = vector.extract_strided_slice %3 {offsets = [1, 1, 0, 0], sizes = [1, 1, 1, 8], strides = [1, 1, 1, 1]} : vector<3x3x1x8xbf16> to vector<1x1x1x8xbf16>
    %45 = vector.shape_cast %44 : vector<1x1x1x8xbf16> to vector<1x8xbf16>
    %46 = arith.extf %43 : vector<16x16x1xbf16> to vector<16x16x1xf32>
    %47 = arith.extf %45 : vector<1x8xbf16> to vector<1x8xf32>
    %48 = vector.shape_cast %47 : vector<1x8xf32> to vector<1x1x8xf32>
    %49 = vector.broadcast %46 : vector<16x16x1xf32> to vector<16x16x8xf32>
    %50 = vector.broadcast %48 : vector<1x1x8xf32> to vector<16x16x8xf32>
    %51 = arith.mulf %49, %50 : vector<16x16x8xf32>
    %52 = arith.addf %42, %51 : vector<16x16x8xf32>
    %53 = vector.extract_strided_slice %1 {offsets = [1, 2, 0], sizes = [16, 16, 1], strides = [1, 1, 1]} : vector<18x18x1xbf16> to vector<16x16x1xbf16>
    %54 = vector.extract_strided_slice %3 {offsets = [1, 2, 0, 0], sizes = [1, 1, 1, 8], strides = [1, 1, 1, 1]} : vector<3x3x1x8xbf16> to vector<1x1x1x8xbf16>
    %55 = vector.shape_cast %54 : vector<1x1x1x8xbf16> to vector<1x8xbf16>
    %56 = arith.extf %53 : vector<16x16x1xbf16> to vector<16x16x1xf32>
    %57 = arith.extf %55 : vector<1x8xbf16> to vector<1x8xf32>
    %58 = vector.shape_cast %57 : vector<1x8xf32> to vector<1x1x8xf32>
    %59 = vector.broadcast %56 : vector<16x16x1xf32> to vector<16x16x8xf32>
    %60 = vector.broadcast %58 : vector<1x1x8xf32> to vector<16x16x8xf32>
    %61 = arith.mulf %59, %60 : vector<16x16x8xf32>
    %62 = arith.addf %52, %61 : vector<16x16x8xf32>
    %63 = vector.extract_strided_slice %1 {offsets = [2, 0, 0], sizes = [16, 16, 1], strides = [1, 1, 1]} : vector<18x18x1xbf16> to vector<16x16x1xbf16>
    %64 = vector.extract_strided_slice %3 {offsets = [2, 0, 0, 0], sizes = [1, 1, 1, 8], strides = [1, 1, 1, 1]} : vector<3x3x1x8xbf16> to vector<1x1x1x8xbf16>
    %65 = vector.shape_cast %64 : vector<1x1x1x8xbf16> to vector<1x8xbf16>
    %66 = arith.extf %63 : vector<16x16x1xbf16> to vector<16x16x1xf32>
    %67 = arith.extf %65 : vector<1x8xbf16> to vector<1x8xf32>
    %68 = vector.shape_cast %67 : vector<1x8xf32> to vector<1x1x8xf32>
    %69 = vector.broadcast %66 : vector<16x16x1xf32> to vector<16x16x8xf32>
    %70 = vector.broadcast %68 : vector<1x1x8xf32> to vector<16x16x8xf32>
    %71 = arith.mulf %69, %70 : vector<16x16x8xf32>
    %72 = arith.addf %62, %71 : vector<16x16x8xf32>
    %73 = vector.extract_strided_slice %1 {offsets = [2, 1, 0], sizes = [16, 16, 1], strides = [1, 1, 1]} : vector<18x18x1xbf16> to vector<16x16x1xbf16>
    %74 = vector.extract_strided_slice %3 {offsets = [2, 1, 0, 0], sizes = [1, 1, 1, 8], strides = [1, 1, 1, 1]} : vector<3x3x1x8xbf16> to vector<1x1x1x8xbf16>
    %75 = vector.shape_cast %74 : vector<1x1x1x8xbf16> to vector<1x8xbf16>
    %76 = arith.extf %73 : vector<16x16x1xbf16> to vector<16x16x1xf32>
    %77 = arith.extf %75 : vector<1x8xbf16> to vector<1x8xf32>
    %78 = vector.shape_cast %77 : vector<1x8xf32> to vector<1x1x8xf32>
    %79 = vector.broadcast %76 : vector<16x16x1xf32> to vector<16x16x8xf32>
    %80 = vector.broadcast %78 : vector<1x1x8xf32> to vector<16x16x8xf32>
    %81 = arith.mulf %79, %80 : vector<16x16x8xf32>
    %82 = arith.addf %72, %81 : vector<16x16x8xf32>
    %83 = vector.extract_strided_slice %1 {offsets = [2, 2, 0], sizes = [16, 16, 1], strides = [1, 1, 1]} : vector<18x18x1xbf16> to vector<16x16x1xbf16>
    %84 = vector.extract_strided_slice %3 {offsets = [2, 2, 0, 0], sizes = [1, 1, 1, 8], strides = [1, 1, 1, 1]} : vector<3x3x1x8xbf16> to vector<1x1x1x8xbf16>
    %85 = vector.shape_cast %84 : vector<1x1x1x8xbf16> to vector<1x8xbf16>
    %86 = arith.extf %83 : vector<16x16x1xbf16> to vector<16x16x1xf32>
    %87 = arith.extf %85 : vector<1x8xbf16> to vector<1x8xf32>
    %88 = vector.shape_cast %87 : vector<1x8xf32> to vector<1x1x8xf32>
    %89 = vector.broadcast %86 : vector<16x16x1xf32> to vector<16x16x8xf32>
    %90 = vector.broadcast %88 : vector<1x1x8xf32> to vector<16x16x8xf32>
    %91 = arith.mulf %89, %90 : vector<16x16x8xf32>
    %92 = arith.addf %82, %91 : vector<16x16x8xf32>
    %c0_i32 = arith.constant 0 : i32
    %93 = arith.cmpi eq, %arg2, %c0_i32 : i32
    %94 = arith.extui %93 : i1 to i32
    %c0_i32_9 = arith.constant 0 : i32
    %95 = arith.cmpi ne, %94, %c0_i32_9 : i32
    scf.if %95 {
      %c0_13 = arith.constant 0 : index
      %c0_14 = arith.constant 0 : index
      %c0_15 = arith.constant 0 : index
      %102 = vector.load %arg7[%c0_13, %c0_14, %c0_15] : memref<16x16x8xf32, #tpu.memory_space<vmem>>, vector<16x16x8xf32>
      tpu.vector_store %arg7[%c0_13, %c0_14, %c0_15], %92 {strides = array<i32>} : memref<16x16x8xf32, #tpu.memory_space<vmem>>, vector<16x16x8xf32>,
    } else {
    }
    %c0_i32_10 = arith.constant 0 : i32
    %96 = arith.cmpi ne, %arg2, %c0_i32_10 : i32
    %97 = arith.extui %96 : i1 to i32
    %c0_i32_11 = arith.constant 0 : i32
    %98 = arith.cmpi ne, %97, %c0_i32_11 : i32
    scf.if %98 {
      %c0_13 = arith.constant 0 : index
      %c0_14 = arith.constant 0 : index
      %c0_15 = arith.constant 0 : index
      %102 = vector.load %arg7[%c0_13, %c0_14, %c0_15] : memref<16x16x8xf32, #tpu.memory_space<vmem>>, vector<16x16x8xf32>
      %103 = arith.addf %102, %92 : vector<16x16x8xf32>
      %c0_16 = arith.constant 0 : index
      %c0_17 = arith.constant 0 : index
      %c0_18 = arith.constant 0 : index
      %104 = vector.load %arg7[%c0_16, %c0_17, %c0_18] : memref<16x16x8xf32, #tpu.memory_space<vmem>>, vector<16x16x8xf32>
      tpu.vector_store %arg7[%c0_16, %c0_17, %c0_18], %103 {strides = array<i32>} : memref<16x16x8xf32, #tpu.memory_space<vmem>>, vector<16x16x8xf32>,
    } else {
    }
    %c2_i32 = arith.constant 2 : i32
    %99 = arith.cmpi eq, %arg2, %c2_i32 : i32
    %100 = arith.extui %99 : i1 to i32
    %c0_i32_12 = arith.constant 0 : i32
    %101 = arith.cmpi ne, %100, %c0_i32_12 : i32
    scf.if %101 {
      %c0_13 = arith.constant 0 : index
      %c0_14 = arith.constant 0 : index
      %c0_15 = arith.constant 0 : index
      %102 = vector.load %arg7[%c0_13, %c0_14, %c0_15] : memref<16x16x8xf32, #tpu.memory_space<vmem>>, vector<16x16x8xf32>
      %103 = vector.shape_cast %102 : vector<16x16x8xf32> to vector<256x8xf32>
      %cst = arith.constant dense<0.000000e+00> : vector<8xf32>
      %104 = vector.multi_reduction <add>, %103, %cst [0] : vector<256x8xf32> to vector<8xf32>
      %105 = vector.shape_cast %104 : vector<8xf32> to vector<1x8xf32>
      %106 = arith.mulf %103, %103 : vector<256x8xf32>
      %cst_16 = arith.constant dense<0.000000e+00> : vector<8xf32>
      %107 = vector.multi_reduction <add>, %106, %cst_16 [0] : vector<256x8xf32> to vector<8xf32>
      %108 = vector.shape_cast %107 : vector<8xf32> to vector<1x8xf32>
      %109 = tpu.concatenate %105, %108 in 0 : vector<1x8xf32>, vector<1x8xf32> -> vector<2x8xf32>
      %110 = vector.shape_cast %109 : vector<2x8xf32> to vector<1x1x2x8xf32>
      %c0_17 = arith.constant 0 : index
      %c0_18 = arith.constant 0 : index
      %c0_19 = arith.constant 0 : index
      %c0_20 = arith.constant 0 : index
      %111 = vector.load %arg6[%c0_17, %c0_18, %c0_19, %c0_20] : memref<1x1x2x8xf32, #tpu.memory_space<vmem>>, vector<1x1x2x8xf32>
      tpu.vector_store %arg6[%c0_17, %c0_18, %c0_19, %c0_20], %110 {strides = array<i32>} : memref<1x1x2x8xf32, #tpu.memory_space<vmem>>, vector<1x1x2x8xf32>,
      %112 = arith.truncf %102 : vector<16x16x8xf32> to vector<16x16x8xbf16>
      %113 = vector.shape_cast %112 : vector<16x16x8xbf16> to vector<1x1x16x16x8xbf16>
      %c0_21 = arith.constant 0 : index
      %c0_22 = arith.constant 0 : index
      %c0_23 = arith.constant 0 : index
      %c0_24 = arith.constant 0 : index
      %c0_25 = arith.constant 0 : index
      %114 = vector.load %arg5[%c0_21, %c0_22, %c0_23, %c0_24, %c0_25] : memref<1x1x16x16x8xbf16, #tpu.memory_space<vmem>>, vector<1x1x16x16x8xbf16>
      tpu.vector_store %arg5[%c0_21, %c0_22, %c0_23, %c0_24, %c0_25], %113 {strides = array<i32>} : memref<1x1x16x16x8xbf16, #tpu.memory_space<vmem>>, vector<1x1x16x16x8xbf16>,
    } else {
    }
    return
  }
  func.func @transform_0(%arg0: i32, %arg1: i32, %arg2: i32) -> (i32, i32, i32, i32, i32) {
    %0 = arith.addi %arg1, %arg2 : i32
    %c0_i32 = arith.constant 0 : i32
    %c0_i32_0 = arith.constant 0 : i32
    %c0_i32_1 = arith.constant 0 : i32
    %c0_i32_2 = arith.constant 0 : i32
    return %arg0, %0, %c0_i32, %c0_i32_0, %c0_i32_1 : i32, i32, i32, i32, i32
  }
  func.func @transform_1(%arg0: i32, %arg1: i32, %arg2: i32) -> (i32, i32, i32, i32, i32) {
    %c0_i32 = arith.constant 0 : i32
    %c0_i32_0 = arith.constant 0 : i32
    %c0_i32_1 = arith.constant 0 : i32
    %c0_i32_2 = arith.constant 0 : i32
    %c0_i32_3 = arith.constant 0 : i32
    return %arg2, %c0_i32, %c0_i32_0, %c0_i32_1, %c0_i32_2 : i32, i32, i32, i32, i32
  }
  func.func @transform_2(%arg0: i32, %arg1: i32, %arg2: i32) -> (i32, i32, i32, i32, i32) {
    %c0_i32 = arith.constant 0 : i32
    %c0_i32_0 = arith.constant 0 : i32
    %c0_i32_1 = arith.constant 0 : i32
    %c0_i32_2 = arith.constant 0 : i32
    return %arg0, %arg1, %c0_i32, %c0_i32_0, %c0_i32_1 : i32, i32, i32, i32, i32
  }
  func.func @transform_3(%arg0: i32, %arg1: i32, %arg2: i32) -> (i32, i32, i32, i32) {
    %c0_i32 = arith.constant 0 : i32
    %c0_i32_0 = arith.constant 0 : i32
    %c0_i32_1 = arith.constant 0 : i32
    return %arg0, %arg1, %c0_i32, %c0_i32_0 : i32, i32, i32, i32
  }
}

module attributes {stable_mosaic.version = 11 : i64} {
  func.func @_bn_relu_kernel(%arg0: i32, %arg1: memref<64x128xbf16, #tpu.memory_space<vmem>>, %arg2: memref<2x128xf32, #tpu.memory_space<vmem>>, %arg3: memref<64x128xbf16, #tpu.memory_space<vmem>>) attributes {dimension_semantics = [#tpu.dimension_semantics<parallel>], iteration_bounds = array<i64: 1>, scalar_prefetch = 0 : i64, scratch_operands = 0 : i64, tpu.core_type = #tpu.core_type<tc>, window_params = [{transform_indices = @transform_0, window_bounds = array<i64: 64, 128>}, {pipeline_mode = #tpu.pipeline_mode<synchronous>, transform_indices = @transform_1, window_bounds = array<i64: 2, 128>}, {transform_indices = @transform_2, window_bounds = array<i64: 64, 128>}]} {
    %c0 = arith.constant 0 : index
    %c0_0 = arith.constant 0 : index
    %0 = vector.load %arg1[%c0, %c0_0] : memref<64x128xbf16, #tpu.memory_space<vmem>>, vector<64x128xbf16>
    %1 = arith.extf %0 : vector<64x128xbf16> to vector<64x128xf32>
    %c0_1 = arith.constant 0 : index
    %c0_2 = arith.constant 0 : index
    %2 = vector.load %arg2[%c0_1, %c0_2] : memref<2x128xf32, #tpu.memory_space<vmem>>, vector<1x128xf32>
    %c1 = arith.constant 1 : index
    %c0_3 = arith.constant 0 : index
    %3 = vector.load %arg2[%c1, %c0_3] : memref<2x128xf32, #tpu.memory_space<vmem>>, vector<1x128xf32>
    %4 = vector.broadcast %2 : vector<1x128xf32> to vector<64x128xf32>
    %5 = arith.subf %1, %4 : vector<64x128xf32>
    %6 = vector.broadcast %3 : vector<1x128xf32> to vector<64x128xf32>
    %7 = arith.mulf %5, %6 : vector<64x128xf32>
    %cst = arith.constant 0.000000e+00 : f32
    %8 = vector.broadcast %cst : f32 to vector<64x128xf32>
    %9 = arith.maximumf %7, %8 : vector<64x128xf32>
    %10 = arith.truncf %9 : vector<64x128xf32> to vector<64x128xbf16>
    %c0_4 = arith.constant 0 : index
    %c0_5 = arith.constant 0 : index
    %11 = vector.load %arg3[%c0_4, %c0_5] : memref<64x128xbf16, #tpu.memory_space<vmem>>, vector<64x128xbf16>
    tpu.vector_store %arg3[%c0_4, %c0_5], %10 {strides = array<i32>} : memref<64x128xbf16, #tpu.memory_space<vmem>>, vector<64x128xbf16>,
    return
  }
  func.func @transform_0(%arg0: i32) -> (i32, i32) {
    %c0_i32 = arith.constant 0 : i32
    %c0_i32_0 = arith.constant 0 : i32
    return %arg0, %c0_i32 : i32, i32
  }
  func.func @transform_1(%arg0: i32) -> (i32, i32) {
    %c0_i32 = arith.constant 0 : i32
    %c0_i32_0 = arith.constant 0 : i32
    %c0_i32_1 = arith.constant 0 : i32
    return %c0_i32, %c0_i32_0 : i32, i32
  }
  func.func @transform_2(%arg0: i32) -> (i32, i32) {
    %c0_i32 = arith.constant 0 : i32
    %c0_i32_0 = arith.constant 0 : i32
    return %arg0, %c0_i32 : i32, i32
  }
}

module attributes {stable_mosaic.version = 11 : i64} {
  func.func @kernel(%arg0: i32, %arg1: i32, %arg2: i32, %arg3: memref<1x1x18x18x8xbf16, #tpu.memory_space<vmem>>, %arg4: memref<1x3x3x8x8xbf16, #tpu.memory_space<vmem>>, %arg5: memref<1x1x16x16x8xbf16, #tpu.memory_space<vmem>>, %arg6: memref<1x1x2x8xf32, #tpu.memory_space<vmem>>, %arg7: memref<16x16x8xf32, #tpu.memory_space<vmem>>) attributes {dimension_semantics = [#tpu.dimension_semantics<parallel>, #tpu.dimension_semantics<parallel>, #tpu.dimension_semantics<arbitrary>], iteration_bounds = array<i64: 1, 4, 3>, scalar_prefetch = 0 : i64, scratch_operands = 1 : i64, tpu.core_type = #tpu.core_type<tc>, window_params = [{transform_indices = @transform_0, window_bounds = array<i64: 1, 1, 18, 18, 8>}, {transform_indices = @transform_1, window_bounds = array<i64: 1, 3, 3, 8, 8>}, {transform_indices = @transform_2, window_bounds = array<i64: 1, 1, 16, 16, 8>}, {transform_indices = @transform_3, window_bounds = array<i64: 1, 1, 2, 8>}]} {
    %c0 = arith.constant 0 : index
    %c0_0 = arith.constant 0 : index
    %c0_1 = arith.constant 0 : index
    %c0_2 = arith.constant 0 : index
    %c0_3 = arith.constant 0 : index
    %0 = vector.load %arg3[%c0, %c0_0, %c0_1, %c0_2, %c0_3] : memref<1x1x18x18x8xbf16, #tpu.memory_space<vmem>>, vector<1x1x18x18x8xbf16>
    %1 = vector.shape_cast %0 : vector<1x1x18x18x8xbf16> to vector<18x18x8xbf16>
    %c0_4 = arith.constant 0 : index
    %c0_5 = arith.constant 0 : index
    %c0_6 = arith.constant 0 : index
    %c0_7 = arith.constant 0 : index
    %c0_8 = arith.constant 0 : index
    %2 = vector.load %arg4[%c0_4, %c0_5, %c0_6, %c0_7, %c0_8] : memref<1x3x3x8x8xbf16, #tpu.memory_space<vmem>>, vector<1x3x3x8x8xbf16>
    %3 = vector.shape_cast %2 : vector<1x3x3x8x8xbf16> to vector<3x3x8x8xbf16>
    %4 = vector.extract_strided_slice %1 {offsets = [0, 0, 0], sizes = [16, 16, 8], strides = [1, 1, 1]} : vector<18x18x8xbf16> to vector<16x16x8xbf16>
    %5 = vector.extract_strided_slice %3 {offsets = [0, 0, 0, 0], sizes = [1, 1, 8, 8], strides = [1, 1, 1, 1]} : vector<3x3x8x8xbf16> to vector<1x1x8x8xbf16>
    %6 = vector.shape_cast %5 : vector<1x1x8x8xbf16> to vector<8x8xbf16>
    %7 = vector.shape_cast %4 : vector<16x16x8xbf16> to vector<256x8xbf16>
    %cst = arith.constant dense<0.000000e+00> : vector<256x8xf32>
    %8 = tpu.matmul %7, %6, %cst {dimension_numbers = #tpu.dot_dimension_numbers<[1], [0], [0], [1], [0, 0, 1, 1], [], []>} : vector<256x8xbf16>, vector<8x8xbf16>, vector<256x8xf32> -> vector<256x8xf32>
    %9 = vector.shape_cast %8 : vector<256x8xf32> to vector<16x16x8xf32>
    %10 = vector.extract_strided_slice %1 {offsets = [0, 1, 0], sizes = [16, 16, 8], strides = [1, 1, 1]} : vector<18x18x8xbf16> to vector<16x16x8xbf16>
    %11 = vector.extract_strided_slice %3 {offsets = [0, 1, 0, 0], sizes = [1, 1, 8, 8], strides = [1, 1, 1, 1]} : vector<3x3x8x8xbf16> to vector<1x1x8x8xbf16>
    %12 = vector.shape_cast %11 : vector<1x1x8x8xbf16> to vector<8x8xbf16>
    %13 = vector.shape_cast %10 : vector<16x16x8xbf16> to vector<256x8xbf16>
    %cst_9 = arith.constant dense<0.000000e+00> : vector<256x8xf32>
    %14 = tpu.matmul %13, %12, %cst_9 {dimension_numbers = #tpu.dot_dimension_numbers<[1], [0], [0], [1], [0, 0, 1, 1], [], []>} : vector<256x8xbf16>, vector<8x8xbf16>, vector<256x8xf32> -> vector<256x8xf32>
    %15 = vector.shape_cast %14 : vector<256x8xf32> to vector<16x16x8xf32>
    %16 = arith.addf %9, %15 : vector<16x16x8xf32>
    %17 = vector.extract_strided_slice %1 {offsets = [0, 2, 0], sizes = [16, 16, 8], strides = [1, 1, 1]} : vector<18x18x8xbf16> to vector<16x16x8xbf16>
    %18 = vector.extract_strided_slice %3 {offsets = [0, 2, 0, 0], sizes = [1, 1, 8, 8], strides = [1, 1, 1, 1]} : vector<3x3x8x8xbf16> to vector<1x1x8x8xbf16>
    %19 = vector.shape_cast %18 : vector<1x1x8x8xbf16> to vector<8x8xbf16>
    %20 = vector.shape_cast %17 : vector<16x16x8xbf16> to vector<256x8xbf16>
    %cst_10 = arith.constant dense<0.000000e+00> : vector<256x8xf32>
    %21 = tpu.matmul %20, %19, %cst_10 {dimension_numbers = #tpu.dot_dimension_numbers<[1], [0], [0], [1], [0, 0, 1, 1], [], []>} : vector<256x8xbf16>, vector<8x8xbf16>, vector<256x8xf32> -> vector<256x8xf32>
    %22 = vector.shape_cast %21 : vector<256x8xf32> to vector<16x16x8xf32>
    %23 = arith.addf %16, %22 : vector<16x16x8xf32>
    %24 = vector.extract_strided_slice %1 {offsets = [1, 0, 0], sizes = [16, 16, 8], strides = [1, 1, 1]} : vector<18x18x8xbf16> to vector<16x16x8xbf16>
    %25 = vector.extract_strided_slice %3 {offsets = [1, 0, 0, 0], sizes = [1, 1, 8, 8], strides = [1, 1, 1, 1]} : vector<3x3x8x8xbf16> to vector<1x1x8x8xbf16>
    %26 = vector.shape_cast %25 : vector<1x1x8x8xbf16> to vector<8x8xbf16>
    %27 = vector.shape_cast %24 : vector<16x16x8xbf16> to vector<256x8xbf16>
    %cst_11 = arith.constant dense<0.000000e+00> : vector<256x8xf32>
    %28 = tpu.matmul %27, %26, %cst_11 {dimension_numbers = #tpu.dot_dimension_numbers<[1], [0], [0], [1], [0, 0, 1, 1], [], []>} : vector<256x8xbf16>, vector<8x8xbf16>, vector<256x8xf32> -> vector<256x8xf32>
    %29 = vector.shape_cast %28 : vector<256x8xf32> to vector<16x16x8xf32>
    %30 = arith.addf %23, %29 : vector<16x16x8xf32>
    %31 = vector.extract_strided_slice %1 {offsets = [1, 1, 0], sizes = [16, 16, 8], strides = [1, 1, 1]} : vector<18x18x8xbf16> to vector<16x16x8xbf16>
    %32 = vector.extract_strided_slice %3 {offsets = [1, 1, 0, 0], sizes = [1, 1, 8, 8], strides = [1, 1, 1, 1]} : vector<3x3x8x8xbf16> to vector<1x1x8x8xbf16>
    %33 = vector.shape_cast %32 : vector<1x1x8x8xbf16> to vector<8x8xbf16>
    %34 = vector.shape_cast %31 : vector<16x16x8xbf16> to vector<256x8xbf16>
    %cst_12 = arith.constant dense<0.000000e+00> : vector<256x8xf32>
    %35 = tpu.matmul %34, %33, %cst_12 {dimension_numbers = #tpu.dot_dimension_numbers<[1], [0], [0], [1], [0, 0, 1, 1], [], []>} : vector<256x8xbf16>, vector<8x8xbf16>, vector<256x8xf32> -> vector<256x8xf32>
    %36 = vector.shape_cast %35 : vector<256x8xf32> to vector<16x16x8xf32>
    %37 = arith.addf %30, %36 : vector<16x16x8xf32>
    %38 = vector.extract_strided_slice %1 {offsets = [1, 2, 0], sizes = [16, 16, 8], strides = [1, 1, 1]} : vector<18x18x8xbf16> to vector<16x16x8xbf16>
    %39 = vector.extract_strided_slice %3 {offsets = [1, 2, 0, 0], sizes = [1, 1, 8, 8], strides = [1, 1, 1, 1]} : vector<3x3x8x8xbf16> to vector<1x1x8x8xbf16>
    %40 = vector.shape_cast %39 : vector<1x1x8x8xbf16> to vector<8x8xbf16>
    %41 = vector.shape_cast %38 : vector<16x16x8xbf16> to vector<256x8xbf16>
    %cst_13 = arith.constant dense<0.000000e+00> : vector<256x8xf32>
    %42 = tpu.matmul %41, %40, %cst_13 {dimension_numbers = #tpu.dot_dimension_numbers<[1], [0], [0], [1], [0, 0, 1, 1], [], []>} : vector<256x8xbf16>, vector<8x8xbf16>, vector<256x8xf32> -> vector<256x8xf32>
    %43 = vector.shape_cast %42 : vector<256x8xf32> to vector<16x16x8xf32>
    %44 = arith.addf %37, %43 : vector<16x16x8xf32>
    %45 = vector.extract_strided_slice %1 {offsets = [2, 0, 0], sizes = [16, 16, 8], strides = [1, 1, 1]} : vector<18x18x8xbf16> to vector<16x16x8xbf16>
    %46 = vector.extract_strided_slice %3 {offsets = [2, 0, 0, 0], sizes = [1, 1, 8, 8], strides = [1, 1, 1, 1]} : vector<3x3x8x8xbf16> to vector<1x1x8x8xbf16>
    %47 = vector.shape_cast %46 : vector<1x1x8x8xbf16> to vector<8x8xbf16>
    %48 = vector.shape_cast %45 : vector<16x16x8xbf16> to vector<256x8xbf16>
    %cst_14 = arith.constant dense<0.000000e+00> : vector<256x8xf32>
    %49 = tpu.matmul %48, %47, %cst_14 {dimension_numbers = #tpu.dot_dimension_numbers<[1], [0], [0], [1], [0, 0, 1, 1], [], []>} : vector<256x8xbf16>, vector<8x8xbf16>, vector<256x8xf32> -> vector<256x8xf32>
    %50 = vector.shape_cast %49 : vector<256x8xf32> to vector<16x16x8xf32>
    %51 = arith.addf %44, %50 : vector<16x16x8xf32>
    %52 = vector.extract_strided_slice %1 {offsets = [2, 1, 0], sizes = [16, 16, 8], strides = [1, 1, 1]} : vector<18x18x8xbf16> to vector<16x16x8xbf16>
    %53 = vector.extract_strided_slice %3 {offsets = [2, 1, 0, 0], sizes = [1, 1, 8, 8], strides = [1, 1, 1, 1]} : vector<3x3x8x8xbf16> to vector<1x1x8x8xbf16>
    %54 = vector.shape_cast %53 : vector<1x1x8x8xbf16> to vector<8x8xbf16>
    %55 = vector.shape_cast %52 : vector<16x16x8xbf16> to vector<256x8xbf16>
    %cst_15 = arith.constant dense<0.000000e+00> : vector<256x8xf32>
    %56 = tpu.matmul %55, %54, %cst_15 {dimension_numbers = #tpu.dot_dimension_numbers<[1], [0], [0], [1], [0, 0, 1, 1], [], []>} : vector<256x8xbf16>, vector<8x8xbf16>, vector<256x8xf32> -> vector<256x8xf32>
    %57 = vector.shape_cast %56 : vector<256x8xf32> to vector<16x16x8xf32>
    %58 = arith.addf %51, %57 : vector<16x16x8xf32>
    %59 = vector.extract_strided_slice %1 {offsets = [2, 2, 0], sizes = [16, 16, 8], strides = [1, 1, 1]} : vector<18x18x8xbf16> to vector<16x16x8xbf16>
    %60 = vector.extract_strided_slice %3 {offsets = [2, 2, 0, 0], sizes = [1, 1, 8, 8], strides = [1, 1, 1, 1]} : vector<3x3x8x8xbf16> to vector<1x1x8x8xbf16>
    %61 = vector.shape_cast %60 : vector<1x1x8x8xbf16> to vector<8x8xbf16>
    %62 = vector.shape_cast %59 : vector<16x16x8xbf16> to vector<256x8xbf16>
    %cst_16 = arith.constant dense<0.000000e+00> : vector<256x8xf32>
    %63 = tpu.matmul %62, %61, %cst_16 {dimension_numbers = #tpu.dot_dimension_numbers<[1], [0], [0], [1], [0, 0, 1, 1], [], []>} : vector<256x8xbf16>, vector<8x8xbf16>, vector<256x8xf32> -> vector<256x8xf32>
    %64 = vector.shape_cast %63 : vector<256x8xf32> to vector<16x16x8xf32>
    %65 = arith.addf %58, %64 : vector<16x16x8xf32>
    %c0_i32 = arith.constant 0 : i32
    %66 = arith.cmpi eq, %arg2, %c0_i32 : i32
    %67 = arith.extui %66 : i1 to i32
    %c0_i32_17 = arith.constant 0 : i32
    %68 = arith.cmpi ne, %67, %c0_i32_17 : i32
    scf.if %68 {
      %c0_21 = arith.constant 0 : index
      %c0_22 = arith.constant 0 : index
      %c0_23 = arith.constant 0 : index
      %75 = vector.load %arg7[%c0_21, %c0_22, %c0_23] : memref<16x16x8xf32, #tpu.memory_space<vmem>>, vector<16x16x8xf32>
      tpu.vector_store %arg7[%c0_21, %c0_22, %c0_23], %65 {strides = array<i32>} : memref<16x16x8xf32, #tpu.memory_space<vmem>>, vector<16x16x8xf32>,
    } else {
    }
    %c0_i32_18 = arith.constant 0 : i32
    %69 = arith.cmpi ne, %arg2, %c0_i32_18 : i32
    %70 = arith.extui %69 : i1 to i32
    %c0_i32_19 = arith.constant 0 : i32
    %71 = arith.cmpi ne, %70, %c0_i32_19 : i32
    scf.if %71 {
      %c0_21 = arith.constant 0 : index
      %c0_22 = arith.constant 0 : index
      %c0_23 = arith.constant 0 : index
      %75 = vector.load %arg7[%c0_21, %c0_22, %c0_23] : memref<16x16x8xf32, #tpu.memory_space<vmem>>, vector<16x16x8xf32>
      %76 = arith.addf %75, %65 : vector<16x16x8xf32>
      %c0_24 = arith.constant 0 : index
      %c0_25 = arith.constant 0 : index
      %c0_26 = arith.constant 0 : index
      %77 = vector.load %arg7[%c0_24, %c0_25, %c0_26] : memref<16x16x8xf32, #tpu.memory_space<vmem>>, vector<16x16x8xf32>
      tpu.vector_store %arg7[%c0_24, %c0_25, %c0_26], %76 {strides = array<i32>} : memref<16x16x8xf32, #tpu.memory_space<vmem>>, vector<16x16x8xf32>,
    } else {
    }
    %c2_i32 = arith.constant 2 : i32
    %72 = arith.cmpi eq, %arg2, %c2_i32 : i32
    %73 = arith.extui %72 : i1 to i32
    %c0_i32_20 = arith.constant 0 : i32
    %74 = arith.cmpi ne, %73, %c0_i32_20 : i32
    scf.if %74 {
      %c0_21 = arith.constant 0 : index
      %c0_22 = arith.constant 0 : index
      %c0_23 = arith.constant 0 : index
      %75 = vector.load %arg7[%c0_21, %c0_22, %c0_23] : memref<16x16x8xf32, #tpu.memory_space<vmem>>, vector<16x16x8xf32>
      %76 = vector.shape_cast %75 : vector<16x16x8xf32> to vector<256x8xf32>
      %cst_24 = arith.constant dense<0.000000e+00> : vector<8xf32>
      %77 = vector.multi_reduction <add>, %76, %cst_24 [0] : vector<256x8xf32> to vector<8xf32>
      %78 = vector.shape_cast %77 : vector<8xf32> to vector<1x8xf32>
      %79 = arith.mulf %76, %76 : vector<256x8xf32>
      %cst_25 = arith.constant dense<0.000000e+00> : vector<8xf32>
      %80 = vector.multi_reduction <add>, %79, %cst_25 [0] : vector<256x8xf32> to vector<8xf32>
      %81 = vector.shape_cast %80 : vector<8xf32> to vector<1x8xf32>
      %82 = tpu.concatenate %78, %81 in 0 : vector<1x8xf32>, vector<1x8xf32> -> vector<2x8xf32>
      %83 = vector.shape_cast %82 : vector<2x8xf32> to vector<1x1x2x8xf32>
      %c0_26 = arith.constant 0 : index
      %c0_27 = arith.constant 0 : index
      %c0_28 = arith.constant 0 : index
      %c0_29 = arith.constant 0 : index
      %84 = vector.load %arg6[%c0_26, %c0_27, %c0_28, %c0_29] : memref<1x1x2x8xf32, #tpu.memory_space<vmem>>, vector<1x1x2x8xf32>
      tpu.vector_store %arg6[%c0_26, %c0_27, %c0_28, %c0_29], %83 {strides = array<i32>} : memref<1x1x2x8xf32, #tpu.memory_space<vmem>>, vector<1x1x2x8xf32>,
      %85 = arith.truncf %75 : vector<16x16x8xf32> to vector<16x16x8xbf16>
      %86 = vector.shape_cast %85 : vector<16x16x8xbf16> to vector<1x1x16x16x8xbf16>
      %c0_30 = arith.constant 0 : index
      %c0_31 = arith.constant 0 : index
      %c0_32 = arith.constant 0 : index
      %c0_33 = arith.constant 0 : index
      %c0_34 = arith.constant 0 : index
      %87 = vector.load %arg5[%c0_30, %c0_31, %c0_32, %c0_33, %c0_34] : memref<1x1x16x16x8xbf16, #tpu.memory_space<vmem>>, vector<1x1x16x16x8xbf16>
      tpu.vector_store %arg5[%c0_30, %c0_31, %c0_32, %c0_33, %c0_34], %86 {strides = array<i32>} : memref<1x1x16x16x8xbf16, #tpu.memory_space<vmem>>, vector<1x1x16x16x8xbf16>,
    } else {
    }
    return
  }
  func.func @transform_0(%arg0: i32, %arg1: i32, %arg2: i32) -> (i32, i32, i32, i32, i32) {
    %0 = arith.addi %arg1, %arg2 : i32
    %c0_i32 = arith.constant 0 : i32
    %c0_i32_0 = arith.constant 0 : i32
    %c0_i32_1 = arith.constant 0 : i32
    %c0_i32_2 = arith.constant 0 : i32
    return %arg0, %0, %c0_i32, %c0_i32_0, %c0_i32_1 : i32, i32, i32, i32, i32
  }
  func.func @transform_1(%arg0: i32, %arg1: i32, %arg2: i32) -> (i32, i32, i32, i32, i32) {
    %c0_i32 = arith.constant 0 : i32
    %c0_i32_0 = arith.constant 0 : i32
    %c0_i32_1 = arith.constant 0 : i32
    %c0_i32_2 = arith.constant 0 : i32
    %c0_i32_3 = arith.constant 0 : i32
    return %arg2, %c0_i32, %c0_i32_0, %c0_i32_1, %c0_i32_2 : i32, i32, i32, i32, i32
  }
  func.func @transform_2(%arg0: i32, %arg1: i32, %arg2: i32) -> (i32, i32, i32, i32, i32) {
    %c0_i32 = arith.constant 0 : i32
    %c0_i32_0 = arith.constant 0 : i32
    %c0_i32_1 = arith.constant 0 : i32
    %c0_i32_2 = arith.constant 0 : i32
    return %arg0, %arg1, %c0_i32, %c0_i32_0, %c0_i32_1 : i32, i32, i32, i32, i32
  }
  func.func @transform_3(%arg0: i32, %arg1: i32, %arg2: i32) -> (i32, i32, i32, i32) {
    %c0_i32 = arith.constant 0 : i32
    %c0_i32_0 = arith.constant 0 : i32
    %c0_i32_1 = arith.constant 0 : i32
    return %arg0, %arg1, %c0_i32, %c0_i32_0 : i32, i32, i32, i32
  }
}

module attributes {stable_mosaic.version = 11 : i64} {
  func.func @kernel(%arg0: i32, %arg1: i32, %arg2: i32, %arg3: memref<1x1x18x18x8xbf16, #tpu.memory_space<vmem>>, %arg4: memref<1x3x3x8x1xbf16, #tpu.memory_space<vmem>>, %arg5: memref<1x1x16x16xf32, #tpu.memory_space<vmem>>, %arg6: memref<16x16x1xf32, #tpu.memory_space<vmem>>) attributes {dimension_semantics = [#tpu.dimension_semantics<parallel>, #tpu.dimension_semantics<parallel>, #tpu.dimension_semantics<arbitrary>], iteration_bounds = array<i64: 1, 4, 3>, scalar_prefetch = 0 : i64, scratch_operands = 1 : i64, tpu.core_type = #tpu.core_type<tc>, window_params = [{transform_indices = @transform_0, window_bounds = array<i64: 1, 1, 18, 18, 8>}, {transform_indices = @transform_1, window_bounds = array<i64: 1, 3, 3, 8, 1>}, {transform_indices = @transform_2, window_bounds = array<i64: 1, 1, 16, 16>}]} {
    %c0 = arith.constant 0 : index
    %c0_0 = arith.constant 0 : index
    %c0_1 = arith.constant 0 : index
    %c0_2 = arith.constant 0 : index
    %c0_3 = arith.constant 0 : index
    %0 = vector.load %arg3[%c0, %c0_0, %c0_1, %c0_2, %c0_3] : memref<1x1x18x18x8xbf16, #tpu.memory_space<vmem>>, vector<1x1x18x18x8xbf16>
    %1 = vector.shape_cast %0 : vector<1x1x18x18x8xbf16> to vector<18x18x8xbf16>
    %c0_4 = arith.constant 0 : index
    %c0_5 = arith.constant 0 : index
    %c0_6 = arith.constant 0 : index
    %c0_7 = arith.constant 0 : index
    %c0_8 = arith.constant 0 : index
    %2 = vector.load %arg4[%c0_4, %c0_5, %c0_6, %c0_7, %c0_8] : memref<1x3x3x8x1xbf16, #tpu.memory_space<vmem>>, vector<1x3x3x8x1xbf16>
    %3 = vector.shape_cast %2 : vector<1x3x3x8x1xbf16> to vector<3x3x8x1xbf16>
    %4 = vector.extract_strided_slice %1 {offsets = [0, 0, 0], sizes = [16, 16, 8], strides = [1, 1, 1]} : vector<18x18x8xbf16> to vector<16x16x8xbf16>
    %5 = vector.extract_strided_slice %3 {offsets = [0, 0, 0, 0], sizes = [1, 1, 8, 1], strides = [1, 1, 1, 1]} : vector<3x3x8x1xbf16> to vector<1x1x8x1xbf16>
    %6 = vector.shape_cast %5 : vector<1x1x8x1xbf16> to vector<8x1xbf16>
    %7 = vector.shape_cast %4 : vector<16x16x8xbf16> to vector<256x8xbf16>
    %cst = arith.constant dense<0.000000e+00> : vector<256x1xf32>
    %8 = tpu.matmul %7, %6, %cst {dimension_numbers = #tpu.dot_dimension_numbers<[1], [0], [0], [1], [0, 0, 1, 1], [], []>} : vector<256x8xbf16>, vector<8x1xbf16>, vector<256x1xf32> -> vector<256x1xf32>
    %9 = vector.shape_cast %8 : vector<256x1xf32> to vector<16x16x1xf32>
    %10 = vector.extract_strided_slice %1 {offsets = [0, 1, 0], sizes = [16, 16, 8], strides = [1, 1, 1]} : vector<18x18x8xbf16> to vector<16x16x8xbf16>
    %11 = vector.extract_strided_slice %3 {offsets = [0, 1, 0, 0], sizes = [1, 1, 8, 1], strides = [1, 1, 1, 1]} : vector<3x3x8x1xbf16> to vector<1x1x8x1xbf16>
    %12 = vector.shape_cast %11 : vector<1x1x8x1xbf16> to vector<8x1xbf16>
    %13 = vector.shape_cast %10 : vector<16x16x8xbf16> to vector<256x8xbf16>
    %cst_9 = arith.constant dense<0.000000e+00> : vector<256x1xf32>
    %14 = tpu.matmul %13, %12, %cst_9 {dimension_numbers = #tpu.dot_dimension_numbers<[1], [0], [0], [1], [0, 0, 1, 1], [], []>} : vector<256x8xbf16>, vector<8x1xbf16>, vector<256x1xf32> -> vector<256x1xf32>
    %15 = vector.shape_cast %14 : vector<256x1xf32> to vector<16x16x1xf32>
    %16 = arith.addf %9, %15 : vector<16x16x1xf32>
    %17 = vector.extract_strided_slice %1 {offsets = [0, 2, 0], sizes = [16, 16, 8], strides = [1, 1, 1]} : vector<18x18x8xbf16> to vector<16x16x8xbf16>
    %18 = vector.extract_strided_slice %3 {offsets = [0, 2, 0, 0], sizes = [1, 1, 8, 1], strides = [1, 1, 1, 1]} : vector<3x3x8x1xbf16> to vector<1x1x8x1xbf16>
    %19 = vector.shape_cast %18 : vector<1x1x8x1xbf16> to vector<8x1xbf16>
    %20 = vector.shape_cast %17 : vector<16x16x8xbf16> to vector<256x8xbf16>
    %cst_10 = arith.constant dense<0.000000e+00> : vector<256x1xf32>
    %21 = tpu.matmul %20, %19, %cst_10 {dimension_numbers = #tpu.dot_dimension_numbers<[1], [0], [0], [1], [0, 0, 1, 1], [], []>} : vector<256x8xbf16>, vector<8x1xbf16>, vector<256x1xf32> -> vector<256x1xf32>
    %22 = vector.shape_cast %21 : vector<256x1xf32> to vector<16x16x1xf32>
    %23 = arith.addf %16, %22 : vector<16x16x1xf32>
    %24 = vector.extract_strided_slice %1 {offsets = [1, 0, 0], sizes = [16, 16, 8], strides = [1, 1, 1]} : vector<18x18x8xbf16> to vector<16x16x8xbf16>
    %25 = vector.extract_strided_slice %3 {offsets = [1, 0, 0, 0], sizes = [1, 1, 8, 1], strides = [1, 1, 1, 1]} : vector<3x3x8x1xbf16> to vector<1x1x8x1xbf16>
    %26 = vector.shape_cast %25 : vector<1x1x8x1xbf16> to vector<8x1xbf16>
    %27 = vector.shape_cast %24 : vector<16x16x8xbf16> to vector<256x8xbf16>
    %cst_11 = arith.constant dense<0.000000e+00> : vector<256x1xf32>
    %28 = tpu.matmul %27, %26, %cst_11 {dimension_numbers = #tpu.dot_dimension_numbers<[1], [0], [0], [1], [0, 0, 1, 1], [], []>} : vector<256x8xbf16>, vector<8x1xbf16>, vector<256x1xf32> -> vector<256x1xf32>
    %29 = vector.shape_cast %28 : vector<256x1xf32> to vector<16x16x1xf32>
    %30 = arith.addf %23, %29 : vector<16x16x1xf32>
    %31 = vector.extract_strided_slice %1 {offsets = [1, 1, 0], sizes = [16, 16, 8], strides = [1, 1, 1]} : vector<18x18x8xbf16> to vector<16x16x8xbf16>
    %32 = vector.extract_strided_slice %3 {offsets = [1, 1, 0, 0], sizes = [1, 1, 8, 1], strides = [1, 1, 1, 1]} : vector<3x3x8x1xbf16> to vector<1x1x8x1xbf16>
    %33 = vector.shape_cast %32 : vector<1x1x8x1xbf16> to vector<8x1xbf16>
    %34 = vector.shape_cast %31 : vector<16x16x8xbf16> to vector<256x8xbf16>
    %cst_12 = arith.constant dense<0.000000e+00> : vector<256x1xf32>
    %35 = tpu.matmul %34, %33, %cst_12 {dimension_numbers = #tpu.dot_dimension_numbers<[1], [0], [0], [1], [0, 0, 1, 1], [], []>} : vector<256x8xbf16>, vector<8x1xbf16>, vector<256x1xf32> -> vector<256x1xf32>
    %36 = vector.shape_cast %35 : vector<256x1xf32> to vector<16x16x1xf32>
    %37 = arith.addf %30, %36 : vector<16x16x1xf32>
    %38 = vector.extract_strided_slice %1 {offsets = [1, 2, 0], sizes = [16, 16, 8], strides = [1, 1, 1]} : vector<18x18x8xbf16> to vector<16x16x8xbf16>
    %39 = vector.extract_strided_slice %3 {offsets = [1, 2, 0, 0], sizes = [1, 1, 8, 1], strides = [1, 1, 1, 1]} : vector<3x3x8x1xbf16> to vector<1x1x8x1xbf16>
    %40 = vector.shape_cast %39 : vector<1x1x8x1xbf16> to vector<8x1xbf16>
    %41 = vector.shape_cast %38 : vector<16x16x8xbf16> to vector<256x8xbf16>
    %cst_13 = arith.constant dense<0.000000e+00> : vector<256x1xf32>
    %42 = tpu.matmul %41, %40, %cst_13 {dimension_numbers = #tpu.dot_dimension_numbers<[1], [0], [0], [1], [0, 0, 1, 1], [], []>} : vector<256x8xbf16>, vector<8x1xbf16>, vector<256x1xf32> -> vector<256x1xf32>
    %43 = vector.shape_cast %42 : vector<256x1xf32> to vector<16x16x1xf32>
    %44 = arith.addf %37, %43 : vector<16x16x1xf32>
    %45 = vector.extract_strided_slice %1 {offsets = [2, 0, 0], sizes = [16, 16, 8], strides = [1, 1, 1]} : vector<18x18x8xbf16> to vector<16x16x8xbf16>
    %46 = vector.extract_strided_slice %3 {offsets = [2, 0, 0, 0], sizes = [1, 1, 8, 1], strides = [1, 1, 1, 1]} : vector<3x3x8x1xbf16> to vector<1x1x8x1xbf16>
    %47 = vector.shape_cast %46 : vector<1x1x8x1xbf16> to vector<8x1xbf16>
    %48 = vector.shape_cast %45 : vector<16x16x8xbf16> to vector<256x8xbf16>
    %cst_14 = arith.constant dense<0.000000e+00> : vector<256x1xf32>
    %49 = tpu.matmul %48, %47, %cst_14 {dimension_numbers = #tpu.dot_dimension_numbers<[1], [0], [0], [1], [0, 0, 1, 1], [], []>} : vector<256x8xbf16>, vector<8x1xbf16>, vector<256x1xf32> -> vector<256x1xf32>
    %50 = vector.shape_cast %49 : vector<256x1xf32> to vector<16x16x1xf32>
    %51 = arith.addf %44, %50 : vector<16x16x1xf32>
    %52 = vector.extract_strided_slice %1 {offsets = [2, 1, 0], sizes = [16, 16, 8], strides = [1, 1, 1]} : vector<18x18x8xbf16> to vector<16x16x8xbf16>
    %53 = vector.extract_strided_slice %3 {offsets = [2, 1, 0, 0], sizes = [1, 1, 8, 1], strides = [1, 1, 1, 1]} : vector<3x3x8x1xbf16> to vector<1x1x8x1xbf16>
    %54 = vector.shape_cast %53 : vector<1x1x8x1xbf16> to vector<8x1xbf16>
    %55 = vector.shape_cast %52 : vector<16x16x8xbf16> to vector<256x8xbf16>
    %cst_15 = arith.constant dense<0.000000e+00> : vector<256x1xf32>
    %56 = tpu.matmul %55, %54, %cst_15 {dimension_numbers = #tpu.dot_dimension_numbers<[1], [0], [0], [1], [0, 0, 1, 1], [], []>} : vector<256x8xbf16>, vector<8x1xbf16>, vector<256x1xf32> -> vector<256x1xf32>
    %57 = vector.shape_cast %56 : vector<256x1xf32> to vector<16x16x1xf32>
    %58 = arith.addf %51, %57 : vector<16x16x1xf32>
    %59 = vector.extract_strided_slice %1 {offsets = [2, 2, 0], sizes = [16, 16, 8], strides = [1, 1, 1]} : vector<18x18x8xbf16> to vector<16x16x8xbf16>
    %60 = vector.extract_strided_slice %3 {offsets = [2, 2, 0, 0], sizes = [1, 1, 8, 1], strides = [1, 1, 1, 1]} : vector<3x3x8x1xbf16> to vector<1x1x8x1xbf16>
    %61 = vector.shape_cast %60 : vector<1x1x8x1xbf16> to vector<8x1xbf16>
    %62 = vector.shape_cast %59 : vector<16x16x8xbf16> to vector<256x8xbf16>
    %cst_16 = arith.constant dense<0.000000e+00> : vector<256x1xf32>
    %63 = tpu.matmul %62, %61, %cst_16 {dimension_numbers = #tpu.dot_dimension_numbers<[1], [0], [0], [1], [0, 0, 1, 1], [], []>} : vector<256x8xbf16>, vector<8x1xbf16>, vector<256x1xf32> -> vector<256x1xf32>
    %64 = vector.shape_cast %63 : vector<256x1xf32> to vector<16x16x1xf32>
    %65 = arith.addf %58, %64 : vector<16x16x1xf32>
    %c0_i32 = arith.constant 0 : i32
    %66 = arith.cmpi eq, %arg2, %c0_i32 : i32
    %67 = arith.extui %66 : i1 to i32
    %c0_i32_17 = arith.constant 0 : i32
    %68 = arith.cmpi ne, %67, %c0_i32_17 : i32
    scf.if %68 {
      %c0_21 = arith.constant 0 : index
      %c0_22 = arith.constant 0 : index
      %c0_23 = arith.constant 0 : index
      %75 = vector.load %arg6[%c0_21, %c0_22, %c0_23] : memref<16x16x1xf32, #tpu.memory_space<vmem>>, vector<16x16x1xf32>
      tpu.vector_store %arg6[%c0_21, %c0_22, %c0_23], %65 {strides = array<i32>} : memref<16x16x1xf32, #tpu.memory_space<vmem>>, vector<16x16x1xf32>,
    } else {
    }
    %c0_i32_18 = arith.constant 0 : i32
    %69 = arith.cmpi ne, %arg2, %c0_i32_18 : i32
    %70 = arith.extui %69 : i1 to i32
    %c0_i32_19 = arith.constant 0 : i32
    %71 = arith.cmpi ne, %70, %c0_i32_19 : i32
    scf.if %71 {
      %c0_21 = arith.constant 0 : index
      %c0_22 = arith.constant 0 : index
      %c0_23 = arith.constant 0 : index
      %75 = vector.load %arg6[%c0_21, %c0_22, %c0_23] : memref<16x16x1xf32, #tpu.memory_space<vmem>>, vector<16x16x1xf32>
      %76 = arith.addf %75, %65 : vector<16x16x1xf32>
      %c0_24 = arith.constant 0 : index
      %c0_25 = arith.constant 0 : index
      %c0_26 = arith.constant 0 : index
      %77 = vector.load %arg6[%c0_24, %c0_25, %c0_26] : memref<16x16x1xf32, #tpu.memory_space<vmem>>, vector<16x16x1xf32>
      tpu.vector_store %arg6[%c0_24, %c0_25, %c0_26], %76 {strides = array<i32>} : memref<16x16x1xf32, #tpu.memory_space<vmem>>, vector<16x16x1xf32>,
    } else {
    }
    %c2_i32 = arith.constant 2 : i32
    %72 = arith.cmpi eq, %arg2, %c2_i32 : i32
    %73 = arith.extui %72 : i1 to i32
    %c0_i32_20 = arith.constant 0 : i32
    %74 = arith.cmpi ne, %73, %c0_i32_20 : i32
    scf.if %74 {
      %c0_21 = arith.constant 0 : index
      %c0_22 = arith.constant 0 : index
      %c0_23 = arith.constant 0 : index
      %75 = vector.load %arg6[%c0_21, %c0_22, %c0_23] : memref<16x16x1xf32, #tpu.memory_space<vmem>>, vector<16x16x1xf32>
      %76 = vector.shape_cast %75 : vector<16x16x1xf32> to vector<16x16xf32>
      %77 = vector.shape_cast %76 : vector<16x16xf32> to vector<1x1x16x16xf32>
      %c0_24 = arith.constant 0 : index
      %c0_25 = arith.constant 0 : index
      %c0_26 = arith.constant 0 : index
      %c0_27 = arith.constant 0 : index
      %78 = vector.load %arg5[%c0_24, %c0_25, %c0_26, %c0_27] : memref<1x1x16x16xf32, #tpu.memory_space<vmem>>, vector<1x1x16x16xf32>
      tpu.vector_store %arg5[%c0_24, %c0_25, %c0_26, %c0_27], %77 {strides = array<i32>} : memref<1x1x16x16xf32, #tpu.memory_space<vmem>>, vector<1x1x16x16xf32>,
    } else {
    }
    return
  }
  func.func @transform_0(%arg0: i32, %arg1: i32, %arg2: i32) -> (i32, i32, i32, i32, i32) {
    %0 = arith.addi %arg1, %arg2 : i32
    %c0_i32 = arith.constant 0 : i32
    %c0_i32_0 = arith.constant 0 : i32
    %c0_i32_1 = arith.constant 0 : i32
    %c0_i32_2 = arith.constant 0 : i32
    return %arg0, %0, %c0_i32, %c0_i32_0, %c0_i32_1 : i32, i32, i32, i32, i32
  }
  func.func @transform_1(%arg0: i32, %arg1: i32, %arg2: i32) -> (i32, i32, i32, i32, i32) {
    %c0_i32 = arith.constant 0 : i32
    %c0_i32_0 = arith.constant 0 : i32
    %c0_i32_1 = arith.constant 0 : i32
    %c0_i32_2 = arith.constant 0 : i32
    %c0_i32_3 = arith.constant 0 : i32
    return %arg2, %c0_i32, %c0_i32_0, %c0_i32_1, %c0_i32_2 : i32, i32, i32, i32, i32
  }
  func.func @transform_2(%arg0: i32, %arg1: i32, %arg2: i32) -> (i32, i32, i32, i32) {
    %c0_i32 = arith.constant 0 : i32
    %c0_i32_0 = arith.constant 0 : i32
    %c0_i32_1 = arith.constant 0 : i32
    return %arg0, %arg1, %c0_i32, %c0_i32_0 : i32, i32, i32, i32
  }
}

</mosaic_0001>

<bundles_post_ra>
// kernel: tile.43
= control target key start
LH: loop header
LB: loop body
LE: loop exit
PB: predicated region body
PF: predicated region fallthrough
CT: control target
= control target key end

     0   :  { %s28_s0 = inlined_call_operand.vmem [shape: f32[8], index: 0, kind: input, shape index: {}]   ;;  %s29_s1 = inlined_call_operand.vmem [shape: f32[16,8], index: 1, kind: output, shape index: {}]  }
   0x1   :  { %v4_v0 = vld [vmem:[%s28_s0] ss:$0 sm:$0xff] }
   0x2   :  { %5 = vst [vmem:[%s29_s1] sm:$0xff] %v4_v0  ;;  %8 = vst [vmem:[%s29_s1 + $0x8] sm:$0xff] %v4_v0 }

// kernel: tile.48
= control target key start
LH: loop header
LB: loop body
LE: loop exit
PB: predicated region body
PF: predicated region fallthrough
CT: control target
= control target key end

     0   :  { %s131_s10 = smov 120   ;;  %s132_s11 = smov 104   ;;  %vm3_vm0 = vcmask 64512   ;;  %vm9_vm1 = vcmask 1048512   ;;  %vm15_vm2 = vcmask 982912   ;;  %vm21_vm3 = vcmask 917312   ;;  %s207_s0 = inlined_call_operand.vmem [shape: f32[16,8], index: 0, kind: input, shape index: {}]   ;;  %s208_s1 = inlined_call_operand.vmem [shape: f32[1,128], index: 1, kind: output, shape index: {}]  }
   0x1   :  { %v101_v0 = vld [vmem:[%s207_s0 + $0xf] sm:$0x1]   ;;  %v103_v1 = vld [vmem:[%s207_s0 + $0xd] sm:$0x1]   ;;  %v102_v2 = vld [vmem:[%s207_s0 + $0xe] sm:$0x1]  }
   0x2   :  { %7 = vrot.lane.b32.xlu0 %v101_v0, %s131_s10  ;;  %19 = vrot.lane.b32.xlu1 %v103_v1, %s132_s11  ;;  %v104_v3 = vld [vmem:[%s207_s0 + $0xc] sm:$0x1]   ;;  %s133_s16 = smov 112   ;;  %s134_s17 = smov 96   ;;  %v105_v4 = vld [vmem:[%s207_s0 + $0xb] sm:$0x1]  }
   0x3   :  { %v106_v5 = vld [vmem:[%s207_s0 + $0xa] sm:$0x1]   ;;  %v2_v6 = vld [vmem:[%s207_s0] sm:$0x1]   ;;  %s135_s24 = smov 88   ;;  %s136_s25 = smov 80  }
   0x4   :  { %4 = vst.msk [vmem:[#allocation0] sm:$0x1] %vm3_vm0, %v2_v6   ;;  %v107_v7 = vld [vmem:[%s207_s0 + $0x9] sm:$0x1]   ;;  %v108_v8 = vld [vmem:[%s207_s0 + $0x8] sm:$0x1]  }
   0x5   :  { %s137_s30 = smov 72   ;;  %s138_s2 = smov 64   ;;  %v109_v9 = vld [vmem:[%s207_s0 + $0x7] sm:$0x1]   ;;  %v110_v10 = vld [vmem:[%s207_s0 + $0x6] sm:$0x1]  }
   0x6   :  { %13 = vrot.lane.b32.xlu0 %v102_v2, %s133_s16  ;;  %25 = vrot.lane.b32.xlu1 %v104_v3, %s134_s17  ;;  %s139_s7 = smov 56   ;;  %s140_s8 = smov 48   ;;  %v111_v11 = vld [vmem:[%s207_s0 + $0x5] sm:$0x1]   ;;  %v112_v12 = vld [vmem:[%s207_s0 + $0x4] sm:$0x1]  }
   0x7   :  { %s141_s13 = smov 40   ;;  %s142_s14 = smov 32   ;;  %v113_v13 = vld [vmem:[%s207_s0 + $0x3] sm:$0x1]   ;;  %v114_v14 = vld [vmem:[%s207_s0 + $0x2] sm:$0x1]  }
   0x8   :  { %s143_s19 = smov 24   ;;  %s144_s20 = smov 16   ;;  %v115_v15 = vld [vmem:[%s207_s0 + $0x1] sm:$0x1]   ;;  %vm27_vm4 = vcmask 851712   ;;  %vm33_vm5 = vcmask 786112  }
   0x9   :  { %s145_s0 = smov 8   ;;  %vm39_vm6 = vcmask 720512   ;;  %vm45_vm7 = vcmask 654912   ;;  %vm51_vm8 = vcmask 589312   ;;  %vm57_vm9 = vcmask 523712  }
   0xa   :  { %31 = vrot.lane.b32.xlu0 %v105_v4, %s135_s24  ;;  %37 = vrot.lane.b32.xlu1 %v106_v5, %s136_s25  ;;  %vm63_vm10 = vcmask 458112   ;;  %vm69_vm11 = vcmask 392512   ;;  %vm75_vm12 = vcmask 326912   ;;  %vm81_vm13 = vcmask 261312  }
   0xb   :  { %vm87_vm14 = vcmask 195712   ;;  %vm93_vm15 = vcmask 130112  }
   0xe   :  { %43 = vrot.lane.b32.xlu0 %v107_v7, %s137_s30  ;;  %49 = vrot.lane.b32.xlu1 %v108_v8, %s138_s2 }
  0x12   :  { %55 = vrot.lane.b32.xlu0 %v109_v9, %s139_s7  ;;  %61 = vrot.lane.b32.xlu1 %v110_v10, %s140_s8 }
  0x16   :  { %67 = vrot.lane.b32.xlu0 %v111_v11, %s141_s13  ;;  %73 = vrot.lane.b32.xlu1 %v112_v12, %s142_s14 }
  0x1a   :  { %79 = vrot.lane.b32.xlu0 %v113_v13, %s143_s19  ;;  %85 = vrot.lane.b32.xlu1 %v114_v14, %s144_s20 }
  0x1e   :  { %91 = vrot.lane.b32.xlu0 %v115_v15, %s145_s0 }
  0x74   :  { %v8_v16 = vpop.permute.xlu0 %7   ;;  %v20_v17 = vpop.permute.xlu1 %19  }
  0x75   :  { %10 = vst.msk [vmem:[#allocation0] sm:$0x1] %vm9_vm1, %v8_v16  }
  0x78   :  { %v14_v18 = vpop.permute.xlu0 %13   ;;  %v26_v19 = vpop.permute.xlu1 %25  }
  0x79   :  { %16 = vst.msk [vmem:[#allocation0] sm:$0x1] %vm15_vm2, %v14_v18  }
  0x7a   :  { %22 = vst.msk [vmem:[#allocation0] sm:$0x1] %vm21_vm3, %v20_v17  }
  0x7b   :  { %28 = vst.msk [vmem:[#allocation0] sm:$0x1] %vm27_vm4, %v26_v19  }
  0x7c   :  { %v32_v20 = vpop.permute.xlu0 %31   ;;  %v38_v21 = vpop.permute.xlu1 %37  }
  0x7d   :  { %34 = vst.msk [vmem:[#allocation0] sm:$0x1] %vm33_vm5, %v32_v20  }
  0x7e   :  { %40 = vst.msk [vmem:[#allocation0] sm:$0x1] %vm39_vm6, %v38_v21  }
  0x80   :  { %v44_v22 = vpop.permute.xlu0 %43   ;;  %v50_v23 = vpop.permute.xlu1 %49  }
  0x81   :  { %46 = vst.msk [vmem:[#allocation0] sm:$0x1] %vm45_vm7, %v44_v22  }
  0x82   :  { %52 = vst.msk [vmem:[#allocation0] sm:$0x1] %vm51_vm8, %v50_v23  }
  0x84   :  { %v56_v24 = vpop.permute.xlu0 %55   ;;  %v62_v25 = vpop.permute.xlu1 %61  }
  0x85   :  { %58 = vst.msk [vmem:[#allocation0] sm:$0x1] %vm57_vm9, %v56_v24  }
  0x86   :  { %64 = vst.msk [vmem:[#allocation0] sm:$0x1] %vm63_vm10, %v62_v25  }
  0x88   :  { %v68_v26 = vpop.permute.xlu0 %67   ;;  %v74_v27 = vpop.permute.xlu1 %73  }
  0x89   :  { %70 = vst.msk [vmem:[#allocation0] sm:$0x1] %vm69_vm11, %v68_v26  }
  0x8a   :  { %76 = vst.msk [vmem:[#allocation0] sm:$0x1] %vm75_vm12, %v74_v27  }
  0x8c   :  { %v80_v28 = vpop.permute.xlu0 %79   ;;  %v86_v29 = vpop.permute.xlu1 %85  }
  0x8d   :  { %82 = vst.msk [vmem:[#allocation0] sm:$0x1] %vm81_vm13, %v80_v28  }
  0x8e   :  { %88 = vst.msk [vmem:[#allocation0] sm:$0x1] %vm87_vm14, %v86_v29  }
  0x90   :  { %v92_v30 = vpop.permute.xlu0 %91  }
  0x91   :  { %94 = vst.msk [vmem:[#allocation0] sm:$0x1] %vm93_vm15, %v92_v30  }
  0x98   :  { %v98_v31 = vld [vmem:[#allocation0] sm:$0x1] }
  0x99   :  { %100 = vst [vmem:[%s208_s1] sm:$0x1] %v98_v31 }

// kernel: _lambda_.11
= control target key start
LH: loop header
LB: loop body
LE: loop exit
PB: predicated region body
PF: predicated region fallthrough
CT: control target
= control target key end

     0   :  { %s210_s0 = inlined_call_operand.vmem [shape: bf16[64,128], index: 0, kind: input, shape index: {}]   ;;  %s211_s1 = inlined_call_operand.vmem [shape: f32[2,128], index: 1, kind: input, shape index: {}]   ;;  %s212_s2 = inlined_call_operand.vmem [shape: bf16[64,128], index: 2, kind: output, shape index: {}]  }
   0x1   :  { %v124_v0 = vld [vmem:[%s210_s0] sm:$0xff]   ;;  %v159_v4 = vld [vmem:[%s210_s0 + $0x8] sm:$0xff]   ;;  %v160_v5 = vld [vmem:[%s210_s0 + $0x10] sm:$0xff]  }
   0x2   :  { %v105_v1 = vld [vmem:[%s211_s1] ss:$0 sm:$0xff]  ;;  %v125_v2 = vunpack.c.l.bf16 %v124_v0  ;;  %v126_v3 = vunpack.c.h.bf16 %v124_v0  ;;  %v161_v6 = vld [vmem:[%s210_s0 + $0x18] sm:$0xff]   ;;  %v106_v7 = vld [vmem:[%s211_s1 + $0x1] ss:$0 sm:$0xff]  ;;  %v129_v8 = vunpack.c.l.bf16 %v159_v4  ;;  %v130_v9 = vunpack.c.h.bf16 %v159_v4 }
   0x3   :  { %v133_v10 = vunpack.c.l.bf16 %v160_v5  ;;  %v134_v11 = vunpack.c.h.bf16 %v160_v5  ;;  %v137_v14 = vunpack.c.l.bf16 %v161_v6  ;;  %v138_v15 = vunpack.c.h.bf16 %v161_v6 }
   0x4   :  { %v33_v12 = vsub.f32 %v125_v2, %v105_v1  ;;  %v34_v13 = vsub.f32 %v126_v3, %v105_v1  ;;  %v35_v16 = vsub.f32 %v129_v8, %v105_v1  ;;  %v36_v17 = vsub.f32 %v130_v9, %v105_v1 }
   0x5   :  { %v37_v18 = vsub.f32 %v133_v10, %v105_v1  ;;  %v38_v19 = vsub.f32 %v134_v11, %v105_v1  ;;  %v39_v22 = vsub.f32 %v137_v14, %v105_v1  ;;  %v40_v23 = vsub.f32 %v138_v15, %v105_v1 }
   0x6   :  { %v45_v20 = vmul.f32 %v106_v7, %v33_v12  ;;  %v46_v21 = vmul.f32 %v106_v7, %v34_v13  ;;  %v47_v24 = vmul.f32 %v106_v7, %v35_v16  ;;  %v48_v25 = vmul.f32 %v106_v7, %v36_v17 }
   0x7   :  { %v49_v26 = vmul.f32 %v106_v7, %v37_v18  ;;  %v50_v27 = vmul.f32 %v106_v7, %v38_v19  ;;  %v51_v30 = vmul.f32 %v106_v7, %v39_v22  ;;  %v52_v31 = vmul.f32 %v106_v7, %v40_v23 }
   0x8   :  { %v53_v28 = vmax.f32 %v45_v20, 0.0  ;;  %v54_v29 = vmax.f32 %v46_v21, 0.0  ;;  %v55_v32 = vmax.f32 %v47_v24, 0.0  ;;  %v56_v33 = vmax.f32 %v48_v25, 0.0 }
   0x9   :  { %v57_v34 = vmax.f32 %v49_v26, 0.0  ;;  %v58_v35 = vmax.f32 %v50_v27, 0.0  ;;  %v59_v37 = vmax.f32 %v51_v30, 0.0  ;;  %v60_v38 = vmax.f32 %v52_v31, 0.0 }
   0xa   :  { %v142_v36 = vpack.c.bf16 %v54_v29, %v53_v28  ;;  %v147_v39 = vpack.c.bf16 %v56_v33, %v55_v32 }
   0xb   :  { %v152_v40 = vpack.c.bf16 %v58_v35, %v57_v34  ;;  %v157_v41 = vpack.c.bf16 %v60_v38, %v59_v37 }
   0xc   :  { %143 = vst [vmem:[%s212_s2] sm:$0xff] %v142_v36   ;;  %162 = vst [vmem:[%s212_s2 + $0x8] sm:$0xff] %v147_v39  }
   0xd   :  { %163 = vst [vmem:[%s212_s2 + $0x10] sm:$0xff] %v152_v40   ;;  %164 = vst [vmem:[%s212_s2 + $0x18] sm:$0xff] %v157_v41  }

// kernel: _lambda_.10
= control target key start
LH: loop header
LB: loop body
LE: loop exit
PB: predicated region body
PF: predicated region fallthrough
CT: control target
= control target key end

     0   :  { %s3319_s12 = smov 0   ;;  %s3321_s13 = smov 0   ;;  %s5579_s0 = inlined_call_operand.vmem [shape: bf16[1,6,18,18,1], index: 0, kind: input, shape index: {}]   ;;  %s5580_s1 = inlined_call_operand.vmem [shape: bf16[3,3,3,1,8], index: 1, kind: input, shape index: {}]   ;;  %s5581_s2 = inlined_call_operand.vmem [shape: bf16[1,4,16,16,8], index: 2, kind: output, shape index: {0}]   ;;  %s5582_s3 = inlined_call_operand.vmem [shape: f32[1,4,2,8], index: 3, kind: output, shape index: {1}]  }
   0x1   :  { %s3323_s14 = smov 0   ;;  %s3325_s15 = smov 0  }
   0x2   :  { %s3327_s16 = smov 0  }
   0x3 LB: > { %s26_s17 = sadd.s32 1, %s3288_s14  ;;  %s29_s18 = sadd.s32 1, %s3292_s15  ;;  %s3296_s16 = sphi %s3327_s16, %s14_s16   ;;  %s3292_s15 = sphi %s3325_s15, %s5891_s15   ;;  %s3288_s14 = sphi %s3323_s14, %s5890_s14   ;;  %s3284_s13 = sphi %s3321_s13, %s5889_s13   ;;  %s3280_s12 = sphi %s3319_s12, %s5888_s12  }
   0x4   : > { %p27_p0 = scmp.ge.s32.totalorder %s26_s17, 3  ;;  %p2964_p1 = scmp.ge.s32.totalorder %s3296_s16, 1 }
   0x5   : > { %p182_p2 = scmp.lt.s32.totalorder %s3296_s16, 13 }
   0x6   : > { %s5893_s17 = smov (%p27_p0, %s26_s17), 0  ;;  %s5895_s18 = smov (!%p27_p0, %s29_s18), %s3292_s15 }
   0x7   : > { %p183_p3 = pnand %p2964_p1, %p182_p2  ;;  %p31_p4 = scmp.ge.s32.totalorder %s5895_s18, 4 }
   0x9   : > { %s5897_s18 = smov (%p31_p4, %s5895_s18), 0  ;;  %186 = sbr.rel (%p183_p3) target bundleno = 582 (0x246), region = 28 }
  0x10   : > { %s227_s19 = sadd.s32 %s3280_s12, %s3284_s13  ;;  %v3298_v0 = vmov 0   ;;  %p238_p6 = scmp.lt.s32.totalorder %s3280_s12, 2  ;;  %vm748_vm0 = vcmask 1046528   ;;  %vm994_vm1 = vcmask 1045504  }
  0x11   : > { %3137 = vset.pattern.permute.xlu1 %v3298_v0  ;;  %3126 = vset.pattern.permute.xlu0 %v3298_v0  ;;  %p230_p5 = scmp.lt.s32.totalorder %s227_s19, 5  ;;  %p244_p7 = scmp.lt.s32.totalorder %s3284_s13, 3 }
  0x12   : > { %s239_s24 = scalar_select %p238_p6, %s3280_s12, 2 }
  0x13   : > { %s5899_s19 = smov (!%p230_p5, %s227_s19), 5  ;;  %s5901_s13 = smov (!%p244_p7, %s3284_s13), 3 }
  0x14   : > { %s3083_s20 = smul.u32 216, %s5899_s19  ;;  %s3006_s29 = sshll.u32 %s5901_s13, 7 }
  0x15   : > { %s3084_s25 = smul.u32 9, %s239_s24  ;;  %s2968_s30 = sshll.u32 %s5901_s13, 1 }
  0x16   : > { %s3358_s23 = scalar_lea.vmem %s5579_s0, %s3083_s20  ;;  %s4467_s6 = scalar_lea.vmem %s5581_s2, %s3006_s29 }
  0x17   : > { %v3075_v1 = vld [vmem:[%s3358_s23 + $0x18] sm:$0xff]   ;;  %v3040_v2 = vld [vmem:[%s3358_s23] sm:$0xff]   ;;  %v262_v8 = vld [vmem:[%s3358_s23 + $0xc] sm:$0xff]   ;;  %s241_s28 = scalar_lea.vmem %s5580_s1, %s3084_s25  ;;  %s4472_s9 = scalar_lea.vmem %s5582_s3, %s2968_s30 }
  0x18   : > { %v268_v3 = vld [vmem:[%s3358_s23 + $0x24] sm:$0xff]   ;;  %v3045_v4 = vunpack.c.l.bf16 %v3075_v1  ;;  %v3046_v5 = vunpack.c.h.bf16 %v3075_v1  ;;  %v3041_v6 = vunpack.c.l.bf16 %v3040_v2  ;;  %v3042_v7 = vunpack.c.h.bf16 %v3040_v2  ;;  %v274_v9 = vld [vmem:[%s3358_s23 + $0x3c] sm:$0xff]   ;;  %v3076_v14 = vld [vmem:[%s3358_s23 + $0x30] sm:$0xff]   ;;  %p2969_p8 = scmp.ne.s32.totalorder %s3280_s12, 0 }
  0x19   : > { %v328_v10 = vunpack.c.l.bf16 %v268_v3  ;;  %v329_v11 = vunpack.c.h.bf16 %v268_v3  ;;  %v324_v12 = vunpack.c.l.bf16 %v262_v8  ;;  %v325_v13 = vunpack.c.h.bf16 %v262_v8  ;;  %v280_v23 = vld [vmem:[%s3358_s23 + $0x54] sm:$0xff]   ;;  %v3077_v24 = vld [vmem:[%s3358_s23 + $0x48] sm:$0xff]   ;;  %v3078_v32 = vld [vmem:[%s3358_s23 + $0x60] sm:$0xff]  }
  0x1a   : > { %v3138_v15 = vpack.i.bf16 %v3046_v5, %v3045_v4  ;;  %v3127_v16 = vpack.i.bf16 %v3042_v7, %v3041_v6  ;;  %v332_v17 = vunpack.c.l.bf16 %v274_v9  ;;  %v333_v18 = vunpack.c.h.bf16 %v274_v9  ;;  %v286_v31 = vld [vmem:[%s3358_s23 + $0x6c] sm:$0xff]   ;;  %v292_v39 = vld [vmem:[%s3358_s23 + $0x84] sm:$0xff]   ;;  %v3079_v40 = vld [vmem:[%s3358_s23 + $0x78] sm:$0xff]  }
  0x1b   : > { %v3143_v19 = vpack.i.bf16 %v329_v11, %v328_v10  ;;  %v3132_v20 = vpack.i.bf16 %v325_v13, %v324_v12  ;;  %v3049_v21 = vunpack.c.l.bf16 %v3076_v14  ;;  %v3050_v22 = vunpack.c.h.bf16 %v3076_v14  ;;  %v298_v47 = vld [vmem:[%s3358_s23 + $0x9c] sm:$0xff]   ;;  %v3080_v48 = vld [vmem:[%s3358_s23 + $0x90] sm:$0xff]   ;;  %v3081_v56 = vld [vmem:[%s3358_s23 + $0xa8] sm:$0xff]  }
  0x1c   : > { %3139 = vperm.xlu1 %3137, %v3138_v15   ;;  %3128 = vperm.xlu0 %3126, %v3127_v16   ;;  %v3153_v25 = vpack.i.bf16 %v333_v18, %v332_v17  ;;  %v336_v26 = vunpack.c.l.bf16 %v280_v23  ;;  %v337_v28 = vunpack.c.h.bf16 %v280_v23  ;;  %v3053_v29 = vunpack.c.l.bf16 %v3077_v24  ;;  %v304_v55 = vld [vmem:[%s3358_s23 + $0xb4] sm:$0xff]   ;;  %v267_v63 = vld [vmem:[%s3358_s23 + $0x20] sm:$0x1]  ;;  %v270_v0 = vld [vmem:[%s3358_s23 + $0x2c] sm:$0x1] }
  0x1d   : > { %v3148_v27 = vpack.i.bf16 %v3050_v22, %v3049_v21  ;;  %v3054_v30 = vunpack.c.h.bf16 %v3077_v24  ;;  %v340_v33 = vunpack.c.l.bf16 %v286_v31  ;;  %v341_v34 = vunpack.c.h.bf16 %v286_v31  ;;  %v261_v1 = vld [vmem:[%s3358_s23 + $0x8] sm:$0x1]  ;;  %v264_v2 = vld [vmem:[%s3358_s23 + $0x14] sm:$0x1]  ;;  %v279_v9 = vld [vmem:[%s3358_s23 + $0x50] sm:$0x1] }
  0x1e   : > { %v3163_v35 = vpack.i.bf16 %v337_v28, %v336_v26  ;;  %v3057_v37 = vunpack.c.l.bf16 %v3078_v32  ;;  %v3058_v38 = vunpack.c.h.bf16 %v3078_v32  ;;  %v344_v42 = vunpack.c.l.bf16 %v292_v39  ;;  %v282_v10 = vld [vmem:[%s3358_s23 + $0x5c] sm:$0x1]  ;;  %v273_v11 = vld [vmem:[%s3358_s23 + $0x38] sm:$0x1]  ;;  %v276_v12 = vld [vmem:[%s3358_s23 + $0x44] sm:$0x1] }
  0x1f   : > { %v3158_v36 = vpack.i.bf16 %v3054_v30, %v3053_v29  ;;  %v3173_v41 = vpack.i.bf16 %v341_v34, %v340_v33  ;;  %v345_v44 = vunpack.c.h.bf16 %v292_v39  ;;  %v3061_v45 = vunpack.c.l.bf16 %v3079_v40  ;;  %v285_v21 = vld [vmem:[%s3358_s23 + $0x68] sm:$0x1]  ;;  %v288_v22 = vld [vmem:[%s3358_s23 + $0x74] sm:$0x1]  ;;  %v303_v29 = vld [vmem:[%s3358_s23 + $0xb0] sm:$0x1] }
  0x20   : > { %3144 = vperm.xlu1 %3137, %v3143_v19   ;;  %3133 = vperm.xlu0 %3126, %v3132_v20   ;;  %v3168_v43 = vpack.i.bf16 %v3058_v38, %v3057_v37  ;;  %v3062_v46 = vunpack.c.h.bf16 %v3079_v40  ;;  %v348_v49 = vunpack.c.l.bf16 %v298_v47  ;;  %v349_v50 = vunpack.c.h.bf16 %v298_v47  ;;  %v291_v19 = vld [vmem:[%s3358_s23 + $0x80] sm:$0x1]  ;;  %v294_v20 = vld [vmem:[%s3358_s23 + $0x8c] sm:$0x1]  ;;  %v306_v30 = vld [vmem:[%s3358_s23 + $0xbc] sm:$0x1] }
  0x21   : > { %v3183_v51 = vpack.i.bf16 %v345_v44, %v344_v42  ;;  %v3065_v53 = vunpack.c.l.bf16 %v3080_v48  ;;  %v3066_v54 = vunpack.c.h.bf16 %v3080_v48  ;;  %v352_v58 = vunpack.c.l.bf16 %v304_v55  ;;  %v297_v31 = vld [vmem:[%s3358_s23 + $0x98] sm:$0x1]  ;;  %v300_v32 = vld [vmem:[%s3358_s23 + $0xa4] sm:$0x1]  ;;  %v309_v44 = vld [vmem:[%s3358_s23 + $0xc8] sm:$0x1] }
  0x22   : > { %v3178_v52 = vpack.i.bf16 %v3062_v46, %v3061_v45  ;;  %v3193_v57 = vpack.i.bf16 %v349_v50, %v348_v49  ;;  %v353_v60 = vunpack.c.h.bf16 %v304_v55  ;;  %v3069_v61 = vunpack.c.l.bf16 %v3081_v56  ;;  %v3082_v39 = vld [vmem:[%s3358_s23 + $0xc0] sm:$0xff]   ;;  %v310_v45 = vld [vmem:[%s3358_s23 + $0xcc] sm:$0xff]   ;;  %v312_v50 = vld [vmem:[%s3358_s23 + $0xd4] sm:$0x1] }
  0x23   : > { %v3188_v59 = vpack.i.bf16 %v3066_v54, %v3065_v53  ;;  %v3070_v62 = vunpack.c.h.bf16 %v3081_v56  ;;  %v553_v3 = vunpack.c.l.bf16 %v267_v63  ;;  %v554_v4 = vunpack.c.l.bf16 %v270_v0  ;;  %v314_v55 = vld [vmem:[%s241_s28 + $0x1] sm:$0x1]  ;;  %v315_v56 = vld [vmem:[%s241_s28 + $0x2] sm:$0x1]  ;;  %v320_v63 = vld [vmem:[%s241_s28 + $0x7] sm:$0x1] }
  0x24   : > { %3154 = vperm.xlu1 %3137, %v3153_v25   ;;  %3149 = vperm.xlu0 %3126, %v3148_v27   ;;  %v3203_v5 = vpack.i.bf16 %v353_v60, %v352_v58  ;;  %v551_v7 = vunpack.c.l.bf16 %v261_v1  ;;  %v552_v8 = vunpack.c.l.bf16 %v264_v2  ;;  %v557_v14 = vunpack.c.l.bf16 %v279_v9  ;;  %v321_v0 = vld [vmem:[%s241_s28 + $0x8] sm:$0x1]  ;;  %v316_v2 = vld [vmem:[%s241_s28 + $0x3] sm:$0x1] }
  0x25   : > { %v3198_v6 = vpack.i.bf16 %v3070_v62, %v3069_v61  ;;  %v3213_v13 = vpack.i.bf16 %v554_v4, %v553_v3  ;;  %v558_v16 = vunpack.c.l.bf16 %v282_v10  ;;  %v555_v17 = vunpack.c.l.bf16 %v273_v11  ;;  %v317_v61 = vld [vmem:[%s241_s28 + $0x4] sm:$0x1]  ;;  %v318_v62 = vld [vmem:[%s241_s28 + $0x5] sm:$0x1] }
  0x26   : > { %v3208_v15 = vpack.i.bf16 %v552_v8, %v551_v7  ;;  %v556_v18 = vunpack.c.l.bf16 %v276_v12  ;;  %v561_v23 = vunpack.c.l.bf16 %v291_v19  ;;  %v562_v24 = vunpack.c.l.bf16 %v294_v20  ;;  %v319_v7 = vld [vmem:[%s241_s28 + $0x6] sm:$0x1] }
  0x27   : > { %v3223_v25 = vpack.i.bf16 %v558_v16, %v557_v14  ;;  %v559_v27 = vunpack.c.l.bf16 %v285_v21  ;;  %v560_v28 = vunpack.c.l.bf16 %v288_v22  ;;  %v565_v34 = vunpack.c.l.bf16 %v303_v29 }
  0x28   : > { %3164 = vperm.xlu1 %3137, %v3163_v35   ;;  %3159 = vperm.xlu0 %3126, %v3158_v36   ;;  %v3218_v26 = vpack.i.bf16 %v556_v18, %v555_v17  ;;  %v3233_v33 = vpack.i.bf16 %v562_v24, %v561_v23  ;;  %v566_v36 = vunpack.c.l.bf16 %v306_v30  ;;  %v563_v37 = vunpack.c.l.bf16 %v297_v31 }
  0x29   : > { %v3228_v35 = vpack.i.bf16 %v560_v28, %v559_v27  ;;  %v564_v38 = vunpack.c.l.bf16 %v300_v32  ;;  %v3073_v42 = vunpack.c.l.bf16 %v3082_v39  ;;  %v1220_v46 = vunpack.c.l.bf16 %v309_v44 }
  0x2a   : > { %v3243_v40 = vpack.i.bf16 %v566_v36, %v565_v34  ;;  %v1716_v48 = vunpack.c.l.bf16 %v310_v45  ;;  %v1717_v49 = vunpack.c.h.bf16 %v310_v45  ;;  %v515_v53 = vlaneseq }
  0x2b   : > { %v893_v60 = vunpack.c.l.bf16 %v315_v56  ;;  %v1798_v9 = vunpack.c.l.bf16 %v320_v63  ;;  %v2048_v11 = vunpack.c.l.bf16 %v321_v0  ;;  %v1141_v14 = vunpack.c.l.bf16 %v316_v2 }
  0x2c   : > { %3174 = vperm.xlu1 %3137, %v3173_v41   ;;  %3169 = vperm.xlu0 %3126, %v3168_v43   ;;  %v3238_v41 = vpack.i.bf16 %v564_v38, %v563_v37  ;;  %v3074_v43 = vunpack.c.h.bf16 %v3082_v39  ;;  %v516_v54 = vshrl.u32 %v515_v53, 7  ;;  %v1718_v16 = vunpack.c.l.bf16 %v319_v7 }
  0x2d   : > { %vm2297_vm2 = vcmask (!%p2969_p8), 64512  }
  0x2e   : > { %v3248_v47 = vpack.i.bf16 %v3074_v43, %v3073_v42  ;;  %v517_v58 = vsub.s32 0, %v516_v54 }
  0x30   : > { %3184 = vperm.xlu1 %3137, %v3183_v51   ;;  %3179 = vperm.xlu0 %3126, %v3178_v52   ;;  %v1797_v51 = vunpack.c.l.bf16 %v312_v50  ;;  %v3253_v52 = vpack.i.bf16 %v1717_v49, %v1716_v48  ;;  %v3403_v4 = vrot.slane %v893_v60, %v517_v58  ;;  %v3419_v22 = vrot.slane %v1798_v9, %v517_v58 }
  0x31   : > { %v3425_v28 = vrot.slane %v2048_v11, %v517_v58  ;;  %v3428_v30 = vrot.slane %v1141_v14, %v517_v58  ;;  %v3432_v34 = vrot.slane %v1718_v16, %v517_v58 }
  0x32   : > { %5651 = vst [vmem:[#allocation4_spill] sm:$0xff] %v3403_v4 }
  0x33   : > { %5653 = vst [vmem:[#allocation6_spill] sm:$0xff] %v3428_v30 }
  0x34   : > { %3194 = vperm.xlu1 %3137, %v3193_v57   ;;  %3189 = vperm.xlu0 %3126, %v3188_v59   ;;  %v313_v57 = vld [vmem:[%s241_s28] sm:$0x1]  ;;  %v567_v59 = vunpack.c.l.bf16 %v314_v55 }
  0x35   : > { %v354_v1 = vunpack.c.l.bf16 %v313_v57 }
  0x36   : > { %v3401_v3 = vrot.slane %v567_v59, %v517_v58 }
  0x38   : > { %3204 = vperm.xlu1 %3137, %v3203_v5   ;;  %3199 = vperm.xlu0 %3126, %v3198_v6   ;;  %5650 = vst [vmem:[#allocation3_spill] sm:$0xff] %v3401_v3  ;;  %v1221_v5 = vunpack.c.l.bf16 %v317_v61  ;;  %v1471_v6 = vunpack.c.l.bf16 %v318_v62 }
  0x3a   : > { %v3407_v17 = vrot.slane %v1221_v5, %v517_v58  ;;  %v3409_v18 = vrot.slane %v1471_v6, %v517_v58 }
  0x3c   : > { %3214 = vperm.xlu1 %3137, %v3213_v13   ;;  %3209 = vperm.xlu0 %3126, %v3208_v15   ;;  %v3405_v15 = vrot.slane %v354_v1, %v517_v58 }
  0x3e   : > { %5652 = vst [vmem:[#allocation5_spill] sm:$0xff] %v3405_v15 }
  0x40   : > { %3224 = vperm.xlu1 %3137, %v3223_v25   ;;  %3219 = vperm.xlu0 %3126, %v3218_v26  }
  0x44   : > { %3234 = vperm.xlu1 %3137, %v3233_v33   ;;  %3229 = vperm.xlu0 %3126, %v3228_v35  }
  0x48   : > { %3244 = vperm.xlu1 %3137, %v3243_v40   ;;  %3239 = vperm.xlu0 %3126, %v3238_v41  }
  0x4c   : > { %1224 = vperm.xlu1 %3137, %v1220_v46   ;;  %3249 = vperm.xlu0 %3126, %v3248_v47  }
  0x50   : > { %1801 = vperm.xlu1 %3137, %v1797_v51   ;;  %3254 = vperm.xlu0 %3126, %v3253_v52  }
  0x9b   : > { %v3140_v8 = vpop.permute.xlu1 %3139  ;;  %v3129_v10 = vpop.permute.xlu0 %3128 }
  0x9c   : > { %v3131_v12 = vunpack.i.h.bf16 %v3129_v10  ;;  %v3130_v13 = vunpack.i.l.bf16 %v3129_v10  ;;  %v3417_v21 = vunpack.i.l.bf16 %v3140_v8  ;;  %v3423_v27 = vunpack.i.h.bf16 %v3140_v8 }
  0x9e   : > { %v3412_v19 = vmul.f32 %v3131_v12, %v3401_v3  ;;  %v3415_v20 = vmul.f32 %v3131_v12, %v3403_v4  ;;  %v652_v23 = vmul.f32 %v3130_v13, %v3401_v3  ;;  %v898_v24 = vmul.f32 %v3130_v13, %v3403_v4 }
  0x9f   : > { %v3145_v25 = vpop.permute.xlu1 %3144  ;;  %v3134_v26 = vpop.permute.xlu0 %3133  ;;  %v519_v36 = vmul.f32 %v3130_v13, %v3405_v15  ;;  %v3439_v39 = vmul.f32 %v3131_v12, %v3405_v15  ;;  %v523_v44 = vmul.f32 %v3417_v21, %v3405_v15  ;;  %v3456_v48 = vmul.f32 %v3423_v27, %v3405_v15 }
  0xa0   : > { %v5584_v29 = vrot.slane %v3412_v19, 1  ;;  %v749_v31 = vrot.slane %v652_v23, 1  ;;  %v3430_v32 = vunpack.i.l.bf16 %v3145_v25  ;;  %v3135_v33 = vunpack.i.l.bf16 %v3134_v26 }
  0xa1   : > { %v5583_v35 = vrot.slane %v3415_v20, 2  ;;  %v995_v37 = vrot.slane %v898_v24, 2  ;;  %v3436_v38 = vunpack.i.h.bf16 %v3145_v25  ;;  %v3449_v46 = vunpack.i.h.bf16 %v3134_v26 }
  0xa2   : > { %v751_v40 = vsel %vm748_vm0, %v749_v31, %v5584_v29  ;;  %v3445_v41 = vmul.f32 %v3135_v33, %v3401_v3  ;;  %v3452_v47 = vmul.f32 %v3135_v33, %v3403_v4  ;;  %v3459_v49 = vmul.f32 %v3135_v33, %v3407_v17 }
  0xa3   : > { %v3155_v42 = vpop.permute.xlu1 %3154  ;;  %v3150_v43 = vpop.permute.xlu0 %3149  ;;  %v861_v45 = vadd.f32 %v751_v40, %v519_v36  ;;  %v525_v50 = vmul.f32 %v3430_v32, %v3405_v15  ;;  %v658_v51 = vmul.f32 %v3417_v21, %v3401_v3  ;;  %v3467_v52 = vmul.f32 %v3423_v27, %v3401_v3 }
  0xa4   : > { %v997_v53 = vsel %vm994_vm1, %v995_v37, %v5583_v35  ;;  %v3473_v54 = vmul.f32 %v3135_v33, %v3405_v15  ;;  %v3476_v55 = vmul.f32 %v3135_v33, %v3409_v18  ;;  %v3480_v56 = vmul.f32 %v3436_v38, %v3405_v15 }
  0xa5   : > { %v1156_v58 = vmul.f32 %v3135_v33, %v3428_v30  ;;  %v661_v61 = vmul.f32 %v3430_v32, %v3401_v3  ;;  %v3488_v62 = vmul.f32 %v3436_v38, %v3401_v3  ;;  %v1107_v63 = vadd.f32 %v997_v53, %v861_v45 }
  0xa6   : > { %v3491_v1 = vunpack.i.h.bf16 %v3155_v42  ;;  %v3493_v2 = vunpack.i.l.bf16 %v3155_v42  ;;  %v3496_v6 = vunpack.i.h.bf16 %v3150_v43  ;;  %v759_v7 = vrot.slane %v658_v51, 1 }
  0xa7   : > { %v3165_v59 = vpop.permute.xlu1 %3164  ;;  %v3160_v60 = vpop.permute.xlu0 %3159  ;;  %v5585_v8 = vrot.slane %v3467_v52, 1  ;;  %v904_v11 = vmul.f32 %v3417_v21, %v3403_v4  ;;  %v3506_v12 = vmul.f32 %v3423_v27, %v3403_v4  ;;  %v3508_v13 = vunpack.i.l.bf16 %v3150_v43 }
  0xa8   : > { %5654 = vst [vmem:[#allocation7_spill] sm:$0xff] %v3491_v1  ;;  %5655 = vst [vmem:[#allocation8_spill] sm:$0xff] %v3493_v2  ;;  %v3500_v10 = vunpack.i.l.bf16 %v3165_v59  ;;  %v764_v24 = vrot.slane %v661_v61, 1  ;;  %v5587_v25 = vrot.slane %v3488_v62, 1  ;;  %v3514_v26 = vadd.f32 %v1156_v58, %v1107_v63 }
  0xa9   : > { %5656 = vst [vmem:[#allocation9_spill] sm:$0xff] %v3496_v6  ;;  %5658 = vst [vmem:[#allocation11_spill] sm:$0xff] %v3508_v13  ;;  %v761_v23 = vsel %vm748_vm0, %v759_v7, %v5585_v8  ;;  %v3516_v31 = vunpack.i.h.bf16 %v3165_v59  ;;  %v907_v33 = vmul.f32 %v3430_v32, %v3403_v4  ;;  %v3522_v36 = vmul.f32 %v3436_v38, %v3403_v4 }
  0xaa   : > { %5657 = vst [vmem:[#allocation10_spill] sm:$0xff] %v3500_v10  ;;  %v3524_v37 = vunpack.i.h.bf16 %v3160_v60  ;;  %v865_v40 = vadd.f32 %v761_v23, %v523_v44  ;;  %v1005_v42 = vrot.slane %v904_v11, 2  ;;  %v5586_v43 = vrot.slane %v3506_v12, 2 }
  0xab   : > { %v3175_v14 = vpop.permute.xlu1 %3174  ;;  %v3170_v16 = vpop.permute.xlu0 %3169  ;;  %5659 = vst [vmem:[#allocation12_spill] sm:$0xff] %v3516_v31  ;;  %v3529_v45 = vmul.f32 %v3500_v10, %v3432_v34  ;;  %v3531_v51 = vunpack.i.l.bf16 %v3160_v60  ;;  %v1160_v58 = vmul.f32 %v3430_v32, %v3428_v30  ;;  %v766_v44 = vsel %vm748_vm0, %v764_v24, %v5587_v25 }
  0xac   : > { %5660 = vst [vmem:[#allocation13_spill] sm:$0xff] %v3524_v37  ;;  %v3533_v53 = vunpack.i.h.bf16 %v3175_v14  ;;  %v3537_v59 = vunpack.i.l.bf16 %v3175_v14  ;;  %v1237_v7 = vmul.f32 %v3430_v32, %v3407_v17  ;;  %v3546_v60 = vmul.f32 %v3436_v38, %v3407_v17 }
  0xad   : > { %5661 = vst [vmem:[#allocation14_spill] sm:$0xff] %v3529_v45  ;;  %v1007_v11 = vsel %vm994_vm1, %v1005_v42, %v5586_v43  ;;  %v1010_v23 = vrot.slane %v907_v33, 2  ;;  %v1482_v9 = vmul.f32 %v3430_v32, %v3409_v18  ;;  %v3557_v29 = vunpack.i.h.bf16 %v3170_v16 }
  0xae   : > { %5662 = vst [vmem:[#allocation15_spill] sm:$0xff] %v3533_v53  ;;  %5663 = vst [vmem:[#allocation16_spill] sm:$0xff] %v3537_v59  ;;  %v1111_v24 = vadd.f32 %v1007_v11, %v865_v40  ;;  %v1337_v0 = vrot.slane %v1237_v7, 1  ;;  %v3559_v57 = vunpack.i.l.bf16 %v3170_v16  ;;  %v867_v8 = vadd.f32 %v766_v44, %v525_v50 }
  0xaf   : > { %v3185_v61 = vpop.permute.xlu1 %3184  ;;  %v3180_v63 = vpop.permute.xlu0 %3179  ;;  %5665 = vst [vmem:[#allocation18_spill] sm:$0xff] %v3557_v29  ;;  %v3563_v42 = vmul.f32 %v3436_v38, %v3409_v18  ;;  %v3567_v25 = vmul.f32 %v3436_v38, %v3428_v30  ;;  %v1811_v40 = vmul.f32 %v3430_v32, %v3419_v22  ;;  %v3573_v7 = vmul.f32 %v3436_v38, %v3419_v22 }
  0xb0   : > { %v3554_v5 = vunpack.i.l.bf16 %v3185_v61  ;;  %5666 = vst [vmem:[#allocation19_spill] sm:$0xff] %v3559_v57  ;;  %v1192_v14 = vadd.f32 %v1160_v58, %v1111_v24  ;;  %v3575_v16 = vunpack.i.h.bf16 %v3185_v61  ;;  %v3577_v50 = vunpack.i.h.bf16 %v3180_v63 }
  0xb1   : > { %v3579_v44 = vunpack.i.l.bf16 %v3180_v63  ;;  %v5670_v11 = vrot.slane %v3522_v36, 2  ;;  %v5672_v24 = vrot.slane %v3546_v60, 1  ;;  %v1582_v57 = vrot.slane %v1482_v9, 2 }
  0xb2   : > { %5664 = vst [vmem:[#allocation17_spill] sm:$0xff] %v3554_v5  ;;  %5667 = vst [vmem:[#allocation20_spill] sm:$0xff] %v3575_v16  ;;  %v3586_v58 = vmul.f32 %v3554_v5, %v3432_v34  ;;  %v1909_v53 = vrot.slane %v1811_v40, 1  ;;  %v2056_v63 = vmul.f32 %v3430_v32, %v3425_v28  ;;  %v3613_v61 = vmul.f32 %v3423_v27, %v3407_v17 }
  0xb3   : > { %v3195_v33 = vpop.permute.xlu1 %3194  ;;  %v3190_v43 = vpop.permute.xlu0 %3189  ;;  %5668 = vst [vmem:[#allocation21_spill] sm:$0xff] %v3577_v50  ;;  %5669 = vst [vmem:[#allocation22_spill] sm:$0xff] %v3579_v44  ;;  %v1012_v35 = vsel %vm994_vm1, %v1010_v23, %v5670_v11  ;;  %v1339_v29 = vsel %vm748_vm0, %v1337_v0, %v5672_v24  ;;  %v3597_v23 = vmul.f32 %v3436_v38, %v3425_v28  ;;  %v5690_v37 = vrot.slane %v3488_v62, 1 }
  0xb4   : > { %5671 = vst [vmem:[#allocation23_spill] sm:$0xff] %v3586_v58  ;;  %v3599_v11 = vunpack.i.h.bf16 %v3195_v33  ;;  %v3601_v16 = vadd.f32 %v1012_v35, %v867_v8  ;;  %v1443_v5 = vadd.f32 %v1339_v29, %v1192_v14  ;;  %v1234_v0 = vmul.f32 %v3417_v21, %v3407_v17 }
  0xb5   : > { %v3605_v9 = vunpack.i.l.bf16 %v3195_v33  ;;  %v3607_v40 = vunpack.i.h.bf16 %v3190_v43  ;;  %v3609_v24 = vunpack.i.l.bf16 %v3190_v43  ;;  %v3620_v29 = vmul.f32 %v3417_v21, %v3428_v30 }
  0xb6   : > { %5673 = vst [vmem:[#allocation24_spill] sm:$0xff] %v3599_v11  ;;  %5674 = vst [vmem:[#allocation25_spill] sm:$0xff] %v3601_v16  ;;  %v2154_v11 = vrot.slane %v2056_v63, 2  ;;  %v5680_v14 = vrot.slane %v3563_v42, 2  ;;  %v5681_v33 = vrot.slane %v3573_v7, 1  ;;  %v3634_v63 = vmul.f32 %v3423_v27, %v3428_v30 }
  0xb7   : > { %v3205_v58 = vpop.permute.xlu1 %3204  ;;  %5675 = vst [vmem:[#allocation26_spill] sm:$0xff] %v3605_v9  ;;  %5676 = vst [vmem:[#allocation27_spill] sm:$0xff] %v3607_v40  ;;  %v3200_v59 = vpop.permute.xlu0 %3199  ;;  %v3694_v62 = vmul.f32 %v3436_v38, %v3432_v34 }
  0xb8   : > { %5677 = vst [vmem:[#allocation28_spill] sm:$0xff] %v3609_v24  ;;  %v3615_v50 = vunpack.i.l.bf16 %v3205_v58  ;;  %v3622_v8 = vunpack.i.h.bf16 %v3205_v58  ;;  %v1584_v43 = vsel %vm994_vm1, %v1582_v57, %v5680_v14  ;;  %v3630_v40 = vsel %vm748_vm0, %v1909_v53, %v5681_v33 }
  0xb9   : > { %5682 = vst [vmem:[#allocation31_spill] sm:$0xff] %v3630_v40  ;;  %v3636_v35 = vunpack.i.h.bf16 %v3200_v59  ;;  %v3638_v24 = vunpack.i.l.bf16 %v3200_v59  ;;  %v3640_v58 = vadd.f32 %v1584_v43, %v1443_v5  ;;  %v1333_v57 = vrot.slane %v3613_v61, 1 }
  0xba   : > { %5678 = vst [vmem:[#allocation29_spill] sm:$0xff] %v3615_v50  ;;  %5679 = vst [vmem:[#allocation30_spill] sm:$0xff] %v3622_v8  ;;  %v1332_v8 = vrot.slane %v1234_v0, 1  ;;  %v1479_v53 = vmul.f32 %v3417_v21, %v3409_v18  ;;  %v3647_v14 = vmul.f32 %v3615_v50, %v3432_v34  ;;  %v5687_v33 = vrot.slane %v3597_v23, 2 }
  0xbb   : > { %5683 = vst [vmem:[#allocation32_spill] sm:$0xff] %v3636_v35  ;;  %5684 = vst [vmem:[#allocation33_spill] sm:$0xff] %v3638_v24  ;;  %v3215_v9 = vpop.permute.xlu1 %3214  ;;  %v1480_v5 = vmul.f32 %v3423_v27, %v3409_v18  ;;  %v3658_v0 = vmul.f32 %v3417_v21, %v3432_v34  ;;  %v3672_v24 = vmul.f32 %v3430_v32, %v3432_v34 }
  0xbc   : > { %5685 = vst [vmem:[#allocation34_spill] sm:$0xff] %v3640_v58  ;;  %v3217_v44 = vunpack.i.h.bf16 %v3215_v9  ;;  %v3216_v45 = vunpack.i.l.bf16 %v3215_v9  ;;  %5686 = vst [vmem:[#allocation35_spill] sm:$0xff] %v3647_v14  ;;  %v3652_v59 = vsel %vm994_vm1, %v2154_v11, %v5687_v33  ;;  %v3665_v14 = vmul.f32 %v3423_v27, %v3432_v34 }
  0xbd   : > { %5688 = vst [vmem:[#allocation36_spill] sm:$0xff] %v3652_v59  ;;  %5689 = vst [vmem:[#allocation37_spill] sm:$0xff] %v3672_v24  ;;  %v3676_v16 = vsel %vm748_vm0, %v1332_v8, %v1333_v57  ;;  %v1577_v6 = vrot.slane %v1479_v53, 2  ;;  %v1578_v59 = vrot.slane %v1480_v5, 2  ;;  %v5691_v24 = vrot.slane %v3467_v52, 1 }
  0xbe   : > { %v663_v61 = vmul.f32 %v3217_v44, %v3401_v3  ;;  %v909_v9 = vmul.f32 %v3217_v44, %v3403_v4  ;;  %v1239_v43 = vmul.f32 %v3217_v44, %v3407_v17  ;;  %v1484_v11 = vmul.f32 %v3217_v44, %v3409_v18 }
  0xbf   : > { %v660_v33 = vmul.f32 %v3216_v45, %v3401_v3  ;;  %v906_v50 = vmul.f32 %v3216_v45, %v3403_v4  ;;  %v1813_v58 = vmul.f32 %v3217_v44, %v3419_v22  ;;  %v2058_v13 = vmul.f32 %v3217_v44, %v3425_v28 }
  0xc0   : > { %v767_v35 = vrot.slane %v663_v61, 1  ;;  %v1013_v31 = vrot.slane %v909_v9, 2  ;;  %v1340_v10 = vrot.slane %v1239_v43, 1  ;;  %v1236_v32 = vmul.f32 %v3216_v45, %v3407_v17 }
  0xc1   : > { %v762_v1 = vrot.slane %v660_v33, 1  ;;  %v1008_v2 = vrot.slane %v906_v50, 2  ;;  %v1585_v61 = vrot.slane %v1484_v11, 2  ;;  %v1481_v44 = vmul.f32 %v3216_v45, %v3409_v18 }
  0xc2   : > { %v768_v40 = vsel %vm748_vm0, %v5690_v37, %v767_v35  ;;  %v1912_v33 = vrot.slane %v1813_v58, 1  ;;  %v3690_v5 = vmul.f32 %v3216_v45, %v3419_v22  ;;  %v2157_v37 = vrot.slane %v2058_v13, 2 }
  0xc3   : > { %v763_v8 = vsel %vm748_vm0, %v5691_v24, %v762_v1  ;;  %v868_v53 = vadd.f32 %v768_v40, %v3480_v56  ;;  %v5692_v35 = vrot.slane %v3506_v12, 2  ;;  %v3701_v56 = vmul.f32 %v3417_v21, %v3419_v22  ;;  %v3210_v12 = vpop.permute.xlu0 %3209 }
  0xc4   : > { %v866_v50 = vadd.f32 %v763_v8, %v3456_v48  ;;  %v3705_v1 = vmul.f32 %v3423_v27, %v3419_v22  ;;  %v5693_v48 = vrot.slane %v3522_v36, 2  ;;  %v1335_v38 = vrot.slane %v1236_v32, 1 }
  0xc5   : > { %v1009_v52 = vsel %vm994_vm1, %v5692_v35, %v1008_v2  ;;  %v3711_v13 = vmul.f32 %v3216_v45, %v3425_v28  ;;  %v5694_v2 = vrot.slane %v3546_v60, 1  ;;  %v1580_v43 = vrot.slane %v1481_v44, 2 }
  0xc6   : > { %v1014_v40 = vsel %vm994_vm1, %v5693_v48, %v1013_v31  ;;  %v1112_v24 = vadd.f32 %v1009_v52, %v866_v50  ;;  %v5695_v11 = vrot.slane %v3563_v42, 2  ;;  %v1907_v36 = vrot.slane %v3690_v5, 1 }
  0xc7   : > { %v3713_v58 = vadd.f32 %v1014_v40, %v868_v53  ;;  %v1341_v9 = vsel %vm748_vm0, %v5694_v2, %v1340_v10  ;;  %v5696_v45 = vrot.slane %v3573_v7, 1  ;;  %v2053_v60 = vmul.f32 %v3417_v21, %v3425_v28 }
  0xc8   : > { %v3721_v8 = vsel %vm994_vm1, %v5695_v11, %v1585_v61  ;;  %v1193_v31 = vadd.f32 %v3567_v25, %v1112_v24  ;;  %v3734_v10 = vmul.f32 %v3423_v27, %v3425_v28  ;;  %v3212_v42 = vunpack.i.h.bf16 %v3210_v12  ;;  %v3225_v11 = vpop.permute.xlu1 %3224 }
  0xc9   : > { %v3728_v32 = vsel %vm748_vm0, %v5696_v45, %v1912_v33  ;;  %v3211_v53 = vunpack.i.l.bf16 %v3210_v12  ;;  %v656_v61 = vmul.f32 %v3449_v46, %v3401_v3  ;;  %v2152_v25 = vrot.slane %v3711_v13, 2 }
  0xca   : > { %v5697_v44 = vrot.slane %v3597_v23, 2  ;;  %v1336_v33 = vsel %vm748_vm0, %v1333_v57, %v1335_v38  ;;  %v3746_v21 = vsel %vm994_vm1, %v1577_v6, %v1578_v59  ;;  %v3749_v27 = vsel %vm994_vm1, %v1578_v59, %v1580_v43 }
  0xcb   : > { %v1904_v50 = vrot.slane %v3701_v56, 1  ;;  %v657_v5 = vmul.f32 %v3212_v42, %v3401_v3  ;;  %v903_v35 = vmul.f32 %v3212_v42, %v3403_v4  ;;  %v1905_v52 = vrot.slane %v3705_v1, 1 }
  0xcc   : > { %v3742_v7 = vsel %vm994_vm1, %v5697_v44, %v2157_v37  ;;  %v522_v23 = vmul.f32 %v3449_v46, %v3405_v15  ;;  %v654_v37 = vmul.f32 %v3211_v53, %v3401_v3  ;;  %v755_v57 = vrot.slane %v656_v61, 1 }
  0xcd   : > { %v1444_v48 = vadd.f32 %v1341_v9, %v1193_v31  ;;  %v2149_v6 = vrot.slane %v2053_v60, 2  ;;  %v2150_v40 = vrot.slane %v3734_v10, 2  ;;  %v757_v59 = vrot.slane %v657_v5, 1 }
  0xce   : > { %v1233_v24 = vmul.f32 %v3212_v42, %v3407_v17  ;;  %v1478_v56 = vmul.f32 %v3212_v42, %v3409_v18  ;;  %v752_v38 = vrot.slane %v654_v37, 1  ;;  %v5698_v13 = vrot.slane %v3445_v41, 1 }
  0xcf   : > { %v1003_v12 = vrot.slane %v903_v35, 2  ;;  %v758_v2 = vsel %vm748_vm0, %v755_v57, %v757_v59  ;;  %v900_v43 = vmul.f32 %v3211_v53, %v3403_v4  ;;  %v902_v9 = vmul.f32 %v3449_v46, %v3403_v4 }
  0xd0   : > { %v756_v1 = vsel %vm748_vm0, %v5698_v13, %v755_v57  ;;  %v5699_v31 = vrot.slane %v3412_v19, 1  ;;  %v864_v10 = vadd.f32 %v758_v2, %v522_v23  ;;  %v1232_v41 = vmul.f32 %v3449_v46, %v3407_v17 }
  0xd1   : > { %v863_v60 = vadd.f32 %v756_v1, %v3473_v54  ;;  %v998_v61 = vrot.slane %v900_v43, 2  ;;  %v1001_v44 = vrot.slane %v902_v9, 2  ;;  %v1477_v53 = vmul.f32 %v3449_v46, %v3409_v18 }
  0xd2   : > { %v753_v45 = vsel %vm748_vm0, %v5699_v31, %v752_v38  ;;  %v1330_v5 = vrot.slane %v1233_v24, 1  ;;  %v1157_v35 = vmul.f32 %v3449_v46, %v3428_v30  ;;  %v1328_v19 = vrot.slane %v1232_v41, 1 }
  0xd3   : > { %v862_v42 = vadd.f32 %v753_v45, %v3439_v39  ;;  %v3227_v37 = vunpack.i.h.bf16 %v3225_v11  ;;  %v5700_v57 = vrot.slane %v3415_v20, 2  ;;  %v5701_v23 = vrot.slane %v3452_v47, 2 }
  0xd4   : > { %v1004_v39 = vsel %vm994_vm1, %v1001_v44, %v1003_v12  ;;  %v1573_v38 = vrot.slane %v1477_v53, 2  ;;  %v5702_v24 = vrot.slane %v3459_v49, 1  ;;  %v1906_v43 = vsel %vm748_vm0, %v1904_v50, %v1905_v52  ;;  %v5706_v53 = vld [vmem:[#allocation37_spill] sm:$0xff] }
  0xd5   : > { %v999_v54 = vsel %vm994_vm1, %v5700_v57, %v998_v61  ;;  %v1002_v59 = vsel %vm994_vm1, %v5701_v23, %v1001_v44  ;;  %v1110_v2 = vadd.f32 %v1004_v39, %v864_v10  ;;  %v1908_v20 = vsel %vm748_vm0, %v1905_v52, %v1907_v36  ;;  %v5708_v23 = vld [vmem:[#allocation31_spill] sm:$0xff]  ;;  %v5709_v39 = vld [vmem:[#allocation13_spill] sm:$0xff] }
  0xd6   : > { %v1108_v13 = vadd.f32 %v999_v54, %v862_v42  ;;  %v1109_v1 = vadd.f32 %v1002_v59, %v863_v60  ;;  %v1329_v46 = vsel %vm748_vm0, %v5702_v24, %v1328_v19  ;;  %v1575_v9 = vrot.slane %v1478_v56, 2 }
  0xd7   : > { %v1439_v31 = vadd.f32 %v1329_v46, %v3514_v26  ;;  %v1191_v12 = vadd.f32 %v3634_v63, %v1110_v2  ;;  %v5703_v41 = vrot.slane %v3476_v55, 2  ;;  %v3798_v49 = vadd.f32 %v3721_v8, %v1444_v48  ;;  %v5711_v2 = vld [vmem:[#allocation12_spill] sm:$0xff] }
  0xd8   : > { %v1189_v47 = vadd.f32 %v1157_v35, %v1108_v13  ;;  %v1190_v45 = vadd.f32 %v3620_v29, %v1109_v1  ;;  %v2151_v10 = vsel %vm994_vm1, %v2149_v6, %v2150_v40  ;;  %v1331_v50 = vsel %vm748_vm0, %v1328_v19, %v1330_v5  ;;  %v5710_v13 = vld [vmem:[#allocation10_spill] sm:$0xff] }
  0xd9   : > { %v1574_v60 = vsel %vm994_vm1, %v5703_v41, %v1573_v38  ;;  %v1442_v56 = vadd.f32 %v1336_v33, %v1191_v12  ;;  %v675_v29 = vmul.f32 %v3227_v37, %v3401_v3  ;;  %v2153_v63 = vsel %vm994_vm1, %v2150_v40, %v2152_v25 }
  0xda   : > { %v1684_v36 = vadd.f32 %v1574_v60, %v1439_v31  ;;  %v1440_v52 = vadd.f32 %v1331_v50, %v1189_v47  ;;  %v1441_v26 = vadd.f32 %v3676_v16, %v1190_v45  ;;  %v1576_v55 = vsel %vm994_vm1, %v1573_v38, %v1575_v9 }
  0xdb   : > { %v3808_v8 = vmul.f32 %v3227_v37, %v3403_v4  ;;  %v1687_v61 = vadd.f32 %v3749_v27, %v1442_v56  ;;  %v3812_v44 = vunpack.i.l.bf16 %v3225_v11  ;;  %v3815_v33 = vmul.f32 %v3227_v37, %v3407_v17  ;;  %v3220_v11 = vpop.permute.xlu0 %3219 }
  0xdc   : > { %v1765_v42 = vadd.f32 %v3658_v0, %v1684_v36  ;;  %v1685_v48 = vadd.f32 %v1576_v55, %v1440_v52  ;;  %v1686_v6 = vadd.f32 %v3746_v21, %v1441_v26  ;;  %v3818_v25 = vmul.f32 %v3227_v37, %v3409_v18 }
  0xdd   : > { %5704 = vst [vmem:[#allocation38_spill] sm:$0xff] %v3808_v8  ;;  %v531_v0 = vmul.f32 %v3531_v51, %v3405_v15  ;;  %v1768_v21 = vadd.f32 %v3694_v62, %v1687_v61  ;;  %v787_v35 = vrot.slane %v675_v29, 1  ;;  %v3829_v19 = vmul.f32 %v3227_v37, %v3419_v22 }
  0xde   : > { %v2016_v16 = vadd.f32 %v1906_v43, %v1765_v42  ;;  %5705 = vst [vmem:[#allocation39_spill] sm:$0xff] %v3818_v25  ;;  %v1766_v40 = vadd.f32 %v3665_v14, %v1685_v48  ;;  %v1767_v5 = vadd.f32 %v5706_v53, %v1686_v6  ;;  %v670_v57 = vmul.f32 %v3531_v51, %v3401_v3 }
  0xdf   : > { %v2019_v14 = vadd.f32 %v3728_v32, %v1768_v21  ;;  %v671_v38 = vmul.f32 %v5709_v39, %v3401_v3  ;;  %v672_v62 = vmul.f32 %v3812_v44, %v3401_v3  ;;  %v673_v1 = vmul.f32 %v5710_v13, %v3401_v3 }
  0xe0   : > { %v3825_v27 = vadd.f32 %v2151_v10, %v2016_v16  ;;  %v2017_v54 = vadd.f32 %v1908_v20, %v1766_v40  ;;  %v2018_v59 = vadd.f32 %v5708_v23, %v1767_v5  ;;  %v674_v24 = vmul.f32 %v5711_v2, %v3401_v3  ;;  %v5713_v20 = vld [vmem:[#allocation36_spill] sm:$0xff] }
  0xe1   : > { %v779_v46 = vrot.slane %v670_v57, 1  ;;  %v3849_v32 = vadd.f32 %v3742_v7, %v2019_v14  ;;  %v780_v31 = vrot.slane %v671_v38, 1  ;;  %v782_v47 = vrot.slane %v672_v62, 1 }
  0xe2   : > { %5707 = vst [vmem:[#allocation37_spill] sm:$0xff] %v3825_v27  ;;  %v3843_v43 = vadd.f32 %v2153_v63, %v2017_v54  ;;  %v3846_v9 = vadd.f32 %v5713_v20, %v2018_v59  ;;  %v784_v45 = vrot.slane %v673_v1, 1  ;;  %v785_v12 = vrot.slane %v674_v24, 1 }
  0xe3   : > { %5715 = vst [vmem:[#allocation10_spill] sm:$0xff] %v3849_v32  ;;  %v916_v41 = vmul.f32 %v3531_v51, %v3403_v4  ;;  %v3854_v60 = vmul.f32 %v3227_v37, %v3425_v28  ;;  %v781_v10 = vsel %vm748_vm0, %v779_v46, %v780_v31  ;;  %v917_v50 = vmul.f32 %v5709_v39, %v3403_v4 }
  0xe4   : > { %5712 = vst [vmem:[#allocation31_spill] sm:$0xff] %v3843_v43  ;;  %5714 = vst [vmem:[#allocation13_spill] sm:$0xff] %v3846_v9  ;;  %v918_v36 = vmul.f32 %v3812_v44, %v3403_v4  ;;  %v1360_v7 = vrot.slane %v3815_v33, 1  ;;  %v532_v26 = vmul.f32 %v5709_v39, %v3405_v15  ;;  %v783_v56 = vsel %vm748_vm0, %v780_v31, %v782_v47 }
  0xe5   : > { %v533_v37 = vmul.f32 %v5710_v13, %v3405_v15  ;;  %v786_v29 = vsel %vm748_vm0, %v784_v45, %v785_v12  ;;  %v788_v63 = vsel %vm748_vm0, %v785_v12, %v787_v35  ;;  %v873_v55 = vadd.f32 %v781_v10, %v531_v0 }
  0xe6   : > { %v874_v42 = vadd.f32 %v783_v56, %v532_v26  ;;  %v1025_v48 = vrot.slane %v916_v41, 2  ;;  %v1026_v6 = vrot.slane %v917_v50, 2  ;;  %v1028_v61 = vrot.slane %v918_v36, 2 }
  0xe7   : > { %v1932_v16 = vrot.slane %v3829_v19, 1  ;;  %v2177_v33 = vrot.slane %v3854_v60, 2  ;;  %v534_v40 = vmul.f32 %v5711_v2, %v3405_v15  ;;  %v1246_v53 = vmul.f32 %v3531_v51, %v3407_v17 }
  0xe8   : > { %v3878_v5 = vmul.f32 %v5710_v13, %v3403_v4  ;;  %v1027_v0 = vsel %vm994_vm1, %v1025_v48, %v1026_v6  ;;  %v1247_v21 = vmul.f32 %v5709_v39, %v3407_v17  ;;  %v1248_v35 = vmul.f32 %v3812_v44, %v3407_v17 }
  0xe9   : > { %v3885_v57 = vadd.f32 %v786_v29, %v533_v37  ;;  %v3887_v54 = vadd.f32 %v788_v63, %v534_v40  ;;  %v1029_v23 = vsel %vm994_vm1, %v1026_v6, %v1028_v61  ;;  %v1119_v59 = vadd.f32 %v1027_v0, %v873_v55 }
  0xea   : > { %5716 = vst [vmem:[#allocation12_spill] sm:$0xff] %v3878_v5  ;;  %v3892_v14 = vmul.f32 %v5711_v2, %v3403_v4  ;;  %v1120_v38 = vadd.f32 %v1029_v23, %v874_v42  ;;  %v1249_v62 = vmul.f32 %v5710_v13, %v3407_v17  ;;  %v1250_v1 = vmul.f32 %v5711_v2, %v3407_v17 }
  0xeb   : > { %5717 = vst [vmem:[#allocation36_spill] sm:$0xff] %v3885_v57  ;;  %5718 = vst [vmem:[#allocation40_spill] sm:$0xff] %v3887_v54  ;;  %v1168_v24 = vmul.f32 %v5710_v13, %v3428_v30  ;;  %v1169_v46 = vmul.f32 %v5711_v2, %v3428_v30  ;;  %v1352_v20 = vrot.slane %v1246_v53, 1  ;;  %v1353_v31 = vrot.slane %v1247_v21, 1 }
  0xec   : > { %5719 = vst [vmem:[#allocation41_spill] sm:$0xff] %v3892_v14  ;;  %v1355_v47 = vrot.slane %v1248_v35, 1  ;;  %v1357_v45 = vrot.slane %v1249_v62, 1  ;;  %v1358_v12 = vrot.slane %v1250_v1, 1  ;;  %v1491_v41 = vmul.f32 %v3531_v51, %v3409_v18 }
  0xed   : > { %v1200_v50 = vadd.f32 %v1168_v24, %v1119_v59  ;;  %v1492_v36 = vmul.f32 %v5709_v39, %v3409_v18  ;;  %v1493_v26 = vmul.f32 %v3812_v44, %v3409_v18  ;;  %v1201_v37 = vadd.f32 %v1169_v46, %v1120_v38 }
  0xee   : > { %v3912_v29 = vmul.f32 %v5710_v13, %v3409_v18  ;;  %v3916_v63 = vmul.f32 %v5711_v2, %v3409_v18  ;;  %v3919_v55 = vsel %vm748_vm0, %v1352_v20, %v1353_v31  ;;  %v3922_v42 = vsel %vm748_vm0, %v1353_v31, %v1355_v47 }
  0xef   : > { %v1597_v48 = vrot.slane %v1491_v41, 2  ;;  %v1598_v6 = vrot.slane %v1492_v36, 2  ;;  %v1359_v61 = vsel %vm748_vm0, %v1357_v45, %v1358_v12  ;;  %v1361_v40 = vsel %vm748_vm0, %v1358_v12, %v1360_v7 }
  0xf0   : > { %5720 = vst [vmem:[#allocation42_spill] sm:$0xff] %v3912_v29  ;;  %5721 = vst [vmem:[#allocation43_spill] sm:$0xff] %v3916_v63  ;;  %v1600_v53 = vrot.slane %v1493_v26, 2  ;;  %v1820_v0 = vmul.f32 %v3531_v51, %v3419_v22  ;;  %v3928_v21 = vadd.f32 %v1359_v61, %v1200_v50  ;;  %v1821_v35 = vmul.f32 %v5709_v39, %v3419_v22  ;;  %v5727_v63 = vld [vmem:[#allocation9_spill] sm:$0xff] }
  0xf1   : > { %v1822_v23 = vmul.f32 %v3812_v44, %v3419_v22  ;;  %v1823_v59 = vmul.f32 %v5710_v13, %v3419_v22  ;;  %v3936_v38 = vadd.f32 %v1361_v40, %v1201_v37  ;;  %v1824_v1 = vmul.f32 %v5711_v2, %v3419_v22 }
  0xf2   : > { %5722 = vst [vmem:[#allocation44_spill] sm:$0xff] %v3928_v21  ;;  %v3943_v24 = vsel %vm994_vm1, %v1597_v48, %v1598_v6  ;;  %v3946_v46 = vsel %vm994_vm1, %v1598_v6, %v1600_v53  ;;  %v1924_v20 = vrot.slane %v1820_v0, 1  ;;  %v1925_v31 = vrot.slane %v1821_v35, 1 }
  0xf3   : > { %5723 = vst [vmem:[#allocation45_spill] sm:$0xff] %v3936_v38  ;;  %v1927_v47 = vrot.slane %v1822_v23, 1  ;;  %v1929_v45 = vrot.slane %v1823_v59, 1  ;;  %v1930_v12 = vrot.slane %v1824_v1, 1  ;;  %v2065_v41 = vmul.f32 %v3531_v51, %v3425_v28  ;;  %v5725_v1 = vld [vmem:[#allocation7_spill] sm:$0xff] }
  0xf4   : > { %v3951_v50 = vsel %vm748_vm0, %v1924_v20, %v1925_v31  ;;  %v2066_v36 = vmul.f32 %v5709_v39, %v3425_v28  ;;  %v2067_v26 = vmul.f32 %v3812_v44, %v3425_v28  ;;  %v2068_v37 = vmul.f32 %v5710_v13, %v3425_v28  ;;  %v5724_v13 = vld [vmem:[#allocation8_spill] sm:$0xff] }
  0xf5   : > { %v3960_v48 = vsel %vm748_vm0, %v1925_v31, %v1927_v47  ;;  %v3963_v6 = vsel %vm748_vm0, %v1929_v45, %v1930_v12  ;;  %v3968_v61 = vsel %vm748_vm0, %v1930_v12, %v1932_v16  ;;  %v2069_v40 = vmul.f32 %v5711_v2, %v3425_v28 }
  0xf6   : > { %v2169_v53 = vrot.slane %v2065_v41, 2  ;;  %v2170_v0 = vrot.slane %v2066_v36, 2  ;;  %v2172_v44 = vrot.slane %v2067_v26, 2  ;;  %v2174_v35 = vrot.slane %v2068_v37, 2 }
  0xf7   : > { %v2175_v23 = vrot.slane %v2069_v40, 2  ;;  %v529_v59 = vmul.f32 %v5724_v13, %v3405_v15  ;;  %v3976_v20 = vmul.f32 %v5725_v1, %v3405_v15  ;;  %v667_v19 = vmul.f32 %v5724_v13, %v3401_v3 }
  0xf8   : > { %v3981_v16 = vsel %vm994_vm1, %v2169_v53, %v2170_v0  ;;  %v3984_v31 = vsel %vm994_vm1, %v2170_v0, %v2172_v44  ;;  %v668_v47 = vmul.f32 %v5725_v1, %v3401_v3  ;;  %v913_v45 = vmul.f32 %v5724_v13, %v3403_v4 }
  0xf9   : > { %v3991_v12 = vsel %vm994_vm1, %v2174_v35, %v2175_v23  ;;  %v3996_v41 = vsel %vm994_vm1, %v2175_v23, %v2177_v33  ;;  %v774_v36 = vrot.slane %v667_v19, 1  ;;  %v914_v26 = vmul.f32 %v5725_v1, %v3403_v4 }
  0xfa   : > { %v775_v37 = vrot.slane %v668_v47, 1  ;;  %v1020_v40 = vrot.slane %v913_v45, 2  ;;  %v4002_v53 = vmul.f32 %v5724_v13, %v3428_v30  ;;  %v4006_v0 = vmul.f32 %v5725_v1, %v3428_v30 }
  0xfb   : > { %v1021_v44 = vrot.slane %v914_v26, 2  ;;  %v1243_v60 = vmul.f32 %v5724_v13, %v3407_v17  ;;  %v1244_v33 = vmul.f32 %v5725_v1, %v3407_v17  ;;  %v1488_v35 = vmul.f32 %v5724_v13, %v3409_v18 }
  0xfc   : > { %v776_v23 = vsel %vm748_vm0, %v774_v36, %v775_v37  ;;  %v1489_v19 = vmul.f32 %v5725_v1, %v3409_v18  ;;  %v4019_v47 = vmul.f32 %v5724_v13, %v3432_v34  ;;  %v4023_v45 = vmul.f32 %v5725_v1, %v3432_v34 }
  0xfd   : > { %v871_v26 = vadd.f32 %v776_v23, %v529_v59  ;;  %v1022_v52 = vsel %vm994_vm1, %v1020_v40, %v1021_v44  ;;  %v1347_v62 = vrot.slane %v1243_v60, 1  ;;  %v1348_v7 = vrot.slane %v1244_v33, 1 }
  0xfe   : > { %v1592_v10 = vrot.slane %v1488_v35, 2  ;;  %v1593_v56 = vrot.slane %v1489_v19, 2  ;;  %v4028_v36 = vmul.f32 %v5711_v2, %v3432_v34  ;;  %v1817_v32 = vmul.f32 %v5724_v13, %v3419_v22 }
  0xff   : > { %v1117_v9 = vadd.f32 %v1022_v52, %v871_v26  ;;  %v4033_v43 = vsel %vm748_vm0, %v1347_v62, %v1348_v7  ;;  %v1818_v59 = vmul.f32 %v5725_v1, %v3419_v22  ;;  %v2062_v40 = vmul.f32 %v5724_v13, %v3425_v28  ;;  %v5726_v62 = vld [vmem:[#allocation11_spill] sm:$0xff] }
 0x100   : > { %v4040_v60 = vsel %vm994_vm1, %v1592_v10, %v1593_v56  ;;  %v1919_v33 = vrot.slane %v1817_v32, 1  ;;  %v2063_v2 = vmul.f32 %v5725_v1, %v3425_v28  ;;  %v3222_v35 = vunpack.i.h.bf16 %v3220_v11 }
 0x101   : > { %v1920_v23 = vrot.slane %v1818_v59, 1  ;;  %v2164_v19 = vrot.slane %v2062_v40, 2  ;;  %v4044_v52 = vunpack.i.l.bf16 %v3220_v11  ;;  %v527_v26 = vmul.f32 %v5726_v62, %v3405_v15 }
 0x102   : > { %v2165_v27 = vrot.slane %v2063_v2, 2  ;;  %v669_v38 = vmul.f32 %v3222_v35, %v3401_v3  ;;  %v915_v13 = vmul.f32 %v3222_v35, %v3403_v4  ;;  %v1245_v10 = vmul.f32 %v3222_v35, %v3407_v17 }
 0x103   : > { %v4052_v32 = vsel %vm748_vm0, %v1919_v33, %v1920_v23  ;;  %v1490_v1 = vmul.f32 %v3222_v35, %v3409_v18  ;;  %v1819_v59 = vmul.f32 %v3222_v35, %v3419_v22  ;;  %v2064_v11 = vmul.f32 %v3222_v35, %v3425_v28 }
 0x104   : > { %v4058_v40 = vsel %vm994_vm1, %v2164_v19, %v2165_v27  ;;  %v777_v21 = vrot.slane %v669_v38, 1  ;;  %v1023_v2 = vrot.slane %v915_v13, 2  ;;  %v1350_v54 = vrot.slane %v1245_v10, 1 }
 0x105   : > { %v1595_v57 = vrot.slane %v1490_v1, 2  ;;  %v1922_v25 = vrot.slane %v1819_v59, 1  ;;  %v2167_v29 = vrot.slane %v2064_v11, 2  ;;  %v528_v8 = vmul.f32 %v5727_v63, %v3405_v15 }
 0x106   : > { %v778_v33 = vsel %vm748_vm0, %v775_v37, %v777_v21  ;;  %v1024_v5 = vsel %vm994_vm1, %v1021_v44, %v1023_v2  ;;  %v1351_v14 = vsel %vm748_vm0, %v1348_v7, %v1350_v54  ;;  %v664_v35 = vmul.f32 %v5726_v62, %v3401_v3 }
 0x107   : > { %v872_v19 = vadd.f32 %v778_v33, %v3976_v20  ;;  %v1596_v38 = vsel %vm994_vm1, %v1593_v56, %v1595_v57  ;;  %v4070_v13 = vsel %vm748_vm0, %v1920_v23, %v1922_v25  ;;  %v4073_v10 = vsel %vm994_vm1, %v2165_v27, %v2167_v29 }
 0x108   : > { %v665_v21 = vmul.f32 %v5727_v63, %v3401_v3  ;;  %v666_v37 = vmul.f32 %v4044_v52, %v3401_v3  ;;  %v769_v54 = vrot.slane %v664_v35, 1  ;;  %v910_v7 = vmul.f32 %v5726_v62, %v3403_v4  ;;  %v5728_v35 = vld [vmem:[#allocation25_spill] sm:$0xff] }
 0x109   : > { %v1118_v44 = vadd.f32 %v1024_v5, %v872_v19  ;;  %v911_v57 = vmul.f32 %v5727_v63, %v3403_v4  ;;  %v912_v25 = vmul.f32 %v4044_v52, %v3403_v4  ;;  %v1162_v27 = vmul.f32 %v5726_v62, %v3428_v30 }
 0x10a   : > { %v770_v56 = vrot.slane %v665_v21, 1  ;;  %v772_v29 = vrot.slane %v666_v37, 1  ;;  %v1015_v20 = vrot.slane %v910_v7, 2  ;;  %v1163_v23 = vmul.f32 %v5727_v63, %v3428_v30 }
 0x10b   : > { %v1016_v1 = vrot.slane %v911_v57, 2  ;;  %v1018_v59 = vrot.slane %v912_v25, 2  ;;  %v1166_v5 = vmul.f32 %v3531_v51, %v3428_v30  ;;  %v1167_v11 = vmul.f32 %v5709_v39, %v3428_v30 }
 0x10c   : > { %v771_v2 = vsel %vm748_vm0, %v769_v54, %v770_v56  ;;  %v773_v33 = vsel %vm748_vm0, %v770_v56, %v772_v29  ;;  %v1194_v19 = vadd.f32 %v1162_v27, %v5728_v35  ;;  %v1195_v21 = vadd.f32 %v1163_v23, %v3713_v58 }
 0x10d   : > { %v869_v37 = vadd.f32 %v771_v2, %v527_v26  ;;  %v870_v7 = vadd.f32 %v773_v33, %v528_v8  ;;  %v1017_v15 = vsel %vm994_vm1, %v1015_v20, %v1016_v1  ;;  %v1019_v57 = vsel %vm994_vm1, %v1016_v1, %v1018_v59 }
 0x10e   : > { %v1198_v25 = vadd.f32 %v1166_v5, %v1117_v9  ;;  %v1199_v4 = vadd.f32 %v1167_v11, %v1118_v44  ;;  %v1240_v3 = vmul.f32 %v5726_v62, %v3407_v17  ;;  %v1241_v54 = vmul.f32 %v5727_v63, %v3407_v17 }
 0x10f   : > { %v1115_v30 = vadd.f32 %v1017_v15, %v869_v37  ;;  %v1116_v56 = vadd.f32 %v1019_v57, %v870_v7  ;;  %v1242_v27 = vmul.f32 %v4044_v52, %v3407_v17  ;;  %v1485_v58 = vmul.f32 %v5726_v62, %v3409_v18 }
 0x110   : > { %v1342_v8 = vrot.slane %v1240_v3, 1  ;;  %v1343_v26 = vrot.slane %v1241_v54, 1  ;;  %v1449_v29 = vadd.f32 %v3919_v55, %v1198_v25  ;;  %v1450_v9 = vadd.f32 %v3922_v42, %v1199_v4 }
 0x111   : > { %v1196_v44 = vadd.f32 %v4002_v53, %v1115_v30  ;;  %v1197_v20 = vadd.f32 %v4006_v0, %v1116_v56  ;;  %v1345_v23 = vrot.slane %v1242_v27, 1  ;;  %v1486_v15 = vmul.f32 %v5727_v63, %v3409_v18  ;;  %v5730_v56 = vld [vmem:[#allocation14_spill] sm:$0xff] }
 0x112   : > { %v1344_v1 = vsel %vm748_vm0, %v1342_v8, %v1343_v26  ;;  %v1487_v59 = vmul.f32 %v4044_v52, %v3409_v18  ;;  %v1587_v5 = vrot.slane %v1485_v58, 2  ;;  %v1694_v3 = vadd.f32 %v3943_v24, %v1449_v29 }
 0x113   : > { %v1346_v55 = vsel %vm748_vm0, %v1343_v26, %v1345_v23  ;;  %v1445_v11 = vadd.f32 %v1344_v1, %v1194_v19  ;;  %v1447_v4 = vadd.f32 %v4033_v43, %v1196_v44  ;;  %v1448_v30 = vadd.f32 %v1351_v14, %v1197_v20 }
 0x114   : > { %v1446_v42 = vadd.f32 %v1346_v55, %v1195_v21  ;;  %v1588_v53 = vrot.slane %v1486_v15, 2  ;;  %v1590_v0 = vrot.slane %v1487_v59, 2  ;;  %v1695_v2 = vadd.f32 %v3946_v46, %v1450_v9 }
 0x115   : > { %v1692_v33 = vadd.f32 %v4040_v60, %v1447_v4  ;;  %v1693_v35 = vadd.f32 %v1596_v38, %v1448_v30  ;;  %v1737_v37 = vmul.f32 %v5726_v62, %v3432_v34  ;;  %v1738_v24 = vmul.f32 %v5727_v63, %v3432_v34  ;;  %v5729_v60 = vld [vmem:[#allocation34_spill] sm:$0xff] }
 0x116   : > { %v1589_v7 = vsel %vm994_vm1, %v1587_v5, %v1588_v53  ;;  %v1591_v19 = vsel %vm994_vm1, %v1588_v53, %v1590_v0  ;;  %v1741_v43 = vmul.f32 %v3531_v51, %v3432_v34  ;;  %v1742_v14 = vmul.f32 %v5709_v39, %v3432_v34  ;;  %v5739_v0 = vld [vmem:[#allocation12_spill] sm:$0xff] }
 0x117   : > { %v1690_v46 = vadd.f32 %v1589_v7, %v1445_v11  ;;  %v1691_v21 = vadd.f32 %v1591_v19, %v1446_v42  ;;  %v1769_v38 = vadd.f32 %v1737_v37, %v5729_v60  ;;  %v1770_v57 = vadd.f32 %v1738_v24, %v3798_v49  ;;  %v5737_v42 = vld [vmem:[#allocation41_spill] sm:$0xff]  ;;  %v5745_v7 = vld [vmem:[#allocation43_spill] sm:$0xff]  ;;  %v5747_v19 = vld [vmem:[#allocation42_spill] sm:$0xff] }
 0x118   : > { %v1773_v25 = vadd.f32 %v1741_v43, %v1692_v33  ;;  %v1774_v54 = vadd.f32 %v1742_v14, %v1693_v35  ;;  %v1775_v27 = vadd.f32 %v5730_v56, %v1694_v3  ;;  %v1776_v58 = vadd.f32 %v4028_v36, %v1695_v2 }
 0x119   : > { %v1771_v8 = vadd.f32 %v4019_v47, %v1690_v46  ;;  %v1772_v26 = vadd.f32 %v4023_v45, %v1691_v21  ;;  %v1814_v51 = vmul.f32 %v5726_v62, %v3419_v22  ;;  %v1815_v39 = vmul.f32 %v5727_v63, %v3419_v22  ;;  %v5749_v46 = vld [vmem:[#allocation39_spill] sm:$0xff] }
 0x11a   : > { %v1816_v29 = vmul.f32 %v4044_v52, %v3419_v22  ;;  %v2024_v49 = vadd.f32 %v3951_v50, %v1773_v25  ;;  %v2025_v9 = vadd.f32 %v3960_v48, %v1774_v54  ;;  %v2026_v44 = vadd.f32 %v3963_v6, %v1775_v27  ;;  %v5753_v54 = vld [vmem:[#allocation36_spill] sm:$0xff] }
 0x11b   : > { %v1914_v36 = vrot.slane %v1814_v51, 1  ;;  %v1915_v20 = vrot.slane %v1815_v39, 1  ;;  %v2022_v47 = vadd.f32 %v4052_v32, %v1771_v8  ;;  %v2023_v45 = vadd.f32 %v4070_v13, %v1772_v26  ;;  %v3235_v13 = vpop.permute.xlu1 %3234  ;;  %v5754_v27 = vld [vmem:[#allocation40_spill] sm:$0xff]  ;;  %v5756_v51 = vld [vmem:[#allocation45_spill] sm:$0xff] }
 0x11c   : > { %v1917_v23 = vrot.slane %v1816_v29, 1  ;;  %v2027_v15 = vadd.f32 %v3968_v61, %v1776_v58  ;;  %v2059_v1 = vmul.f32 %v5726_v62, %v3425_v28  ;;  %v2060_v59 = vmul.f32 %v5727_v63, %v3425_v28  ;;  %v5755_v8 = vld [vmem:[#allocation44_spill] sm:$0xff]  ;;  %v5757_v29 = vld [vmem:[#allocation3_spill] sm:$0xff] }
 0x11d   : > { %v1916_v50 = vsel %vm748_vm0, %v1914_v36, %v1915_v20  ;;  %v2061_v48 = vmul.f32 %v4044_v52, %v3425_v28  ;;  %v4157_v6 = vadd.f32 %v4058_v40, %v2022_v47  ;;  %v4160_v32 = vadd.f32 %v4073_v10, %v2023_v45  ;;  %v5761_v47 = vld [vmem:[#allocation22_spill] sm:$0xff] }
 0x11e   : > { %v1918_v61 = vsel %vm748_vm0, %v1915_v20, %v1917_v23  ;;  %v2020_v5 = vadd.f32 %v1916_v50, %v1769_v38  ;;  %v2159_v3 = vrot.slane %v2059_v1, 2  ;;  %v2160_v62 = vrot.slane %v2060_v59, 2  ;;  %v5760_v20 = vld [vmem:[#allocation5_spill] sm:$0xff] }
 0x11f   : > { %5731 = vst [vmem:[#allocation8_spill] sm:$0xff] %v4157_v6  ;;  %5732 = vst [vmem:[#allocation7_spill] sm:$0xff] %v4160_v32  ;;  %v2021_v55 = vadd.f32 %v1918_v61, %v1770_v57  ;;  %v2162_v11 = vrot.slane %v2061_v48, 2  ;;  %v4164_v63 = vadd.f32 %v3981_v16, %v2024_v49  ;;  %v4167_v4 = vadd.f32 %v3984_v31, %v2025_v9  ;;  %v5741_v16 = vld [vmem:[#allocation38_spill] sm:$0xff]  ;;  %v5758_v9 = vld [vmem:[#allocation4_spill] sm:$0xff] }
 0x120   : > { %v2161_v52 = vsel %vm994_vm1, %v2159_v3, %v2160_v62  ;;  %v4171_v40 = vadd.f32 %v3991_v12, %v2026_v44  ;;  %v4174_v10 = vadd.f32 %v3996_v41, %v2027_v15  ;;  %v3237_v30 = vunpack.i.h.bf16 %v3235_v13  ;;  %v5763_v59 = vld [vmem:[#allocation21_spill] sm:$0xff] }
 0x121   : > { %5733 = vst [vmem:[#allocation11_spill] sm:$0xff] %v4164_v63  ;;  %5734 = vst [vmem:[#allocation9_spill] sm:$0xff] %v4167_v4  ;;  %v5738_v53 = vrot.slane %v5737_v42, 2  ;;  %v5740_v2 = vrot.slane %v5739_v0, 2  ;;  %v5742_v35 = vrot.slane %v5741_v16, 2  ;;  %v2163_v24 = vsel %vm994_vm1, %v2160_v62, %v2162_v11  ;;  %v5765_v62 = vld [vmem:[#allocation20_spill] sm:$0xff]  ;;  %v3230_v63 = vpop.permute.xlu0 %3229 }
 0x122   : > { %5735 = vst [vmem:[#allocation25_spill] sm:$0xff] %v4171_v40  ;;  %5736 = vst [vmem:[#allocation34_spill] sm:$0xff] %v4174_v10  ;;  %v4187_v12 = vadd.f32 %v2161_v52, %v2020_v5  ;;  %v5746_v41 = vrot.slane %v5745_v7, 2  ;;  %v5748_v43 = vrot.slane %v5747_v19, 2  ;;  %v5750_v21 = vrot.slane %v5749_v46, 2  ;;  %v5764_v5 = vld [vmem:[#allocation17_spill] sm:$0xff] }
 0x123   : > { %v1032_v33 = vsel %vm994_vm1, %v5740_v2, %v5738_v53  ;;  %v5743_v31 = vmov %v5738_v53  ;;  %v4199_v57 = vadd.f32 %v2163_v24, %v2021_v55  ;;  %v4201_v25 = vunpack.i.l.bf16 %v3235_v13 }
 0x124   : > { %v1034_v37 = vsel %vm994_vm1, %v5743_v31, %v5742_v35  ;;  %5744 = vst [vmem:[#allocation14_spill] sm:$0xff] %v4187_v12  ;;  %v1604_v14 = vsel %vm994_vm1, %v5748_v43, %v5746_v41  ;;  %v5751_v60 = vmov %v5746_v41  ;;  %v4204_v56 = vadd.f32 %v1032_v33, %v5753_v54 }
 0x125   : > { %v1606_v38 = vsel %vm994_vm1, %v5751_v60, %v5750_v21  ;;  %5752 = vst [vmem:[#allocation41_spill] sm:$0xff] %v4199_v57  ;;  %v4207_v58 = vadd.f32 %v1034_v37, %v5754_v27  ;;  %v4210_v26 = vadd.f32 %v1604_v14, %v5755_v8  ;;  %v687_v49 = vmul.f32 %v3237_v30, %v5757_v29 }
 0x126   : > { %v4213_v39 = vadd.f32 %v1606_v38, %v5756_v51  ;;  %v4217_v44 = vmul.f32 %v3237_v30, %v5758_v9  ;;  %v4220_v36 = vmul.f32 %v3237_v30, %v3407_v17  ;;  %v539_v45 = vmul.f32 %v5761_v47, %v5760_v20 }
 0x127   : > { %v4225_v23 = vmul.f32 %v3237_v30, %v3409_v18  ;;  %v4228_v15 = vmul.f32 %v3237_v30, %v3419_v22  ;;  %v4231_v1 = vmul.f32 %v3237_v30, %v3425_v28  ;;  %v540_v50 = vmul.f32 %v5763_v59, %v5760_v20 }
 0x128   : > { %5759 = vst [vmem:[#allocation12_spill] sm:$0xff] %v4217_v44  ;;  %v682_v48 = vmul.f32 %v5761_v47, %v5757_v29  ;;  %v683_v13 = vmul.f32 %v5763_v59, %v5757_v29  ;;  %v684_v61 = vmul.f32 %v4201_v25, %v5757_v29  ;;  %v685_v3 = vmul.f32 %v5764_v5, %v5757_v29 }
 0x129   : > { %5762 = vst [vmem:[#allocation38_spill] sm:$0xff] %v4225_v23  ;;  %v686_v55 = vmul.f32 %v5765_v62, %v5757_v29  ;;  %v928_v11 = vmul.f32 %v5761_v47, %v5758_v9  ;;  %v929_v52 = vmul.f32 %v5763_v59, %v5758_v9  ;;  %v930_v30 = vmul.f32 %v4201_v25, %v5758_v9 }
 0x12a   : > { %v799_v42 = vrot.slane %v682_v48, 1  ;;  %v800_v53 = vrot.slane %v683_v13, 1  ;;  %v802_v0 = vrot.slane %v684_v61, 1  ;;  %v804_v2 = vrot.slane %v685_v3, 1 }
 0x12b   : > { %v807_v33 = vrot.slane %v687_v49, 1  ;;  %v1380_v35 = vrot.slane %v4220_v36, 1  ;;  %v805_v31 = vrot.slane %v686_v55, 1  ;;  %v1045_v7 = vrot.slane %v928_v11, 2 }
 0x12c   : > { %v801_v37 = vsel %vm748_vm0, %v799_v42, %v800_v53  ;;  %v803_v24 = vsel %vm748_vm0, %v800_v53, %v802_v0  ;;  %v1046_v41 = vrot.slane %v929_v52, 2  ;;  %v541_v19 = vmul.f32 %v5764_v5, %v5760_v20 }
 0x12d   : > { %v806_v43 = vsel %vm748_vm0, %v804_v2, %v805_v31  ;;  %v881_v14 = vadd.f32 %v801_v37, %v539_v45  ;;  %v1048_v46 = vrot.slane %v930_v30, 2  ;;  %v1952_v60 = vrot.slane %v4228_v15, 1  ;;  %v5770_v30 = vld [vmem:[#allocation6_spill] sm:$0xff] }
 0x12e   : > { %v2197_v38 = vrot.slane %v4231_v1, 2  ;;  %v882_v54 = vadd.f32 %v803_v24, %v540_v50  ;;  %v542_v27 = vmul.f32 %v5765_v62, %v5760_v20  ;;  %v808_v8 = vsel %vm748_vm0, %v805_v31, %v807_v33 }
 0x12f   : > { %v4266_v51 = vmul.f32 %v5764_v5, %v5758_v9  ;;  %v4270_v49 = vmul.f32 %v5765_v62, %v5758_v9  ;;  %v4272_v36 = vadd.f32 %v806_v43, %v541_v19  ;;  %v1047_v45 = vsel %vm994_vm1, %v1045_v7, %v1046_v41 }
 0x130   : > { %v1258_v50 = vmul.f32 %v5761_v47, %v3407_v17  ;;  %v1259_v48 = vmul.f32 %v5763_v59, %v3407_v17  ;;  %v1049_v13 = vsel %vm994_vm1, %v1046_v41, %v1048_v46  ;;  %v1127_v61 = vadd.f32 %v1047_v45, %v881_v14 }
 0x131   : > { %5766 = vst [vmem:[#allocation43_spill] sm:$0xff] %v4266_v51  ;;  %5767 = vst [vmem:[#allocation42_spill] sm:$0xff] %v4270_v49  ;;  %v1260_v3 = vmul.f32 %v4201_v25, %v3407_v17  ;;  %v1261_v55 = vmul.f32 %v5764_v5, %v3407_v17  ;;  %v4284_v11 = vadd.f32 %v808_v8, %v542_v27  ;;  %v4442_v6 = vunpack.i.l.bf16 %v3230_v63  ;;  %v5779_v51 = vld [vmem:[#allocation18_spill] sm:$0xff] }
 0x132   : > { %5768 = vst [vmem:[#allocation39_spill] sm:$0xff] %v4272_v36  ;;  %v1128_v52 = vadd.f32 %v1049_v13, %v882_v54  ;;  %v1176_v42 = vmul.f32 %v5764_v5, %v5770_v30  ;;  %v1177_v53 = vmul.f32 %v5765_v62, %v5770_v30  ;;  %v1262_v0 = vmul.f32 %v5765_v62, %v3407_v17 }
 0x133   : > { %5769 = vst [vmem:[#allocation36_spill] sm:$0xff] %v4284_v11  ;;  %v1372_v2 = vrot.slane %v1258_v50, 1  ;;  %v1373_v33 = vrot.slane %v1259_v48, 1  ;;  %v1375_v31 = vrot.slane %v1260_v3, 1  ;;  %v1377_v37 = vrot.slane %v1261_v55, 1 }
 0x134   : > { %v1503_v24 = vmul.f32 %v5761_v47, %v3409_v18  ;;  %v1504_v7 = vmul.f32 %v5763_v59, %v3409_v18  ;;  %v1505_v41 = vmul.f32 %v4201_v25, %v3409_v18  ;;  %v1208_v43 = vadd.f32 %v1176_v42, %v1127_v61 }
 0x135   : > { %v1378_v14 = vrot.slane %v1262_v0, 1  ;;  %v4301_v46 = vmul.f32 %v5764_v5, %v3409_v18  ;;  %v1209_v27 = vadd.f32 %v1177_v53, %v1128_v52  ;;  %v4305_v8 = vsel %vm748_vm0, %v1372_v2, %v1373_v33 }
 0x136   : > { %v4308_v45 = vsel %vm748_vm0, %v1373_v33, %v1375_v31  ;;  %v4312_v50 = vmul.f32 %v5765_v62, %v3409_v18  ;;  %v1617_v48 = vrot.slane %v1503_v24, 2  ;;  %v1618_v13 = vrot.slane %v1504_v7, 2 }
 0x137   : > { %5771 = vst [vmem:[#allocation40_spill] sm:$0xff] %v4301_v46  ;;  %v1832_v61 = vmul.f32 %v5761_v47, %v3419_v22  ;;  %v1379_v3 = vsel %vm748_vm0, %v1377_v37, %v1378_v14  ;;  %v1381_v55 = vsel %vm748_vm0, %v1378_v14, %v1380_v35  ;;  %v1620_v52 = vrot.slane %v1505_v41, 2 }
 0x138   : > { %5772 = vst [vmem:[#allocation44_spill] sm:$0xff] %v4312_v50  ;;  %v4319_v53 = vadd.f32 %v1379_v3, %v1208_v43  ;;  %v1833_v0 = vmul.f32 %v5763_v59, %v3419_v22  ;;  %v1834_v2 = vmul.f32 %v4201_v25, %v3419_v22  ;;  %v1835_v33 = vmul.f32 %v5764_v5, %v3419_v22 }
 0x139   : > { %v4327_v31 = vadd.f32 %v1381_v55, %v1209_v27  ;;  %v1836_v37 = vmul.f32 %v5765_v62, %v3419_v22  ;;  %v1944_v35 = vrot.slane %v1832_v61, 1  ;;  %v2077_v24 = vmul.f32 %v5761_v47, %v3425_v28 }
 0x13a   : > { %5773 = vst [vmem:[#allocation45_spill] sm:$0xff] %v4319_v53  ;;  %v4334_v7 = vsel %vm994_vm1, %v1617_v48, %v1618_v13  ;;  %v1945_v41 = vrot.slane %v1833_v0, 1  ;;  %v1947_v43 = vrot.slane %v1834_v2, 1  ;;  %v2078_v14 = vmul.f32 %v5763_v59, %v3425_v28 }
 0x13b   : > { %5774 = vst [vmem:[#allocation22_spill] sm:$0xff] %v4327_v31  ;;  %v4339_v3 = vsel %vm994_vm1, %v1618_v13, %v1620_v52  ;;  %v1949_v55 = vrot.slane %v1835_v33, 1  ;;  %v1950_v21 = vrot.slane %v1836_v37, 1  ;;  %v2079_v48 = vmul.f32 %v4201_v25, %v3425_v28  ;;  %v5775_v25 = vld [vmem:[#allocation16_spill] sm:$0xff]  ;;  %v5778_v31 = vld [vmem:[#allocation19_spill] sm:$0xff] }
 0x13c   : > { %v4343_v61 = vsel %vm748_vm0, %v1944_v35, %v1945_v41  ;;  %v4346_v42 = vsel %vm748_vm0, %v1945_v41, %v1947_v43  ;;  %v2080_v0 = vmul.f32 %v5764_v5, %v3425_v28  ;;  %v2081_v52 = vmul.f32 %v5765_v62, %v3425_v28  ;;  %v5776_v5 = vld [vmem:[#allocation15_spill] sm:$0xff] }
 0x13d   : > { %v4353_v2 = vsel %vm748_vm0, %v1949_v55, %v1950_v21  ;;  %v4358_v13 = vsel %vm748_vm0, %v1950_v21, %v1952_v60  ;;  %v2189_v33 = vrot.slane %v2077_v24, 2  ;;  %v2190_v37 = vrot.slane %v2078_v14, 2 }
 0x13e   : > { %v2192_v35 = vrot.slane %v2079_v48, 2  ;;  %v2194_v41 = vrot.slane %v2080_v0, 2  ;;  %v537_v43 = vmul.f32 %v5775_v25, %v5760_v20  ;;  %v2195_v27 = vrot.slane %v2081_v52, 2 }
 0x13f   : > { %v4366_v55 = vmul.f32 %v5776_v5, %v5760_v20  ;;  %v679_v15 = vmul.f32 %v5775_v25, %v5757_v29  ;;  %v4372_v21 = vmul.f32 %v5776_v5, %v5757_v29  ;;  %v4375_v60 = vsel %vm994_vm1, %v2189_v33, %v2190_v37 }
 0x140   : > { %v4378_v24 = vsel %vm994_vm1, %v2190_v37, %v2192_v35  ;;  %v925_v14 = vmul.f32 %v5775_v25, %v5758_v9  ;;  %v4384_v48 = vmul.f32 %v5776_v5, %v5758_v9  ;;  %v4387_v0 = vsel %vm994_vm1, %v2194_v41, %v2195_v27 }
 0x141   : > { %v4392_v52 = vsel %vm994_vm1, %v2195_v27, %v2197_v38  ;;  %v794_v33 = vrot.slane %v679_v15, 1  ;;  %v795_v16 = vrot.slane %v4372_v21, 1  ;;  %v4398_v19 = vmul.f32 %v5775_v25, %v5770_v30 }
 0x142   : > { %5777 = vst [vmem:[#allocation21_spill] sm:$0xff] %v4392_v52  ;;  %v1040_v37 = vrot.slane %v925_v14, 2  ;;  %v1041_v35 = vrot.slane %v4384_v48, 2  ;;  %v4402_v54 = vmul.f32 %v5776_v5, %v5770_v30  ;;  %v1255_v1 = vmul.f32 %v5775_v25, %v3407_v17 }
 0x143   : > { %v796_v41 = vsel %vm748_vm0, %v794_v33, %v795_v16  ;;  %v1256_v38 = vmul.f32 %v5776_v5, %v3407_v17  ;;  %v1500_v27 = vmul.f32 %v5775_v25, %v3409_v18  ;;  %v1501_v14 = vmul.f32 %v5776_v5, %v3409_v18 }
 0x144   : > { %v879_v15 = vadd.f32 %v796_v41, %v537_v43  ;;  %v1042_v21 = vsel %vm994_vm1, %v1040_v37, %v1041_v35  ;;  %v4416_v48 = vmul.f32 %v5775_v25, %v3432_v34  ;;  %v1367_v33 = vrot.slane %v1255_v1, 1 }
 0x145   : > { %v1368_v10 = vrot.slane %v1256_v38, 1  ;;  %v1612_v40 = vrot.slane %v1500_v27, 2  ;;  %v4420_v4 = vmul.f32 %v5776_v5, %v3432_v34  ;;  %v1613_v43 = vrot.slane %v1501_v14, 2 }
 0x146   : > { %v4422_v32 = vadd.f32 %v1042_v21, %v879_v15  ;;  %v4426_v37 = vmul.f32 %v5765_v62, %v3432_v34  ;;  %v1829_v41 = vmul.f32 %v5775_v25, %v3419_v22  ;;  %v1830_v38 = vmul.f32 %v5776_v5, %v3419_v22 }
 0x147   : > { %v4431_v1 = vsel %vm748_vm0, %v1367_v33, %v1368_v10  ;;  %v2074_v27 = vmul.f32 %v5775_v25, %v3425_v28  ;;  %v2075_v15 = vmul.f32 %v5776_v5, %v3425_v28  ;;  %v4440_v21 = vsel %vm994_vm1, %v1612_v40, %v1613_v43 }
 0x148   : > { %v1939_v62 = vrot.slane %v1829_v41, 1  ;;  %v3232_v14 = vunpack.i.h.bf16 %v3230_v63  ;;  %v1940_v33 = vrot.slane %v1830_v38, 1  ;;  %v535_v53 = vmul.f32 %v5778_v31, %v5760_v20 }
 0x149   : > { %v2184_v57 = vrot.slane %v2074_v27, 2  ;;  %v2185_v12 = vrot.slane %v2075_v15, 2  ;;  %v536_v49 = vmul.f32 %v5779_v51, %v5760_v20  ;;  %v1252_v52 = vmul.f32 %v5778_v31, %v3407_v17 }
 0x14a   : > { %v681_v23 = vmul.f32 %v3232_v14, %v5757_v29  ;;  %v927_v25 = vmul.f32 %v3232_v14, %v5758_v9  ;;  %v1257_v5 = vmul.f32 %v3232_v14, %v3407_v17  ;;  %v1502_v40 = vmul.f32 %v3232_v14, %v3409_v18 }
 0x14b   : > { %v4453_v41 = vsel %vm748_vm0, %v1939_v62, %v1940_v33  ;;  %v4456_v63 = vsel %vm994_vm1, %v2184_v57, %v2185_v12  ;;  %v1831_v38 = vmul.f32 %v3232_v14, %v3419_v22  ;;  %v2076_v27 = vmul.f32 %v3232_v14, %v3425_v28 }
 0x14c   : > { %v797_v15 = vrot.slane %v681_v23, 1  ;;  %v1043_v46 = vrot.slane %v927_v25, 2  ;;  %v1370_v50 = vrot.slane %v1257_v5, 1  ;;  %v1615_v11 = vrot.slane %v1502_v40, 2 }
 0x14d   : > { %v1942_v36 = vrot.slane %v1831_v38, 1  ;;  %v2187_v44 = vrot.slane %v2076_v27, 2  ;;  %v676_v62 = vmul.f32 %v5778_v31, %v5757_v29  ;;  %v677_v27 = vmul.f32 %v5779_v51, %v5757_v29 }
 0x14e   : > { %v798_v57 = vsel %vm748_vm0, %v795_v16, %v797_v15  ;;  %v1044_v23 = vsel %vm994_vm1, %v1041_v35, %v1043_v46  ;;  %v1371_v14 = vsel %vm748_vm0, %v1368_v10, %v1370_v50  ;;  %v1616_v25 = vsel %vm994_vm1, %v1613_v43, %v1615_v11 }
 0x14f   : > { %v880_v5 = vadd.f32 %v798_v57, %v4366_v55  ;;  %v4480_v40 = vsel %vm748_vm0, %v1940_v33, %v1942_v36  ;;  %v4483_v38 = vsel %vm994_vm1, %v2185_v12, %v2187_v44  ;;  %v678_v16 = vmul.f32 %v4442_v6, %v5757_v29 }
 0x150   : > { %v789_v15 = vrot.slane %v676_v62, 1  ;;  %v922_v10 = vmul.f32 %v5778_v31, %v5758_v9  ;;  %v923_v11 = vmul.f32 %v5779_v51, %v5758_v9  ;;  %v790_v50 = vrot.slane %v677_v27, 1 }
 0x151   : > { %v1126_v46 = vadd.f32 %v1044_v23, %v880_v5  ;;  %v924_v36 = vmul.f32 %v4442_v6, %v5758_v9  ;;  %v1170_v12 = vmul.f32 %v5778_v31, %v5770_v30  ;;  %v792_v44 = vrot.slane %v678_v16, 1 }
 0x152   : > { %v1035_v55 = vrot.slane %v922_v10, 2  ;;  %v1036_v35 = vrot.slane %v923_v11, 2  ;;  %v1171_v43 = vmul.f32 %v5779_v51, %v5770_v30  ;;  %v791_v33 = vsel %vm748_vm0, %v789_v15, %v790_v50 }
 0x153   : > { %v1038_v62 = vrot.slane %v924_v36, 2  ;;  %v1174_v57 = vmul.f32 %v5761_v47, %v5770_v30  ;;  %v1175_v23 = vmul.f32 %v5763_v59, %v5770_v30  ;;  %v793_v5 = vsel %vm748_vm0, %v790_v50, %v792_v44 }
 0x154   : > { %v877_v27 = vadd.f32 %v791_v33, %v535_v53  ;;  %v1037_v20 = vsel %vm994_vm1, %v1035_v55, %v1036_v35  ;;  %v1202_v16 = vadd.f32 %v1170_v12, %v4204_v56  ;;  %v878_v10 = vadd.f32 %v793_v5, %v536_v49 }
 0x155   : > { %v1039_v11 = vsel %vm994_vm1, %v1036_v35, %v1038_v62  ;;  %v1203_v9 = vadd.f32 %v1171_v43, %v4207_v58  ;;  %v1206_v15 = vadd.f32 %v1174_v57, %v4422_v32  ;;  %v1207_v29 = vadd.f32 %v1175_v23, %v1126_v46 }
 0x156   : > { %v1123_v36 = vadd.f32 %v1037_v20, %v877_v27  ;;  %v1253_v50 = vmul.f32 %v5779_v51, %v3407_v17  ;;  %v1124_v53 = vadd.f32 %v1039_v11, %v878_v10  ;;  %v1254_v44 = vmul.f32 %v4442_v6, %v3407_v17 }
 0x157   : > { %v1457_v56 = vadd.f32 %v4305_v8, %v1206_v15  ;;  %v1497_v49 = vmul.f32 %v5778_v31, %v3409_v18  ;;  %v1362_v32 = vrot.slane %v1252_v52, 1  ;;  %v1458_v46 = vadd.f32 %v4308_v45, %v1207_v29 }
 0x158   : > { %v1204_v58 = vadd.f32 %v4398_v19, %v1123_v36  ;;  %v1363_v20 = vrot.slane %v1253_v50, 1  ;;  %v1205_v12 = vadd.f32 %v4402_v54, %v1124_v53  ;;  %v1365_v55 = vrot.slane %v1254_v44, 1  ;;  %v5780_v36 = vld [vmem:[#allocation23_spill] sm:$0xff] }
 0x159   : > { %v1498_v35 = vmul.f32 %v5779_v51, %v3409_v18  ;;  %v1499_v43 = vmul.f32 %v4442_v6, %v3409_v18  ;;  %v1607_v62 = vrot.slane %v1497_v49, 2  ;;  %v1702_v19 = vadd.f32 %v4334_v7, %v1457_v56 }
 0x15a   : > { %v1364_v8 = vsel %vm748_vm0, %v1362_v32, %v1363_v20  ;;  %v1455_v33 = vadd.f32 %v4431_v1, %v1204_v58  ;;  %v1366_v52 = vsel %vm748_vm0, %v1363_v20, %v1365_v55  ;;  %v1456_v29 = vadd.f32 %v1371_v14, %v1205_v12 }
 0x15b   : > { %v1453_v57 = vadd.f32 %v1364_v8, %v1202_v16  ;;  %v1608_v45 = vrot.slane %v1498_v35, 2  ;;  %v1454_v54 = vadd.f32 %v1366_v52, %v1203_v9  ;;  %v1610_v23 = vrot.slane %v1499_v43, 2 }
 0x15c   : > { %v1700_v5 = vadd.f32 %v4440_v21, %v1455_v33  ;;  %v1703_v27 = vadd.f32 %v4339_v3, %v1458_v46  ;;  %v1701_v11 = vadd.f32 %v1616_v25, %v1456_v29  ;;  %v1745_v1 = vmul.f32 %v5778_v31, %v3432_v34 }
 0x15d   : > { %v1609_v10 = vsel %vm994_vm1, %v1607_v62, %v1608_v45  ;;  %v1746_v7 = vmul.f32 %v5779_v51, %v3432_v34  ;;  %v1611_v15 = vsel %vm994_vm1, %v1608_v45, %v1610_v23  ;;  %v1749_v9 = vmul.f32 %v5761_v47, %v3432_v34 }
 0x15e   : > { %v1698_v16 = vadd.f32 %v1609_v10, %v1453_v57  ;;  %v1750_v21 = vmul.f32 %v5763_v59, %v3432_v34  ;;  %v1699_v14 = vadd.f32 %v1611_v15, %v1454_v54  ;;  %v1777_v3 = vadd.f32 %v1745_v1, %v4210_v26  ;;  %v5786_v57 = vld [vmem:[#allocation21_spill] sm:$0xff]  ;;  %v5788_v54 = vld [vmem:[#allocation42_spill] sm:$0xff]  ;;  %v5792_v10 = vld [vmem:[#allocation12_spill] sm:$0xff] }
 0x15f   : > { %v1778_v25 = vadd.f32 %v1746_v7, %v4213_v39  ;;  %v1783_v50 = vadd.f32 %v5780_v36, %v1702_v19  ;;  %v1781_v44 = vadd.f32 %v1749_v9, %v1700_v5  ;;  %v1784_v49 = vadd.f32 %v4426_v37, %v1703_v27  ;;  %v5790_v5 = vld [vmem:[#allocation43_spill] sm:$0xff]  ;;  %v5797_v9 = vld [vmem:[#allocation36_spill] sm:$0xff] }
 0x160   : > { %v1779_v53 = vadd.f32 %v4416_v48, %v1698_v16  ;;  %v1782_v56 = vadd.f32 %v1750_v21, %v1701_v11  ;;  %v1780_v58 = vadd.f32 %v4420_v4, %v1699_v14  ;;  %v1826_v47 = vmul.f32 %v5778_v31, %v3419_v22  ;;  %v5796_v15 = vld [vmem:[#allocation39_spill] sm:$0xff] }
 0x161   : > { %v1827_v59 = vmul.f32 %v5779_v51, %v3419_v22  ;;  %v1828_v26 = vmul.f32 %v4442_v6, %v3419_v22  ;;  %v2032_v32 = vadd.f32 %v4343_v61, %v1781_v44  ;;  %v2034_v20 = vadd.f32 %v4353_v2, %v1783_v50  ;;  %v5802_v50 = vld [vmem:[#allocation44_spill] sm:$0xff] }
 0x162   : > { %v2030_v39 = vadd.f32 %v4453_v41, %v1779_v53  ;;  %v2033_v48 = vadd.f32 %v4346_v42, %v1782_v56  ;;  %v1934_v37 = vrot.slane %v1826_v47, 1  ;;  %v2031_v12 = vadd.f32 %v4480_v40, %v1780_v58  ;;  %v5804_v44 = vld [vmem:[#allocation40_spill] sm:$0xff]  ;;  %v5806_v58 = vld [vmem:[#allocation38_spill] sm:$0xff] }
 0x163   : > { %v1935_v46 = vrot.slane %v1827_v59, 1  ;;  %v1937_v4 = vrot.slane %v1828_v26, 1  ;;  %v2035_v55 = vadd.f32 %v4358_v13, %v1784_v49  ;;  %v2071_v35 = vmul.f32 %v5778_v31, %v3425_v28  ;;  %v3245_v13 = vpop.permute.xlu1 %3244 }
 0x164   : > { %v2072_v43 = vmul.f32 %v5779_v51, %v3425_v28  ;;  %v2073_v61 = vmul.f32 %v4442_v6, %v3425_v28  ;;  %v4569_v41 = vadd.f32 %v4456_v63, %v2030_v39  ;;  %v4572_v40 = vadd.f32 %v4483_v38, %v2031_v12 }
 0x165   : > { %v1936_v42 = vsel %vm748_vm0, %v1934_v37, %v1935_v46  ;;  %v1938_v2 = vsel %vm748_vm0, %v1935_v46, %v1937_v4  ;;  %v2179_v31 = vrot.slane %v2071_v35, 2  ;;  %v4575_v51 = vadd.f32 %v4375_v60, %v2032_v32  ;;  %v5811_v37 = vld [vmem:[#allocation22_spill] sm:$0xff]  ;;  %v5813_v35 = vld [vmem:[#allocation4_spill] sm:$0xff] }
 0x166   : > { %5781 = vst [vmem:[#allocation17_spill] sm:$0xff] %v4569_v41  ;;  %5782 = vst [vmem:[#allocation20_spill] sm:$0xff] %v4572_v40  ;;  %v2028_v8 = vadd.f32 %v1936_v42, %v1777_v3  ;;  %v2029_v33 = vadd.f32 %v1938_v2, %v1778_v25  ;;  %v2180_v62 = vrot.slane %v2072_v43, 2  ;;  %v2182_v19 = vrot.slane %v2073_v61, 2  ;;  %v5799_v3 = vld [vmem:[#allocation3_spill] sm:$0xff]  ;;  %v5800_v25 = vld [vmem:[#allocation32_spill] sm:$0xff] }
 0x167   : > { %5783 = vst [vmem:[#allocation6_spill] sm:$0xff] %v4575_v51  ;;  %v4578_v6 = vadd.f32 %v4378_v24, %v2033_v48  ;;  %v4581_v52 = vadd.f32 %v4387_v0, %v2034_v20  ;;  %v4585_v38 = vadd.f32 %v5786_v57, %v2035_v55  ;;  %v3247_v29 = vunpack.i.h.bf16 %v3245_v13  ;;  %v5810_v48 = vld [vmem:[#allocation45_spill] sm:$0xff] }
 0x168   : > { %v2181_v63 = vsel %vm994_vm1, %v2179_v31, %v2180_v62  ;;  %v3246_v45 = vunpack.i.l.bf16 %v3245_v13  ;;  %v5789_v23 = vrot.slane %v5788_v54, 2  ;;  %v5791_v27 = vrot.slane %v5790_v5, 2  ;;  %v5815_v61 = vld [vmem:[#allocation5_spill] sm:$0xff] }
 0x169   : > { %5784 = vst [vmem:[#allocation16_spill] sm:$0xff] %v4578_v6  ;;  %5785 = vst [vmem:[#allocation15_spill] sm:$0xff] %v4581_v52  ;;  %v5793_v11 = vrot.slane %v5792_v10, 2  ;;  %v2183_v1 = vsel %vm994_vm1, %v2180_v62, %v2182_v19  ;;  %v4598_v7 = vadd.f32 %v2181_v63, %v2028_v8  ;;  %v4610_v36 = vmul.f32 %v5800_v25, %v5799_v3 }
 0x16a   : > { %5787 = vst [vmem:[#allocation19_spill] sm:$0xff] %v4585_v38  ;;  %v1052_v60 = vsel %vm994_vm1, %v5791_v27, %v5789_v23  ;;  %v5794_v24 = vmov %v5789_v23  ;;  %v4606_v14 = vadd.f32 %v2183_v1, %v2029_v33  ;;  %v5803_v53 = vrot.slane %v5802_v50, 2  ;;  %v5817_v33 = vld [vmem:[#allocation33_spill] sm:$0xff] }
 0x16b   : > { %v1054_v0 = vsel %vm994_vm1, %v5794_v24, %v5793_v11  ;;  %5795 = vst [vmem:[#allocation18_spill] sm:$0xff] %v4598_v7  ;;  %v4601_v16 = vadd.f32 %v1052_v60, %v5796_v15  ;;  %5801 = vst [vmem:[#allocation21_spill] sm:$0xff] %v4610_v36  ;;  %v5805_v56 = vrot.slane %v5804_v44, 2  ;;  %v5807_v47 = vrot.slane %v5806_v58, 2 }
 0x16c   : > { %v4604_v21 = vadd.f32 %v1054_v0, %v5797_v9  ;;  %5798 = vst [vmem:[#allocation23_spill] sm:$0xff] %v4606_v14  ;;  %v5808_v59 = vmov %v5803_v53  ;;  %v4623_v39 = vmul.f32 %v3247_v29, %v3407_v17  ;;  %v696_v32 = vmul.f32 %v3246_v45, %v5799_v3  ;;  %v5820_v0 = vld [vmem:[#allocation30_spill] sm:$0xff] }
 0x16d   : > { %v1624_v49 = vsel %vm994_vm1, %v5805_v56, %v5803_v53  ;;  %v1626_v26 = vsel %vm994_vm1, %v5808_v59, %v5807_v47  ;;  %v1849_v4 = vmul.f32 %v3247_v29, %v3419_v22  ;;  %v4634_v12 = vmul.f32 %v3247_v29, %v3425_v28 }
 0x16e   : > { %5809 = vst [vmem:[#allocation42_spill] sm:$0xff] %v4623_v39  ;;  %v4627_v20 = vadd.f32 %v1624_v49, %v5810_v48  ;;  %v4630_v46 = vadd.f32 %v1626_v26, %v5811_v37  ;;  %v4637_v55 = vmul.f32 %v3247_v29, %v5799_v3  ;;  %v4640_v43 = vmul.f32 %v3247_v29, %v5813_v35 }
 0x16f   : > { %v548_v42 = vmul.f32 %v5800_v25, %v5815_v61  ;;  %v822_v2 = vrot.slane %v696_v32, 1  ;;  %v4645_v13 = vmul.f32 %v3247_v29, %v3409_v18  ;;  %v5641_v8 = vrot.slane %v4610_v36, 1  ;;  %v5823_v32 = vld [vmem:[#allocation29_spill] sm:$0xff] }
 0x170   : > { %5812 = vst [vmem:[#allocation43_spill] sm:$0xff] %v4637_v55  ;;  %5814 = vst [vmem:[#allocation12_spill] sm:$0xff] %v4640_v43  ;;  %v1270_v31 = vmul.f32 %v5817_v33, %v3407_v17  ;;  %v1271_v62 = vmul.f32 %v5800_v25, %v3407_v17  ;;  %v4654_v63 = vmul.f32 %v3246_v45, %v5813_v35  ;;  %v1972_v29 = vrot.slane %v1849_v4, 1 }
 0x171   : > { %5816 = vst [vmem:[#allocation39_spill] sm:$0xff] %v4645_v13  ;;  %v1272_v57 = vmul.f32 %v3246_v45, %v3407_v17  ;;  %v1515_v54 = vmul.f32 %v5817_v33, %v3409_v18  ;;  %v2217_v23 = vrot.slane %v4634_v12, 2  ;;  %v823_v5 = vsel %vm748_vm0, %v5641_v8, %v822_v2 }
 0x172   : > { %5818 = vst [vmem:[#allocation36_spill] sm:$0xff] %v4654_v63  ;;  %v1392_v27 = vrot.slane %v1270_v31, 1  ;;  %v4665_v60 = vmul.f32 %v5800_v25, %v5813_v35  ;;  %v1393_v10 = vrot.slane %v1271_v62, 1  ;;  %v1516_v24 = vmul.f32 %v5800_v25, %v3409_v18 }
 0x173   : > { %v1395_v11 = vrot.slane %v1272_v57, 1  ;;  %v4671_v1 = vmul.f32 %v5820_v0, %v3407_v17  ;;  %v1517_v15 = vmul.f32 %v3246_v45, %v3409_v18  ;;  %v1637_v9 = vrot.slane %v1515_v54, 2 }
 0x174   : > { %5819 = vst [vmem:[#allocation3_spill] sm:$0xff] %v4665_v60  ;;  %v1844_v50 = vmul.f32 %v5817_v33, %v3419_v22  ;;  %v4676_v53 = vadd.f32 %v823_v5, %v548_v42  ;;  %v4680_v56 = vsel %vm748_vm0, %v1392_v27, %v1393_v10  ;;  %v1638_v58 = vrot.slane %v1516_v24, 2 }
 0x175   : > { %5821 = vst [vmem:[#allocation32_spill] sm:$0xff] %v4671_v1  ;;  %v4683_v49 = vsel %vm748_vm0, %v1393_v10, %v1395_v11  ;;  %v1640_v47 = vrot.slane %v1517_v15, 2  ;;  %v1845_v59 = vmul.f32 %v5800_v25, %v3419_v22  ;;  %v1846_v26 = vmul.f32 %v3246_v45, %v3419_v22 }
 0x176   : > { %5822 = vst [vmem:[#allocation44_spill] sm:$0xff] %v4676_v53  ;;  %v1847_v48 = vmul.f32 %v5823_v32, %v3419_v22  ;;  %v1848_v37 = vmul.f32 %v5820_v0, %v3419_v22  ;;  %v1964_v4 = vrot.slane %v1844_v50, 1  ;;  %v2089_v12 = vmul.f32 %v5817_v33, %v3425_v28 }
 0x177   : > { %v4695_v42 = vsel %vm994_vm1, %v1637_v9, %v1638_v58  ;;  %v4698_v2 = vsel %vm994_vm1, %v1638_v58, %v1640_v47  ;;  %v1965_v31 = vrot.slane %v1845_v59, 1  ;;  %v1967_v62 = vrot.slane %v1846_v26, 1 }
 0x178   : > { %v1969_v57 = vrot.slane %v1847_v48, 1  ;;  %v1970_v54 = vrot.slane %v1848_v37, 1  ;;  %v2090_v5 = vmul.f32 %v5800_v25, %v3425_v28  ;;  %v2091_v27 = vmul.f32 %v3246_v45, %v3425_v28  ;;  %v5824_v48 = vld [vmem:[#allocation26_spill] sm:$0xff] }
 0x179   : > { %v4704_v10 = vsel %vm748_vm0, %v1964_v4, %v1965_v31  ;;  %v4707_v11 = vsel %vm748_vm0, %v1965_v31, %v1967_v62  ;;  %v2092_v24 = vmul.f32 %v5823_v32, %v3425_v28  ;;  %v2093_v15 = vmul.f32 %v5820_v0, %v3425_v28  ;;  %v5825_v31 = vld [vmem:[#allocation24_spill] sm:$0xff]  ;;  %v5829_v32 = vld [vmem:[#allocation27_spill] sm:$0xff] }
 0x17a   : > { %v4714_v9 = vsel %vm748_vm0, %v1969_v57, %v1970_v54  ;;  %v4717_v50 = vsel %vm748_vm0, %v1970_v54, %v1972_v29  ;;  %v2209_v58 = vrot.slane %v2089_v12, 2  ;;  %v2210_v45 = vrot.slane %v2090_v5, 2 }
 0x17b   : > { %v2212_v47 = vrot.slane %v2091_v27, 2  ;;  %v2214_v59 = vrot.slane %v2092_v24, 2  ;;  %v2215_v26 = vrot.slane %v2093_v15, 2  ;;  %v545_v37 = vmul.f32 %v5824_v48, %v5815_v61 }
 0x17c   : > { %v4722_v4 = vsel %vm994_vm1, %v2209_v58, %v2210_v45  ;;  %v4726_v62 = vmul.f32 %v5825_v31, %v5815_v61  ;;  %v691_v57 = vmul.f32 %v5824_v48, %v5799_v3  ;;  %v692_v29 = vmul.f32 %v5825_v31, %v5799_v3 }
 0x17d   : > { %v4733_v12 = vsel %vm994_vm1, %v2210_v45, %v2212_v47  ;;  %v4736_v54 = vsel %vm994_vm1, %v2214_v59, %v2215_v26  ;;  %v4739_v5 = vsel %vm994_vm1, %v2215_v26, %v2217_v23  ;;  %v937_v27 = vmul.f32 %v5824_v48, %v5813_v35 }
 0x17e   : > { %5826 = vst [vmem:[#allocation40_spill] sm:$0xff] %v4736_v54  ;;  %5827 = vst [vmem:[#allocation38_spill] sm:$0xff] %v4739_v5  ;;  %v814_v24 = vrot.slane %v691_v57, 1  ;;  %v815_v15 = vrot.slane %v692_v29, 1  ;;  %v938_v58 = vmul.f32 %v5825_v31, %v5813_v35  ;;  %v4747_v8 = vmul.f32 %v5824_v48, %v5770_v30 }
 0x17f   : > { %v1060_v45 = vrot.slane %v937_v27, 2  ;;  %v4751_v47 = vmul.f32 %v5825_v31, %v5770_v30  ;;  %v1267_v23 = vmul.f32 %v5824_v48, %v3407_v17  ;;  %v1268_v59 = vmul.f32 %v5825_v31, %v3407_v17 }
 0x180   : > { %v816_v26 = vsel %vm748_vm0, %v814_v24, %v815_v15  ;;  %v1061_v57 = vrot.slane %v938_v58, 2  ;;  %v1512_v29 = vmul.f32 %v5824_v48, %v3409_v18  ;;  %v1513_v19 = vmul.f32 %v5825_v31, %v3409_v18  ;;  %v3240_v58 = vpop.permute.xlu0 %3239 }
 0x181   : > { %v887_v27 = vadd.f32 %v816_v26, %v545_v37  ;;  %v1387_v44 = vrot.slane %v1267_v23, 1  ;;  %v1388_v38 = vrot.slane %v1268_v59, 1  ;;  %v4764_v52 = vmul.f32 %v5824_v48, %v3432_v34 }
 0x182   : > { %v1062_v6 = vsel %vm994_vm1, %v1060_v45, %v1061_v57  ;;  %v1632_v51 = vrot.slane %v1512_v29, 2  ;;  %v1633_v40 = vrot.slane %v1513_v19, 2  ;;  %v4769_v24 = vmul.f32 %v5825_v31, %v3432_v34 }
 0x183   : > { %v4771_v41 = vadd.f32 %v1062_v6, %v887_v27  ;;  %v4774_v14 = vsel %vm748_vm0, %v1387_v44, %v1388_v38  ;;  %v4778_v37 = vmul.f32 %v5820_v0, %v3432_v34  ;;  %v1841_v23 = vmul.f32 %v5824_v48, %v3419_v22  ;;  %v5828_v27 = vld [vmem:[#allocation28_spill] sm:$0xff] }
 0x184   : > { %v4783_v45 = vsel %vm994_vm1, %v1632_v51, %v1633_v40  ;;  %v1842_v19 = vmul.f32 %v5825_v31, %v3419_v22  ;;  %v2086_v6 = vmul.f32 %v5824_v48, %v3425_v28  ;;  %v2087_v44 = vmul.f32 %v5825_v31, %v3425_v28 }
 0x185   : > { %v1959_v59 = vrot.slane %v1841_v23, 1  ;;  %v3242_v26 = vunpack.i.h.bf16 %v3240_v58  ;;  %v4791_v29 = vunpack.i.l.bf16 %v3240_v58  ;;  %v543_v7 = vmul.f32 %v5828_v27, %v5815_v61 }
 0x186   : > { %v1960_v36 = vrot.slane %v1842_v19, 1  ;;  %v2204_v0 = vrot.slane %v2086_v6, 2  ;;  %v2205_v51 = vrot.slane %v2087_v44, 2  ;;  %v544_v39 = vmul.f32 %v5829_v32, %v5815_v61 }
 0x187   : > { %v693_v53 = vmul.f32 %v3242_v26, %v5799_v3  ;;  %v939_v48 = vmul.f32 %v3242_v26, %v5813_v35  ;;  %v1269_v63 = vmul.f32 %v3242_v26, %v3407_v17  ;;  %v1514_v31 = vmul.f32 %v3242_v26, %v3409_v18 }
 0x188   : > { %v4802_v58 = vsel %vm748_vm0, %v1959_v59, %v1960_v36  ;;  %v4805_v23 = vsel %vm994_vm1, %v2204_v0, %v2205_v51  ;;  %v1843_v19 = vmul.f32 %v3242_v26, %v3419_v22  ;;  %v2088_v6 = vmul.f32 %v3242_v26, %v3425_v28 }
 0x189   : > { %v817_v44 = vrot.slane %v693_v53, 1  ;;  %v1063_v61 = vrot.slane %v939_v48, 2  ;;  %v1390_v13 = vrot.slane %v1269_v63, 1  ;;  %v1635_v43 = vrot.slane %v1514_v31, 2 }
 0x18a   : > { %v1962_v1 = vrot.slane %v1843_v19, 1  ;;  %v2207_v55 = vrot.slane %v2088_v6, 2  ;;  %v688_v60 = vmul.f32 %v5828_v27, %v5799_v3  ;;  %v689_v59 = vmul.f32 %v5829_v32, %v5799_v3 }
 0x18b   : > { %v818_v5 = vsel %vm748_vm0, %v815_v15, %v817_v44  ;;  %v1064_v0 = vsel %vm994_vm1, %v1061_v57, %v1063_v61  ;;  %v1391_v54 = vsel %vm748_vm0, %v1388_v38, %v1390_v13  ;;  %v1636_v26 = vsel %vm994_vm1, %v1633_v40, %v1635_v43 }
 0x18c   : > { %v888_v53 = vadd.f32 %v818_v5, %v4726_v62  ;;  %v4819_v63 = vsel %vm748_vm0, %v1960_v36, %v1962_v1  ;;  %v4822_v48 = vsel %vm994_vm1, %v2205_v51, %v2207_v55  ;;  %v690_v31 = vmul.f32 %v4791_v29, %v5799_v3 }
 0x18d   : > { %v809_v19 = vrot.slane %v688_v60, 1  ;;  %v810_v6 = vrot.slane %v689_v59, 1  ;;  %v934_v61 = vmul.f32 %v5828_v27, %v5813_v35  ;;  %v935_v38 = vmul.f32 %v5829_v32, %v5813_v35 }
 0x18e   : > { %v1134_v40 = vadd.f32 %v1064_v0, %v888_v53  ;;  %v812_v43 = vrot.slane %v690_v31, 1  ;;  %v936_v36 = vmul.f32 %v4791_v29, %v5813_v35  ;;  %v1178_v55 = vmul.f32 %v5828_v27, %v5770_v30 }
 0x18f   : > { %v811_v13 = vsel %vm748_vm0, %v809_v19, %v810_v6  ;;  %v1055_v1 = vrot.slane %v934_v61, 2  ;;  %v1056_v62 = vrot.slane %v935_v38, 2  ;;  %v1179_v60 = vmul.f32 %v5829_v32, %v5770_v30 }
 0x190   : > { %v813_v5 = vsel %vm748_vm0, %v810_v6, %v812_v43  ;;  %v885_v15 = vadd.f32 %v811_v13, %v543_v7  ;;  %v1058_v57 = vrot.slane %v936_v36, 2  ;;  %v1182_v51 = vmul.f32 %v5817_v33, %v5770_v30 }
 0x191   : > { %v886_v44 = vadd.f32 %v813_v5, %v544_v39  ;;  %v1057_v59 = vsel %vm994_vm1, %v1055_v1, %v1056_v62  ;;  %v1183_v0 = vmul.f32 %v5800_v25, %v5770_v30  ;;  %v1210_v53 = vadd.f32 %v1178_v55, %v4601_v16 }
 0x192   : > { %v1059_v31 = vsel %vm994_vm1, %v1056_v62, %v1058_v57  ;;  %v1131_v19 = vadd.f32 %v1057_v59, %v885_v15  ;;  %v1211_v61 = vadd.f32 %v1179_v60, %v4604_v21  ;;  %v1214_v6 = vadd.f32 %v1182_v51, %v4771_v41 }
 0x193   : > { %v1132_v7 = vadd.f32 %v1059_v31, %v886_v44  ;;  %v1215_v38 = vadd.f32 %v1183_v0, %v1134_v40  ;;  %v1264_v43 = vmul.f32 %v5828_v27, %v3407_v17  ;;  %v1265_v39 = vmul.f32 %v5829_v32, %v3407_v17 }
 0x194   : > { %v1212_v36 = vadd.f32 %v4747_v8, %v1131_v19  ;;  %v1266_v16 = vmul.f32 %v4791_v29, %v3407_v17  ;;  %v1465_v55 = vadd.f32 %v4680_v56, %v1214_v6  ;;  %v1509_v21 = vmul.f32 %v5828_v27, %v3409_v18 }
 0x195   : > { %v1213_v41 = vadd.f32 %v4751_v47, %v1132_v7  ;;  %v1382_v13 = vrot.slane %v1264_v43, 1  ;;  %v1383_v40 = vrot.slane %v1265_v39, 1  ;;  %v1466_v1 = vadd.f32 %v4683_v49, %v1215_v38  ;;  %v5830_v43 = vld [vmem:[#allocation35_spill] sm:$0xff] }
 0x196   : > { %v1385_v62 = vrot.slane %v1266_v16, 1  ;;  %v1463_v60 = vadd.f32 %v4774_v14, %v1212_v36  ;;  %v1510_v8 = vmul.f32 %v5829_v32, %v3409_v18  ;;  %v1511_v5 = vmul.f32 %v4791_v29, %v3409_v18 }
 0x197   : > { %v1384_v56 = vsel %vm748_vm0, %v1382_v13, %v1383_v40  ;;  %v1464_v15 = vadd.f32 %v1391_v54, %v1213_v41  ;;  %v1627_v57 = vrot.slane %v1509_v21, 2  ;;  %v1710_v51 = vadd.f32 %v4695_v42, %v1465_v55 }
 0x198   : > { %v1386_v47 = vsel %vm748_vm0, %v1383_v40, %v1385_v62  ;;  %v1461_v44 = vadd.f32 %v1384_v56, %v1210_v53  ;;  %v1628_v59 = vrot.slane %v1510_v8, 2  ;;  %v1630_v49 = vrot.slane %v1511_v5, 2 }
 0x199   : > { %v1462_v0 = vadd.f32 %v1386_v47, %v1211_v61  ;;  %v1708_v14 = vadd.f32 %v4783_v45, %v1463_v60  ;;  %v1709_v31 = vadd.f32 %v1636_v26, %v1464_v15  ;;  %v1711_v19 = vadd.f32 %v4698_v2, %v1466_v1 }
 0x19a   : > { %v1629_v6 = vsel %vm994_vm1, %v1627_v57, %v1628_v59  ;;  %v1631_v7 = vsel %vm994_vm1, %v1628_v59, %v1630_v49  ;;  %v1753_v54 = vmul.f32 %v5828_v27, %v3432_v34  ;;  %v1754_v42 = vmul.f32 %v5829_v32, %v3432_v34  ;;  %v5833_v49 = vld [vmem:[#allocation3_spill] sm:$0xff] }
 0x19b   : > { %v1706_v38 = vadd.f32 %v1629_v6, %v1461_v44  ;;  %v1707_v53 = vadd.f32 %v1631_v7, %v1462_v0  ;;  %v1757_v61 = vmul.f32 %v5817_v33, %v3432_v34  ;;  %v1758_v45 = vmul.f32 %v5800_v25, %v3432_v34  ;;  %v5832_v44 = vld [vmem:[#allocation38_spill] sm:$0xff] }
 0x19c   : > { %v1785_v2 = vadd.f32 %v1753_v54, %v4627_v20  ;;  %v1786_v26 = vadd.f32 %v1754_v42, %v4630_v46  ;;  %v1791_v39 = vadd.f32 %v5830_v43, %v1710_v51  ;;  %v1792_v36 = vadd.f32 %v4778_v37, %v1711_v19  ;;  %v5835_v19 = vld [vmem:[#allocation32_spill] sm:$0xff] }
 0x19d   : > { %v1787_v16 = vadd.f32 %v4764_v52, %v1706_v38  ;;  %v1788_v55 = vadd.f32 %v4769_v24, %v1707_v53  ;;  %v1789_v21 = vadd.f32 %v1757_v61, %v1708_v14  ;;  %v1790_v41 = vadd.f32 %v1758_v45, %v1709_v31  ;;  %v5834_v14 = vld [vmem:[#allocation43_spill] sm:$0xff]  ;;  %v5836_v42 = vld [vmem:[#allocation12_spill] sm:$0xff] }
 0x19e   : > { %v1838_v13 = vmul.f32 %v5828_v27, %v3419_v22  ;;  %v1839_v25 = vmul.f32 %v5829_v32, %v3419_v22  ;;  %v1840_v20 = vmul.f32 %v4791_v29, %v3419_v22  ;;  %v2042_v46 = vadd.f32 %v4714_v9, %v1791_v39  ;;  %v5837_v53 = vld [vmem:[#allocation39_spill] sm:$0xff]  ;;  %v5838_v45 = vld [vmem:[#allocation36_spill] sm:$0xff] }
 0x19f   : > { %v2038_v40 = vadd.f32 %v4802_v58, %v1787_v16  ;;  %v2039_v37 = vadd.f32 %v4819_v63, %v1788_v55  ;;  %v2040_v52 = vadd.f32 %v4704_v10, %v1789_v21  ;;  %v2041_v24 = vadd.f32 %v4707_v11, %v1790_v41  ;;  %v5840_v39 = vld [vmem:[#allocation44_spill] sm:$0xff]  ;;  %v5841_v16 = vld [vmem:[#allocation42_spill] sm:$0xff] }
 0x1a0   : > { %v1954_v1 = vrot.slane %v1838_v13, 1  ;;  %v1955_v62 = vrot.slane %v1839_v25, 1  ;;  %v1957_v60 = vrot.slane %v1840_v20, 1  ;;  %v2043_v8 = vadd.f32 %v4717_v50, %v1792_v36  ;;  %v5843_v25 = vld [vmem:[#allocation29_spill] sm:$0xff] }
 0x1a1   : > { %v2083_v5 = vmul.f32 %v5828_v27, %v3425_v28  ;;  %v2084_v56 = vmul.f32 %v5829_v32, %v3425_v28  ;;  %v2085_v9 = vmul.f32 %v4791_v29, %v3425_v28  ;;  %v4904_v58 = vadd.f32 %v4805_v23, %v2038_v40  ;;  %v5831_v23 = vld [vmem:[#allocation40_spill] sm:$0xff]  ;;  %v5844_v40 = vld [vmem:[#allocation30_spill] sm:$0xff] }
 0x1a2   : > { %v1956_v10 = vsel %vm748_vm0, %v1954_v1, %v1955_v62  ;;  %v1958_v11 = vsel %vm748_vm0, %v1955_v62, %v1957_v60  ;;  %v4909_v63 = vadd.f32 %v4822_v48, %v2039_v37  ;;  %v4912_v50 = vadd.f32 %v4722_v4, %v2040_v52  ;;  %v1225_v4 = vpop.permute.xlu1 %1224 }
 0x1a3   : > { %v2036_v27 = vadd.f32 %v1956_v10, %v1785_v2  ;;  %v2037_v15 = vadd.f32 %v1958_v11, %v1786_v26  ;;  %v2199_v57 = vrot.slane %v2083_v5, 2  ;;  %v2200_v32 = vrot.slane %v2084_v56, 2  ;;  %2320 = vst.msk [vmem:[#allocation2 + $0xb0] sm:$0xff] (!%p2969_p8), %vm2297_vm2, %v4904_v58 }
 0x1a4   : > { %v2202_v51 = vrot.slane %v2085_v9, 2  ;;  %v4915_v29 = vadd.f32 %v4733_v12, %v2041_v24  ;;  %v4918_v47 = vadd.f32 %v5831_v23, %v2042_v46  ;;  %v4921_v59 = vadd.f32 %v5832_v44, %v2043_v8  ;;  %v3250_v12 = vpop.permute.xlu0 %3249  ;;  %v5845_v23 = vld [vmem:[#allocation5_spill] sm:$0xff]  ;;  %2321 = vst.msk [vmem:[#allocation2 + $0xb8] sm:$0xff] (!%p2969_p8), %vm2297_vm2, %v4909_v63  ;;  %2322 = vst.msk [vmem:[#allocation2 + $0xc0] sm:$0xff] (!%p2969_p8), %vm2297_vm2, %v4912_v50 }
 0x1a5   : > { %v1066_v48 = vrot.slane %v5833_v49, 2  ;;  %v2201_v0 = vsel %vm994_vm1, %v2199_v57, %v2200_v32  ;;  %v827_v31 = vrot.slane %v5834_v14, 1  ;;  %v1398_v6 = vrot.slane %v5835_v19, 1 }
 0x1a6   : > { %v2203_v7 = vsel %vm994_vm1, %v2200_v32, %v2202_v51  ;;  %v4928_v54 = vadd.f32 %v2201_v0, %v2036_v27  ;;  %v1073_v38 = vrot.slane %v5836_v42, 2  ;;  %v1645_v61 = vrot.slane %v5837_v53, 2  ;;  %v1802_v42 = vpop.permute.xlu1 %1801  ;;  %2323 = vst.msk [vmem:[#allocation2 + $0xc8] sm:$0xff] (!%p2969_p8), %vm2297_vm2, %v4915_v29  ;;  %2324 = vst.msk [vmem:[#allocation2 + $0xd0] sm:$0xff] (!%p2969_p8), %vm2297_vm2, %v4918_v47 }
 0x1a7   : > { %v5839_v2 = vrot.slane %v5838_v45, 2  ;;  %v4935_v43 = vadd.f32 %v2203_v7, %v2037_v15  ;;  %v5842_v55 = vrot.slane %v5841_v16, 1  ;;  %v4942_v41 = vmul.f32 %v3407_v17, %v1225_v4  ;;  %2325 = vst.msk [vmem:[#allocation2 + $0xd8] sm:$0xff] (!%p2969_p8), %vm2297_vm2, %v4921_v59 }
 0x1a8   : > { %v4945_v13 = vmul.f32 %v3409_v18, %v1225_v4  ;;  %v1273_v20 = vmul.f32 %v5843_v25, %v3407_v17  ;;  %v1518_v46 = vmul.f32 %v5843_v25, %v3409_v18  ;;  %v1519_v37 = vmul.f32 %v5844_v40, %v3409_v18  ;;  %2318 = vst.msk [vmem:[#allocation2 + $0xa0] sm:$0xff] (!%p2969_p8), %vm2297_vm2, %v4928_v54 }
 0x1a9   : > { %v1069_v26 = vsel %vm994_vm1, %v1066_v48, %v5839_v2  ;;  %v1401_v21 = vsel %vm748_vm0, %v1398_v6, %v5842_v55  ;;  %v4953_v52 = vunpack.i.h.bf16 %v3250_v12  ;;  %v1852_v24 = vmul.f32 %v3419_v22, %v1225_v4  ;;  %2319 = vst.msk [vmem:[#allocation2 + $0xa8] sm:$0xff] (!%p2969_p8), %vm2297_vm2, %v4935_v43 }
 0x1aa   : > { %v1136_v36 = vadd.f32 %v1069_v26, %v5840_v39  ;;  %v1185_v1 = vmul.f32 %v5844_v40, %v5770_v30  ;;  %v694_v62 = vmul.f32 %v5817_v33, %v5799_v3  ;;  %v940_v60 = vmul.f32 %v5817_v33, %v5813_v35 }
 0x1ab   : > { %v2097_v8 = vmul.f32 %v3425_v28, %v1225_v4  ;;  %v1851_v5 = vmul.f32 %v4953_v52, %v3419_v22  ;;  %v4967_v56 = vmul.f32 %v4953_v52, %v3425_v28  ;;  %v4969_v9 = vunpack.i.l.bf16 %v3250_v12  ;;  %v5846_v4 = vld [vmem:[#allocation21_spill] sm:$0xff] }
 0x1ac   : > { %v1184_v10 = vmul.f32 %v5843_v25, %v5770_v30  ;;  %v819_v11 = vrot.slane %v694_v62, 1  ;;  %v1065_v27 = vrot.slane %v940_v60, 2  ;;  %v1217_v15 = vadd.f32 %v1185_v1, %v1136_v36 }
 0x1ad   : > { %v1397_v57 = vrot.slane %v1273_v20, 1  ;;  %v1642_v32 = vrot.slane %v1518_v46, 2  ;;  %v1643_v51 = vrot.slane %v1519_v37, 2  ;;  %v547_v44 = vmul.f32 %v5817_v33, %v5845_v23 }
 0x1ae   : > { %v1975_v49 = vrot.slane %v1851_v5, 1  ;;  %v2220_v0 = vrot.slane %v4967_v56, 2  ;;  %v5847_v19 = vrot.slane %v5846_v4, 1  ;;  %v1468_v12 = vadd.f32 %v1401_v21, %v1217_v15 }
 0x1af   : > { %v1977_v53 = vrot.slane %v1852_v24, 1  ;;  %v1646_v45 = vsel %vm994_vm1, %v1643_v51, %v1645_v61  ;;  %v1850_v26 = vmul.f32 %v4969_v9, %v3419_v22  ;;  %v2222_v39 = vrot.slane %v2097_v8, 2 }
 0x1b0   : > { %v821_v7 = vsel %vm748_vm0, %v819_v11, %v5847_v19  ;;  %v1762_v36 = vmul.f32 %v4953_v52, %v3432_v34  ;;  %v1067_v33 = vsel %vm994_vm1, %v1065_v27, %v1066_v48  ;;  %v1713_v16 = vadd.f32 %v1646_v45, %v1468_v12 }
 0x1b1   : > { %v889_v2 = vadd.f32 %v821_v7, %v547_v44  ;;  %v1399_v55 = vsel %vm748_vm0, %v1397_v57, %v1398_v6  ;;  %v1644_v20 = vsel %vm994_vm1, %v1642_v32, %v1643_v51  ;;  %v1761_v21 = vmul.f32 %v4969_v9, %v3432_v34  ;;  %v3255_v32 = vpop.permute.xlu0 %3254 }
 0x1b2   : > { %v1978_v61 = vsel %vm748_vm0, %v1975_v49, %v1977_v53  ;;  %v2223_v37 = vsel %vm994_vm1, %v2220_v0, %v2222_v39  ;;  %v1794_v24 = vadd.f32 %v1762_v36, %v1713_v16  ;;  %v2095_v1 = vmul.f32 %v4969_v9, %v3425_v28 }
 0x1b3   : > { %v1135_v46 = vadd.f32 %v1067_v33, %v889_v2  ;;  %v1974_v60 = vrot.slane %v1850_v26, 1  ;;  %v697_v48 = vmul.f32 %v5843_v25, %v5799_v3  ;;  %v698_v6 = vmul.f32 %v5844_v40, %v5799_v3 }
 0x1b4   : > { %v2045_v8 = vadd.f32 %v1978_v61, %v1794_v24  ;;  %v549_v5 = vmul.f32 %v5843_v25, %v5845_v23  ;;  %v943_v56 = vmul.f32 %v5843_v25, %v5813_v35  ;;  %v944_v11 = vmul.f32 %v5844_v40, %v5813_v35 }
 0x1b5   : > { %v1216_v62 = vadd.f32 %v1184_v10, %v1135_v46  ;;  %v550_v10 = vmul.f32 %v5844_v40, %v5845_v23  ;;  %v824_v15 = vrot.slane %v697_v48, 1  ;;  %v825_v57 = vrot.slane %v698_v6, 1 }
 0x1b6   : > { %v2219_v51 = vrot.slane %v2095_v1, 2  ;;  %v5005_v44 = vadd.f32 %v2223_v37, %v2045_v8  ;;  %v1070_v3 = vrot.slane %v943_v56, 2  ;;  %v1071_v4 = vrot.slane %v944_v11, 2 }
 0x1b7   : > { %v1467_v27 = vadd.f32 %v1399_v55, %v1216_v62  ;;  %v1976_v7 = vsel %vm748_vm0, %v1974_v60, %v1975_v49  ;;  %v826_v25 = vsel %vm748_vm0, %v824_v15, %v825_v57  ;;  %v828_v35 = vsel %vm748_vm0, %v825_v57, %v827_v31 }
 0x1b8   : > { %v891_v12 = vadd.f32 %v826_v25, %v549_v5  ;;  %v892_v53 = vadd.f32 %v828_v35, %v550_v10  ;;  %v3257_v40 = vunpack.i.h.bf16 %v3255_v32  ;;  %v3256_v23 = vunpack.i.l.bf16 %v3255_v32  ;;  %2327 = vst.msk [vmem:[#allocation2 + $0xe8] sm:$0xff] (!%p2969_p8), %vm2297_vm2, %v5005_v44 }
 0x1b9   : > { %v1712_v19 = vadd.f32 %v1644_v20, %v1467_v27  ;;  %v1072_v2 = vsel %vm994_vm1, %v1070_v3, %v1071_v4  ;;  %v1074_v26 = vsel %vm994_vm1, %v1071_v4, %v1073_v38  ;;  %v1186_v49 = vmul.f32 %v4969_v9, %v5770_v30 }
 0x1ba   : > { %v1137_v39 = vadd.f32 %v1072_v2, %v891_v12  ;;  %v1138_v36 = vadd.f32 %v1074_v26, %v892_v53  ;;  %v1187_v14 = vmul.f32 %v4953_v52, %v5770_v30  ;;  %v1276_v31 = vmul.f32 %v4969_v9, %v3407_v17  ;;  %v5850_v26 = vld [vmem:[#allocation13_spill] sm:$0xff] (!%p2969_p8) }
 0x1bb   : > { %v1793_v45 = vadd.f32 %v1761_v21, %v1712_v19  ;;  %v2221_v16 = vsel %vm994_vm1, %v2219_v51, %v2220_v0  ;;  %v1277_v55 = vmul.f32 %v4953_v52, %v3407_v17  ;;  %v1521_v21 = vmul.f32 %v4969_v9, %v3409_v18  ;;  %2300 = vst.msk [vmem:[#allocation2 + $0x10] sm:$0xff] (!%p2969_p8), %vm2297_vm2, %v5850_v26 }
 0x1bc   : > { %v1218_v20 = vadd.f32 %v1186_v49, %v1137_v39  ;;  %v1219_v38 = vadd.f32 %v1187_v14, %v1138_v36  ;;  %v1402_v46 = vrot.slane %v1276_v31, 1  ;;  %v1405_v61 = vrot.slane %v4942_v41, 1  ;;  %v5851_v49 = vld [vmem:[#allocation10_spill] sm:$0xff] (!%p2969_p8)  ;;  %v5853_v36 = vld [vmem:[#allocation41_spill] sm:$0xff] (!%p2969_p8)  ;;  %v5854_v14 = vld [vmem:[#allocation8_spill] sm:$0xff] (!%p2969_p8) }
 0x1bd   : > { %v2044_v33 = vadd.f32 %v1976_v7, %v1793_v45  ;;  %v1650_v30 = vrot.slane %v4945_v13, 2  ;;  %v1403_v24 = vrot.slane %v1277_v55, 1  ;;  %v1854_v1 = vmul.f32 %v3257_v40, %v3419_v22  ;;  %2301 = vst.msk [vmem:[#allocation2 + $0x18] sm:$0xff] (!%p2969_p8), %vm2297_vm2, %v5851_v49  ;;  %v5852_v39 = vld [vmem:[#allocation14_spill] sm:$0xff] (!%p2969_p8)  ;;  %2303 = vst.msk [vmem:[#allocation2 + $0x28] sm:$0xff] (!%p2969_p8), %vm2297_vm2, %v5853_v36  ;;  %v5855_v31 = vld [vmem:[#allocation7_spill] sm:$0xff] (!%p2969_p8) }
 0x1be   : > { %v1522_v0 = vmul.f32 %v4953_v52, %v3409_v18  ;;  %v1647_v17 = vrot.slane %v1521_v21, 2  ;;  %v1853_v62 = vmul.f32 %v3256_v23, %v3419_v22  ;;  %v1855_v60 = vmul.f32 %v3419_v22, %v1802_v42  ;;  %2302 = vst.msk [vmem:[#allocation2 + $0x20] sm:$0xff] (!%p2969_p8), %vm2297_vm2, %v5852_v39  ;;  %2304 = vst.msk [vmem:[#allocation2 + $0x30] sm:$0xff] (!%p2969_p8), %vm2297_vm2, %v5854_v14  ;;  %v5858_v55 = vld [vmem:[#allocation25_spill] sm:$0xff] (!%p2969_p8)  ;;  %v5863_v21 = vld [vmem:[#allocation20_spill] sm:$0xff] (!%p2969_p8) }
 0x1bf   : > { %v5029_v37 = vadd.f32 %v2221_v16, %v2044_v33  ;;  %v2099_v48 = vmul.f32 %v3257_v40, %v3425_v28  ;;  %v1404_v9 = vsel %vm748_vm0, %v1402_v46, %v1403_v24  ;;  %v1406_v41 = vsel %vm748_vm0, %v1403_v24, %v1405_v61  ;;  %2305 = vst.msk [vmem:[#allocation2 + $0x38] sm:$0xff] (!%p2969_p8), %vm2297_vm2, %v5855_v31  ;;  %v5856_v33 = vld [vmem:[#allocation11_spill] sm:$0xff] (!%p2969_p8)  ;;  %v5857_v16 = vld [vmem:[#allocation9_spill] sm:$0xff] (!%p2969_p8)  ;;  %v5864_v61 = vld [vmem:[#allocation6_spill] sm:$0xff] (!%p2969_p8) }
 0x1c0   : > { %v1469_v13 = vadd.f32 %v1404_v9, %v1218_v20  ;;  %v1470_v6 = vadd.f32 %v1406_v41, %v1219_v38  ;;  %v1648_v8 = vrot.slane %v1522_v0, 2  ;;  %v2098_v5 = vmul.f32 %v3256_v23, %v3425_v28  ;;  %2306 = vst.msk [vmem:[#allocation2 + $0x40] sm:$0xff] (!%p2969_p8), %vm2297_vm2, %v5856_v33  ;;  %2307 = vst.msk [vmem:[#allocation2 + $0x48] sm:$0xff] (!%p2969_p8), %vm2297_vm2, %v5857_v16  ;;  %v5860_v20 = vld [vmem:[#allocation18_spill] sm:$0xff] (!%p2969_p8)  ;;  %v5861_v38 = vld [vmem:[#allocation23_spill] sm:$0xff] (!%p2969_p8) }
 0x1c1   : > { %v2100_v56 = vmul.f32 %v3425_v28, %v1802_v42  ;;  %v1980_v11 = vrot.slane %v1854_v1, 1  ;;  %v1979_v27 = vrot.slane %v1853_v62, 1  ;;  %v1764_v22 = vmul.f32 %v3257_v40, %v3432_v34  ;;  %2308 = vst.msk [vmem:[#allocation2 + $0x50] sm:$0xff] (!%p2969_p8), %vm2297_vm2, %v5858_v55  ;;  %v5859_v42 = vld [vmem:[#allocation34_spill] sm:$0xff] (!%p2969_p8)  ;;  %2310 = vst.msk [vmem:[#allocation2 + $0x60] sm:$0xff] (!%p2969_p8), %vm2297_vm2, %v5860_v20  ;;  %v5862_v46 = vld [vmem:[#allocation17_spill] sm:$0xff] (!%p2969_p8) }
 0x1c2   : > { %v1649_v18 = vsel %vm994_vm1, %v1647_v17, %v1648_v8  ;;  %v1651_v52 = vsel %vm994_vm1, %v1648_v8, %v1650_v30  ;;  %v1763_v57 = vmul.f32 %v3256_v23, %v3432_v34  ;;  %v1982_v32 = vrot.slane %v1855_v60, 1  ;;  %v5848_v34 = vld [vmem:[#allocation37_spill] sm:$0xff] (!%p2969_p8)  ;;  %v5849_v23 = vld [vmem:[#allocation31_spill] sm:$0xff] (!%p2969_p8)  ;;  %2309 = vst.msk [vmem:[#allocation2 + $0x58] sm:$0xff] (!%p2969_p8), %vm2297_vm2, %v5859_v42  ;;  %2311 = vst.msk [vmem:[#allocation2 + $0x68] sm:$0xff] (!%p2969_p8), %vm2297_vm2, %v5861_v38 }
 0x1c3   : > { %v1714_v10 = vadd.f32 %v1649_v18, %v1469_v13  ;;  %v1715_v15 = vadd.f32 %v1651_v52, %v1470_v6  ;;  %v2225_v51 = vrot.slane %v2099_v48, 2  ;;  %v2224_v3 = vrot.slane %v2098_v5, 2  ;;  %2296 = sbr.rel (%p2969_p8) target bundleno = 460 (0x1cc), region = 32  ;;  %2298 = vst.msk [vmem:[#allocation2] sm:$0xff] (!%p2969_p8), %vm2297_vm2, %v5848_v34  ;;  %2299 = vst.msk [vmem:[#allocation2 + $0x8] sm:$0xff] (!%p2969_p8), %vm2297_vm2, %v5849_v23  ;;  %v5865_v30 = vld [vmem:[#allocation16_spill] sm:$0xff] (!%p2969_p8) }
 0x1c4   : > { %v2227_v7 = vrot.slane %v2100_v56, 2  ;;  %v1983_v28 = vsel %vm748_vm0, %v1980_v11, %v1982_v32  ;;  %v1981_v25 = vsel %vm748_vm0, %v1979_v27, %v1980_v11  ;;  %2312 = vst.msk [vmem:[#allocation2 + $0x70] sm:$0xff] (!%p2969_p8), %vm2297_vm2, %v5862_v46  ;;  %2313 = vst.msk [vmem:[#allocation2 + $0x78] sm:$0xff] (!%p2969_p8), %vm2297_vm2, %v5863_v21  ;;  %v5866_v24 = vld [vmem:[#allocation15_spill] sm:$0xff] (!%p2969_p8) }
 0x1c5   : > { %v1795_v4 = vadd.f32 %v1763_v57, %v1714_v10  ;;  %v1796_v19 = vadd.f32 %v1764_v22, %v1715_v15  ;;  %v2226_v40 = vsel %vm994_vm1, %v2224_v3, %v2225_v51  ;;  %2314 = vst.msk [vmem:[#allocation2 + $0x80] sm:$0xff] (!%p2969_p8), %vm2297_vm2, %v5864_v61  ;;  %2315 = vst.msk [vmem:[#allocation2 + $0x88] sm:$0xff] (!%p2969_p8), %vm2297_vm2, %v5865_v30  ;;  %v5867_v1 = vld [vmem:[#allocation19_spill] sm:$0xff] (!%p2969_p8) }
 0x1c6   : > { %v2228_v53 = vsel %vm994_vm1, %v2225_v51, %v2227_v7  ;;  %2316 = vst.msk [vmem:[#allocation2 + $0x90] sm:$0xff] (!%p2969_p8), %vm2297_vm2, %v5866_v24  ;;  %2317 = vst.msk [vmem:[#allocation2 + $0x98] sm:$0xff] (!%p2969_p8), %vm2297_vm2, %v5867_v1 }
 0x1c7   : > { %v2046_v35 = vadd.f32 %v1981_v25, %v1795_v4  ;;  %v2047_v12 = vadd.f32 %v1983_v28, %v1796_v19  ;;  %2326 = vst.msk [vmem:[#allocation2 + $0xe0] sm:$0xff] (!%p2969_p8), %vm2297_vm2, %v5029_v37 }
 0x1c9   : > { %v5049_v45 = vadd.f32 %v2226_v40, %v2046_v35  ;;  %v5051_v2 = vadd.f32 %v2228_v53, %v2047_v12 }
 0x1cb   : > { %2328 = vst.msk [vmem:[#allocation2 + $0xf0] sm:$0xff] %vm2297_vm2, %v5049_v45  ;;  %2329 = vst.msk [vmem:[#allocation2 + $0xf8] sm:$0xff] %vm2297_vm2, %v5051_v2 }
 0x1cc PF: > { %p2970_p9 = scmp.eq.s32.totalorder %s3280_s12, 0 }
 0x1cd   : > { %v2334_v0 = vld [vmem:[#allocation2] sm:$0xff] (!%p2970_p9)  ;;  %vm2398_vm3 = vcmask (!%p2970_p9), 64512   ;;  %v2335_v17 = vld [vmem:[#allocation2 + $0x8] sm:$0xff] (!%p2970_p9)  ;;  %v2336_v62 = vld [vmem:[#allocation2 + $0x10] sm:$0xff] (!%p2970_p9) }
 0x1ce   : > { %2333 = sbr.rel (%p2970_p9) target bundleno = 485 (0x1e5), region = 36  ;;  %v5868_v60 = vld [vmem:[#allocation37_spill] sm:$0xff] (!%p2970_p9)  ;;  %v5869_v9 = vld [vmem:[#allocation31_spill] sm:$0xff] (!%p2970_p9)  ;;  %v2337_v8 = vld [vmem:[#allocation2 + $0x18] sm:$0xff] (!%p2970_p9) }
 0x1cf   : > { %v2366_v48 = vadd.f32 (!%p2970_p9), %v2334_v0, %v5868_v60  ;;  %v2367_v41 = vadd.f32 (!%p2970_p9), %v2335_v17, %v5869_v9  ;;  %v5870_v13 = vld [vmem:[#allocation13_spill] sm:$0xff] (!%p2970_p9)  ;;  %v2338_v5 = vld [vmem:[#allocation2 + $0x20] sm:$0xff] (!%p2970_p9)  ;;  %v2339_v56 = vld [vmem:[#allocation2 + $0x28] sm:$0xff] (!%p2970_p9) }
 0x1d0   : > { %v2368_v6 = vadd.f32 (!%p2970_p9), %v2336_v62, %v5870_v13  ;;  %v5871_v11 = vld [vmem:[#allocation10_spill] sm:$0xff] (!%p2970_p9)  ;;  %v5873_v22 = vld [vmem:[#allocation41_spill] sm:$0xff] (!%p2970_p9)  ;;  %v2342_v32 = vld [vmem:[#allocation2 + $0x40] sm:$0xff] (!%p2970_p9) }
 0x1d1   : > { %v2369_v18 = vadd.f32 (!%p2970_p9), %v2337_v8, %v5871_v11  ;;  %v5872_v52 = vld [vmem:[#allocation14_spill] sm:$0xff] (!%p2970_p9)  ;;  %v2371_v10 = vadd.f32 (!%p2970_p9), %v2339_v56, %v5873_v22  ;;  %v2340_v15 = vld [vmem:[#allocation2 + $0x30] sm:$0xff] (!%p2970_p9)  ;;  %2399 = vst.msk [vmem:[#allocation2] sm:$0xff] (!%p2970_p9), %vm2398_vm3, %v2366_v48  ;;  %2400 = vst.msk [vmem:[#allocation2 + $0x8] sm:$0xff] (!%p2970_p9), %vm2398_vm3, %v2367_v41 }
 0x1d2   : > { %v2370_v27 = vadd.f32 (!%p2970_p9), %v2338_v5, %v5872_v52  ;;  %v2341_v57 = vld [vmem:[#allocation2 + $0x38] sm:$0xff] (!%p2970_p9)  ;;  %2401 = vst.msk [vmem:[#allocation2 + $0x10] sm:$0xff] (!%p2970_p9), %vm2398_vm3, %v2368_v6  ;;  %v5874_v51 = vld [vmem:[#allocation8_spill] sm:$0xff] (!%p2970_p9)  ;;  %v5875_v4 = vld [vmem:[#allocation7_spill] sm:$0xff] (!%p2970_p9) }
 0x1d3   : > { %v2372_v3 = vadd.f32 (!%p2970_p9), %v2340_v15, %v5874_v51  ;;  %v2373_v19 = vadd.f32 (!%p2970_p9), %v2341_v57, %v5875_v4  ;;  %v5876_v7 = vld [vmem:[#allocation11_spill] sm:$0xff] (!%p2970_p9)  ;;  %v2343_v25 = vld [vmem:[#allocation2 + $0x48] sm:$0xff] (!%p2970_p9)  ;;  %v2344_v35 = vld [vmem:[#allocation2 + $0x50] sm:$0xff] (!%p2970_p9)  ;;  %2402 = vst.msk [vmem:[#allocation2 + $0x18] sm:$0xff] (!%p2970_p9), %vm2398_vm3, %v2369_v18 }
 0x1d4   : > { %v2374_v28 = vadd.f32 (!%p2970_p9), %v2342_v32, %v5876_v7  ;;  %v2345_v12 = vld [vmem:[#allocation2 + $0x58] sm:$0xff] (!%p2970_p9)  ;;  %2403 = vst.msk [vmem:[#allocation2 + $0x20] sm:$0xff] (!%p2970_p9), %vm2398_vm3, %v2370_v27  ;;  %2404 = vst.msk [vmem:[#allocation2 + $0x28] sm:$0xff] (!%p2970_p9), %vm2398_vm3, %v2371_v10  ;;  %v5877_v53 = vld [vmem:[#allocation9_spill] sm:$0xff] (!%p2970_p9) }
 0x1d5   : > { %v2375_v40 = vadd.f32 %v2343_v25, %v5877_v53  ;;  %v5878_v34 = vld [vmem:[#allocation25_spill] sm:$0xff]  ;;  %v5879_v26 = vld [vmem:[#allocation34_spill] sm:$0xff]  ;;  %v2346_v39 = vld [vmem:[#allocation2 + $0x60] sm:$0xff]  ;;  %2405 = vst.msk [vmem:[#allocation2 + $0x30] sm:$0xff] %vm2398_vm3, %v2372_v3 }
 0x1d6   : > { %v2376_v23 = vadd.f32 %v2344_v35, %v5878_v34  ;;  %v2377_v49 = vadd.f32 %v2345_v12, %v5879_v26  ;;  %v2347_v36 = vld [vmem:[#allocation2 + $0x68] sm:$0xff]  ;;  %v2348_v14 = vld [vmem:[#allocation2 + $0x70] sm:$0xff]  ;;  %2406 = vst.msk [vmem:[#allocation2 + $0x38] sm:$0xff] %vm2398_vm3, %v2373_v19  ;;  %2407 = vst.msk [vmem:[#allocation2 + $0x40] sm:$0xff] %vm2398_vm3, %v2374_v28 }
 0x1d7   : > { %v5880_v31 = vld [vmem:[#allocation18_spill] sm:$0xff]  ;;  %v5881_v16 = vld [vmem:[#allocation23_spill] sm:$0xff]  ;;  %v5882_v42 = vld [vmem:[#allocation17_spill] sm:$0xff]  ;;  %2408 = vst.msk [vmem:[#allocation2 + $0x48] sm:$0xff] %vm2398_vm3, %v2375_v40 }
 0x1d8   : > { %v2378_v33 = vadd.f32 %v2346_v39, %v5880_v31  ;;  %v2379_v55 = vadd.f32 %v2347_v36, %v5881_v16  ;;  %v2380_v20 = vadd.f32 %v2348_v14, %v5882_v42  ;;  %v2349_v38 = vld [vmem:[#allocation2 + $0x78] sm:$0xff]  ;;  %v2350_v46 = vld [vmem:[#allocation2 + $0x80] sm:$0xff]  ;;  %v2351_v21 = vld [vmem:[#allocation2 + $0x88] sm:$0xff]  ;;  %2409 = vst.msk [vmem:[#allocation2 + $0x50] sm:$0xff] %vm2398_vm3, %v2376_v23 }
 0x1d9   : > { %2410 = vst.msk [vmem:[#allocation2 + $0x58] sm:$0xff] %vm2398_vm3, %v2377_v49  ;;  %v5883_v61 = vld [vmem:[#allocation20_spill] sm:$0xff]  ;;  %v5884_v24 = vld [vmem:[#allocation6_spill] sm:$0xff]  ;;  %v2352_v62 = vld [vmem:[#allocation2 + $0x90] sm:$0xff] }
 0x1da   : > { %v2381_v30 = vadd.f32 %v2349_v38, %v5883_v61  ;;  %v2382_v1 = vadd.f32 %v2350_v46, %v5884_v24  ;;  %v5885_v0 = vld [vmem:[#allocation16_spill] sm:$0xff]  ;;  %v2353_v60 = vld [vmem:[#allocation2 + $0x98] sm:$0xff]  ;;  %v2354_v48 = vld [vmem:[#allocation2 + $0xa0] sm:$0xff]  ;;  %2411 = vst.msk [vmem:[#allocation2 + $0x60] sm:$0xff] %vm2398_vm3, %v2378_v33 }
 0x1db   : > { %v2383_v17 = vadd.f32 %v2351_v21, %v5885_v0  ;;  %2412 = vst.msk [vmem:[#allocation2 + $0x68] sm:$0xff] %vm2398_vm3, %v2379_v55  ;;  %2413 = vst.msk [vmem:[#allocation2 + $0x70] sm:$0xff] %vm2398_vm3, %v2380_v20  ;;  %v5886_v9 = vld [vmem:[#allocation15_spill] sm:$0xff]  ;;  %v2386_v8 = vadd.f32 %v2354_v48, %v4928_v54  ;;  %v2355_v5 = vld [vmem:[#allocation2 + $0xa8] sm:$0xff] }
 0x1dc   : > { %v2384_v41 = vadd.f32 %v2352_v62, %v5886_v9  ;;  %v5887_v13 = vld [vmem:[#allocation19_spill] sm:$0xff]  ;;  %v2356_v56 = vld [vmem:[#allocation2 + $0xb0] sm:$0xff]  ;;  %v2357_v11 = vld [vmem:[#allocation2 + $0xb8] sm:$0xff]  ;;  %2414 = vst.msk [vmem:[#allocation2 + $0x78] sm:$0xff] %vm2398_vm3, %v2381_v30  ;;  %v2387_v18 = vadd.f32 %v2355_v5, %v4935_v43 }
 0x1dd   : > { %v2385_v6 = vadd.f32 %v2353_v60, %v5887_v13  ;;  %2415 = vst.msk [vmem:[#allocation2 + $0x80] sm:$0xff] %vm2398_vm3, %v2382_v1  ;;  %2416 = vst.msk [vmem:[#allocation2 + $0x88] sm:$0xff] %vm2398_vm3, %v2383_v17  ;;  %v2388_v52 = vadd.f32 %v2356_v56, %v4904_v58  ;;  %v2389_v27 = vadd.f32 %v2357_v11, %v4909_v63  ;;  %v2358_v22 = vld [vmem:[#allocation2 + $0xc0] sm:$0xff]  ;;  %v2359_v10 = vld [vmem:[#allocation2 + $0xc8] sm:$0xff] }
 0x1de   : > { %v2360_v15 = vld [vmem:[#allocation2 + $0xd0] sm:$0xff]  ;;  %2417 = vst.msk [vmem:[#allocation2 + $0x90] sm:$0xff] %vm2398_vm3, %v2384_v41  ;;  %2419 = vst.msk [vmem:[#allocation2 + $0xa0] sm:$0xff] %vm2398_vm3, %v2386_v8  ;;  %v2390_v54 = vadd.f32 %v2358_v22, %v4912_v50  ;;  %v2391_v57 = vadd.f32 %v2359_v10, %v4915_v29  ;;  %v2361_v43 = vld [vmem:[#allocation2 + $0xd8] sm:$0xff] }
 0x1df   : > { %2418 = vst.msk [vmem:[#allocation2 + $0x98] sm:$0xff] %vm2398_vm3, %v2385_v6  ;;  %v2392_v32 = vadd.f32 %v2360_v15, %v4918_v47  ;;  %v2362_v51 = vld [vmem:[#allocation2 + $0xe0] sm:$0xff]  ;;  %v2363_v58 = vld [vmem:[#allocation2 + $0xe8] sm:$0xff]  ;;  %2420 = vst.msk [vmem:[#allocation2 + $0xa8] sm:$0xff] %vm2398_vm3, %v2387_v18  ;;  %v2393_v63 = vadd.f32 %v2361_v43, %v4921_v59 }
 0x1e0   : > { %2421 = vst.msk [vmem:[#allocation2 + $0xb0] sm:$0xff] %vm2398_vm3, %v2388_v52  ;;  %2422 = vst.msk [vmem:[#allocation2 + $0xb8] sm:$0xff] %vm2398_vm3, %v2389_v27  ;;  %v2394_v3 = vadd.f32 %v2362_v51, %v5029_v37  ;;  %v2395_v4 = vadd.f32 %v2363_v58, %v5005_v44  ;;  %v2364_v50 = vld [vmem:[#allocation2 + $0xf0] sm:$0xff]  ;;  %v2365_v19 = vld [vmem:[#allocation2 + $0xf8] sm:$0xff] }
 0x1e1   : > { %2423 = vst.msk [vmem:[#allocation2 + $0xc0] sm:$0xff] %vm2398_vm3, %v2390_v54  ;;  %2424 = vst.msk [vmem:[#allocation2 + $0xc8] sm:$0xff] %vm2398_vm3, %v2391_v57  ;;  %v2396_v29 = vadd.f32 %v2364_v50, %v5049_v45  ;;  %v2397_v47 = vadd.f32 %v2365_v19, %v5051_v2 }
 0x1e2   : > { %2425 = vst.msk [vmem:[#allocation2 + $0xd0] sm:$0xff] %vm2398_vm3, %v2392_v32  ;;  %2426 = vst.msk [vmem:[#allocation2 + $0xd8] sm:$0xff] %vm2398_vm3, %v2393_v63 }
 0x1e3   : > { %2427 = vst.msk [vmem:[#allocation2 + $0xe0] sm:$0xff] %vm2398_vm3, %v2394_v3  ;;  %2428 = vst.msk [vmem:[#allocation2 + $0xe8] sm:$0xff] %vm2398_vm3, %v2395_v4 }
 0x1e4   : > { %2429 = vst.msk [vmem:[#allocation2 + $0xf0] sm:$0xff] %vm2398_vm3, %v2396_v29  ;;  %2430 = vst.msk [vmem:[#allocation2 + $0xf8] sm:$0xff] %vm2398_vm3, %v2397_v47 }
 0x1e5 PF: > { %p2971_p10 = scmp.ne.s32.totalorder %s3280_s12, 2 }
 0x1e6   : > { %vm2467_vm4 = vcmask (!%p2971_p10), 64512   ;;  %v5212_v14 = vld [vmem:[#allocation2 + $0x38] sm:$0xff] (!%p2971_p10)  ;;  %v5216_v16 = vld [vmem:[#allocation2 + $0x40] sm:$0xff] (!%p2971_p10)  ;;  %v5220_v20 = vld [vmem:[#allocation2 + $0x48] sm:$0xff] (!%p2971_p10)  ;;  %vm2770_vm5 = vcmask (!%p2971_p10), 60416   ;;  %vm2638_vm6 = vcmask (!%p2971_p10), 1040384  }
 0x1e7   : > { %2434 = sbr.rel (%p2971_p10) target bundleno = 582 (0x246), region = 40  ;;  %v2481_v33 = vsel (!%p2971_p10), %vm2467_vm4, %v5212_v14, 0.0  ;;  %v2483_v42 = vsel (!%p2971_p10), %vm2467_vm4, %v5216_v16, 0.0  ;;  %v2485_v46 = vsel (!%p2971_p10), %vm2467_vm4, %v5220_v20, 0.0  ;;  %v5230_v24 = vld [vmem:[#allocation2 + $0x50] sm:$0xff] (!%p2971_p10)  ;;  %v5232_v0 = vld [vmem:[#allocation2 + $0x58] sm:$0xff] (!%p2971_p10) }
 0x1e8   : > { %v5184_v59 = vld [vmem:[#allocation2] sm:$0xff] (!%p2971_p10)  ;;  %v5186_v44 = vld [vmem:[#allocation2 + $0x8] sm:$0xff] (!%p2971_p10)  ;;  %v2487_v62 = vsel (!%p2971_p10), %vm2467_vm4, %v5230_v24, 0.0  ;;  %v2489_v9 = vsel (!%p2971_p10), %vm2467_vm4, %v5232_v0, 0.0  ;;  %v5246_v6 = vld [vmem:[#allocation2 + $0x70] sm:$0xff] (!%p2971_p10)  ;;  %vm2640_vm7 = vcmask (!%p2971_p10), 58368  }
 0x1e9   : > { %v5188_v37 = vld [vmem:[#allocation2 + $0x10] sm:$0xff] (!%p2971_p10)  ;;  %v2468_v45 = vsel (!%p2971_p10), %vm2467_vm4, %v5184_v59, 0.0  ;;  %v2469_v2 = vsel (!%p2971_p10), %vm2467_vm4, %v5186_v44, 0.0  ;;  %v2537_v21 = vmul.f32 (!%p2971_p10), %v5184_v59, %v5184_v59  ;;  %v2538_v61 = vmul.f32 (!%p2971_p10), %v5186_v44, %v5186_v44  ;;  %v5234_v17 = vld [vmem:[#allocation2 + $0x60] sm:$0xff] (!%p2971_p10)  ;;  %v5244_v13 = vld [vmem:[#allocation2 + $0x68] sm:$0xff] (!%p2971_p10) }
 0x1ea   : > { %v2471_v7 = vsel (!%p2971_p10), %vm2467_vm4, %v5188_v37, 0.0  ;;  %v5196_v28 = vld [vmem:[#allocation2 + $0x18] sm:$0xff] (!%p2971_p10)  ;;  %v2470_v25 = vadd.f32 (!%p2971_p10), %v2469_v2, %v2468_v45  ;;  %v2539_v30 = vmul.f32 (!%p2971_p10), %v5188_v37, %v5188_v37  ;;  %v2491_v41 = vsel (!%p2971_p10), %vm2467_vm4, %v5234_v17, 0.0  ;;  %v5255_v52 = vld [vmem:[#allocation2 + $0x80] sm:$0xff] (!%p2971_p10)  ;;  %v5261_v54 = vld [vmem:[#allocation2 + $0x88] sm:$0xff] (!%p2971_p10) }
 0x1eb   : > { %v2473_v35 = vsel (!%p2971_p10), %vm2467_vm4, %v5196_v28, 0.0  ;;  %v5200_v12 = vld [vmem:[#allocation2 + $0x20] sm:$0xff] (!%p2971_p10)  ;;  %v5204_v34 = vld [vmem:[#allocation2 + $0x28] sm:$0xff] (!%p2971_p10)  ;;  %v2540_v60 = vmul.f32 (!%p2971_p10), %v5196_v28, %v5196_v28  ;;  %v2569_v5 = vsel (!%p2971_p10), %vm2467_vm4, %v2537_v21, 0.0  ;;  %v2570_v56 = vsel (!%p2971_p10), %vm2467_vm4, %v2538_v61, 0.0  ;;  %v5253_v18 = vld [vmem:[#allocation2 + $0x78] sm:$0xff] (!%p2971_p10) }
 0x1ec   : > { %v2472_v53 = vadd.f32 (!%p2971_p10), %v2471_v7, %v2470_v25  ;;  %v2475_v40 = vsel (!%p2971_p10), %vm2467_vm4, %v5200_v12, 0.0  ;;  %v2477_v26 = vsel (!%p2971_p10), %vm2467_vm4, %v5204_v34, 0.0  ;;  %v5208_v49 = vld [vmem:[#allocation2 + $0x30] sm:$0xff] (!%p2971_p10)  ;;  %v2541_v8 = vmul.f32 (!%p2971_p10), %v5200_v12, %v5200_v12  ;;  %v5272_v63 = vld [vmem:[#allocation2 + $0x98] sm:$0xff] (!%p2971_p10) }
 0x1ed   : > { %v2479_v36 = vsel (!%p2971_p10), %vm2467_vm4, %v5208_v49, 0.0  ;;  %v2572_v11 = vsel (!%p2971_p10), %vm2467_vm4, %v2539_v30, 0.0  ;;  %v2493_v22 = vsel (!%p2971_p10), %vm2467_vm4, %v5244_v13, 0.0  ;;  %v2495_v10 = vsel (!%p2971_p10), %vm2467_vm4, %v5246_v6, 0.0  ;;  %v5263_v57 = vld [vmem:[#allocation2 + $0x90] sm:$0xff] (!%p2971_p10) }
 0x1ee   : > { %v2474_v23 = vadd.f32 %v2473_v35, %v2472_v53  ;;  %v2571_v15 = vadd.f32 %v2570_v56, %v2569_v5  ;;  %v2497_v32 = vsel %vm2467_vm4, %v5253_v18, 0.0  ;;  %v2499_v43 = vsel %vm2467_vm4, %v5255_v52, 0.0 }
 0x1ef   : > { %v2542_v51 = vmul.f32 %v5204_v34, %v5204_v34  ;;  %v2574_v58 = vsel %vm2467_vm4, %v2540_v60, 0.0  ;;  %v2501_v4 = vsel %vm2467_vm4, %v5261_v54, 0.0  ;;  %v5278_v50 = vsel %vm2467_vm4, %v5263_v57, 0.0 }
 0x1f0   : > { %v2476_v39 = vadd.f32 %v2475_v40, %v2474_v23  ;;  %v2573_v19 = vadd.f32 %v2572_v11, %v2571_v15  ;;  %v5282_v29 = vsel %vm2467_vm4, %v5272_v63, 0.0  ;;  %v2543_v47 = vmul.f32 %v5208_v49, %v5208_v49  ;;  %v5293_v40 = vld [vmem:[#allocation2 + $0xa0] sm:$0xff]  ;;  %v5295_v23 = vld [vmem:[#allocation2 + $0xa8] sm:$0xff] }
 0x1f1   : > { %v2544_v45 = vmul.f32 %v5212_v14, %v5212_v14  ;;  %v2576_v2 = vsel %vm2467_vm4, %v2541_v8, 0.0  ;;  %v2545_v25 = vmul.f32 %v5216_v16, %v5216_v16  ;;  %v2546_v35 = vmul.f32 %v5220_v20, %v5220_v20 }
 0x1f2   : > { %v2478_v31 = vadd.f32 %v2477_v26, %v2476_v39  ;;  %v2575_v53 = vadd.f32 %v2574_v58, %v2573_v19  ;;  %v2547_v26 = vmul.f32 %v5230_v24, %v5230_v24  ;;  %v2548_v39 = vmul.f32 %v5232_v0, %v5232_v0  ;;  %v5393_v58 = vld [vmem:[#allocation2 + $0xb0] sm:$0xff] }
 0x1f3   : > { %v5318_v21 = vmul.f32 %v5246_v6, %v5246_v6  ;;  %v2580_v61 = vsel %vm2467_vm4, %v2543_v47, 0.0  ;;  %v2582_v30 = vsel %vm2467_vm4, %v2544_v45, 0.0  ;;  %v2584_v60 = vsel %vm2467_vm4, %v2545_v25, 0.0  ;;  %v5406_v45 = vld [vmem:[#allocation2 + $0xc0] sm:$0xff] }
 0x1f4   : > { %v2480_v55 = vadd.f32 %v2479_v36, %v2478_v31  ;;  %v2549_v36 = vmul.f32 %v5234_v17, %v5234_v17  ;;  %v2578_v31 = vsel %vm2467_vm4, %v2542_v51, 0.0  ;;  %v3007_v5 = vpack.c.bf16 %v5184_v59, %v5184_v59 }
 0x1f5   : > { %v3011_v59 = vpack.c.bf16 %v5200_v12, %v5200_v12  ;;  %v3012_v15 = vpack.c.bf16 %v5204_v34, %v5204_v34  ;;  %v3016_v12 = vpack.c.bf16 %v5220_v20, %v5220_v20  ;;  %v3017_v34 = vpack.c.bf16 %v5230_v24, %v5230_v24 }
 0x1f6   : > { %v2482_v38 = vadd.f32 %v2481_v33, %v2480_v55  ;;  %v5306_v55 = vsel %vm2467_vm4, %v5293_v40, 0.0  ;;  %v5331_v8 = vsel %vm2467_vm4, %v2549_v36, 0.0  ;;  %2771 = vst.msk [vmem:[%s4467_s6] sm:$0xf] %vm2770_vm5, %v3007_v5  ;;  %v3020_v20 = vpack.c.bf16 %v5244_v13, %v5244_v13  ;;  %v5432_v36 = vld [vmem:[#allocation2 + $0xe8] sm:$0xff] }
 0x1f7   : > { %2775 = vst.msk [vmem:[%s4467_s6 + $0x10] sm:$0xf] %vm2770_vm5, %v3011_v59  ;;  %2776 = vst.msk [vmem:[%s4467_s6 + $0x14] sm:$0xf] %vm2770_vm5, %v3012_v15  ;;  %v3021_v24 = vpack.c.bf16 %v5246_v6, %v5246_v6  ;;  %v3025_v6 = vpack.c.bf16 %v5263_v57, %v5263_v57  ;;  %v3026_v47 = vpack.c.bf16 %v5272_v63, %v5272_v63  ;;  %v2596_v59 = vsel %vm2467_vm4, %v5318_v21, 0.0 }
 0x1f8   : > { %v2484_v1 = vadd.f32 %v2483_v42, %v2482_v38  ;;  %v5310_v42 = vsel %vm2467_vm4, %v5295_v23, 0.0  ;;  %v2577_v38 = vadd.f32 %v2576_v2, %v2575_v53  ;;  %2780 = vst.msk [vmem:[%s4467_s6 + $0x24] sm:$0xf] %vm2770_vm5, %v3016_v12  ;;  %2781 = vst.msk [vmem:[%s4467_s6 + $0x28] sm:$0xf] %vm2770_vm5, %v3017_v34  ;;  %v5408_v2 = vld [vmem:[#allocation2 + $0xc8] sm:$0xff]  ;;  %v3028_v25 = vpack.c.bf16 %v5295_v23, %v5295_v23 }
 0x1f9   : > { %2784 = vst.msk [vmem:[%s4467_s6 + $0x34] sm:$0xf] %vm2770_vm5, %v3020_v20  ;;  %2785 = vst.msk [vmem:[%s4467_s6 + $0x38] sm:$0xf] %vm2770_vm5, %v3021_v24 }
 0x1fa   : > { %v2486_v48 = vadd.f32 %v2485_v46, %v2484_v1  ;;  %v5314_v46 = vmul.f32 %v5244_v13, %v5244_v13  ;;  %v3024_v13 = vpack.c.bf16 %v5261_v54, %v5261_v54  ;;  %2789 = vst.msk [vmem:[%s4467_s6 + $0x48] sm:$0xf] %vm2770_vm5, %v3025_v6  ;;  %2790 = vst.msk [vmem:[%s4467_s6 + $0x4c] sm:$0xf] %vm2770_vm5, %v3026_v47  ;;  %v2525_v47 = vsel %vm2467_vm4, %v5432_v36, 0.0 }
 0x1fb   : > { %2792 = vst.msk [vmem:[%s4467_s6 + $0x54] sm:$0xf] %vm2770_vm5, %v3028_v25 }
 0x1fc   : > { %v2488_v27 = vadd.f32 %v2487_v62, %v2486_v48  ;;  %v2579_v62 = vadd.f32 %v2578_v31, %v2577_v38  ;;  %v2586_v48 = vsel %vm2467_vm4, %v2546_v35, 0.0  ;;  %2788 = vst.msk [vmem:[%s4467_s6 + $0x44] sm:$0xf] %vm2770_vm5, %v3024_v13  ;;  %v3029_v35 = vpack.c.bf16 %v5393_v58, %v5393_v58 }
 0x1fd   : > { %v3031_v38 = vpack.c.bf16 %v5406_v45, %v5406_v45 }
 0x1fe   : > { %v2490_v3 = vadd.f32 %v2489_v9, %v2488_v27  ;;  %v5325_v9 = vsel %vm2467_vm4, %v2547_v26, 0.0  ;;  %v2581_v11 = vadd.f32 %v2580_v61, %v2579_v62  ;;  %v3008_v27 = vpack.c.bf16 %v5186_v44, %v5186_v44  ;;  %v5428_v26 = vld [vmem:[#allocation2 + $0xd8] sm:$0xff]  ;;  %2793 = vst.msk [vmem:[%s4467_s6 + $0x58] sm:$0xf] %vm2770_vm5, %v3029_v35 }
 0x1ff   : > { %v3013_v44 = vpack.c.bf16 %v5208_v49, %v5208_v49  ;;  %v3018_v49 = vpack.c.bf16 %v5232_v0, %v5232_v0  ;;  %v3022_v0 = vpack.c.bf16 %v5253_v18, %v5253_v18  ;;  %v3032_v61 = vpack.c.bf16 %v5408_v2, %v5408_v2  ;;  %2795 = vst.msk [vmem:[%s4467_s6 + $0x60] sm:$0xf] %vm2770_vm5, %v3031_v38 }
 0x200   : > { %v2492_v7 = vadd.f32 %v2491_v41, %v2490_v3  ;;  %v5328_v41 = vsel %vm2467_vm4, %v2548_v39, 0.0  ;;  %v2583_v51 = vadd.f32 %v2582_v30, %v2581_v11  ;;  %2772 = vst.msk [vmem:[%s4467_s6 + $0x4] sm:$0xf] %vm2770_vm5, %v3008_v27  ;;  %v5395_v3 = vld [vmem:[#allocation2 + $0xb8] sm:$0xff]  ;;  %v5430_v39 = vld [vmem:[#allocation2 + $0xe0] sm:$0xff]  ;;  %v5444_v30 = vld [vmem:[#allocation2 + $0xf0] sm:$0xff]  ;;  %v3034_v62 = vpack.c.bf16 %v5428_v26, %v5428_v26 }
 0x201   : > { %2777 = vst.msk [vmem:[%s4467_s6 + $0x18] sm:$0xf] %vm2770_vm5, %v3013_v44  ;;  %2782 = vst.msk [vmem:[%s4467_s6 + $0x2c] sm:$0xf] %vm2770_vm5, %v3018_v49  ;;  %v3030_v53 = vpack.c.bf16 %v5395_v3, %v5395_v3  ;;  %v2511_v27 = vsel %vm2467_vm4, %v5393_v58, 0.0  ;;  %v2521_v20 = vsel %vm2467_vm4, %v5428_v26, 0.0 }
 0x202   : > { %v2494_v33 = vadd.f32 %v2493_v22, %v2492_v7  ;;  %v3009_v22 = vpack.c.bf16 %v5188_v37, %v5188_v37  ;;  %v3014_v37 = vpack.c.bf16 %v5212_v14, %v5212_v14  ;;  %v5410_v7 = vld [vmem:[#allocation2 + $0xd0] sm:$0xff]  ;;  %2786 = vst.msk [vmem:[%s4467_s6 + $0x3c] sm:$0xf] %vm2770_vm5, %v3022_v0  ;;  %2796 = vst.msk [vmem:[%s4467_s6 + $0x64] sm:$0xf] %vm2770_vm5, %v3032_v61  ;;  %v2523_v13 = vsel %vm2467_vm4, %v5430_v39, 0.0 }
 0x203   : > { %2794 = vst.msk [vmem:[%s4467_s6 + $0x5c] sm:$0xf] %vm2770_vm5, %v3030_v53  ;;  %2798 = vst.msk [vmem:[%s4467_s6 + $0x6c] sm:$0xf] %vm2770_vm5, %v3034_v62  ;;  %v2519_v49 = vsel %vm2467_vm4, %v5410_v7, 0.0  ;;  %v2560_v53 = vmul.f32 %v5395_v3, %v5395_v3  ;;  %v2527_v38 = vsel %vm2467_vm4, %v5444_v30, 0.0  ;;  %v2561_v61 = vmul.f32 %v5406_v45, %v5406_v45 }
 0x204   : > { %v2496_v1 = vadd.f32 %v2495_v10, %v2494_v33  ;;  %v3010_v10 = vpack.c.bf16 %v5196_v28, %v5196_v28  ;;  %2773 = vst.msk [vmem:[%s4467_s6 + $0x8] sm:$0xf] %vm2770_vm5, %v3009_v22  ;;  %v3015_v28 = vpack.c.bf16 %v5216_v16, %v5216_v16  ;;  %2778 = vst.msk [vmem:[%s4467_s6 + $0x1c] sm:$0xf] %vm2770_vm5, %v3014_v37 }
 0x205   : > { %v3019_v16 = vpack.c.bf16 %v5234_v17, %v5234_v17  ;;  %v3023_v17 = vpack.c.bf16 %v5255_v52, %v5255_v52  ;;  %v2552_v22 = vmul.f32 %v5253_v18, %v5253_v18  ;;  %v2513_v18 = vsel %vm2467_vm4, %v5395_v3, 0.0 }
 0x206   : > { %v2498_v56 = vadd.f32 %v2497_v32, %v2496_v1  ;;  %2774 = vst.msk [vmem:[%s4467_s6 + $0xc] sm:$0xf] %vm2770_vm5, %v3010_v10  ;;  %2779 = vst.msk [vmem:[%s4467_s6 + $0x20] sm:$0xf] %vm2770_vm5, %v3015_v28  ;;  %v5446_v1 = vld [vmem:[#allocation2 + $0xf8] sm:$0xff]  ;;  %v2517_v28 = vsel %vm2467_vm4, %v5408_v2, 0.0  ;;  %v2562_v62 = vmul.f32 %v5408_v2, %v5408_v2 }
 0x207   : > { %2783 = vst.msk [vmem:[%s4467_s6 + $0x30] sm:$0xf] %vm2770_vm5, %v3019_v16  ;;  %2787 = vst.msk [vmem:[%s4467_s6 + $0x40] sm:$0xf] %vm2770_vm5, %v3023_v17  ;;  %v3038_v11 = vpack.c.bf16 %v5446_v1, %v5446_v1 }
 0x208   : > { %v2500_v32 = vadd.f32 %v2499_v43, %v2498_v56  ;;  %v2585_v43 = vadd.f32 %v2584_v60, %v2583_v51  ;;  %v3035_v60 = vpack.c.bf16 %v5430_v39, %v5430_v39  ;;  %v3037_v56 = vpack.c.bf16 %v5444_v30, %v5444_v30 }
 0x209   : > { %2802 = vst.msk [vmem:[%s4467_s6 + $0x7c] sm:$0xf] %vm2770_vm5, %v3038_v11  ;;  %v2598_v51 = vsel %vm2467_vm4, %v2552_v22, 0.0 }
 0x20a   : > { %v2502_v14 = vadd.f32 %v2501_v4, %v2500_v32  ;;  %v2587_v19 = vadd.f32 %v2586_v48, %v2585_v43  ;;  %v3036_v48 = vpack.c.bf16 %v5432_v36, %v5432_v36  ;;  %2799 = vst.msk [vmem:[%s4467_s6 + $0x70] sm:$0xf] %vm2770_vm5, %v3035_v60  ;;  %2801 = vst.msk [vmem:[%s4467_s6 + $0x78] sm:$0xf] %vm2770_vm5, %v3037_v56  ;;  %v2614_v60 = vsel %vm2467_vm4, %v2560_v53, 0.0 }
 0x20b   : > { %v2616_v56 = vsel %vm2467_vm4, %v2561_v61, 0.0 }
 0x20c   : > { %v2504_v4 = vadd.f32 %v5278_v50, %v2502_v14  ;;  %v3027_v50 = vpack.c.bf16 %v5293_v40, %v5293_v40  ;;  %v2589_v33 = vadd.f32 %v5325_v9, %v2587_v19  ;;  %2800 = vst.msk [vmem:[%s4467_s6 + $0x74] sm:$0xf] %vm2770_vm5, %v3036_v48 }
 0x20e   : > { %v2506_v31 = vadd.f32 %v5282_v29, %v2504_v4  ;;  %2791 = vst.msk [vmem:[%s4467_s6 + $0x50] sm:$0xf] %vm2770_vm5, %v3027_v50  ;;  %v3033_v29 = vpack.c.bf16 %v5410_v7, %v5410_v7  ;;  %v2591_v5 = vadd.f32 %v5328_v41, %v2589_v33 }
 0x210   : > { %v2508_v9 = vadd.f32 %v5306_v55, %v2506_v31  ;;  %v2594_v55 = vsel %vm2467_vm4, %v5314_v46, 0.0  ;;  %2797 = vst.msk [vmem:[%s4467_s6 + $0x68] sm:$0xf] %vm2770_vm5, %v3033_v29  ;;  %v2593_v10 = vadd.f32 %v5331_v8, %v2591_v5  ;;  %v2553_v46 = vmul.f32 %v5255_v52, %v5255_v52 }
 0x211   : > { %v2554_v8 = vmul.f32 %v5261_v54, %v5261_v54  ;;  %v2555_v52 = vmul.f32 %v5263_v57, %v5263_v57  ;;  %v2556_v54 = vmul.f32 %v5272_v63, %v5272_v63  ;;  %v2557_v57 = vmul.f32 %v5293_v40, %v5293_v40 }
 0x212   : > { %v2510_v41 = vadd.f32 %v5310_v42, %v2508_v9  ;;  %v2595_v32 = vadd.f32 %v2594_v55, %v2593_v10  ;;  %v2515_v42 = vsel %vm2467_vm4, %v5406_v45, 0.0  ;;  %v2600_v21 = vsel %vm2467_vm4, %v2553_v46, 0.0 }
 0x213   : > { %v2602_v14 = vsel %vm2467_vm4, %v2554_v8, 0.0  ;;  %v2604_v24 = vsel %vm2467_vm4, %v2555_v52, 0.0  ;;  %v2558_v63 = vmul.f32 %v5295_v23, %v5295_v23  ;;  %v2606_v4 = vsel %vm2467_vm4, %v2556_v54, 0.0 }
 0x214   : > { %v2512_v15 = vadd.f32 %v2511_v27, %v2510_v41  ;;  %v2597_v37 = vadd.f32 %v2596_v59, %v2595_v32  ;;  %v2559_v40 = vmul.f32 %v5393_v58, %v5393_v58  ;;  %v2608_v50 = vsel %vm2467_vm4, %v2557_v57, 0.0 }
 0x215   : > { %v2610_v31 = vsel %vm2467_vm4, %v2558_v63, 0.0  ;;  %v2529_v9 = vsel %vm2467_vm4, %v5446_v1, 0.0  ;;  %v2563_v5 = vmul.f32 %v5410_v7, %v5410_v7  ;;  %v2564_v45 = vmul.f32 %v5428_v26, %v5428_v26 }
 0x216   : > { %v2514_v44 = vadd.f32 %v2513_v18, %v2512_v15  ;;  %v2599_v34 = vadd.f32 %v2598_v51, %v2597_v37  ;;  %v2612_v29 = vsel %vm2467_vm4, %v2559_v40, 0.0  ;;  %v2618_v27 = vsel %vm2467_vm4, %v2562_v62, 0.0 }
 0x217   : > { %v2565_v55 = vmul.f32 %v5430_v39, %v5430_v39  ;;  %v2620_v41 = vsel %vm2467_vm4, %v2563_v5, 0.0  ;;  %v2566_v18 = vmul.f32 %v5432_v36, %v5432_v36  ;;  %v2622_v7 = vsel %vm2467_vm4, %v2564_v45, 0.0 }
 0x218   : > { %v2516_v12 = vadd.f32 %v2515_v42, %v2514_v44  ;;  %v2601_v16 = vadd.f32 %v2600_v21, %v2599_v34  ;;  %v2567_v26 = vmul.f32 %v5444_v30, %v5444_v30  ;;  %v2568_v42 = vmul.f32 %v5446_v1, %v5446_v1 }
 0x219   : > { %v2624_v15 = vsel %vm2467_vm4, %v2565_v55, 0.0  ;;  %v2626_v39 = vsel %vm2467_vm4, %v2566_v18, 0.0 }
 0x21a   : > { %v2518_v43 = vadd.f32 %v2517_v28, %v2516_v12  ;;  %v2603_v17 = vadd.f32 %v2602_v14, %v2601_v16  ;;  %v2628_v44 = vsel %vm2467_vm4, %v2567_v26, 0.0  ;;  %v2630_v37 = vsel %vm2467_vm4, %v2568_v42, 0.0 }
 0x21c   : > { %v2520_v0 = vadd.f32 %v2519_v49, %v2518_v43  ;;  %v2605_v6 = vadd.f32 %v2604_v24, %v2603_v17 }
 0x21e   : > { %v2522_v19 = vadd.f32 %v2521_v20, %v2520_v0  ;;  %v2607_v35 = vadd.f32 %v2606_v4, %v2605_v6 }
 0x220   : > { %v2524_v25 = vadd.f32 %v2523_v13, %v2522_v19  ;;  %v2609_v33 = vadd.f32 %v2608_v50, %v2607_v35 }
 0x222   : > { %v2526_v23 = vadd.f32 %v2525_v47, %v2524_v25  ;;  %v2611_v58 = vadd.f32 %v2610_v31, %v2609_v33 }
 0x224   : > { %v2528_v48 = vadd.f32 %v2527_v38, %v2526_v23  ;;  %v2613_v3 = vadd.f32 %v2612_v29, %v2611_v58 }
 0x226   : > { %v2615_v11 = vadd.f32 %v2614_v60, %v2613_v3  ;;  %v2530_v22 = vadd.f32 %v2529_v9, %v2528_v48 }
 0x228   : > { %v2617_v2 = vadd.f32 %v2616_v56, %v2615_v11  ;;  %v2531_v46 = vrot.slane %v2530_v22, 4 }
 0x22a   : > { %v2619_v10 = vadd.f32 %v2618_v27, %v2617_v2  ;;  %v2532_v8 = vadd.f32 %v2531_v46, %v2530_v22 }
 0x22c   : > { %v2621_v59 = vadd.f32 %v2620_v41, %v2619_v10  ;;  %v2533_v28 = vrot.slane %v2532_v8, 2 }
 0x22e   : > { %v2623_v32 = vadd.f32 %v2622_v7, %v2621_v59  ;;  %v2534_v30 = vadd.f32 %v2533_v28, %v2532_v8 }
 0x230   : > { %v2625_v51 = vadd.f32 %v2624_v15, %v2623_v32  ;;  %v2535_v49 = vrot.slane %v2534_v30, 1 }
 0x232   : > { %v2627_v36 = vadd.f32 %v2626_v39, %v2625_v51  ;;  %v2536_v1 = vadd.f32 %v2535_v49, %v2534_v30 }
 0x234   : > { %v2629_v52 = vadd.f32 %v2628_v44, %v2627_v36 }
 0x236   : > { %v2631_v21 = vadd.f32 %v2630_v37, %v2629_v52 }
 0x238   : > { %v2632_v12 = vrot.slane %v2631_v21, 4 }
 0x23a   : > { %v2633_v34 = vadd.f32 %v2632_v12, %v2631_v21 }
 0x23c   : > { %v2634_v54 = vrot.slane %v2633_v34, 2 }
 0x23e   : > { %v2635_v14 = vadd.f32 %v2634_v54, %v2633_v34 }
 0x240   : > { %v2636_v43 = vrot.slane %v2635_v14, 1 }
 0x242   : > { %v2637_v16 = vadd.f32 %v2636_v43, %v2635_v14 }
 0x244   : > { %v2639_v20 = vsel %vm2638_vm6, %v2536_v1, %v2637_v16 }
 0x245   : > { %2641 = vst.msk [vmem:[%s4472_s9] sm:$0x3] %vm2640_vm7, %v2639_v20 }
 0x246 PF: > { %s14_s16 = sadd.s32 1, %s3296_s16   ;;  %s5888_s12 = smov %s3288_s14 }
 0x247   : > { %p11_p11 = scmp.ge.s32.totalorder %s14_s16, 14   ;;  %s5889_s13 = smov %s3292_s15 }
 0x248   : > { %s5890_s14 = smov %s5893_s17  ;;  %s5891_s15 = smov %s5897_s18 }
 0x249   :  { %13 = sbr.rel (!%p11_p11) target bundleno = 3 (0x3), region = 85 }

// kernel: _lambda_.12
= control target key start
LH: loop header
LB: loop body
LE: loop exit
PB: predicated region body
PF: predicated region fallthrough
CT: control target
= control target key end

     0   :  { %s4810_s12 = smov 0   ;;  %s4812_s13 = smov 0   ;;  %s6467_s0 = inlined_call_operand.vmem [shape: bf16[1,6,18,18,8], index: 0, kind: input, shape index: {}]   ;;  %s6468_s1 = inlined_call_operand.vmem [shape: bf16[3,3,3,8,8], index: 1, kind: input, shape index: {}]   ;;  %s6469_s2 = inlined_call_operand.vmem [shape: bf16[1,4,16,16,8], index: 2, kind: output, shape index: {0}]   ;;  %s6470_s3 = inlined_call_operand.vmem [shape: f32[1,4,2,8], index: 3, kind: output, shape index: {1}]  }
   0x1   :  { %s4814_s14 = smov 0   ;;  %s4816_s15 = smov 0  }
   0x2   :  { %s4818_s16 = smov 0  }
   0x3 LB: > { %s26_s17 = sadd.s32 1, %s4780_s14  ;;  %s29_s18 = sadd.s32 1, %s4784_s15  ;;  %s4788_s16 = sphi %s4818_s16, %s14_s16   ;;  %s4784_s15 = sphi %s4816_s15, %s6601_s15   ;;  %s4780_s14 = sphi %s4814_s14, %s6600_s14   ;;  %s4776_s13 = sphi %s4812_s13, %s6599_s13   ;;  %s4772_s12 = sphi %s4810_s12, %s6598_s12  }
   0x4   : > { %p27_p0 = scmp.ge.s32.totalorder %s26_s17, 3  ;;  %p3670_p1 = scmp.ge.s32.totalorder %s4788_s16, 1 }
   0x5   : > { %p183_p2 = scmp.lt.s32.totalorder %s4788_s16, 13 }
   0x6   : > { %s6603_s17 = smov (%p27_p0, %s26_s17), 0  ;;  %s6605_s18 = smov (!%p27_p0, %s29_s18), %s4784_s15 }
   0x7   : > { %p184_p3 = pnand %p3670_p1, %p183_p2  ;;  %p31_p4 = scmp.ge.s32.totalorder %s6605_s18, 4 }
   0x9   : > { %s6607_s18 = smov (%p31_p4, %s6605_s18), 0  ;;  %187 = sbr.rel (%p184_p3) target bundleno = 664 (0x298), region = 28 }
  0x10   : > { %p240_p5 = scmp.lt.s32.totalorder %s4772_s12, 2  ;;  %p247_p6 = scmp.lt.s32.totalorder %s4776_s13, 3  ;;  %vm455_vm0 = vcmask 1043456   ;;  %vm406_vm1 = vcmask 64512   ;;  %vm620_vm2 = vsmask.f32 3328 }
  0x11   : > { %s229_s19 = sadd.s32 %s4772_s12, %s4776_s13  ;;  %vm621_vm3 = vsmask.f32 7440  ;;  %vm1315_vm5 = vcmask 1042432   ;;  %vm1316_vm6 = vcmask 1046532   ;;  %p3892_p8 = scmp.ne.s32.totalorder %s4772_s12, 0 }
  0x12   : > { %s241_s20 = scalar_select %p240_p5, %s4772_s12, 2  ;;  %vm4967_vm4 = vmor %vm620_vm2, %vm621_vm3 }
  0x13   : > { %s6609_s13 = smov (!%p247_p6, %s4776_s13), 3  ;;  %p232_p7 = scmp.lt.s32.totalorder %s229_s19, 5  ;;  %vm5176_vm7 = vmor %vm1315_vm5, %vm1316_vm6 }
  0x14   : > { %s4690_s21 = smul.u32 36, %s241_s20  ;;  %s3929_s22 = sshll.u32 %s6609_s13, 7 }
  0x15   : > { %s3675_s23 = sshll.u32 %s6609_s13, 1  ;;  %s4853_s29 = scalar_lea.vmem %s6469_s2, %s3929_s22 }
  0x16   : > { %s4848_s26 = scalar_lea.vmem %s6468_s1, %s4690_s21  ;;  %s4858_s5 = scalar_lea.vmem %s6470_s3, %s3675_s23 }
  0x17   : > { %v317_v0 = vld [vmem:[%s4848_s26] sm:$0xf]  ;;  %v321_v1 = vld [vmem:[%s4848_s26 + $0x10] sm:$0xf]  ;;  %v318_v2 = vld [vmem:[%s4848_s26 + $0x4] sm:$0xf] }
  0x18   : > { %4679 = vmatprep.subr.msk.bf16.mxu1 %vm455_vm0, %v317_v0  ;;  %v457_v3 = vsel %vm455_vm0, %v317_v0, 0  ;;  %s6611_s19 = smov (!%p232_p7, %s229_s19), 5  ;;  %4683 = vmatprep.subr.msk.bf16.mxu0 %vm455_vm0, %v321_v1  ;;  %v4867_v4 = vsel %vm455_vm0, %v321_v1, 0  ;;  %v322_v5 = vld [vmem:[%s4848_s26 + $0x14] sm:$0xf]  ;;  %v1104_v13 = vsel %vm455_vm0, %v318_v2, 0 }
  0x19   : > { %6517 = vst [vmem:[#allocation3_spill] sm:$0xff] %v4867_v4  ;;  %4116 = vmatpush3.bf16.msra.mxu1 %v457_v3  ;;  %4252 = vmatpush3.bf16.msra.mxu0 %v4867_v4  ;;  %s4689_s6 = smul.u32 216, %s6611_s19  ;;  %v4905_v15 = vld [vmem:[%s4848_s26 + $0x8] sm:$0xf]  ;;  %v4927_v22 = vsel %vm455_vm0, %v322_v5, 0 }
  0x1a   : > { %4680 = vmatprep.subr.msk.bf16.mxu1 %vm455_vm0, %v318_v2  ;;  %4685 = vmatprep.subr.msk.bf16.mxu0 %vm455_vm0, %v322_v5 }
  0x1b   : > { %s4876_s9 = scalar_lea.vmem %s6467_s0, %s4689_s6 }
  0x1c   : > { %v4879_v6 = vld [vmem:[%s4876_s9] sm:$0xf]  ;;  %v4882_v7 = vld [vmem:[%s4876_s9 + $0x4] sm:$0xf]  ;;  %v4885_v8 = vld [vmem:[%s4876_s9 + $0xc] sm:$0xf] }
  0x1d   : > { %v3676_v9 = vcombine.low %v4879_v6, %v4882_v7  ;;  %v4890_v10 = vld [vmem:[%s4876_s9 + $0x10] sm:$0xf]  ;;  %v4897_v12 = vld [vmem:[%s4876_s9 + $0x18] sm:$0xf]  ;;  %v4902_v14 = vld [vmem:[%s4876_s9 + $0x1c] sm:$0xf] }
  0x1e   : > { %v4894_v11 = vcombine.low %v4885_v8, %v4890_v10  ;;  %v4911_v16 = vcombine.low %v4897_v12, %v4902_v14  ;;  %v672_v17 = vshrl.u32 %v4897_v12, 16  ;;  %v4915_v18 = vld [vmem:[%s4876_s9 + $0x24] sm:$0xf]  ;;  %v4918_v19 = vld [vmem:[%s4876_s9 + $0x28] sm:$0xf]  ;;  %v675_v20 = vshll.u32 %v4897_v12, 16 }
  0x1f   : > { %4117 = vmatprep.mubr.msk.bf16.mxu1 %vm406_vm1, %v3676_v9  ;;  %v4924_v21 = vld [vmem:[%s4876_s9 + $0x14] sm:$0x1]  ;;  %v685_v25 = vshrl.u32 %v4902_v14, 16  ;;  %v648_v26 = vshrl.u32 %v4885_v8, 16  ;;  %v4937_v27 = vcombine.low %v4915_v18, %v4918_v19  ;;  %v651_v28 = vshll.u32 %v4885_v8, 16 }
  0x20   : > { %6518 = vst [vmem:[#allocation4_spill] sm:$0xff] %v4894_v11  ;;  %4118 = vmatmul.mubr.msk.bf16.vlgmr.msra.gmra.mrb[0].mxu1 %vm406_vm1, %v4894_v11  ;;  %6519 = vst [vmem:[#allocation5_spill] sm:$0xff] %v4911_v16  ;;  %v657_v29 = vshll.u32 %v4890_v10, 16  ;;  %v661_v30 = vshrl.u32 %v4890_v10, 16  ;;  %v4943_v31 = vld [vmem:[%s4876_s9 + $0x20] sm:$0x1] }
  0x21   : > { %4150 = vmatpush3.bf16.msra.mxu1 %v1104_v13  ;;  %4121 = vmatprep.mubr.msk.bf16.mxu1 %vm406_vm1, %v4911_v16  ;;  %6520 = vst [vmem:[#allocation6_spill] sm:$0xff] %v4937_v27  ;;  %v696_v32 = vshrl.u32 %v4915_v18, 16  ;;  %v650_v33 = vrot.slane %v648_v26, 4  ;;  %v667_v34 = vshll.u32 %v4924_v21, 16  ;;  %v674_v35 = vrot.slane %v672_v17, 4 }
  0x22   : > { %4681 = vmatprep.subr.msk.bf16.mxu1 %vm455_vm0, %v4905_v15  ;;  %v653_v36 = vrot.slane %v651_v28, 5  ;;  %v659_v37 = vrot.slane %v657_v29, 5  ;;  %v663_v38 = vrot.slane %v661_v30, 4  ;;  %v677_v39 = vrot.slane %v675_v20, 5  ;;  %v4948_v40 = vld [vmem:[%s4876_s9 + $0x30] sm:$0xf] }
  0x23   : > { %v699_v41 = vshll.u32 %v4915_v18, 16  ;;  %v681_v42 = vshll.u32 %v4902_v14, 16  ;;  %v687_v43 = vrot.slane %v685_v25, 4  ;;  %v691_v44 = vshll.u32 %v4943_v31, 16  ;;  %v4954_v45 = vld [vmem:[%s4876_s9 + $0x34] sm:$0xf] }
  0x24   : > { %v654_v46 = vor.u32 %v653_v36, %v650_v33  ;;  %v664_v47 = vor.u32 %v663_v38, %v659_v37  ;;  %v669_v48 = vrot.slane %v667_v34, 5  ;;  %v678_v49 = vor.u32 %v677_v39, %v674_v35  ;;  %v4959_v50 = vld [vmem:[%s4876_s9 + $0x3c] sm:$0xf]  ;;  %v4962_v51 = vld [vmem:[%s4876_s9 + $0x40] sm:$0xf] }
  0x25   : > { %v709_v52 = vshrl.u32 %v4918_v19, 16  ;;  %v683_v54 = vrot.slane %v681_v42, 5  ;;  %v693_v55 = vrot.slane %v691_v44, 5  ;;  %v4973_v56 = vcombine.low %v4948_v40, %v4954_v45  ;;  %v4985_v1 = vld [vmem:[%s4876_s9 + $0x2c] sm:$0x1] }
  0x26   : > { %v655_v57 = vrot.slane %v654_v46, 4  ;;  %v665_v58 = vrot.slane %v664_v47, 4  ;;  %v679_v59 = vrot.slane %v678_v49, 4  ;;  %v720_v60 = vshrl.u32 %v4948_v40, 16  ;;  %v5000_v33 = vld [vmem:[%s4876_s9 + $0x38] sm:$0x1] }
  0x27   : > { %6523 = vst [vmem:[#allocation7_spill] sm:$0xff] %v4973_v56  ;;  %v688_v61 = vor.u32 %v687_v43, %v683_v54  ;;  %v723_v62 = vshll.u32 %v4948_v40, 16  ;;  %v733_v63 = vshrl.u32 %v4954_v45, 16  ;;  %v4982_v0 = vcombine.low %v4959_v50, %v4962_v51  ;;  %v5011_v38 = vld [vmem:[%s4848_s26 + $0x18] sm:$0xf] }
  0x28   : > { %4122 = vmatmul.mubr.msk.bf16.gmra.mrb[4].mxu1 %vm406_vm1, %v4937_v27  ;;  %v660_v2 = vsel %vm4967_vm4, %v655_v57, %v659_v37  ;;  %v670_v3 = vsel %vm4967_vm4, %v665_v58, %v669_v48  ;;  %v684_v5 = vsel %vm4967_vm4, %v679_v59, %v683_v54  ;;  %v744_v9 = vshrl.u32 %v4959_v50, 16  ;;  %v5008_v37 = vld [vmem:[%s4876_s9 + $0x48] sm:$0xf]  ;;  %v5019_v44 = vld [vmem:[%s4876_s9 + $0x4c] sm:$0xf] }
  0x29   : > { %4125 = vmatprep.mubr.msk.bf16.mxu1 %vm406_vm1, %v4973_v56  ;;  %6524 = vst [vmem:[#allocation8_spill] sm:$0xff] %v4982_v0  ;;  %v4994_v13 = vcombine.low %v660_v2, %v670_v3  ;;  %v689_v17 = vrot.slane %v688_v61, 4  ;;  %v747_v20 = vshll.u32 %v4959_v50, 16  ;;  %v698_v25 = vrot.slane %v696_v32, 4  ;;  %v5022_v46 = vld [vmem:[%s4876_s9 + $0x54] sm:$0xf] }
  0x2a   : > { %v701_v26 = vrot.slane %v699_v41, 5  ;;  %v705_v28 = vshll.u32 %v4918_v19, 16  ;;  %v711_v29 = vrot.slane %v709_v52, 4  ;;  %v715_v30 = vshll.u32 %v4985_v1, 16  ;;  %v5026_v54 = vld [vmem:[%s4876_s9 + $0x58] sm:$0xf] }
  0x2b   : > { %4253 = vmatprep.mubr.msk.bf16.mxu0 %vm406_vm1, %v4994_v13  ;;  %v694_v34 = vsel %vm4967_vm4, %v689_v17, %v693_v55  ;;  %v722_v35 = vrot.slane %v720_v60, 4  ;;  %v725_v36 = vrot.slane %v723_v62, 5  ;;  %v729_v32 = vshll.u32 %v4954_v45, 16 }
  0x2c   : > { %v5013_v39 = vcombine.low %v684_v5, %v694_v34  ;;  %v757_v41 = vshrl.u32 %v4962_v51, 16  ;;  %v702_v42 = vor.u32 %v701_v26, %v698_v25  ;;  %v707_v43 = vrot.slane %v705_v28, 5 }
  0x2d   : > { %v726_v47 = vor.u32 %v725_v36, %v722_v35  ;;  %v731_v48 = vrot.slane %v729_v32, 5  ;;  %v735_v49 = vrot.slane %v733_v63, 4  ;;  %v739_v52 = vshll.u32 %v5000_v33, 16 }
  0x2e   : > { %6525 = vst [vmem:[#allocation9_spill] sm:$0xff] %v5013_v39  ;;  %4254 = vmatmul.mubr.msk.bf16.vlgmr.msra.gmra.mrb[0].mxu0 %vm406_vm1, %v5013_v39  ;;  %v703_v55 = vrot.slane %v702_v42, 4  ;;  %v712_v57 = vor.u32 %v711_v29, %v707_v43  ;;  %v717_v58 = vrot.slane %v715_v30, 5  ;;  %v5032_v59 = vcombine.low %v5008_v37, %v5019_v44  ;;  %v5052_v29 = vld [vmem:[%s4876_s9 + $0x44] sm:$0x1] }
  0x2f   : > { %4286 = vmatpush3.bf16.msra.mxu0 %v4927_v22  ;;  %v727_v60 = vrot.slane %v726_v47, 4  ;;  %v736_v61 = vor.u32 %v735_v49, %v731_v48  ;;  %v741_v62 = vrot.slane %v739_v52, 5  ;;  %v768_v63 = vshrl.u32 %v5008_v37, 16 }
  0x30   : > { %4126 = vmatmul.mubr.msk.bf16.gmra.mrb[8].mxu1 %vm406_vm1, %v4982_v0  ;;  %6526 = vst [vmem:[#allocation10_spill] sm:$0xff] %v5032_v59  ;;  %v708_v2 = vsel %vm4967_vm4, %v703_v55, %v707_v43  ;;  %v713_v3 = vrot.slane %v712_v57, 4  ;;  %v771_v5 = vshll.u32 %v5008_v37, 16  ;;  %v5043_v17 = vcombine.low %v5022_v46, %v5026_v54  ;;  %4686 = vmatprep.subr.msk.bf16.mxu0 %vm455_vm0, %v5011_v38  ;;  %v5071_v55 = vld [vmem:[%s4876_s9 + $0x60] sm:$0xf] }
  0x31   : > { %4129 = vmatprep.mubr.msk.bf16.mxu1 %vm406_vm1, %v5032_v59  ;;  %v732_v22 = vsel %vm4967_vm4, %v727_v60, %v731_v48  ;;  %v737_v25 = vrot.slane %v736_v61, 4  ;;  %v781_v26 = vshrl.u32 %v5019_v44, 16  ;;  %v792_v28 = vshrl.u32 %v5022_v46, 16  ;;  %v5063_v48 = vld [vmem:[%s4876_s9 + $0x50] sm:$0x1] }
  0x32   : > { %6527 = vst [vmem:[#allocation11_spill] sm:$0xff] %v5043_v17  ;;  %v718_v30 = vsel %vm4967_vm4, %v713_v3, %v717_v58  ;;  %v795_v34 = vshll.u32 %v5022_v46, 16  ;;  %v746_v35 = vrot.slane %v744_v9, 4  ;;  %v749_v36 = vrot.slane %v747_v20, 5  ;;  %v5074_v57 = vld [vmem:[%s4876_s9 + $0x64] sm:$0xf] }
  0x33   : > { %v5057_v32 = vcombine.low %v708_v2, %v718_v30  ;;  %v742_v42 = vsel %vm4967_vm4, %v737_v25, %v741_v62  ;;  %v753_v43 = vshll.u32 %v4962_v51, 16  ;;  %v759_v47 = vrot.slane %v757_v41, 4  ;;  %v5080_v62 = vld [vmem:[%s4876_s9 + $0x6c] sm:$0xf]  ;;  %v5091_v25 = vld [vmem:[%s4876_s9 + $0x70] sm:$0xf] }
  0x34   : > { %v5065_v49 = vcombine.low %v732_v22, %v742_v42  ;;  %v750_v52 = vor.u32 %v749_v36, %v746_v35  ;;  %v763_v9 = vshll.u32 %v5052_v29, 16  ;;  %v770_v20 = vrot.slane %v768_v63, 4  ;;  %v5144_v59 = vld [vmem:[%s4876_s9 + $0x88] sm:$0xf] }
  0x35   : > { %4257 = vmatprep.mubr.msk.bf16.mxu0 %vm406_vm1, %v5057_v32  ;;  %v755_v41 = vrot.slane %v753_v43, 5  ;;  %v773_v58 = vrot.slane %v771_v5, 5  ;;  %v777_v60 = vshll.u32 %v5019_v44, 16  ;;  %v783_v61 = vrot.slane %v781_v26, 4 }
  0x36   : > { %4258 = vmatmul.mubr.msk.bf16.gmra.mrb[4].mxu0 %vm406_vm1, %v5065_v49  ;;  %v805_v2 = vshrl.u32 %v5026_v54, 16  ;;  %v751_v63 = vrot.slane %v750_v52, 4  ;;  %v787_v3 = vshll.u32 %v5063_v48, 16  ;;  %v5088_v22 = vcombine.low %v5071_v55, %v5074_v57 }
  0x37   : > { %v760_v5 = vor.u32 %v759_v47, %v755_v41  ;;  %v765_v30 = vrot.slane %v763_v9, 5  ;;  %v774_v26 = vor.u32 %v773_v58, %v770_v20  ;;  %v779_v35 = vrot.slane %v777_v60, 5  ;;  %v5104_v9 = vld [vmem:[%s4876_s9 + $0x5c] sm:$0x1] }
  0x38   : > { %4130 = vmatmul.mubr.msk.bf16.gmra.mrb[12].mxu1 %vm406_vm1, %v5043_v17  ;;  %6528 = vst [vmem:[#allocation12_spill] sm:$0xff] %v5088_v22  ;;  %v756_v36 = vsel %vm4967_vm4, %v751_v63, %v755_v41  ;;  %v789_v42 = vrot.slane %v787_v3, 5  ;;  %v816_v43 = vshrl.u32 %v5071_v55, 16  ;;  %v819_v52 = vshll.u32 %v5071_v55, 16  ;;  %v5120_v17 = vld [vmem:[%s4876_s9 + $0x68] sm:$0x1] }
  0x39   : > { %4133 = vmatprep.mubr.msk.bf16.mxu1 %vm406_vm1, %v5088_v22  ;;  %v761_v24 = vrot.slane %v760_v5, 4  ;;  %v775_v23 = vrot.slane %v774_v26, 4  ;;  %v784_v4 = vor.u32 %v783_v61, %v779_v35  ;;  %v5101_v47 = vcombine.low %v5080_v62, %v5091_v25 }
  0x3a   : > { %v633_v20 = vshll.u32 %v4882_v7, 16  ;;  %v637_v41 = vshrl.u32 %v4882_v7, 16  ;;  %v829_v58 = vshrl.u32 %v5074_v57, 16  ;;  %v794_v60 = vrot.slane %v792_v28, 4 }
  0x3b   : > { %6529 = vst [vmem:[#allocation13_spill] sm:$0xff] %v5101_v47  ;;  %v766_v63 = vsel %vm4967_vm4, %v761_v24, %v765_v30  ;;  %v780_v61 = vsel %vm4967_vm4, %v775_v23, %v779_v35  ;;  %v785_v3 = vrot.slane %v784_v4, 4  ;;  %v797_v5 = vrot.slane %v795_v34, 5  ;;  %v5125_v30 = vld [vmem:[%s4876_s9 + $0x78] sm:$0xf] }
  0x3c   : > { %v5113_v26 = vcombine.low %v756_v36, %v766_v63  ;;  %v801_v11 = vshll.u32 %v5026_v54, 16  ;;  %v807_v22 = vrot.slane %v805_v2, 4  ;;  %v811_v28 = vshll.u32 %v5104_v9, 16  ;;  %v5128_v35 = vld [vmem:[%s4876_s9 + $0x7c] sm:$0xf] }
  0x3d   : > { %v790_v24 = vsel %vm4967_vm4, %v785_v3, %v789_v42  ;;  %v798_v23 = vor.u32 %v797_v5, %v794_v60  ;;  %v818_v4 = vrot.slane %v816_v43, 4  ;;  %v821_v34 = vrot.slane %v819_v52, 5  ;;  %v5140_v3 = vld [vmem:[%s4876_s9 + $0x84] sm:$0xf] }
  0x3e   : > { %6530 = vst [vmem:[#allocation14_spill] sm:$0xff] %v5113_v26  ;;  %v6531_v36 = vshrl.u32 %v4879_v6, 16  ;;  %4261 = vmatprep.mubr.msk.bf16.mxu0 %vm406_vm1, %v5113_v26  ;;  %v5136_v2 = vcombine.low %v780_v61, %v790_v24  ;;  %v825_v42 = vshll.u32 %v5074_v57, 16  ;;  %v831_v60 = vrot.slane %v829_v58, 4 }
  0x3f   : > { %v799_v43 = vrot.slane %v798_v23, 4  ;;  %v822_v52 = vor.u32 %v821_v34, %v818_v4  ;;  %v835_v5 = vshll.u32 %v5120_v17, 16  ;;  %v813_v61 = vrot.slane %v811_v28, 5  ;;  %v5164_v28 = vld [vmem:[%s4876_s9 + $0x90] sm:$0xf] }
  0x40   : > { %4134 = vmatmul.mubr.msk.bf16.gmra.mrb[16].mxu1 %vm406_vm1, %v5101_v47  ;;  %v5132_v63 = vrot.slane %v6531_v36, 4  ;;  %6532 = vst [vmem:[#allocation15_spill] sm:$0xff] %v5136_v2  ;;  %v803_v47 = vrot.slane %v801_v11, 5  ;;  %4262 = vmatmul.mubr.msk.bf16.gmra.mrb[8].mxu0 %vm406_vm1, %v5136_v2  ;;  %v827_v24 = vrot.slane %v825_v42, 5  ;;  %v5150_v11 = vcombine.low %v5125_v30, %v5128_v35  ;;  %v5167_v42 = vld [vmem:[%s4876_s9 + $0x94] sm:$0xf] }
  0x41   : > { %v6534_v23 = vshll.u32 %v4879_v6, 16  ;;  %v1334_v58 = vrot.slane %v4902_v14, 5  ;;  %v823_v0 = vrot.slane %v822_v52, 4  ;;  %v837_v16 = vrot.slane %v835_v5, 5 }
  0x42   : > { %v808_v36 = vor.u32 %v807_v22, %v803_v47  ;;  %6533 = vst [vmem:[#allocation16_spill] sm:$0xff] %v5150_v11  ;;  %v804_v34 = vsel %vm4967_vm4, %v799_v43, %v803_v47  ;;  %v832_v27 = vor.u32 %v831_v60, %v827_v24  ;;  %4137 = vmatprep.mubr.msk.bf16.mxu1 %vm406_vm1, %v5150_v11  ;;  %v5169_v14 = vrot.slane %v633_v20, 5 }
  0x43   : > { %v629_v4 = vrot.slane %v6534_v23, 5  ;;  %v5161_v22 = vcombine.low %v5140_v3, %v5144_v59  ;;  %v639_v47 = vrot.slane %v637_v41, 4  ;;  %v1330_v43 = vrot.slane %v4924_v21, 5 }
  0x44   : > { %v809_v56 = vrot.slane %v808_v36, 4  ;;  %v828_v52 = vsel %vm4967_vm4, %v823_v0, %v827_v24  ;;  %v833_v36 = vrot.slane %v832_v27, 4  ;;  %v3741_v20 = vrot.slane %v4885_v8, 9  ;;  %v5197_v27 = vld [vmem:[%s4876_s9 + $0xa0] sm:$0xf] }
  0x45   : > { %6535 = vst [vmem:[#allocation17_spill] sm:$0xff] %v5161_v22  ;;  %v1327_v21 = vrot.slane %v4890_v10, 5  ;;  %v3742_v41 = vrot.slane %v4897_v12, 9  ;;  %v1336_v0 = vrot.slane %v1334_v58, 4  ;;  %v5191_v23 = vcombine.low %v5164_v28, %v5167_v42 }
  0x46   : > { %v814_v5 = vsel %vm4967_vm4, %v809_v56, %v813_v61  ;;  %v5194_v56 = vld [vmem:[%s4876_s9 + $0x9c] sm:$0xf]  ;;  %v1337_v61 = vrot.slane %v4943_v31, 5  ;;  %v838_v8 = vsel %vm4967_vm4, %v833_v36, %v837_v16  ;;  %v5219_v36 = vld [vmem:[%s4876_s9 + $0xa8] sm:$0xf] }
  0x47   : > { %v5187_v24 = vcombine.low %v804_v34, %v814_v5  ;;  %6539 = vst [vmem:[#allocation19_spill] sm:$0xff] %v5191_v23  ;;  %v1328_v10 = vsel %vm5176_vm7, %v3741_v20, %v1327_v21  ;;  %v1329_v12 = vrot.slane %v1327_v21, 4  ;;  %v5206_v34 = vcombine.low %v828_v52, %v838_v8  ;;  %v5222_v20 = vld [vmem:[%s4876_s9 + $0xac] sm:$0xf] }
  0x48   : > { %4138 = vmatmul.mubr.msk.bf16.gmra.mrb[20].mxu1 %vm406_vm1, %v5161_v22  ;;  %v630_v5 = vor.u32 %v629_v4, %v5132_v63  ;;  %v6491_v22 = vrot.slane %v4882_v7, 5  ;;  %v5216_v16 = vcombine.low %v5194_v56, %v5197_v27  ;;  %v640_v52 = vor.u32 %v639_v47, %v5169_v14 }
  0x49   : > { %6538 = vst [vmem:[#allocation18_spill] sm:$0xff] %v5187_v24  ;;  %4265 = vmatprep.mubr.msk.bf16.mxu0 %vm406_vm1, %v5187_v24  ;;  %6540 = vst [vmem:[#allocation20_spill] sm:$0xff] %v5206_v34  ;;  %4141 = vmatprep.mubr.msk.bf16.mxu1 %vm406_vm1, %v5191_v23  ;;  %v1331_v31 = vsel %vm5176_vm7, %v1329_v12, %v1330_v43  ;;  %v3743_v4 = vrot.slane %v4915_v18, 9  ;;  %v1341_v43 = vrot.slane %v4918_v19, 5  ;;  %v1344_v12 = vrot.slane %v4985_v1, 5 }
  0x4a   : > { %6541 = vst [vmem:[#allocation21_spill] sm:$0xff] %v5216_v16  ;;  %4266 = vmatmul.mubr.msk.bf16.gmra.mrb[12].mxu0 %vm406_vm1, %v5206_v34  ;;  %v5227_v63 = vcombine.low %v1328_v10, %v1331_v31  ;;  %v1335_v21 = vsel %vm5176_vm7, %v3742_v41, %v1334_v58  ;;  %v1338_v8 = vsel %vm5176_vm7, %v1336_v0, %v1337_v61  ;;  %v1348_v47 = vrot.slane %v4954_v45, 5  ;;  %v5255_v41 = vld [vmem:[%s4876_s9 + $0xb4] sm:$0xf]  ;;  %v5272_v58 = vld [vmem:[%s4876_s9 + $0x8] sm:$0x1] }
  0x4b   : > { %v1342_v18 = vsel %vm5176_vm7, %v3743_v4, %v1341_v43  ;;  %v1343_v10 = vrot.slane %v1341_v43, 4  ;;  %v5243_v19 = vcombine.low %v5219_v36, %v5222_v20  ;;  %v5248_v1 = vrot.slane %v6491_v22, 4 }
  0x4c   : > { %4287 = vmatprep.mubr.msk.bf16.mxu0 %vm406_vm1, %v5227_v63  ;;  %v2371_v45 = vsel %vm455_vm0, %v5011_v38, 0  ;;  %v5259_v0 = vsel %vm455_vm0, %v4905_v15, 0  ;;  %v631_v61 = vrot.slane %v630_v5, 4  ;;  %v5261_v31 = vcombine.low %v1335_v21, %v1338_v8  ;;  %v5269_v38 = vld [vmem:[%s4876_s9 + $0xb8] sm:$0xf] }
  0x4d   : > { %6542 = vst [vmem:[#allocation22_spill] sm:$0xff] %v5243_v19  ;;  %v1345_v4 = vsel %vm5176_vm7, %v1343_v10, %v1344_v12  ;;  %v3744_v43 = vrot.slane %v4948_v40, 9  ;;  %v641_v22 = vrot.slane %v640_v52, 4  ;;  %v1350_v15 = vrot.slane %v1348_v47, 4 }
  0x4e   : > { %v1351_v5 = vrot.slane %v5000_v33, 5  ;;  %v3745_v8 = vrot.slane %v4959_v50, 9  ;;  %v1355_v40 = vrot.slane %v4962_v51, 5  ;;  %v1358_v12 = vrot.slane %v5052_v29, 5 }
  0x4f   : > { %v5285_v52 = vcombine.low %v5255_v41, %v5269_v38  ;;  %v1349_v51 = vsel %vm5176_vm7, %v3744_v43, %v1348_v47  ;;  %v1362_v10 = vrot.slane %v5019_v44, 5  ;;  %v636_v50 = vsel %vm4967_vm4, %v631_v61, %v5169_v14 }
  0x50   : > { %4142 = vmatmul.mubr.msk.bf16.gmra.mrb[24].mxu1 %vm406_vm1, %v5216_v16  ;;  %v5274_v16 = vcombine.low %v1342_v18, %v1345_v4  ;;  %v643_v18 = vshll.u32 %v5272_v58, 16  ;;  %v5289_v4 = vld [vmem:[%s4848_s26 + $0x1c] sm:$0xf]  ;;  %v1357_v29 = vrot.slane %v1355_v40, 4  ;;  %v1356_v47 = vsel %vm5176_vm7, %v3745_v8, %v1355_v40 }
  0x51   : > { %4145 = vmatprep.mubr.msk.bf16.mxu1 %vm406_vm1, %v5243_v19  ;;  %6544 = vst [vmem:[#allocation24_spill] sm:$0xff] %v5285_v52  ;;  %v1352_v19 = vsel %vm5176_vm7, %v1350_v15, %v1351_v5  ;;  %v1369_v43 = vrot.slane %v5026_v54, 5  ;;  %v3746_v54 = vrot.slane %v5008_v37, 9  ;;  %v3747_v14 = vrot.slane %v5022_v46, 9  ;;  %v5354_v46 = vld [vmem:[%s4876_s9 + $0x80] sm:$0x1] }
  0x52   : > { %6543 = vst [vmem:[#allocation23_spill] sm:$0xff] %v5274_v16  ;;  %4288 = vmatmul.mubr.msk.bf16.vlgmr.msra.gmra.mrb[0].mxu0 %vm406_vm1, %v5261_v31  ;;  %v645_v33 = vrot.slane %v643_v18, 5  ;;  %v5321_v8 = vcombine.low %v1349_v51, %v1352_v19  ;;  %v1364_v18 = vrot.slane %v1362_v10, 4  ;;  %v1376_v19 = vrot.slane %v5074_v57, 5  ;;  %v5384_v15 = vld [vmem:[%s4876_s9 + $0x98] sm:$0x1] }
  0x53   : > { %4320 = vmatpush3.bf16.msra.mxu0 %v2371_v45  ;;  %4291 = vmatprep.mubr.msk.bf16.mxu0 %vm406_vm1, %v5274_v16  ;;  %v1359_v45 = vsel %vm5176_vm7, %v1357_v29, %v1358_v12  ;;  %v1365_v29 = vrot.slane %v5063_v48, 5  ;;  %v1371_v44 = vrot.slane %v1369_v43, 4  ;;  %v1383_v57 = vrot.slane %v5091_v25, 5 }
  0x54   : > { %4687 = vmatprep.subr.msk.bf16.mxu0 %vm455_vm0, %v5289_v4  ;;  %v646_v61 = vsel %vm4967_vm4, %v641_v22, %v645_v33  ;;  %6545 = vst [vmem:[#allocation25_spill] sm:$0xff] %v5321_v8  ;;  %v5324_v12 = vcombine.low %v1356_v47, %v1359_v45  ;;  %v1372_v22 = vrot.slane %v5104_v9, 5  ;;  %v1363_v47 = vsel %vm5176_vm7, %v3746_v54, %v1362_v10  ;;  %v5362_v54 = vld [vmem:[%s4848_s26 + $0xc] sm:$0xf] }
  0x55   : > { %v3708_v40 = vcombine.low %v636_v50, %v646_v61  ;;  %v1366_v45 = vsel %vm5176_vm7, %v1364_v18, %v1365_v29  ;;  %v1370_v61 = vsel %vm5176_vm7, %v3747_v14, %v1369_v43  ;;  %v1390_v9 = vrot.slane %v5128_v35, 5 }
  0x56   : > { %6546 = vst [vmem:[#allocation26_spill] sm:$0xff] %v5324_v12  ;;  %v1373_v51 = vsel %vm5176_vm7, %v1371_v44, %v1372_v22  ;;  %v3748_v48 = vrot.slane %v5071_v55, 9  ;;  %v1378_v50 = vrot.slane %v1376_v19, 4  ;;  %v1379_v10 = vrot.slane %v5120_v17, 5 }
  0x57   : > { %v3749_v14 = vrot.slane %v5080_v62, 9  ;;  %v3750_v18 = vrot.slane %v5125_v30, 9  ;;  %v1397_v44 = vrot.slane %v5144_v59, 5  ;;  %v5371_v55 = vcombine.low %v1363_v47, %v1366_v45 }
  0x58   : > { %4146 = vmatmul.mubr.msk.bf16.gmra.mrb[28].mxu1 %vm406_vm1, %v5285_v52  ;;  %v1385_v17 = vrot.slane %v1383_v57, 4  ;;  %v5380_v43 = vcombine.low %v1370_v61, %v1373_v51  ;;  %v1392_v33 = vrot.slane %v1390_v9, 4  ;;  %v1393_v37 = vrot.slane %v5354_v46, 5  ;;  %v5401_v52 = vld [vmem:[%s4876_s9 + $0xa4] sm:$0x1] }
  0x59   : > { %4151 = vmatprep.mubr.msk.bf16.mxu1 %vm406_vm1, %v3708_v40  ;;  %v5351_v40 = vld [vmem:[%s4876_s9 + $0x74] sm:$0x1]  ;;  %6547 = vst [vmem:[#allocation27_spill] sm:$0xff] %v5371_v55  ;;  %v1404_v47 = vrot.slane %v5167_v42, 5  ;;  %v1380_v29 = vsel %vm5176_vm7, %v1378_v50, %v1379_v10  ;;  %v1411_v51 = vrot.slane %v5197_v27, 5  ;;  %v1384_v61 = vsel %vm5176_vm7, %v3749_v14, %v1383_v57 }
  0x5a   : > { %4292 = vmatmul.mubr.msk.bf16.gmra.mrb[4].mxu0 %vm406_vm1, %v5321_v8  ;;  %v1386_v22 = vrot.slane %v5351_v40, 5  ;;  %6548 = vst [vmem:[#allocation28_spill] sm:$0xff] %v5380_v43  ;;  %v1391_v5 = vsel %vm5176_vm7, %v3750_v18, %v1390_v9  ;;  %v3751_v21 = vrot.slane %v5140_v3, 9  ;;  %v1407_v57 = vrot.slane %v5384_v15, 5 }
  0x5b   : > { %4295 = vmatprep.mubr.msk.bf16.mxu0 %vm406_vm1, %v5324_v12  ;;  %v1394_v9 = vsel %vm5176_vm7, %v1392_v33, %v1393_v37  ;;  %v1406_v10 = vrot.slane %v1404_v47, 4  ;;  %v3753_v14 = vrot.slane %v5194_v56, 9  ;;  %v1418_v18 = vrot.slane %v5222_v20, 5 }
  0x5c   : > { %v1413_v45 = vrot.slane %v1411_v51, 4  ;;  %v6549_v23 = vshrl.u32 %v5080_v62, 16  ;;  %v6550_v12 = vshll.u32 %v5080_v62, 16  ;;  %v1398_v33 = vsel %vm5176_vm7, %v3751_v21, %v1397_v44 }
  0x5d   : > { %v849_v8 = vshll.u32 %v5091_v25, 16  ;;  %v5433_v16 = vcombine.low %v1391_v5, %v1394_v9  ;;  %v1412_v21 = vsel %vm5176_vm7, %v3753_v14, %v1411_v51  ;;  %v1420_v5 = vrot.slane %v1418_v18, 4 }
  0x5e   : > { %v845_v11 = vrot.slane %v6550_v12, 5  ;;  %v3754_v12 = vrot.slane %v5219_v36, 9  ;;  %v6553_v51 = vshll.u32 %v5125_v30, 16 }
  0x60   : > { %4152 = vmatmul.mubr.msk.bf16.vlgmr.msra.gmra.mrb[0].mxu1 %vm406_vm1, %v4994_v13  ;;  %v5378_v13 = vld [vmem:[%s4876_s9 + $0x8c] sm:$0x1] }
  0x61   : > { %4155 = vmatprep.mubr.msk.bf16.mxu1 %vm406_vm1, %v5013_v39  ;;  %4184 = vmatpush3.bf16.msra.mxu1 %v5259_v0  ;;  %v1377_v0 = vsel %vm5176_vm7, %v3748_v48, %v1376_v19  ;;  %v1399_v39 = vrot.slane %v1397_v44, 4  ;;  %v1387_v19 = vsel %vm5176_vm7, %v1385_v17, %v1386_v22  ;;  %v1400_v50 = vrot.slane %v5378_v13, 5  ;;  %v5418_v22 = vld [vmem:[%s4876_s9 + $0xb0] sm:$0x1] }
  0x62   : > { %4682 = vmatprep.subr.msk.bf16.mxu1 %vm455_vm0, %v5362_v54  ;;  %4296 = vmatmul.mubr.msk.bf16.gmra.mrb[8].mxu0 %vm406_vm1, %v5371_v55  ;;  %v3752_v48 = vrot.slane %v5164_v28, 9  ;;  %v1414_v17 = vrot.slane %v5401_v52, 5  ;;  %v842_v55 = vrot.slane %v6549_v23, 4  ;;  %v5428_v37 = vcombine.low %v1384_v61, %v1387_v19 }
  0x63   : > { %4299 = vmatprep.mubr.msk.bf16.mxu0 %vm406_vm1, %v5380_v43  ;;  %v5424_v43 = vcombine.low %v1377_v0, %v1380_v29  ;;  %v1401_v62 = vsel %vm5176_vm7, %v1399_v39, %v1400_v50  ;;  %v1408_v29 = vsel %vm5176_vm7, %v1406_v10, %v1407_v57  ;;  %v1421_v44 = vrot.slane %v5418_v22, 5 }
  0x64   : > { %v1405_v23 = vsel %vm5176_vm7, %v3752_v48, %v1404_v47  ;;  %v1415_v0 = vsel %vm5176_vm7, %v1413_v45, %v1414_v17  ;;  %v846_v61 = vor.u32 %v845_v11, %v842_v55  ;;  %v1425_v39 = vrot.slane %v5269_v38, 5  ;;  %v5466_v55 = vld [vmem:[%s4876_s9 + $0xbc] sm:$0x1] }
  0x65   : > { %v873_v47 = vshll.u32 %v5128_v35, 16  ;;  %v5451_v19 = vrot.slane %v849_v8, 5  ;;  %v6551_v50 = vshrl.u32 %v5091_v25, 16  ;;  %v6552_v57 = vshrl.u32 %v5125_v30, 16 }
  0x66   : > { %v869_v10 = vrot.slane %v6553_v51, 5  ;;  %v5461_v45 = vcombine.low %v1398_v33, %v1401_v62  ;;  %v5463_v11 = vcombine.low %v1405_v23, %v1408_v29  ;;  %v6554_v25 = vshrl.u32 %v5128_v35, 16  ;;  %v5498_v51 = vld [vmem:[%s4876_s9 + $0xc0] sm:$0xf] }
  0x67   : > { %v855_v48 = vrot.slane %v6551_v50, 4  ;;  %v866_v9 = vrot.slane %v6552_v57, 4  ;;  %v5468_v8 = vrot.slane %v873_v47, 5  ;;  %v5474_v17 = vcombine.low %v1412_v21, %v1415_v0 }
  0x68   : > { %4156 = vmatmul.mubr.msk.bf16.gmra.mrb[4].mxu1 %vm406_vm1, %v5057_v32  ;;  %v879_v14 = vrot.slane %v6554_v25, 4  ;;  %v1419_v30 = vsel %vm5176_vm7, %v3754_v12, %v1418_v18  ;;  %v859_v33 = vshll.u32 %v5351_v40, 16  ;;  %v3755_v62 = vrot.slane %v5255_v41, 9 }
  0x69   : > { %4159 = vmatprep.mubr.msk.bf16.mxu1 %vm406_vm1, %v5065_v49  ;;  %v1422_v23 = vsel %vm5176_vm7, %v1420_v5, %v1421_v44  ;;  %v847_v29 = vrot.slane %v846_v61, 4  ;;  %v1427_v47 = vrot.slane %v1425_v39, 4  ;;  %v897_v35 = vshll.u32 %v5144_v59, 16 }
  0x6a   : > { %4300 = vmatmul.mubr.msk.bf16.gmra.mrb[12].mxu0 %vm406_vm1, %v5424_v43  ;;  %v856_v21 = vor.u32 %v855_v48, %v5451_v19  ;;  %v1428_v0 = vrot.slane %v5466_v55, 5  ;;  %v870_v18 = vor.u32 %v869_v10, %v866_v9  ;;  %v883_v40 = vshll.u32 %v5354_v46, 16 }
  0x6b   : > { %4303 = vmatprep.mubr.msk.bf16.mxu0 %vm406_vm1, %v5428_v37  ;;  %v880_v12 = vor.u32 %v879_v14, %v5468_v8  ;;  %v6555_v5 = vshrl.u32 %v5140_v3, 16  ;;  %v6556_v61 = vshll.u32 %v5140_v3, 16  ;;  %v6557_v57 = vshrl.u32 %v5144_v59, 16 }
  0x6c   : > { %v5500_v9 = vrot.slane %v897_v35, 5  ;;  %v6558_v46 = vshrl.u32 %v5164_v28, 16  ;;  %v6559_v25 = vshll.u32 %v5164_v28, 16  ;;  %v861_v3 = vrot.slane %v859_v33, 5 }
  0x6d   : > { %v890_v44 = vrot.slane %v6555_v5, 4  ;;  %v893_v50 = vrot.slane %v6556_v61, 5  ;;  %v903_v48 = vrot.slane %v6557_v57, 4  ;;  %v5507_v5 = vcombine.low %v1419_v30, %v1422_v23 }
  0x6e   : > { %v914_v10 = vrot.slane %v6558_v46, 4  ;;  %v917_v14 = vrot.slane %v6559_v25, 5  ;;  %v1426_v59 = vsel %vm5176_vm7, %v3755_v62, %v1425_v39  ;;  %v6560_v61 = vshrl.u32 %v5167_v42, 16  ;;  %v5517_v46 = vld [vmem:[%s4876_s9 + $0xc4] sm:$0xf] }
  0x6f   : > { %v852_v35 = vsel %vm4967_vm4, %v847_v29, %v5451_v19  ;;  %v871_v28 = vrot.slane %v870_v18, 4  ;;  %v1429_v30 = vsel %vm5176_vm7, %v1427_v47, %v1428_v0  ;;  %v5526_v39 = vld [vmem:[%s4876_s9 + $0xc8] sm:$0x1]  ;;  %v894_v33 = vor.u32 %v893_v50, %v890_v44 }
  0x70   : > { %4160 = vmatmul.mubr.msk.bf16.gmra.mrb[8].mxu1 %vm406_vm1, %v5113_v26  ;;  %v927_v57 = vrot.slane %v6560_v61, 4  ;;  %v857_v26 = vrot.slane %v856_v21, 4  ;;  %v907_v62 = vshll.u32 %v5378_v13, 16  ;;  %v881_v19 = vrot.slane %v880_v12, 4 }
  0x71   : > { %4163 = vmatprep.mubr.msk.bf16.mxu1 %vm406_vm1, %v5136_v2  ;;  %v921_v2 = vshll.u32 %v5167_v42, 16  ;;  %v3822_v42 = vrot.slane %v5498_v51, 9  ;;  %v885_v23 = vrot.slane %v883_v40, 5  ;;  %v918_v29 = vor.u32 %v917_v14, %v914_v10 }
  0x72   : > { %4304 = vmatmul.mubr.msk.bf16.gmra.mrb[16].mxu0 %vm406_vm1, %v5433_v16  ;;  %v2155_v21 = vrot.slane %v5517_v46, 5  ;;  %v931_v47 = vshll.u32 %v5384_v15, 16  ;;  %v945_v0 = vshll.u32 %v5197_v27, 16  ;;  %v862_v13 = vsel %vm4967_vm4, %v857_v26, %v861_v3 }
  0x73   : > { %v5519_v25 = vrot.slane %v921_v2, 5  ;;  %4307 = vmatprep.mubr.msk.bf16.mxu0 %vm406_vm1, %v5461_v45  ;;  %v904_v2 = vor.u32 %v903_v48, %v5500_v9  ;;  %v5541_v44 = vcombine.low %v1426_v59, %v1429_v30  ;;  %v2158_v40 = vrot.slane %v5526_v39, 5 }
  0x74   : > { %v876_v12 = vsel %vm4967_vm4, %v871_v28, %v5468_v8  ;;  %v895_v15 = vrot.slane %v894_v33, 4  ;;  %v909_v50 = vrot.slane %v907_v62, 5  ;;  %v6561_v48 = vshrl.u32 %v5194_v56, 16 }
  0x75   : > { %v928_v18 = vor.u32 %v927_v57, %v5519_v25  ;;  %v6562_v14 = vshll.u32 %v5194_v56, 16  ;;  %v886_v26 = vsel %vm4967_vm4, %v881_v19, %v885_v23  ;;  %v905_v3 = vrot.slane %v904_v2, 4 }
  0x76   : > { %v938_v10 = vrot.slane %v6561_v48, 4  ;;  %v919_v59 = vrot.slane %v918_v29, 4  ;;  %v969_v57 = vshll.u32 %v5222_v20, 16  ;;  %v933_v8 = vrot.slane %v931_v47, 5 }
  0x77   : > { %v941_v61 = vrot.slane %v6562_v14, 5  ;;  %v929_v30 = vrot.slane %v928_v18, 4  ;;  %v5556_v28 = vrot.slane %v945_v0, 5  ;;  %v6563_v33 = vshrl.u32 %v5197_v27, 16 }
  0x78   : > { %4164 = vmatmul.mubr.msk.bf16.gmra.mrb[12].mxu1 %vm406_vm1, %v5187_v24  ;;  %v2157_v48 = vrot.slane %v2155_v21, 4  ;;  %v6564_v56 = vshrl.u32 %v5219_v36, 16  ;;  %v6565_v24 = vshll.u32 %v5219_v36, 16  ;;  %v5568_v23 = vcombine.low %v876_v12, %v886_v26 }
  0x79   : > { %4167 = vmatprep.mubr.msk.bf16.mxu1 %vm406_vm1, %v5206_v34  ;;  %v951_v62 = vrot.slane %v6563_v33, 4  ;;  %v5560_v34 = vcombine.low %v852_v35, %v862_v13  ;;  %v900_v2 = vsel %vm4967_vm4, %v895_v15, %v5500_v9  ;;  %v942_v27 = vor.u32 %v941_v61, %v938_v10 }
  0x7a   : > { %v962_v14 = vrot.slane %v6564_v56, 4  ;;  %v965_v19 = vrot.slane %v6565_v24, 5  ;;  %4308 = vmatmul.mubr.msk.bf16.gmra.mrb[20].mxu0 %vm406_vm1, %v5463_v11  ;;  %v955_v35 = vshll.u32 %v5401_v52, 16  ;;  %v910_v29 = vsel %vm4967_vm4, %v905_v3, %v909_v50 }
  0x7b   : > { %4311 = vmatprep.mubr.msk.bf16.mxu0 %vm406_vm1, %v5474_v17  ;;  %v971_v36 = vrot.slane %v969_v57, 5  ;;  %v6566_v24 = vshrl.u32 %v5222_v20, 16  ;;  %v6567_v47 = vrot.slane %v4882_v7, 5  ;;  %v6568_v0 = vrot.slane %v4879_v6, 9 }
  0x7c   : > { %v924_v52 = vsel %vm4967_vm4, %v919_v59, %v5519_v25  ;;  %v934_v13 = vsel %vm4967_vm4, %v929_v30, %v933_v8  ;;  %v952_v12 = vor.u32 %v951_v62, %v5556_v28  ;;  %v979_v20 = vshll.u32 %v5418_v22, 16 }
  0x7d   : > { %v975_v18 = vrot.slane %v6566_v24, 4  ;;  %v5586_v9 = vsel %vm5176_vm7, %v6568_v0, %v6567_v47  ;;  %v2156_v6 = vsel %vm5176_vm7, %v3822_v42, %v2155_v21  ;;  %v2159_v7 = vsel %vm5176_vm7, %v2157_v48, %v2158_v40 }
  0x7e   : > { %v966_v15 = vor.u32 %v965_v19, %v962_v14  ;;  %v1323_v50 = vrot.slane %v5272_v58, 5  ;;  %v5604_v25 = vcombine.low %v900_v2, %v910_v29  ;;  %v943_v10 = vrot.slane %v942_v27, 4 }
  0x7f   : > { %v957_v61 = vrot.slane %v955_v35, 5  ;;  %v993_v22 = vshll.u32 %v5269_v38, 16  ;;  %v5607_v26 = vcombine.low %v924_v52, %v934_v13  ;;  %v976_v3 = vor.u32 %v975_v18, %v971_v36 }
  0x80   : > { %4168 = vmatmul.mubr.msk.bf16.gmra.mrb[16].mxu1 %vm406_vm1, %v5560_v34  ;;  %v6569_v42 = vshrl.u32 %v5255_v41, 16  ;;  %v1324_v40 = vsel %vm5176_vm7, %v5248_v1, %v1323_v50  ;;  %v953_v58 = vrot.slane %v952_v12, 4  ;;  %v981_v59 = vrot.slane %v979_v20, 5 }
  0x81   : > { %4171 = vmatprep.mubr.msk.bf16.mxu1 %vm406_vm1, %v5568_v23  ;;  %v6570_v57 = vshll.u32 %v5255_v41, 16  ;;  %v3756_v8 = vcombine.low %v5586_v9, %v1324_v40  ;;  %v967_v33 = vrot.slane %v966_v15, 4  ;;  %v1927_v62 = vshrl.u32 %v5498_v51, 16 }
  0x82   : > { %v986_v21 = vrot.slane %v6569_v42, 4  ;;  %v1930_v48 = vshll.u32 %v5498_v51, 16  ;;  %v1936_v56 = vshll.u32 %v5517_v46, 16  ;;  %4312 = vmatmul.mubr.msk.bf16.gmra.mrb[24].mxu0 %vm406_vm1, %v5507_v5  ;;  %v995_v14 = vrot.slane %v993_v22, 5  ;;  %v6572_v42 = vld [vmem:[#allocation5_spill] sm:$0xff] }
  0x83   : > { %v989_v30 = vrot.slane %v6570_v57, 5  ;;  %v6571_v1 = vshrl.u32 %v5269_v38, 16  ;;  %v1940_v2 = vshrl.u32 %v5517_v46, 16  ;;  %v1946_v41 = vshll.u32 %v5526_v39, 16  ;;  %4315 = vmatprep.mubr.msk.bf16.mxu0 %vm406_vm1, %v5541_v44 }
  0x84   : > { %v977_v27 = vrot.slane %v976_v3, 4  ;;  %v1929_v35 = vrot.slane %v1927_v62, 4  ;;  %v1932_v29 = vrot.slane %v1930_v48, 5  ;;  %v1938_v24 = vrot.slane %v1936_v56, 5  ;;  %v6574_v62 = vld [vmem:[#allocation7_spill] sm:$0xff]  ;;  %v6575_v48 = vld [vmem:[#allocation8_spill] sm:$0xff] }
  0x85   : > { %v999_v19 = vrot.slane %v6571_v1, 4  ;;  %v5628_v18 = vcombine.low %v2156_v6, %v2159_v7  ;;  %v1942_v47 = vrot.slane %v1940_v2, 4  ;;  %v948_v38 = vsel %vm4967_vm4, %v943_v10, %v5556_v28  ;;  %v6578_v1 = vld [vmem:[#allocation12_spill] sm:$0xff] }
  0x86   : > { %v958_v39 = vsel %vm4967_vm4, %v953_v58, %v957_v61  ;;  %v1003_v0 = vshll.u32 %v5466_v55, 16  ;;  %v1933_v9 = vor.u32 %v1932_v29, %v1929_v35  ;;  %v990_v52 = vor.u32 %v989_v30, %v986_v21  ;;  %v325_v30 = vld [vmem:[%s4848_s26 + $0x20] sm:$0xf]  ;;  %v6582_v2 = vld [vmem:[#allocation16_spill] sm:$0xff]  ;;  %v6585_v35 = vld [vmem:[#allocation17_spill] sm:$0xff] }
  0x87   : > { %v1000_v13 = vor.u32 %v999_v19, %v995_v14  ;;  %v1943_v12 = vor.u32 %v1942_v47, %v1938_v24  ;;  %v1948_v20 = vrot.slane %v1946_v41, 5  ;;  %v972_v6 = vsel %vm4967_vm4, %v967_v33, %v971_v36  ;;  %v6573_v33 = vld [vmem:[#allocation6_spill] sm:$0xff]  ;;  %v6579_v19 = vld [vmem:[#allocation23_spill] sm:$0xff]  ;;  %v6588_v47 = vld [vmem:[#allocation21_spill] sm:$0xff] }
  0x88   : > { %4172 = vmatmul.mubr.msk.bf16.gmra.mrb[20].mxu1 %vm406_vm1, %v5604_v25  ;;  %v982_v7 = vsel %vm4967_vm4, %v977_v27, %v981_v59  ;;  %v1934_v28 = vrot.slane %v1933_v9, 4  ;;  %v5644_v50 = vcombine.low %v948_v38, %v958_v39  ;;  %v1005_v55 = vrot.slane %v1003_v0, 5  ;;  %v6583_v41 = vld [vmem:[#allocation26_spill] sm:$0xff]  ;;  %v6584_v27 = vld [vmem:[#allocation27_spill] sm:$0xff]  ;;  %v6590_v0 = vld [vmem:[#allocation24_spill] sm:$0xff] }
  0x89   : > { %4175 = vmatprep.mubr.msk.bf16.mxu1 %vm406_vm1, %v5607_v26  ;;  %v1944_v15 = vrot.slane %v1943_v12, 4  ;;  %v5650_v61 = vcombine.low %v972_v6, %v982_v7  ;;  %v991_v22 = vrot.slane %v990_v52, 4  ;;  %v1001_v3 = vrot.slane %v1000_v13, 4  ;;  %v6586_v29 = vld [vmem:[#allocation19_spill] sm:$0xff]  ;;  %v6589_v38 = vld [vmem:[#allocation22_spill] sm:$0xff]  ;;  %v6592_v12 = vld [vmem:[#allocation4_spill] sm:$0xff] }
  0x8a   : > { %v1939_v10 = vsel %vm4967_vm4, %v1934_v28, %v1938_v24  ;;  %4316 = vmatmul.mubr.msk.bf16.gmra.mrb[28].mxu0 %vm406_vm1, %v5628_v18  ;;  %v2597_v59 = vsel %vm455_vm0, %v5289_v4, 0  ;;  %v6576_v4 = vld [vmem:[#allocation10_spill] sm:$0xff]  ;;  %v1731_v56 = vsel %vm455_vm0, %v5362_v54, 0  ;;  %v6580_v54 = vld [vmem:[#allocation25_spill] sm:$0xff]  ;;  %v6587_v24 = vld [vmem:[#allocation28_spill] sm:$0xff]  ;;  %v5725_v39 = vcombine.low %v5498_v51, %v5517_v46 }
  0x8b   : > { %v1949_v36 = vsel %vm4967_vm4, %v1944_v15, %v1948_v20  ;;  %4321 = vmatprep.mubr.msk.bf16.mxu0 %vm406_vm1, %v6572_v42  ;;  %v996_v40 = vsel %vm4967_vm4, %v991_v22, %v995_v14  ;;  %v1006_v58 = vsel %vm4967_vm4, %v1001_v3, %v1005_v55  ;;  %v4749_v14 = vld [vmem:[%s4848_s26 + $0x10] sm:$0xf]  ;;  %v5732_v9 = vld [vmem:[%s4876_s9 + $0xcc] sm:$0xf]  ;;  %v2807_v46 = vsel %vm455_vm0, %v325_v30, 0  ;;  %v6593_v20 = vld [vmem:[#allocation14_spill] sm:$0xff] }
  0x8c   : > { %v5656_v21 = vcombine.low %v1939_v10, %v1949_v36  ;;  %v5668_v57 = vcombine.low %v996_v40, %v1006_v58  ;;  %v5735_v52 = vld [vmem:[%s4876_s9 + $0xd0] sm:$0xf]  ;;  %v6594_v6 = vld [vmem:[#allocation15_spill] sm:$0xff]  ;;  %v6597_v7 = vld [vmem:[#allocation20_spill] sm:$0xff]  ;;  %v2567_v28 = vshrl.u32 %v5732_v9, 16  ;;  %v2570_v15 = vshll.u32 %v5732_v9, 16 }
  0x8d   : > { %v3840_v13 = vcombine.low %v5732_v9, %v5735_v52  ;;  %v6591_v51 = vld [vmem:[#allocation9_spill] sm:$0xff]  ;;  %v2580_v55 = vshrl.u32 %v5735_v52, 16  ;;  %v2576_v10 = vshll.u32 %v5735_v52, 16  ;;  %v2795_v53 = vrot.slane %v5735_v52, 5 }
  0x8e   : > { %v2569_v22 = vrot.slane %v2567_v28, 4  ;;  %v2572_v3 = vrot.slane %v2570_v15, 5  ;;  %v316_v40 = vld [vmem:[%s4876_s9 + $0xd4] sm:$0x1] }
  0x8f   : > { %v2578_v36 = vrot.slane %v2576_v10, 5 }
  0x90   : > { %4176 = vmatmul.mubr.msk.bf16.gmra.mrb[24].mxu1 %vm406_vm1, %v5644_v50  ;;  %v2573_v58 = vor.u32 %v2572_v3, %v2569_v22 }
  0x91   : > { %4179 = vmatprep.mubr.msk.bf16.mxu1 %vm406_vm1, %v5650_v61 }
  0x92   : > { %4322 = vmatmul.mubr.msk.bf16.vlgmr.msra.gmra.mrb[0].mxu0 %vm406_vm1, %v6573_v33 }
  0x93   : > { %4354 = vmatpush3.bf16.msra.mxu0 %v2597_v59  ;;  %4325 = vmatprep.mubr.msk.bf16.mxu0 %vm406_vm1, %v6574_v62 }
  0x94   : > { %4688 = vmatprep.subr.msk.bf16.mxu0 %vm455_vm0, %v325_v30  ;;  %v2586_v30 = vshll.u32 %v316_v40, 16 }
  0x98   : > { %4180 = vmatmul.mubr.msk.bf16.gmra.mrb[28].mxu1 %vm406_vm1, %v5668_v57 }
  0x99   : > { %4185 = vmatprep.mubr.msk.bf16.mxu1 %vm406_vm1, %v3756_v8  ;;  %v6577_v8 = vld [vmem:[#allocation11_spill] sm:$0xff] }
  0x9a   : > { %4326 = vmatmul.mubr.msk.bf16.gmra.mrb[4].mxu0 %vm406_vm1, %v6575_v48 }
  0x9b   : > { %4329 = vmatprep.mubr.msk.bf16.mxu0 %vm406_vm1, %v6576_v4 }
  0xa0   : > { %4186 = vmatmul.mubr.msk.bf16.vlgmr.msra.gmra.mrb[0].mxu1 %vm406_vm1, %v5227_v63  ;;  %v6581_v63 = vld [vmem:[#allocation13_spill] sm:$0xff] }
  0xa1   : > { %4189 = vmatprep.mubr.msk.bf16.mxu1 %vm406_vm1, %v5261_v31  ;;  %4218 = vmatpush3.bf16.msra.mxu1 %v1731_v56 }
  0xa2   : > { %4684 = vmatprep.subr.msk.bf16.mxu1 %vm455_vm0, %v4749_v14  ;;  %4330 = vmatmul.mubr.msk.bf16.gmra.mrb[8].mxu0 %vm406_vm1, %v6577_v8 }
  0xa3   : > { %4333 = vmatprep.mubr.msk.bf16.mxu0 %vm406_vm1, %v6578_v1 }
  0xa8   : > { %4190 = vmatmul.mubr.msk.bf16.gmra.mrb[4].mxu1 %vm406_vm1, %v6579_v19 }
  0xa9   : > { %4193 = vmatprep.mubr.msk.bf16.mxu1 %vm406_vm1, %v6580_v54 }
  0xaa   : > { %4334 = vmatmul.mubr.msk.bf16.gmra.mrb[12].mxu0 %vm406_vm1, %v6581_v63 }
  0xab   : > { %4337 = vmatprep.mubr.msk.bf16.mxu0 %vm406_vm1, %v6582_v2 }
  0xb0   : > { %4194 = vmatmul.mubr.msk.bf16.gmra.mrb[8].mxu1 %vm406_vm1, %v6583_v41 }
  0xb1   : > { %4197 = vmatprep.mubr.msk.bf16.mxu1 %vm406_vm1, %v6584_v27 }
  0xb2   : > { %4338 = vmatmul.mubr.msk.bf16.gmra.mrb[16].mxu0 %vm406_vm1, %v6585_v35 }
  0xb3   : > { %4341 = vmatprep.mubr.msk.bf16.mxu0 %vm406_vm1, %v6586_v29 }
  0xb8   : > { %4198 = vmatmul.mubr.msk.bf16.gmra.mrb[12].mxu1 %vm406_vm1, %v6587_v24 }
  0xb9   : > { %4201 = vmatprep.mubr.msk.bf16.mxu1 %vm406_vm1, %v5424_v43 }
  0xba   : > { %4342 = vmatmul.mubr.msk.bf16.gmra.mrb[20].mxu0 %vm406_vm1, %v6588_v47 }
  0xbb   : > { %4345 = vmatprep.mubr.msk.bf16.mxu0 %vm406_vm1, %v6589_v38 }
  0xc0   : > { %4202 = vmatmul.mubr.msk.bf16.gmra.mrb[16].mxu1 %vm406_vm1, %v5428_v37 }
  0xc1   : > { %4205 = vmatprep.mubr.msk.bf16.mxu1 %vm406_vm1, %v5433_v16 }
  0xc2   : > { %4346 = vmatmul.mubr.msk.bf16.gmra.mrb[24].mxu0 %vm406_vm1, %v6590_v0 }
  0xc3   : > { %4349 = vmatprep.mubr.msk.bf16.mxu0 %vm406_vm1, %v5725_v39 }
  0xc8   : > { %4206 = vmatmul.mubr.msk.bf16.gmra.mrb[20].mxu1 %vm406_vm1, %v5461_v45 }
  0xc9   : > { %4209 = vmatprep.mubr.msk.bf16.mxu1 %vm406_vm1, %v5463_v11 }
  0xca   : > { %4350 = vmatmul.mubr.msk.bf16.gmra.mrb[28].mxu0 %vm406_vm1, %v3840_v13 }
  0xcb   : > { %4355 = vmatprep.mubr.msk.bf16.mxu0 %vm406_vm1, %v6591_v51 }
  0xd0   : > { %4210 = vmatmul.mubr.msk.bf16.gmra.mrb[24].mxu1 %vm406_vm1, %v5474_v17 }
  0xd1   : > { %4213 = vmatprep.mubr.msk.bf16.mxu1 %vm406_vm1, %v5507_v5 }
  0xd2   : > { %4356 = vmatmul.mubr.msk.bf16.vlgmr.msra.gmra.mrb[0].mxu0 %vm406_vm1, %v5057_v32  ;;  %v6595_v32 = vld [vmem:[#allocation3_spill] sm:$0xff] }
  0xd3   : > { %4388 = vmatpush3.bf16.msra.mxu0 %v2807_v46  ;;  %4359 = vmatprep.mubr.msk.bf16.mxu0 %vm406_vm1, %v5065_v49  ;;  %v6596_v49 = vld [vmem:[#allocation18_spill] sm:$0xff] }
  0xd8   : > { %4214 = vmatmul.mubr.msk.bf16.gmra.mrb[28].mxu1 %vm406_vm1, %v5541_v44 }
  0xd9   : > { %4219 = vmatprep.mubr.msk.bf16.mxu1 %vm406_vm1, %v6592_v12 }
  0xda   : > { %4360 = vmatmul.mubr.msk.bf16.gmra.mrb[4].mxu0 %vm406_vm1, %v6593_v20 }
  0xdb   : > { %4363 = vmatprep.mubr.msk.bf16.mxu0 %vm406_vm1, %v6594_v6 }
  0xe0   : > { %4220 = vmatmul.mubr.msk.bf16.vlgmr.msra.gmra.mrb[0].mxu1 %vm406_vm1, %v6572_v42  ;;  %v2582_v42 = vrot.slane %v2580_v55, 4 }
  0xe1   : > { %4223 = vmatprep.mubr.msk.bf16.mxu1 %vm406_vm1, %v6573_v33  ;;  %4422 = vmatpush3.bf16.msra.mxu1 %v6595_v32  ;;  %v2574_v33 = vrot.slane %v2573_v58, 4 }
  0xe2   : > { %4364 = vmatmul.mubr.msk.bf16.gmra.mrb[8].mxu0 %vm406_vm1, %v6596_v49  ;;  %v2583_v59 = vor.u32 %v2582_v42, %v2578_v36 }
  0xe3   : > { %4367 = vmatprep.mubr.msk.bf16.mxu0 %vm406_vm1, %v6597_v7 }
  0xe8   : > { %4224 = vmatmul.mubr.msk.bf16.gmra.mrb[4].mxu1 %vm406_vm1, %v6574_v62  ;;  %v2584_v62 = vrot.slane %v2583_v59, 4 }
  0xe9   : > { %4227 = vmatprep.mubr.msk.bf16.mxu1 %vm406_vm1, %v6575_v48  ;;  %v2588_v48 = vrot.slane %v2586_v30, 5 }
  0xea   : > { %4368 = vmatmul.mubr.msk.bf16.gmra.mrb[12].mxu0 %vm406_vm1, %v5560_v34 }
  0xeb   : > { %4371 = vmatprep.mubr.msk.bf16.mxu0 %vm406_vm1, %v5568_v23  ;;  %v2589_v56 = vsel %vm4967_vm4, %v2584_v62, %v2588_v48 }
  0xf0   : > { %4228 = vmatmul.mubr.msk.bf16.gmra.mrb[8].mxu1 %vm406_vm1, %v6576_v4  ;;  %v2579_v4 = vsel %vm4967_vm4, %v2574_v33, %v2578_v36 }
  0xf1   : > { %4231 = vmatprep.mubr.msk.bf16.mxu1 %vm406_vm1, %v6577_v8  ;;  %v3857_v14 = vcombine.low %v2579_v4, %v2589_v56 }
  0xf2   : > { %4372 = vmatmul.mubr.msk.bf16.gmra.mrb[16].mxu0 %vm406_vm1, %v5604_v25 }
  0xf3   : > { %4375 = vmatprep.mubr.msk.bf16.mxu0 %vm406_vm1, %v5607_v26 }
  0xf8   : > { %4232 = vmatmul.mubr.msk.bf16.gmra.mrb[12].mxu1 %vm406_vm1, %v6578_v1 }
  0xf9   : > { %4235 = vmatprep.mubr.msk.bf16.mxu1 %vm406_vm1, %v6581_v63 }
  0xfa   : > { %4376 = vmatmul.mubr.msk.bf16.gmra.mrb[20].mxu0 %vm406_vm1, %v5644_v50 }
  0xfb   : > { %4379 = vmatprep.mubr.msk.bf16.mxu0 %vm406_vm1, %v5650_v61 }
 0x100   : > { %4236 = vmatmul.mubr.msk.bf16.gmra.mrb[16].mxu1 %vm406_vm1, %v6582_v2 }
 0x101   : > { %4239 = vmatprep.mubr.msk.bf16.mxu1 %vm406_vm1, %v6585_v35 }
 0x102   : > { %4380 = vmatmul.mubr.msk.bf16.gmra.mrb[24].mxu0 %vm406_vm1, %v5668_v57 }
 0x103   : > { %4383 = vmatprep.mubr.msk.bf16.mxu0 %vm406_vm1, %v5656_v21 }
 0x108   : > { %4240 = vmatmul.mubr.msk.bf16.gmra.mrb[20].mxu1 %vm406_vm1, %v6586_v29 }
 0x109   : > { %4243 = vmatprep.mubr.msk.bf16.mxu1 %vm406_vm1, %v6588_v47 }
 0x10a   : > { %4384 = vmatmul.mubr.msk.bf16.gmra.mrb[28].mxu0 %vm406_vm1, %v3857_v14 }
 0x10b   : > { %4389 = vmatprep.mubr.msk.bf16.mxu0 %vm406_vm1, %v5261_v31  ;;  %v2798_v31 = vrot.slane %v316_v40, 5 }
 0x110   : > { %4244 = vmatmul.mubr.msk.bf16.gmra.mrb[24].mxu1 %vm406_vm1, %v6589_v38 }
 0x111   : > { %4247 = vmatprep.mubr.msk.bf16.mxu1 %vm406_vm1, %v6590_v0 }
 0x112   : > { %4390 = vmatmul.mubr.msk.bf16.vlgmr.msra.gmra.mrb[0].mxu0 %vm406_vm1, %v6579_v19 }
 0x113   : > { %4393 = vmatprep.mubr.msk.bf16.mxu0 %vm406_vm1, %v6580_v54 }
 0x118   : > { %4248 = vmatmul.mubr.msk.bf16.gmra.mrb[28].mxu1 %vm406_vm1, %v5725_v39 }
 0x119   : > { %4269 = vmatprep.mubr.msk.bf16.mxu1 %vm406_vm1, %v5560_v34  ;;  %v3874_v34 = vrot.slane %v5732_v9, 9 }
 0x11a   : > { %4394 = vmatmul.mubr.msk.bf16.gmra.mrb[4].mxu0 %vm406_vm1, %v6583_v41 }
 0x11b   : > { %4397 = vmatprep.mubr.msk.bf16.mxu0 %vm406_vm1, %v6584_v27 }
 0x120   : > { %4270 = vmatmul.mubr.msk.bf16.vlgmr.msra.gmra.mrb[16].mxu1 %vm406_vm1, %v5568_v23 }
 0x121   : > { %4273 = vmatprep.mubr.msk.bf16.mxu1 %vm406_vm1, %v5604_v25 }
 0x122   : > { %4398 = vmatmul.mubr.msk.bf16.gmra.mrb[8].mxu0 %vm406_vm1, %v6587_v24 }
 0x123   : > { %4401 = vmatprep.mubr.msk.bf16.mxu0 %vm406_vm1, %v5424_v43  ;;  %v2796_v43 = vsel %vm5176_vm7, %v3874_v34, %v2795_v53 }
 0x128   : > { %4274 = vmatmul.mubr.msk.bf16.gmra.mrb[20].mxu1 %vm406_vm1, %v5607_v26 }
 0x129   : > { %4277 = vmatprep.mubr.msk.bf16.mxu1 %vm406_vm1, %v5644_v50 }
 0x12a   : > { %4402 = vmatmul.mubr.msk.bf16.gmra.mrb[12].mxu0 %vm406_vm1, %v5428_v37 }
 0x12b   : > { %4405 = vmatprep.mubr.msk.bf16.mxu0 %vm406_vm1, %v5433_v16  ;;  %v2797_v16 = vrot.slane %v2795_v53, 4 }
 0x12d   : > { %v2799_v37 = vsel %vm5176_vm7, %v2797_v16, %v2798_v31 }
 0x130   : > { %4278 = vmatmul.mubr.msk.bf16.gmra.mrb[24].mxu1 %vm406_vm1, %v5650_v61 }
 0x131   : > { %4281 = vmatprep.mubr.msk.bf16.mxu1 %vm406_vm1, %v5668_v57 }
 0x132   : > { %4406 = vmatmul.mubr.msk.bf16.gmra.mrb[16].mxu0 %vm406_vm1, %v5461_v45  ;;  %v3875_v45 = vcombine.low %v2796_v43, %v2799_v37 }
 0x133   : > { %4409 = vmatprep.mubr.msk.bf16.mxu0 %vm406_vm1, %v5463_v11 }
 0x138   : > { %4282 = vmatmul.mubr.msk.bf16.gmra.mrb[28].mxu1 %vm406_vm1, %v5656_v21 }
 0x13a   : > { %4410 = vmatmul.mubr.msk.bf16.gmra.mrb[20].mxu0 %vm406_vm1, %v5474_v17 }
 0x13b   : > { %4413 = vmatprep.mubr.msk.bf16.mxu0 %vm406_vm1, %v5507_v5 }
 0x142   : > { %4414 = vmatmul.mubr.msk.bf16.gmra.mrb[24].mxu0 %vm406_vm1, %v5541_v44 }
 0x143   : > { %4417 = vmatprep.mubr.msk.bf16.mxu0 %vm406_vm1, %v5628_v18 }
 0x14a   : > { %4418 = vmatmul.mubr.msk.bf16.gmra.mrb[28].mxu0 %vm406_vm1, %v3875_v45 }
 0x1b3   : > { %v4221_v11 = vpop.f32.mrb[0].mxu1 }
 0x1b4   : > { %v1767_v17 = vpop.f32.mrb[1].mxu1 }
 0x1b5   : > { %v4222_v5 = vpop.f32.mrb[2].mxu1 }
 0x1b6   : > { %v1770_v23 = vpop.f32.mrb[3].mxu1 }
 0x1bb   : > { %v4225_v25 = vpop.f32.mrb[4].mxu1 }
 0x1bc   : > { %v1783_v26 = vpop.f32.mrb[5].mxu1 }
 0x1bd   : > { %v4226_v50 = vpop.f32.mrb[6].mxu1 }
 0x1be   : > { %v1786_v44 = vpop.f32.mrb[7].mxu1 }
 0x1c3   : > { %v4229_v61 = vpop.f32.mrb[8].mxu1 }
 0x1c4   : > { %v1799_v21 = vpop.f32.mrb[9].mxu1 }
 0x1c5   : > { %v4230_v18 = vpop.f32.mrb[10].mxu1 }
 0x1c6   : > { %v1802_v57 = vpop.f32.mrb[11].mxu1 }
 0x1cb   : > { %v4233_v8 = vpop.f32.mrb[12].mxu1 }
 0x1cc   : > { %v1815_v1 = vpop.f32.mrb[13].mxu1 }
 0x1cd   : > { %v4234_v19 = vpop.f32.mrb[14].mxu1 }
 0x1ce   : > { %v1818_v60 = vpop.f32.mrb[15].mxu1 }
 0x1e5   : > { %v4391_v54 = vpop.f32.mrb[0].mxu0 }
 0x1e6   : > { %v5877_v63 = vadd.f32 %v4391_v54, %v4221_v11  ;;  %v2843_v2 = vpop.f32.mrb[1].mxu0 }
 0x1e7   : > { %v5879_v41 = vadd.f32 %v2843_v2, %v1767_v17  ;;  %v4392_v27 = vpop.f32.mrb[2].mxu0 }
 0x1e8   : > { %v5881_v35 = vadd.f32 %v4392_v27, %v4222_v5  ;;  %v2846_v29 = vpop.f32.mrb[3].mxu0  ;;  %3008 = vst.msk [vmem:[#allocation2 + $0x10] sm:$0xff] (!%p3892_p8), %vm406_vm1, %v5877_v63 }
 0x1e9   : > { %v5883_v24 = vadd.f32 %v2846_v29, %v1770_v23  ;;  %3006 = vst.msk [vmem:[#allocation2] sm:$0xff] (!%p3892_p8), %vm406_vm1, %v5879_v41 }
 0x1ea   : > { %3009 = vst.msk [vmem:[#allocation2 + $0x18] sm:$0xff] (!%p3892_p8), %vm406_vm1, %v5881_v35 }
 0x1eb   : > { %3007 = vst.msk [vmem:[#allocation2 + $0x8] sm:$0xff] (!%p3892_p8), %vm406_vm1, %v5883_v24 }
 0x1ed   : > { %v4395_v47 = vpop.f32.mrb[4].mxu0 }
 0x1ee   : > { %v5885_v38 = vadd.f32 %v4395_v47, %v4225_v25  ;;  %v2859_v39 = vpop.f32.mrb[5].mxu0 }
 0x1ef   : > { %v5887_v0 = vadd.f32 %v2859_v39, %v1783_v26  ;;  %v4396_v9 = vpop.f32.mrb[6].mxu0 }
 0x1f0   : > { %v5889_v52 = vadd.f32 %v4396_v9, %v4226_v50  ;;  %v2862_v13 = vpop.f32.mrb[7].mxu0  ;;  %3012 = vst.msk [vmem:[#allocation2 + $0x30] sm:$0xff] (!%p3892_p8), %vm406_vm1, %v5885_v38 }
 0x1f1   : > { %v5891_v46 = vadd.f32 %v2862_v13, %v1786_v44  ;;  %3010 = vst.msk [vmem:[#allocation2 + $0x20] sm:$0xff] (!%p3892_p8), %vm406_vm1, %v5887_v0 }
 0x1f2   : > { %3013 = vst.msk [vmem:[#allocation2 + $0x38] sm:$0xff] (!%p3892_p8), %vm406_vm1, %v5889_v52 }
 0x1f3   : > { %v4271_v51 = vpop.f32.mrb[16].mxu1  ;;  %3011 = vst.msk [vmem:[#allocation2 + $0x28] sm:$0xff] (!%p3892_p8), %vm406_vm1, %v5891_v46 }
 0x1f4   : > { %v2057_v12 = vpop.f32.mrb[17].mxu1 }
 0x1f5   : > { %v4272_v20 = vpop.f32.mrb[18].mxu1  ;;  %v4399_v32 = vpop.f32.mrb[8].mxu0 }
 0x1f6   : > { %v2060_v6 = vpop.f32.mrb[19].mxu1  ;;  %v5893_v49 = vadd.f32 %v4399_v32, %v4229_v61  ;;  %v2875_v7 = vpop.f32.mrb[9].mxu0 }
 0x1f7   : > { %v5895_v28 = vadd.f32 %v2875_v7, %v1799_v21  ;;  %v4400_v15 = vpop.f32.mrb[10].mxu0 }
 0x1f8   : > { %v5897_v55 = vadd.f32 %v4400_v15, %v4230_v18  ;;  %v2878_v10 = vpop.f32.mrb[11].mxu0  ;;  %3016 = vst.msk [vmem:[#allocation2 + $0x50] sm:$0xff] (!%p3892_p8), %vm406_vm1, %v5893_v49 }
 0x1f9   : > { %v5899_v3 = vadd.f32 %v2878_v10, %v1802_v57  ;;  %3014 = vst.msk [vmem:[#allocation2 + $0x40] sm:$0xff] (!%p3892_p8), %vm406_vm1, %v5895_v28 }
 0x1fa   : > { %3017 = vst.msk [vmem:[#allocation2 + $0x58] sm:$0xff] (!%p3892_p8), %vm406_vm1, %v5897_v55 }
 0x1fb   : > { %v4275_v22 = vpop.f32.mrb[20].mxu1  ;;  %3015 = vst.msk [vmem:[#allocation2 + $0x48] sm:$0xff] (!%p3892_p8), %vm406_vm1, %v5899_v3 }
 0x1fc   : > { %v2073_v36 = vpop.f32.mrb[21].mxu1 }
 0x1fd   : > { %v4276_v42 = vpop.f32.mrb[22].mxu1  ;;  %v4403_v58 = vpop.f32.mrb[12].mxu0 }
 0x1fe   : > { %v2076_v40 = vpop.f32.mrb[23].mxu1  ;;  %v5901_v59 = vadd.f32 %v4403_v58, %v4233_v8  ;;  %v2891_v30 = vpop.f32.mrb[13].mxu0 }
 0x1ff   : > { %v5903_v33 = vadd.f32 %v2891_v30, %v1815_v1  ;;  %v4404_v62 = vpop.f32.mrb[14].mxu0 }
 0x200   : > { %v5905_v48 = vadd.f32 %v4404_v62, %v4234_v19  ;;  %v2894_v4 = vpop.f32.mrb[15].mxu0  ;;  %3020 = vst.msk [vmem:[#allocation2 + $0x70] sm:$0xff] (!%p3892_p8), %vm406_vm1, %v5901_v59 }
 0x201   : > { %v5907_v14 = vadd.f32 %v2894_v4, %v1818_v60  ;;  %3018 = vst.msk [vmem:[#allocation2 + $0x60] sm:$0xff] (!%p3892_p8), %vm406_vm1, %v5903_v33 }
 0x202   : > { %3021 = vst.msk [vmem:[#allocation2 + $0x78] sm:$0xff] (!%p3892_p8), %vm406_vm1, %v5905_v48 }
 0x203   : > { %v4279_v56 = vpop.f32.mrb[24].mxu1  ;;  %3019 = vst.msk [vmem:[#allocation2 + $0x68] sm:$0xff] (!%p3892_p8), %vm406_vm1, %v5907_v14 }
 0x204   : > { %v2089_v53 = vpop.f32.mrb[25].mxu1 }
 0x205   : > { %v4280_v34 = vpop.f32.mrb[26].mxu1  ;;  %v4407_v31 = vpop.f32.mrb[16].mxu0 }
 0x206   : > { %v2092_v16 = vpop.f32.mrb[27].mxu1  ;;  %v5909_v43 = vadd.f32 %v4407_v31, %v4271_v51  ;;  %v2907_v37 = vpop.f32.mrb[17].mxu0 }
 0x207   : > { %v5911_v45 = vadd.f32 %v2907_v37, %v2057_v12  ;;  %v4408_v11 = vpop.f32.mrb[18].mxu0 }
 0x208   : > { %v5913_v17 = vadd.f32 %v4408_v11, %v4272_v20  ;;  %v2910_v5 = vpop.f32.mrb[19].mxu0  ;;  %3024 = vst.msk [vmem:[#allocation2 + $0x90] sm:$0xff] (!%p3892_p8), %vm406_vm1, %v5909_v43 }
 0x209   : > { %v5915_v25 = vadd.f32 %v2910_v5, %v2060_v6  ;;  %3022 = vst.msk [vmem:[#allocation2 + $0x80] sm:$0xff] (!%p3892_p8), %vm406_vm1, %v5911_v45 }
 0x20a   : > { %3025 = vst.msk [vmem:[#allocation2 + $0x98] sm:$0xff] (!%p3892_p8), %vm406_vm1, %v5913_v17 }
 0x20b   : > { %v4283_v23 = vpop.f32.mrb[28].mxu1  ;;  %3023 = vst.msk [vmem:[#allocation2 + $0x88] sm:$0xff] (!%p3892_p8), %vm406_vm1, %v5915_v25 }
 0x20c   : > { %v2105_v26 = vpop.f32.mrb[29].mxu1 }
 0x20d   : > { %v4284_v50 = vpop.f32.mrb[30].mxu1  ;;  %v4411_v61 = vpop.f32.mrb[20].mxu0 }
 0x20e   : > { %v2108_v44 = vpop.f32.mrb[31].mxu1  ;;  %v5917_v21 = vadd.f32 %v4411_v61, %v4275_v22  ;;  %v2923_v18 = vpop.f32.mrb[21].mxu0 }
 0x20f   : > { %v5919_v57 = vadd.f32 %v2923_v18, %v2073_v36  ;;  %v4412_v8 = vpop.f32.mrb[22].mxu0 }
 0x210   : > { %v5921_v1 = vadd.f32 %v4412_v8, %v4276_v42  ;;  %v2926_v19 = vpop.f32.mrb[23].mxu0  ;;  %3028 = vst.msk [vmem:[#allocation2 + $0xb0] sm:$0xff] (!%p3892_p8), %vm406_vm1, %v5917_v21 }
 0x211   : > { %v5923_v60 = vadd.f32 %v2926_v19, %v2076_v40  ;;  %3026 = vst.msk [vmem:[#allocation2 + $0xa0] sm:$0xff] (!%p3892_p8), %vm406_vm1, %v5919_v57 }
 0x212   : > { %3029 = vst.msk [vmem:[#allocation2 + $0xb8] sm:$0xff] (!%p3892_p8), %vm406_vm1, %v5921_v1 }
 0x213   : > { %3027 = vst.msk [vmem:[#allocation2 + $0xa8] sm:$0xff] (!%p3892_p8), %vm406_vm1, %v5923_v60 }
 0x215   : > { %v4415_v54 = vpop.f32.mrb[24].mxu0 }
 0x216   : > { %v5925_v2 = vadd.f32 %v4415_v54, %v4279_v56  ;;  %v2939_v27 = vpop.f32.mrb[25].mxu0 }
 0x217   : > { %v5927_v29 = vadd.f32 %v2939_v27, %v2089_v53  ;;  %v4416_v47 = vpop.f32.mrb[26].mxu0 }
 0x218   : > { %v5929_v39 = vadd.f32 %v4416_v47, %v4280_v34  ;;  %v2942_v9 = vpop.f32.mrb[27].mxu0  ;;  %3032 = vst.msk [vmem:[#allocation2 + $0xd0] sm:$0xff] (!%p3892_p8), %vm406_vm1, %v5925_v2 }
 0x219   : > { %v5931_v13 = vadd.f32 %v2942_v9, %v2092_v16  ;;  %3030 = vst.msk [vmem:[#allocation2 + $0xc0] sm:$0xff] (!%p3892_p8), %vm406_vm1, %v5927_v29 }
 0x21a   : > { %3033 = vst.msk [vmem:[#allocation2 + $0xd8] sm:$0xff] (!%p3892_p8), %vm406_vm1, %v5929_v39 }
 0x21b   : > { %3005 = sbr.rel (%p3892_p8) target bundleno = 548 (0x224), region = 32  ;;  %3031 = vst.msk [vmem:[#allocation2 + $0xc8] sm:$0xff] (!%p3892_p8), %vm406_vm1, %v5931_v13 }
 0x21d   : > { %v4419_v51 = vpop.f32.mrb[28].mxu0 }
 0x21e   : > { %v5933_v12 = vadd.f32 %v4419_v51, %v4283_v23  ;;  %v2955_v20 = vpop.f32.mrb[29].mxu0 }
 0x21f   : > { %v5935_v6 = vadd.f32 %v2955_v20, %v2105_v26  ;;  %v4420_v32 = vpop.f32.mrb[30].mxu0 }
 0x220   : > { %v5937_v7 = vadd.f32 %v4420_v32, %v4284_v50  ;;  %v2958_v15 = vpop.f32.mrb[31].mxu0  ;;  %3036 = vst.msk [vmem:[#allocation2 + $0xf0] sm:$0xff] (!%p3892_p8), %vm406_vm1, %v5933_v12 }
 0x221   : > { %v5939_v10 = vadd.f32 %v2958_v15, %v2108_v44  ;;  %3034 = vst.msk [vmem:[#allocation2 + $0xe0] sm:$0xff] (!%p3892_p8), %vm406_vm1, %v5935_v6 }
 0x222   : > { %3037 = vst.msk [vmem:[#allocation2 + $0xf8] sm:$0xff] %vm406_vm1, %v5937_v7 }
 0x223   : > { %3035 = vst.msk [vmem:[#allocation2 + $0xe8] sm:$0xff] %vm406_vm1, %v5939_v10 }
 0x224 PF: > { %p3893_p9 = scmp.eq.s32.totalorder %s4772_s12, 0 }
 0x225   : > { %v3042_v22 = vld [vmem:[#allocation2] sm:$0xff] (!%p3893_p9)  ;;  %v3043_v36 = vld [vmem:[#allocation2 + $0x8] sm:$0xff] (!%p3893_p9)  ;;  %v3044_v42 = vld [vmem:[#allocation2 + $0x10] sm:$0xff] (!%p3893_p9) }
 0x226   : > { %3041 = sbr.rel (%p3893_p9) target bundleno = 568 (0x238), region = 36  ;;  %v3074_v40 = vadd.f32 (!%p3893_p9), %v5879_v41, %v3042_v22  ;;  %v3075_v58 = vadd.f32 (!%p3893_p9), %v5883_v24, %v3043_v36  ;;  %v3076_v30 = vadd.f32 (!%p3893_p9), %v5877_v63, %v3044_v42  ;;  %v3045_v62 = vld [vmem:[#allocation2 + $0x18] sm:$0xff] (!%p3893_p9)  ;;  %v3046_v4 = vld [vmem:[#allocation2 + $0x20] sm:$0xff] (!%p3893_p9)  ;;  %v3047_v56 = vld [vmem:[#allocation2 + $0x28] sm:$0xff] (!%p3893_p9) }
 0x227   : > { %v3077_v53 = vadd.f32 (!%p3893_p9), %v5881_v35, %v3045_v62  ;;  %v3078_v34 = vadd.f32 (!%p3893_p9), %v5887_v0, %v3046_v4  ;;  %v3079_v16 = vadd.f32 (!%p3893_p9), %v5891_v46, %v3047_v56  ;;  %v3048_v31 = vld [vmem:[#allocation2 + $0x30] sm:$0xff] (!%p3893_p9)  ;;  %v3049_v37 = vld [vmem:[#allocation2 + $0x38] sm:$0xff] (!%p3893_p9)  ;;  %v3050_v11 = vld [vmem:[#allocation2 + $0x40] sm:$0xff] (!%p3893_p9) }
 0x228   : > { %3106 = vst.msk [vmem:[#allocation2] sm:$0xff] (!%p3893_p9), %vm406_vm1, %v3074_v40  ;;  %3107 = vst.msk [vmem:[#allocation2 + $0x8] sm:$0xff] (!%p3893_p9), %vm406_vm1, %v3075_v58  ;;  %v3080_v63 = vadd.f32 (!%p3893_p9), %v5885_v38, %v3048_v31  ;;  %v3081_v41 = vadd.f32 (!%p3893_p9), %v5889_v52, %v3049_v37  ;;  %v3082_v24 = vadd.f32 (!%p3893_p9), %v5895_v28, %v3050_v11  ;;  %v3051_v35 = vld [vmem:[#allocation2 + $0x48] sm:$0xff] (!%p3893_p9)  ;;  %v3052_v5 = vld [vmem:[#allocation2 + $0x50] sm:$0xff] (!%p3893_p9) }
 0x229   : > { %3108 = vst.msk [vmem:[#allocation2 + $0x10] sm:$0xff] (!%p3893_p9), %vm406_vm1, %v3076_v30  ;;  %v3053_v0 = vld [vmem:[#allocation2 + $0x58] sm:$0xff] (!%p3893_p9)  ;;  %3109 = vst.msk [vmem:[#allocation2 + $0x18] sm:$0xff] (!%p3893_p9), %vm406_vm1, %v3077_v53  ;;  %v3083_v46 = vadd.f32 (!%p3893_p9), %v5899_v3, %v3051_v35  ;;  %v3084_v23 = vadd.f32 (!%p3893_p9), %v5893_v49, %v3052_v5  ;;  %v3054_v38 = vld [vmem:[#allocation2 + $0x60] sm:$0xff] (!%p3893_p9) }
 0x22a   : > { %3110 = vst.msk [vmem:[#allocation2 + $0x20] sm:$0xff] (!%p3893_p9), %vm406_vm1, %v3078_v34  ;;  %3111 = vst.msk [vmem:[#allocation2 + $0x28] sm:$0xff] (!%p3893_p9), %vm406_vm1, %v3079_v16  ;;  %v3085_v26 = vadd.f32 (!%p3893_p9), %v5897_v55, %v3053_v0  ;;  %v3055_v50 = vld [vmem:[#allocation2 + $0x68] sm:$0xff] (!%p3893_p9)  ;;  %v3056_v52 = vld [vmem:[#allocation2 + $0x70] sm:$0xff] (!%p3893_p9)  ;;  %v3086_v28 = vadd.f32 (!%p3893_p9), %v5903_v33, %v3054_v38 }
 0x22b   : > { %3112 = vst.msk [vmem:[#allocation2 + $0x30] sm:$0xff] (!%p3893_p9), %vm406_vm1, %v3080_v63  ;;  %3113 = vst.msk [vmem:[#allocation2 + $0x38] sm:$0xff] (!%p3893_p9), %vm406_vm1, %v3081_v41  ;;  %v3087_v44 = vadd.f32 (!%p3893_p9), %v5907_v14, %v3055_v50  ;;  %v3088_v61 = vadd.f32 (!%p3893_p9), %v5901_v59, %v3056_v52  ;;  %v3057_v3 = vld [vmem:[#allocation2 + $0x78] sm:$0xff] (!%p3893_p9)  ;;  %v3058_v18 = vld [vmem:[#allocation2 + $0x80] sm:$0xff] (!%p3893_p9) }
 0x22c   : > { %3114 = vst.msk [vmem:[#allocation2 + $0x40] sm:$0xff] (!%p3893_p9), %vm406_vm1, %v3082_v24  ;;  %v3059_v49 = vld [vmem:[#allocation2 + $0x88] sm:$0xff] (!%p3893_p9)  ;;  %3115 = vst.msk [vmem:[#allocation2 + $0x48] sm:$0xff] (!%p3893_p9), %vm406_vm1, %v3083_v46  ;;  %v3089_v55 = vadd.f32 (!%p3893_p9), %v5905_v48, %v3057_v3  ;;  %v3090_v8 = vadd.f32 (!%p3893_p9), %v5911_v45, %v3058_v18  ;;  %v3060_v33 = vld [vmem:[#allocation2 + $0x90] sm:$0xff] (!%p3893_p9) }
 0x22d   : > { %3116 = vst.msk [vmem:[#allocation2 + $0x50] sm:$0xff] %vm406_vm1, %v3084_v23  ;;  %3117 = vst.msk [vmem:[#allocation2 + $0x58] sm:$0xff] %vm406_vm1, %v3085_v26  ;;  %v3091_v19 = vadd.f32 %v5915_v25, %v3059_v49  ;;  %v3061_v54 = vld [vmem:[#allocation2 + $0x98] sm:$0xff]  ;;  %v3062_v14 = vld [vmem:[#allocation2 + $0xa0] sm:$0xff]  ;;  %v3092_v59 = vadd.f32 %v5909_v43, %v3060_v33 }
 0x22e   : > { %3118 = vst.msk [vmem:[#allocation2 + $0x60] sm:$0xff] %vm406_vm1, %v3086_v28  ;;  %3119 = vst.msk [vmem:[#allocation2 + $0x68] sm:$0xff] %vm406_vm1, %v3087_v44  ;;  %v3093_v27 = vadd.f32 %v5913_v17, %v3061_v54  ;;  %v3094_v47 = vadd.f32 %v5919_v57, %v3062_v14  ;;  %v3063_v48 = vld [vmem:[#allocation2 + $0xa8] sm:$0xff]  ;;  %v3064_v9 = vld [vmem:[#allocation2 + $0xb0] sm:$0xff] }
 0x22f   : > { %3120 = vst.msk [vmem:[#allocation2 + $0x70] sm:$0xff] %vm406_vm1, %v3088_v61  ;;  %v3065_v45 = vld [vmem:[#allocation2 + $0xb8] sm:$0xff]  ;;  %3121 = vst.msk [vmem:[#allocation2 + $0x78] sm:$0xff] %vm406_vm1, %v3089_v55  ;;  %v3095_v25 = vadd.f32 %v5923_v60, %v3063_v48  ;;  %v3096_v51 = vadd.f32 %v5917_v21, %v3064_v9  ;;  %v3066_v43 = vld [vmem:[#allocation2 + $0xc0] sm:$0xff] }
 0x230   : > { %3122 = vst.msk [vmem:[#allocation2 + $0x80] sm:$0xff] %vm406_vm1, %v3090_v8  ;;  %3123 = vst.msk [vmem:[#allocation2 + $0x88] sm:$0xff] %vm406_vm1, %v3091_v19  ;;  %v3097_v20 = vadd.f32 %v5921_v1, %v3065_v45  ;;  %v3067_v32 = vld [vmem:[#allocation2 + $0xc8] sm:$0xff]  ;;  %v3068_v17 = vld [vmem:[#allocation2 + $0xd0] sm:$0xff]  ;;  %v3098_v57 = vadd.f32 %v5927_v29, %v3066_v43 }
 0x231   : > { %3124 = vst.msk [vmem:[#allocation2 + $0x90] sm:$0xff] %vm406_vm1, %v3092_v59  ;;  %3125 = vst.msk [vmem:[#allocation2 + $0x98] sm:$0xff] %vm406_vm1, %v3093_v27  ;;  %v3099_v15 = vadd.f32 %v5931_v13, %v3067_v32  ;;  %v3100_v22 = vadd.f32 %v5925_v2, %v3068_v17  ;;  %v3069_v60 = vld [vmem:[#allocation2 + $0xd8] sm:$0xff]  ;;  %v3070_v36 = vld [vmem:[#allocation2 + $0xe0] sm:$0xff] }
 0x232   : > { %3126 = vst.msk [vmem:[#allocation2 + $0xa0] sm:$0xff] %vm406_vm1, %v3094_v47  ;;  %v3071_v21 = vld [vmem:[#allocation2 + $0xe8] sm:$0xff]  ;;  %3127 = vst.msk [vmem:[#allocation2 + $0xa8] sm:$0xff] %vm406_vm1, %v3095_v25  ;;  %v3101_v1 = vadd.f32 %v5929_v39, %v3069_v60  ;;  %v3102_v42 = vadd.f32 %v5935_v6, %v3070_v36  ;;  %v3072_v29 = vld [vmem:[#allocation2 + $0xf0] sm:$0xff] }
 0x233   : > { %3128 = vst.msk [vmem:[#allocation2 + $0xb0] sm:$0xff] %vm406_vm1, %v3096_v51  ;;  %3129 = vst.msk [vmem:[#allocation2 + $0xb8] sm:$0xff] %vm406_vm1, %v3097_v20  ;;  %v3103_v40 = vadd.f32 %v5939_v10, %v3071_v21  ;;  %v3073_v58 = vld [vmem:[#allocation2 + $0xf8] sm:$0xff]  ;;  %v3104_v2 = vadd.f32 %v5933_v12, %v3072_v29 }
 0x234   : > { %3130 = vst.msk [vmem:[#allocation2 + $0xc0] sm:$0xff] %vm406_vm1, %v3098_v57  ;;  %3131 = vst.msk [vmem:[#allocation2 + $0xc8] sm:$0xff] %vm406_vm1, %v3099_v15  ;;  %v3105_v13 = vadd.f32 %v5937_v7, %v3073_v58 }
 0x235   : > { %3132 = vst.msk [vmem:[#allocation2 + $0xd0] sm:$0xff] %vm406_vm1, %v3100_v22  ;;  %3133 = vst.msk [vmem:[#allocation2 + $0xd8] sm:$0xff] %vm406_vm1, %v3101_v1 }
 0x236   : > { %3134 = vst.msk [vmem:[#allocation2 + $0xe0] sm:$0xff] %vm406_vm1, %v3102_v42  ;;  %3135 = vst.msk [vmem:[#allocation2 + $0xe8] sm:$0xff] %vm406_vm1, %v3103_v40 }
 0x237   : > { %3136 = vst.msk [vmem:[#allocation2 + $0xf0] sm:$0xff] %vm406_vm1, %v3104_v2  ;;  %3137 = vst.msk [vmem:[#allocation2 + $0xf8] sm:$0xff] %vm406_vm1, %v3105_v13 }
 0x238 PF: > { %p3894_p10 = scmp.ne.s32.totalorder %s4772_s12, 2 }
 0x239   : > { %v6122_v55 = vld [vmem:[#allocation2 + $0x60] sm:$0xff] (!%p3894_p10)  ;;  %v6132_v59 = vld [vmem:[#allocation2 + $0x68] sm:$0xff] (!%p3894_p10)  ;;  %v6134_v27 = vld [vmem:[#allocation2 + $0x70] sm:$0xff] (!%p3894_p10)  ;;  %vm3476_vm8 = vcmask (!%p3894_p10), 60416   ;;  %vm3344_vm9 = vcmask (!%p3894_p10), 1040384   ;;  %vm3346_vm10 = vcmask (!%p3894_p10), 58368  }
 0x23a   : > { %3141 = sbr.rel (%p3894_p10) target bundleno = 664 (0x298), region = 40  ;;  %v6072_v39 = vld [vmem:[#allocation2] sm:$0xff] (!%p3894_p10)  ;;  %v6074_v6 = vld [vmem:[#allocation2 + $0x8] sm:$0xff] (!%p3894_p10)  ;;  %v3197_v14 = vsel (!%p3894_p10), %vm406_vm1, %v6122_v55, 0.0  ;;  %v6141_v25 = vld [vmem:[#allocation2 + $0x78] sm:$0xff] (!%p3894_p10)  ;;  %v3199_v43 = vsel (!%p3894_p10), %vm406_vm1, %v6132_v59, 0.0 }
 0x23b   : > { %v6076_v12 = vld [vmem:[#allocation2 + $0x10] sm:$0xff] (!%p3894_p10)  ;;  %v3174_v7 = vsel (!%p3894_p10), %vm406_vm1, %v6072_v39, 0.0  ;;  %v3175_v10 = vsel (!%p3894_p10), %vm406_vm1, %v6074_v6, 0.0  ;;  %v6084_v62 = vld [vmem:[#allocation2 + $0x18] sm:$0xff] (!%p3894_p10)  ;;  %v3243_v28 = vmul.f32 (!%p3894_p10), %v6072_v39, %v6072_v39  ;;  %v3244_v44 = vmul.f32 (!%p3894_p10), %v6074_v6, %v6074_v6  ;;  %v6143_v51 = vld [vmem:[#allocation2 + $0x80] sm:$0xff] (!%p3894_p10) }
 0x23c   : > { %v3177_v30 = vsel (!%p3894_p10), %vm406_vm1, %v6076_v12, 0.0  ;;  %v3176_v4 = vadd.f32 (!%p3894_p10), %v3175_v10, %v3174_v7  ;;  %v3179_v56 = vsel (!%p3894_p10), %vm406_vm1, %v6084_v62, 0.0  ;;  %v6088_v53 = vld [vmem:[#allocation2 + $0x20] sm:$0xff] (!%p3894_p10)  ;;  %v6092_v31 = vld [vmem:[#allocation2 + $0x28] sm:$0xff] (!%p3894_p10)  ;;  %v3245_v61 = vmul.f32 (!%p3894_p10), %v6076_v12, %v6076_v12  ;;  %v6151_v15 = vld [vmem:[#allocation2 + $0x90] sm:$0xff] (!%p3894_p10) }
 0x23d   : > { %v3181_v16 = vsel (!%p3894_p10), %vm406_vm1, %v6088_v53, 0.0  ;;  %v3183_v11 = vsel (!%p3894_p10), %vm406_vm1, %v6092_v31, 0.0  ;;  %v6096_v63 = vld [vmem:[#allocation2 + $0x30] sm:$0xff] (!%p3894_p10)  ;;  %v6100_v35 = vld [vmem:[#allocation2 + $0x38] sm:$0xff] (!%p3894_p10)  ;;  %v3246_v19 = vmul.f32 (!%p3894_p10), %v6084_v62, %v6084_v62  ;;  %v3247_v47 = vmul.f32 (!%p3894_p10), %v6088_v53, %v6088_v53  ;;  %v6149_v57 = vld [vmem:[#allocation2 + $0x88] sm:$0xff] (!%p3894_p10) }
 0x23e   : > { %v3178_v34 = vadd.f32 (!%p3894_p10), %v3177_v30, %v3176_v4  ;;  %v3185_v24 = vsel (!%p3894_p10), %vm406_vm1, %v6096_v63, 0.0  ;;  %v3187_v0 = vsel (!%p3894_p10), %vm406_vm1, %v6100_v35, 0.0  ;;  %v6104_v46 = vld [vmem:[#allocation2 + $0x40] sm:$0xff] (!%p3894_p10)  ;;  %v6108_v38 = vld [vmem:[#allocation2 + $0x48] sm:$0xff] (!%p3894_p10)  ;;  %v3275_v48 = vsel (!%p3894_p10), %vm406_vm1, %v3243_v28, 0.0  ;;  %v6160_v1 = vld [vmem:[#allocation2 + $0x98] sm:$0xff] (!%p3894_p10) }
 0x23f   : > { %v3189_v26 = vsel (!%p3894_p10), %vm406_vm1, %v6104_v46, 0.0  ;;  %v3191_v52 = vsel (!%p3894_p10), %vm406_vm1, %v6108_v38, 0.0  ;;  %v6118_v3 = vld [vmem:[#allocation2 + $0x50] sm:$0xff] (!%p3894_p10)  ;;  %v6120_v49 = vld [vmem:[#allocation2 + $0x58] sm:$0xff] (!%p3894_p10)  ;;  %v3276_v9 = vsel (!%p3894_p10), %vm406_vm1, %v3244_v44, 0.0  ;;  %v3278_v45 = vsel (!%p3894_p10), %vm406_vm1, %v3245_v61, 0.0 }
 0x240   : > { %v3180_v37 = vadd.f32 (!%p3894_p10), %v3179_v56, %v3178_v34  ;;  %v3193_v8 = vsel (!%p3894_p10), %vm406_vm1, %v6118_v3, 0.0  ;;  %v3195_v54 = vsel (!%p3894_p10), %vm406_vm1, %v6120_v49, 0.0  ;;  %v3201_v32 = vsel (!%p3894_p10), %vm406_vm1, %v6134_v27, 0.0 }
 0x241   : > { %v3277_v17 = vadd.f32 %v3276_v9, %v3275_v48  ;;  %v3203_v22 = vsel %vm406_vm1, %v6141_v25, 0.0  ;;  %v3205_v60 = vsel %vm406_vm1, %v6143_v51, 0.0  ;;  %v3248_v36 = vmul.f32 %v6092_v31, %v6092_v31 }
 0x242   : > { %v3182_v41 = vadd.f32 %v3181_v16, %v3180_v37  ;;  %v3280_v21 = vsel %vm406_vm1, %v3246_v19, 0.0  ;;  %v3207_v40 = vsel %vm406_vm1, %v6149_v57, 0.0  ;;  %v6166_v29 = vsel %vm406_vm1, %v6151_v15, 0.0  ;;  %v6181_v16 = vld [vmem:[#allocation2 + $0xa0] sm:$0xff]  ;;  %v6183_v37 = vld [vmem:[#allocation2 + $0xa8] sm:$0xff] }
 0x243   : > { %v3279_v58 = vadd.f32 %v3278_v45, %v3277_v17  ;;  %v6170_v2 = vsel %vm406_vm1, %v6160_v1, 0.0  ;;  %v3249_v13 = vmul.f32 %v6096_v63, %v6096_v63  ;;  %v3250_v7 = vmul.f32 %v6100_v35, %v6100_v35 }
 0x244   : > { %v3184_v5 = vadd.f32 %v3183_v11, %v3182_v41  ;;  %v3282_v10 = vsel %vm406_vm1, %v3247_v47, 0.0  ;;  %v3251_v4 = vmul.f32 %v6104_v46, %v6104_v46  ;;  %v3252_v56 = vmul.f32 %v6108_v38, %v6108_v38 }
 0x245   : > { %v3281_v34 = vadd.f32 %v3280_v21, %v3279_v58  ;;  %v3253_v11 = vmul.f32 %v6118_v3, %v6118_v3  ;;  %v3254_v41 = vmul.f32 %v6120_v49, %v6120_v49  ;;  %v6206_v28 = vmul.f32 %v6134_v27, %v6134_v27 }
 0x246   : > { %v3186_v23 = vadd.f32 %v3185_v24, %v3184_v5  ;;  %v3255_v24 = vmul.f32 %v6122_v55, %v6122_v55  ;;  %v3284_v5 = vsel %vm406_vm1, %v3248_v36, 0.0  ;;  %v3286_v44 = vsel %vm406_vm1, %v3249_v13, 0.0 }
 0x247   : > { %v3288_v61 = vsel %vm406_vm1, %v3250_v7, 0.0  ;;  %v3290_v19 = vsel %vm406_vm1, %v3251_v4, 0.0  ;;  %v3930_v48 = vpack.c.bf16 %v6072_v39, %v6072_v39  ;;  %v3934_v39 = vpack.c.bf16 %v6088_v53, %v6088_v53  ;;  %v6302_v4 = vld [vmem:[#allocation2 + $0xd0] sm:$0xff] }
 0x248   : > { %v3188_v50 = vadd.f32 %v3187_v0, %v3186_v23  ;;  %v6194_v23 = vsel %vm406_vm1, %v6181_v16, 0.0  ;;  %v6219_v47 = vsel %vm406_vm1, %v3255_v24, 0.0  ;;  %v3935_v17 = vpack.c.bf16 %v6092_v31, %v6092_v31  ;;  %v6322_v24 = vld [vmem:[#allocation2 + $0xe0] sm:$0xff] }
 0x249   : > { %3477 = vst.msk [vmem:[%s4853_s29] sm:$0xf] %vm3476_vm8, %v3930_v48  ;;  %3481 = vst.msk [vmem:[%s4853_s29 + $0x10] sm:$0xf] %vm3476_vm8, %v3934_v39  ;;  %v3939_v53 = vpack.c.bf16 %v6108_v38, %v6108_v38  ;;  %v3940_v31 = vpack.c.bf16 %v6118_v3, %v6118_v3  ;;  %v3943_v21 = vpack.c.bf16 %v6132_v59, %v6132_v59  ;;  %v3302_v39 = vsel %vm406_vm1, %v6206_v28, 0.0 }
 0x24a   : > { %v3190_v18 = vadd.f32 %v3189_v26, %v3188_v50  ;;  %v6198_v26 = vsel %vm406_vm1, %v6183_v37, 0.0  ;;  %v3283_v50 = vadd.f32 %v3282_v10, %v3281_v34  ;;  %3482 = vst.msk [vmem:[%s4853_s29 + $0x14] sm:$0xf] %vm3476_vm8, %v3935_v17  ;;  %v3944_v38 = vpack.c.bf16 %v6134_v27, %v6134_v27  ;;  %v6285_v27 = vld [vmem:[#allocation2 + $0xb0] sm:$0xff] }
 0x24b   : > { %3486 = vst.msk [vmem:[%s4853_s29 + $0x24] sm:$0xf] %vm3476_vm8, %v3939_v53  ;;  %3487 = vst.msk [vmem:[%s4853_s29 + $0x28] sm:$0xf] %vm3476_vm8, %v3940_v31  ;;  %v3945_v3 = vpack.c.bf16 %v6141_v25, %v6141_v25  ;;  %v3949_v7 = vpack.c.bf16 %v6160_v1, %v6160_v1  ;;  %v3950_v10 = vpack.c.bf16 %v6181_v16, %v6181_v16 }
 0x24c   : > { %v3192_v33 = vadd.f32 %v3191_v52, %v3190_v18  ;;  %v6202_v52 = vmul.f32 %v6132_v59, %v6132_v59  ;;  %v3948_v59 = vpack.c.bf16 %v6151_v15, %v6151_v15  ;;  %3490 = vst.msk [vmem:[%s4853_s29 + $0x34] sm:$0xf] %vm3476_vm8, %v3943_v21  ;;  %3491 = vst.msk [vmem:[%s4853_s29 + $0x38] sm:$0xf] %vm3476_vm8, %v3944_v38 }
 0x24d   : > { %3492 = vst.msk [vmem:[%s4853_s29 + $0x3c] sm:$0xf] %vm3476_vm8, %v3945_v3  ;;  %v3952_v34 = vpack.c.bf16 %v6285_v27, %v6285_v27  ;;  %3496 = vst.msk [vmem:[%s4853_s29 + $0x4c] sm:$0xf] %vm3476_vm8, %v3949_v7 }
 0x24e   : > { %v3194_v20 = vadd.f32 %v3193_v8, %v3192_v33  ;;  %v3285_v8 = vadd.f32 %v3284_v5, %v3283_v50  ;;  %v3292_v33 = vsel %vm406_vm1, %v3252_v56, 0.0  ;;  %v6304_v56 = vld [vmem:[#allocation2 + $0xd8] sm:$0xff]  ;;  %3495 = vst.msk [vmem:[%s4853_s29 + $0x48] sm:$0xf] %vm3476_vm8, %v3948_v59  ;;  %v6324_v5 = vld [vmem:[#allocation2 + $0xe8] sm:$0xff] }
 0x24f   : > { %3497 = vst.msk [vmem:[%s4853_s29 + $0x50] sm:$0xf] %vm3476_vm8, %v3950_v10  ;;  %3499 = vst.msk [vmem:[%s4853_s29 + $0x58] sm:$0xf] %vm3476_vm8, %v3952_v34  ;;  %v3227_v21 = vsel %vm406_vm1, %v6304_v56, 0.0  ;;  %v3231_v7 = vsel %vm406_vm1, %v6324_v5, 0.0 }
 0x250   : > { %v3196_v42 = vadd.f32 %v3195_v54, %v3194_v20  ;;  %v6213_v54 = vsel %vm406_vm1, %v3253_v11, 0.0  ;;  %v3287_v45 = vadd.f32 %v3286_v44, %v3285_v8  ;;  %v3931_v20 = vpack.c.bf16 %v6074_v6, %v6074_v6  ;;  %v6338_v8 = vld [vmem:[#allocation2 + $0xf8] sm:$0xff] }
 0x252   : > { %v3198_v30 = vadd.f32 %v3197_v14, %v3196_v42  ;;  %v6216_v14 = vsel %vm406_vm1, %v3254_v41, 0.0  ;;  %v3289_v6 = vadd.f32 %v3288_v61, %v3287_v45  ;;  %3478 = vst.msk [vmem:[%s4853_s29 + $0x4] sm:$0xf] %vm3476_vm8, %v3931_v20  ;;  %v6287_v42 = vld [vmem:[#allocation2 + $0xb8] sm:$0xff]  ;;  %v3961_v45 = vpack.c.bf16 %v6338_v8, %v6338_v8 }
 0x253   : > { %v3953_v11 = vpack.c.bf16 %v6287_v42, %v6287_v42  ;;  %v3217_v20 = vsel %vm406_vm1, %v6285_v27, 0.0 }
 0x254   : > { %v3200_v0 = vadd.f32 %v3199_v43, %v3198_v30  ;;  %v3932_v43 = vpack.c.bf16 %v6076_v12, %v6076_v12  ;;  %v3937_v12 = vpack.c.bf16 %v6100_v35, %v6100_v35  ;;  %v3942_v35 = vpack.c.bf16 %v6122_v55, %v6122_v55  ;;  %v6300_v30 = vld [vmem:[#allocation2 + $0xc8] sm:$0xff]  ;;  %3508 = vst.msk [vmem:[%s4853_s29 + $0x7c] sm:$0xf] %vm3476_vm8, %v3961_v45 }
 0x255   : > { %v3947_v55 = vpack.c.bf16 %v6149_v57, %v6149_v57  ;;  %v3955_v61 = vpack.c.bf16 %v6300_v30, %v6300_v30  ;;  %3500 = vst.msk [vmem:[%s4853_s29 + $0x5c] sm:$0xf] %vm3476_vm8, %v3953_v11  ;;  %v3266_v11 = vmul.f32 %v6287_v42, %v6287_v42 }
 0x256   : > { %v3202_v18 = vadd.f32 %v3201_v32, %v3200_v0  ;;  %v3933_v32 = vpack.c.bf16 %v6084_v62, %v6084_v62  ;;  %3479 = vst.msk [vmem:[%s4853_s29 + $0x8] sm:$0xf] %vm3476_vm8, %v3932_v43  ;;  %v3938_v62 = vpack.c.bf16 %v6104_v46, %v6104_v46  ;;  %3484 = vst.msk [vmem:[%s4853_s29 + $0x1c] sm:$0xf] %vm3476_vm8, %v3937_v12  ;;  %v6326_v0 = vld [vmem:[#allocation2 + $0xf0] sm:$0xff] }
 0x257   : > { %3489 = vst.msk [vmem:[%s4853_s29 + $0x30] sm:$0xf] %vm3476_vm8, %v3942_v35  ;;  %3494 = vst.msk [vmem:[%s4853_s29 + $0x44] sm:$0xf] %vm3476_vm8, %v3947_v55  ;;  %v3258_v43 = vmul.f32 %v6141_v25, %v6141_v25  ;;  %v3219_v25 = vsel %vm406_vm1, %v6287_v42, 0.0  ;;  %v3229_v55 = vsel %vm406_vm1, %v6322_v24, 0.0 }
 0x258   : > { %v3204_v9 = vadd.f32 %v3203_v22, %v3202_v18  ;;  %v3936_v22 = vpack.c.bf16 %v6096_v63, %v6096_v63  ;;  %3480 = vst.msk [vmem:[%s4853_s29 + $0xc] sm:$0xf] %vm3476_vm8, %v3933_v32  ;;  %v3941_v63 = vpack.c.bf16 %v6120_v49, %v6120_v49  ;;  %3485 = vst.msk [vmem:[%s4853_s29 + $0x20] sm:$0xf] %vm3476_vm8, %v3938_v62  ;;  %v3300_v32 = vsel %vm406_vm1, %v6202_v52, 0.0 }
 0x259   : > { %v3946_v49 = vpack.c.bf16 %v6143_v51, %v6143_v51  ;;  %v3956_v18 = vpack.c.bf16 %v6302_v4, %v6302_v4  ;;  %3502 = vst.msk [vmem:[%s4853_s29 + $0x64] sm:$0xf] %vm3476_vm8, %v3955_v61  ;;  %v3259_v52 = vmul.f32 %v6143_v51, %v6143_v51  ;;  %v3223_v62 = vsel %vm406_vm1, %v6300_v30, 0.0 }
 0x25a   : > { %v3206_v36 = vadd.f32 %v3205_v60, %v3204_v9  ;;  %3483 = vst.msk [vmem:[%s4853_s29 + $0x18] sm:$0xf] %vm3476_vm8, %v3936_v22  ;;  %v3291_v60 = vadd.f32 %v3290_v19, %v3289_v6  ;;  %3488 = vst.msk [vmem:[%s4853_s29 + $0x2c] sm:$0xf] %vm3476_vm8, %v3941_v63  ;;  %v3958_v19 = vpack.c.bf16 %v6322_v24, %v6322_v24  ;;  %v3225_v63 = vsel %vm406_vm1, %v6302_v4, 0.0 }
 0x25b   : > { %3493 = vst.msk [vmem:[%s4853_s29 + $0x40] sm:$0xf] %vm3476_vm8, %v3946_v49  ;;  %3503 = vst.msk [vmem:[%s4853_s29 + $0x68] sm:$0xf] %vm3476_vm8, %v3956_v18  ;;  %v3261_v51 = vmul.f32 %v6151_v15, %v6151_v15  ;;  %v3306_v28 = vsel %vm406_vm1, %v3259_v52, 0.0  ;;  %v3263_v15 = vmul.f32 %v6181_v16, %v6181_v16  ;;  %v3265_v16 = vmul.f32 %v6285_v27, %v6285_v27 }
 0x25c   : > { %v3208_v46 = vadd.f32 %v3207_v40, %v3206_v36  ;;  %v6289_v40 = vld [vmem:[#allocation2 + $0xc0] sm:$0xff]  ;;  %v3293_v13 = vadd.f32 %v3292_v33, %v3291_v60  ;;  %v3959_v33 = vpack.c.bf16 %v6324_v5, %v6324_v5  ;;  %3505 = vst.msk [vmem:[%s4853_s29 + $0x70] sm:$0xf] %vm3476_vm8, %v3958_v19  ;;  %v3320_v19 = vsel %vm406_vm1, %v3266_v11, 0.0 }
 0x25d   : > { %v3954_v41 = vpack.c.bf16 %v6289_v40, %v6289_v40  ;;  %v3221_v36 = vsel %vm406_vm1, %v6289_v40, 0.0  ;;  %v3310_v38 = vsel %vm406_vm1, %v3261_v51, 0.0  ;;  %v3314_v10 = vsel %vm406_vm1, %v3263_v15, 0.0 }
 0x25e   : > { %v3210_v58 = vadd.f32 %v6166_v29, %v3208_v46  ;;  %v3951_v29 = vpack.c.bf16 %v6183_v37, %v6183_v37  ;;  %v3295_v44 = vadd.f32 %v6213_v54, %v3293_v13  ;;  %v3960_v54 = vpack.c.bf16 %v6326_v0, %v6326_v0  ;;  %3506 = vst.msk [vmem:[%s4853_s29 + $0x74] sm:$0xf] %vm3476_vm8, %v3959_v33 }
 0x25f   : > { %3501 = vst.msk [vmem:[%s4853_s29 + $0x60] sm:$0xf] %vm3476_vm8, %v3954_v41  ;;  %v3267_v61 = vmul.f32 %v6289_v40, %v6289_v40  ;;  %v3318_v18 = vsel %vm406_vm1, %v3265_v16, 0.0  ;;  %v3270_v40 = vmul.f32 %v6304_v56, %v6304_v56 }
 0x260   : > { %v3212_v50 = vadd.f32 %v6170_v2, %v3210_v58  ;;  %3498 = vst.msk [vmem:[%s4853_s29 + $0x54] sm:$0xf] %vm3476_vm8, %v3951_v29  ;;  %v3957_v2 = vpack.c.bf16 %v6304_v56, %v6304_v56  ;;  %v3297_v9 = vadd.f32 %v6216_v14, %v3295_v44  ;;  %3507 = vst.msk [vmem:[%s4853_s29 + $0x78] sm:$0xf] %vm3476_vm8, %v3960_v54  ;;  %v3233_v44 = vsel %vm406_vm1, %v6326_v0, 0.0 }
 0x261   : > { %v3235_v54 = vsel %vm406_vm1, %v6338_v8, 0.0  ;;  %v3273_v56 = vmul.f32 %v6326_v0, %v6326_v0 }
 0x262   : > { %v3214_v48 = vadd.f32 %v6194_v23, %v3212_v50  ;;  %3504 = vst.msk [vmem:[%s4853_s29 + $0x6c] sm:$0xf] %vm3476_vm8, %v3957_v2  ;;  %v3299_v14 = vadd.f32 %v6219_v47, %v3297_v9  ;;  %v3304_v47 = vsel %vm406_vm1, %v3258_v43, 0.0  ;;  %v3268_v2 = vmul.f32 %v6300_v30, %v6300_v30 }
 0x263   : > { %v3322_v9 = vsel %vm406_vm1, %v3267_v61, 0.0 }
 0x264   : > { %v3216_v23 = vadd.f32 %v6198_v26, %v3214_v48  ;;  %v3301_v22 = vadd.f32 %v3300_v32, %v3299_v14  ;;  %v3260_v26 = vmul.f32 %v6149_v57, %v6149_v57  ;;  %v3262_v57 = vmul.f32 %v6160_v1, %v6160_v1 }
 0x265   : > { %v3264_v1 = vmul.f32 %v6183_v37, %v6183_v37  ;;  %v3269_v48 = vmul.f32 %v6302_v4, %v6302_v4  ;;  %v3271_v32 = vmul.f32 %v6322_v24, %v6322_v24  ;;  %v3328_v4 = vsel %vm406_vm1, %v3270_v40, 0.0 }
 0x266   : > { %v3218_v17 = vadd.f32 %v3217_v20, %v3216_v23  ;;  %v3303_v12 = vadd.f32 %v3302_v39, %v3301_v22  ;;  %v3308_v35 = vsel %vm406_vm1, %v3260_v26, 0.0  ;;  %v3312_v59 = vsel %vm406_vm1, %v3262_v57, 0.0 }
 0x267   : > { %v3316_v41 = vsel %vm406_vm1, %v3264_v1, 0.0  ;;  %v3324_v20 = vsel %vm406_vm1, %v3268_v2, 0.0  ;;  %v3326_v23 = vsel %vm406_vm1, %v3269_v48, 0.0 }
 0x268   : > { %v3220_v6 = vadd.f32 %v3219_v25, %v3218_v17  ;;  %v3305_v31 = vadd.f32 %v3304_v47, %v3303_v12  ;;  %v3272_v25 = vmul.f32 %v6324_v5, %v6324_v5  ;;  %v3330_v17 = vsel %vm406_vm1, %v3271_v32, 0.0 }
 0x26a   : > { %v3222_v53 = vadd.f32 %v3221_v36, %v3220_v6  ;;  %v3307_v60 = vadd.f32 %v3306_v28, %v3305_v31  ;;  %v3274_v36 = vmul.f32 %v6338_v8, %v6338_v8  ;;  %v3332_v24 = vsel %vm406_vm1, %v3272_v25, 0.0 }
 0x26b   : > { %v3334_v6 = vsel %vm406_vm1, %v3273_v56, 0.0 }
 0x26c   : > { %v3224_v46 = vadd.f32 %v3223_v62, %v3222_v53  ;;  %v3309_v49 = vadd.f32 %v3308_v35, %v3307_v60  ;;  %v3336_v12 = vsel %vm406_vm1, %v3274_v36, 0.0 }
 0x26e   : > { %v3226_v3 = vadd.f32 %v3225_v63, %v3224_v46  ;;  %v3311_v13 = vadd.f32 %v3310_v38, %v3309_v49 }
 0x270   : > { %v3228_v58 = vadd.f32 %v3227_v21, %v3226_v3  ;;  %v3313_v34 = vadd.f32 %v3312_v59, %v3311_v13 }
 0x272   : > { %v3230_v29 = vadd.f32 %v3229_v55, %v3228_v58  ;;  %v3315_v50 = vadd.f32 %v3314_v10, %v3313_v34 }
 0x274   : > { %v3232_v37 = vadd.f32 %v3231_v7, %v3230_v29  ;;  %v3317_v27 = vadd.f32 %v3316_v41, %v3315_v50 }
 0x276   : > { %v3234_v33 = vadd.f32 %v3233_v44, %v3232_v37  ;;  %v3319_v42 = vadd.f32 %v3318_v18, %v3317_v27 }
 0x278   : > { %v3321_v45 = vadd.f32 %v3320_v19, %v3319_v42  ;;  %v3236_v43 = vadd.f32 %v3235_v54, %v3234_v33 }
 0x27a   : > { %v3323_v30 = vadd.f32 %v3322_v9, %v3321_v45  ;;  %v3237_v52 = vrot.slane %v3236_v43, 4 }
 0x27c   : > { %v3325_v14 = vadd.f32 %v3324_v20, %v3323_v30  ;;  %v3238_v26 = vadd.f32 %v3237_v52, %v3236_v43 }
 0x27e   : > { %v3327_v39 = vadd.f32 %v3326_v23, %v3325_v14  ;;  %v3239_v62 = vrot.slane %v3238_v26, 2 }
 0x280   : > { %v3329_v22 = vadd.f32 %v3328_v4, %v3327_v39  ;;  %v3240_v0 = vadd.f32 %v3239_v62, %v3238_v26 }
 0x282   : > { %v3331_v47 = vadd.f32 %v3330_v17, %v3329_v22  ;;  %v3241_v63 = vrot.slane %v3240_v0, 1 }
 0x284   : > { %v3333_v5 = vadd.f32 %v3332_v24, %v3331_v47  ;;  %v3242_v8 = vadd.f32 %v3241_v63, %v3240_v0 }
 0x286   : > { %v3335_v51 = vadd.f32 %v3334_v6, %v3333_v5 }
 0x288   : > { %v3337_v28 = vadd.f32 %v3336_v12, %v3335_v51 }
 0x28a   : > { %v3338_v53 = vrot.slane %v3337_v28, 4 }
 0x28c   : > { %v3339_v31 = vadd.f32 %v3338_v53, %v3337_v28 }
 0x28e   : > { %v3340_v57 = vrot.slane %v3339_v31, 2 }
 0x290   : > { %v3341_v35 = vadd.f32 %v3340_v57, %v3339_v31 }
 0x292   : > { %v3342_v46 = vrot.slane %v3341_v35, 1 }
 0x294   : > { %v3343_v60 = vadd.f32 %v3342_v46, %v3341_v35 }
 0x296   : > { %v3345_v21 = vsel %vm3344_vm9, %v3242_v8, %v3343_v60 }
 0x297   : > { %3347 = vst.msk [vmem:[%s4858_s5] sm:$0x3] %vm3346_vm10, %v3345_v21 }
 0x298 PF: > { %s14_s16 = sadd.s32 1, %s4788_s16   ;;  %s6598_s12 = smov %s4780_s14 }
 0x299   : > { %p11_p11 = scmp.ge.s32.totalorder %s14_s16, 14   ;;  %s6599_s13 = smov %s4784_s15 }
 0x29a   : > { %s6600_s14 = smov %s6603_s17  ;;  %s6601_s15 = smov %s6607_s18 }
 0x29b   :  { %13 = sbr.rel (!%p11_p11) target bundleno = 3 (0x3), region = 85 }

// kernel: _lambda_.14
= control target key start
LH: loop header
LB: loop body
LE: loop exit
PB: predicated region body
PF: predicated region fallthrough
CT: control target
= control target key end

     0   :  { %s4618_s9 = smov 0   ;;  %s4620_s10 = smov 0   ;;  %s5978_s0 = inlined_call_operand.vmem [shape: bf16[1,6,18,18,8], index: 0, kind: input, shape index: {}]   ;;  %s5979_s1 = inlined_call_operand.vmem [shape: bf16[3,3,3,8,1], index: 1, kind: input, shape index: {}]   ;;  %s5980_s2 = inlined_call_operand.vmem [shape: f32[1,4,16,16], index: 2, kind: output, shape index: {}]  }
   0x1   :  { %s4622_s11 = smov 0   ;;  %s4624_s12 = smov 0  }
   0x2   :  { %s4626_s13 = smov 0  }
   0x3 LB: > { %s24_s14 = sadd.s32 1, %s4592_s11  ;;  %s27_s15 = sadd.s32 1, %s4596_s12  ;;  %s4600_s13 = sphi %s4626_s13, %s12_s13   ;;  %s4596_s12 = sphi %s4624_s12, %s6111_s12   ;;  %s4592_s11 = sphi %s4622_s11, %s6110_s11   ;;  %s4588_s10 = sphi %s4620_s10, %s6109_s10   ;;  %s4584_s9 = sphi %s4618_s9, %s6108_s9  }
   0x4   : > { %p25_p0 = scmp.ge.s32.totalorder %s24_s14, 3  ;;  %p3544_p1 = scmp.ge.s32.totalorder %s4600_s13, 1 }
   0x5   : > { %p153_p2 = scmp.lt.s32.totalorder %s4600_s13, 13 }
   0x6   : > { %s6113_s14 = smov (%p25_p0, %s24_s14), 0  ;;  %s6115_s15 = smov (!%p25_p0, %s27_s15), %s4596_s12 }
   0x7   : > { %p154_p3 = pnand %p3544_p1, %p153_p2  ;;  %p29_p4 = scmp.ge.s32.totalorder %s6115_s15, 4 }
   0x9   : > { %s6117_s15 = smov (%p29_p4, %s6115_s15), 0  ;;  %157 = sbr.rel (%p154_p3) target bundleno = 762 (0x2fa), region = 28 }
  0x10   : > { %p200_p5 = scmp.lt.s32.totalorder %s4584_s9, 2  ;;  %p207_p6 = scmp.lt.s32.totalorder %s4588_s10, 3  ;;  %vm407_vm0 = vcmask 1043456   ;;  %vm358_vm1 = vcmask 64512   ;;  %vm572_vm2 = vsmask.f32 3328 }
  0x11   : > { %s189_s16 = sadd.s32 %s4584_s9, %s4588_s10  ;;  %vm573_vm3 = vsmask.f32 7440  ;;  %vm1267_vm5 = vcmask 1042432   ;;  %vm1268_vm6 = vcmask 1046532   ;;  %p3765_p8 = scmp.ne.s32.totalorder %s4584_s9, 0 }
  0x12   : > { %s201_s17 = scalar_select %p200_p5, %s4584_s9, 2  ;;  %vm4770_vm4 = vmor %vm572_vm2, %vm573_vm3 }
  0x13   : > { %s6119_s10 = smov (!%p207_p6, %s4588_s10), 3  ;;  %p192_p7 = scmp.lt.s32.totalorder %s189_s16, 5  ;;  %vm4979_vm7 = vmor %vm1267_vm5, %vm1268_vm6  ;;  %vm2958_vm8 = vcmask (!%p3765_p8), 7168  }
  0x14   : > { %s4499_s18 = smul.u32 36, %s201_s17  ;;  %s3770_s19 = sshll.u32 %s6119_s10, 4 }
  0x15   : > { %s4661_s25 = scalar_lea.vmem %s5980_s2, %s3770_s19  ;;  %s6121_s16 = smov (!%p192_p7, %s189_s16), 5 }
  0x16   : > { %s4656_s22 = scalar_lea.vmem %s5979_s1, %s4499_s18  ;;  %s4498_s26 = smul.u32 216, %s6121_s16 }
  0x17   : > { %v269_v0 = vld [vmem:[%s4656_s22] sm:$0xf]  ;;  %v273_v1 = vld [vmem:[%s4656_s22 + $0x10] sm:$0xf]  ;;  %v270_v4 = vld [vmem:[%s4656_s22 + $0x4] sm:$0xf] }
  0x18   : > { %4488 = vmatprep.subr.msk.bf16.mxu1 %vm407_vm0, %v269_v0  ;;  %v409_v2 = vsel %vm407_vm0, %v269_v0, 0  ;;  %4492 = vmatprep.subr.msk.bf16.mxu0 %vm407_vm0, %v273_v1  ;;  %v4669_v3 = vsel %vm407_vm0, %v273_v1, 0  ;;  %v274_v5 = vld [vmem:[%s4656_s22 + $0x14] sm:$0xf]  ;;  %s4679_s29 = scalar_lea.vmem %s5978_s0, %s4498_s26  ;;  %v1056_v13 = vsel %vm407_vm0, %v270_v4, 0 }
  0x19   : > { %6027 = vst [vmem:[#allocation3_spill] sm:$0xff] %v4669_v3  ;;  %3925 = vmatpush3.bf16.msra.mxu1 %v409_v2  ;;  %4061 = vmatpush3.bf16.msra.mxu0 %v4669_v3  ;;  %v4682_v6 = vld [vmem:[%s4679_s29] sm:$0xf]  ;;  %v4685_v7 = vld [vmem:[%s4679_s29 + $0x4] sm:$0xf]  ;;  %v4730_v22 = vsel %vm407_vm0, %v274_v5, 0 }
  0x1a   : > { %4489 = vmatprep.subr.msk.bf16.mxu1 %vm407_vm0, %v270_v4  ;;  %4494 = vmatprep.subr.msk.bf16.mxu0 %vm407_vm0, %v274_v5  ;;  %v4688_v8 = vld [vmem:[%s4679_s29 + $0xc] sm:$0xf]  ;;  %v3549_v9 = vcombine.low %v4682_v6, %v4685_v7  ;;  %v4693_v10 = vld [vmem:[%s4679_s29 + $0x10] sm:$0xf]  ;;  %v4700_v12 = vld [vmem:[%s4679_s29 + $0x18] sm:$0xf] }
  0x1b   : > { %v4697_v11 = vcombine.low %v4688_v8, %v4693_v10  ;;  %v4705_v14 = vld [vmem:[%s4679_s29 + $0x1c] sm:$0xf]  ;;  %v4708_v15 = vld [vmem:[%s4656_s22 + $0x8] sm:$0xf]  ;;  %v624_v17 = vshrl.u32 %v4700_v12, 16  ;;  %v627_v20 = vshll.u32 %v4700_v12, 16 }
  0x1c   : > { %3926 = vmatprep.mubr.msk.bf16.mxu1 %vm358_vm1, %v3549_v9  ;;  %v4714_v16 = vcombine.low %v4700_v12, %v4705_v14  ;;  %v4718_v18 = vld [vmem:[%s4679_s29 + $0x24] sm:$0xf]  ;;  %v4721_v19 = vld [vmem:[%s4679_s29 + $0x28] sm:$0xf]  ;;  %v4727_v21 = vld [vmem:[%s4679_s29 + $0x14] sm:$0x1] }
  0x1d   : > { %6028 = vst [vmem:[#allocation4_spill] sm:$0xff] %v4697_v11  ;;  %3927 = vmatmul.mubr.msk.bf16.vlgmr.msra.gmra.mrb[0].mxu1 %vm358_vm1, %v4697_v11  ;;  %v637_v25 = vshrl.u32 %v4705_v14, 16  ;;  %v600_v26 = vshrl.u32 %v4688_v8, 16  ;;  %v4740_v27 = vcombine.low %v4718_v18, %v4721_v19  ;;  %v603_v28 = vshll.u32 %v4688_v8, 16  ;;  %v4746_v31 = vld [vmem:[%s4679_s29 + $0x20] sm:$0x1] }
  0x1e   : > { %6029 = vst [vmem:[#allocation5_spill] sm:$0xff] %v4714_v16  ;;  %3959 = vmatpush3.bf16.msra.mxu1 %v1056_v13  ;;  %3930 = vmatprep.mubr.msk.bf16.mxu1 %vm358_vm1, %v4714_v16  ;;  %v609_v29 = vshll.u32 %v4693_v10, 16  ;;  %v613_v30 = vshrl.u32 %v4693_v10, 16  ;;  %v648_v32 = vshrl.u32 %v4718_v18, 16  ;;  %v619_v34 = vshll.u32 %v4727_v21, 16 }
  0x1f   : > { %4490 = vmatprep.subr.msk.bf16.mxu1 %vm407_vm0, %v4708_v15  ;;  %6030 = vst [vmem:[#allocation6_spill] sm:$0xff] %v4740_v27  ;;  %v602_v33 = vrot.slane %v600_v26, 4  ;;  %v626_v35 = vrot.slane %v624_v17, 4  ;;  %v605_v36 = vrot.slane %v603_v28, 5  ;;  %v629_v39 = vrot.slane %v627_v20, 5 }
  0x20   : > { %v611_v37 = vrot.slane %v609_v29, 5  ;;  %v615_v38 = vrot.slane %v613_v30, 4  ;;  %v4751_v40 = vld [vmem:[%s4679_s29 + $0x30] sm:$0xf]  ;;  %v651_v41 = vshll.u32 %v4718_v18, 16  ;;  %v633_v42 = vshll.u32 %v4705_v14, 16 }
  0x21   : > { %v639_v43 = vrot.slane %v637_v25, 4  ;;  %v643_v44 = vshll.u32 %v4746_v31, 16  ;;  %v4757_v45 = vld [vmem:[%s4679_s29 + $0x34] sm:$0xf]  ;;  %v606_v46 = vor.u32 %v605_v36, %v602_v33  ;;  %v621_v48 = vrot.slane %v619_v34, 5 }
  0x22   : > { %v616_v47 = vor.u32 %v615_v38, %v611_v37  ;;  %v630_v49 = vor.u32 %v629_v39, %v626_v35  ;;  %v4762_v50 = vld [vmem:[%s4679_s29 + $0x3c] sm:$0xf]  ;;  %v4765_v51 = vld [vmem:[%s4679_s29 + $0x40] sm:$0xf]  ;;  %v661_v52 = vshrl.u32 %v4721_v19, 16  ;;  %v635_v54 = vrot.slane %v633_v42, 5 }
  0x23   : > { %v645_v55 = vrot.slane %v643_v44, 5  ;;  %v4776_v56 = vcombine.low %v4751_v40, %v4757_v45  ;;  %v607_v57 = vrot.slane %v606_v46, 4  ;;  %v672_v60 = vshrl.u32 %v4751_v40, 16  ;;  %v4788_v1 = vld [vmem:[%s4679_s29 + $0x2c] sm:$0x1] }
  0x24   : > { %v617_v58 = vrot.slane %v616_v47, 4  ;;  %v631_v59 = vrot.slane %v630_v49, 4  ;;  %v640_v61 = vor.u32 %v639_v43, %v635_v54  ;;  %v675_v62 = vshll.u32 %v4751_v40, 16  ;;  %v4803_v33 = vld [vmem:[%s4679_s29 + $0x38] sm:$0x1] }
  0x25   : > { %3931 = vmatmul.mubr.msk.bf16.gmra.mrb[4].mxu1 %vm358_vm1, %v4740_v27  ;;  %6033 = vst [vmem:[#allocation7_spill] sm:$0xff] %v4776_v56  ;;  %v685_v63 = vshrl.u32 %v4757_v45, 16  ;;  %v4785_v0 = vcombine.low %v4762_v50, %v4765_v51  ;;  %v612_v2 = vsel %vm4770_vm4, %v607_v57, %v611_v37  ;;  %v696_v9 = vshrl.u32 %v4762_v50, 16  ;;  %v4811_v37 = vld [vmem:[%s4679_s29 + $0x48] sm:$0xf] }
  0x26   : > { %3934 = vmatprep.mubr.msk.bf16.mxu1 %vm358_vm1, %v4776_v56  ;;  %v622_v4 = vsel %vm4770_vm4, %v617_v58, %v621_v48  ;;  %v636_v5 = vsel %vm4770_vm4, %v631_v59, %v635_v54  ;;  %v641_v17 = vrot.slane %v640_v61, 4  ;;  %v699_v20 = vshll.u32 %v4762_v50, 16  ;;  %v4814_v38 = vld [vmem:[%s4656_s22 + $0x18] sm:$0xf]  ;;  %v4822_v44 = vld [vmem:[%s4679_s29 + $0x4c] sm:$0xf] }
  0x27   : > { %6034 = vst [vmem:[#allocation8_spill] sm:$0xff] %v4785_v0  ;;  %v4797_v13 = vcombine.low %v612_v2, %v622_v4  ;;  %v650_v25 = vrot.slane %v648_v32, 4  ;;  %v653_v26 = vrot.slane %v651_v41, 5  ;;  %v657_v28 = vshll.u32 %v4721_v19, 16  ;;  %v4825_v46 = vld [vmem:[%s4679_s29 + $0x54] sm:$0xf] }
  0x28   : > { %v663_v29 = vrot.slane %v661_v52, 4  ;;  %v667_v30 = vshll.u32 %v4788_v1, 16  ;;  %v646_v34 = vsel %vm4770_vm4, %v641_v17, %v645_v55  ;;  %v674_v35 = vrot.slane %v672_v60, 4  ;;  %v4829_v54 = vld [vmem:[%s4679_s29 + $0x58] sm:$0xf] }
  0x29   : > { %4062 = vmatprep.mubr.msk.bf16.mxu0 %vm358_vm1, %v4797_v13  ;;  %v677_v36 = vrot.slane %v675_v62, 5  ;;  %v681_v32 = vshll.u32 %v4757_v45, 16  ;;  %v4816_v39 = vcombine.low %v636_v5, %v646_v34  ;;  %v709_v41 = vshrl.u32 %v4765_v51, 16 }
  0x2a   : > { %v654_v42 = vor.u32 %v653_v26, %v650_v25  ;;  %v659_v43 = vrot.slane %v657_v28, 5  ;;  %v687_v49 = vrot.slane %v685_v63, 4  ;;  %v691_v52 = vshll.u32 %v4803_v33, 16 }
  0x2b   : > { %6035 = vst [vmem:[#allocation9_spill] sm:$0xff] %v4816_v39  ;;  %v678_v47 = vor.u32 %v677_v36, %v674_v35  ;;  %v683_v48 = vrot.slane %v681_v32, 5  ;;  %4063 = vmatmul.mubr.msk.bf16.vlgmr.msra.gmra.mrb[0].mxu0 %vm358_vm1, %v4816_v39  ;;  %v669_v58 = vrot.slane %v667_v30, 5  ;;  %v4835_v59 = vcombine.low %v4811_v37, %v4822_v44 }
  0x2c   : > { %v655_v55 = vrot.slane %v654_v42, 4  ;;  %v664_v57 = vor.u32 %v663_v29, %v659_v43  ;;  %4095 = vmatpush3.bf16.msra.mxu0 %v4730_v22  ;;  %v693_v62 = vrot.slane %v691_v52, 5  ;;  %v720_v63 = vshrl.u32 %v4811_v37, 16  ;;  %v4855_v29 = vld [vmem:[%s4679_s29 + $0x44] sm:$0x1] }
  0x2d   : > { %3935 = vmatmul.mubr.msk.bf16.gmra.mrb[8].mxu1 %vm358_vm1, %v4785_v0  ;;  %6036 = vst [vmem:[#allocation10_spill] sm:$0xff] %v4835_v59  ;;  %v679_v60 = vrot.slane %v678_v47, 4  ;;  %v688_v61 = vor.u32 %v687_v49, %v683_v48  ;;  %v723_v5 = vshll.u32 %v4811_v37, 16  ;;  %v4846_v17 = vcombine.low %v4825_v46, %v4829_v54  ;;  %4495 = vmatprep.subr.msk.bf16.mxu0 %vm407_vm0, %v4814_v38 }
  0x2e   : > { %v660_v2 = vsel %vm4770_vm4, %v655_v55, %v659_v43  ;;  %v665_v4 = vrot.slane %v664_v57, 4  ;;  %3938 = vmatprep.mubr.msk.bf16.mxu1 %vm358_vm1, %v4835_v59  ;;  %v733_v26 = vshrl.u32 %v4822_v44, 16  ;;  %v744_v28 = vshrl.u32 %v4825_v46, 16  ;;  %v4874_v55 = vld [vmem:[%s4679_s29 + $0x60] sm:$0xf] }
  0x2f   : > { %6037 = vst [vmem:[#allocation11_spill] sm:$0xff] %v4846_v17  ;;  %v684_v22 = vsel %vm4770_vm4, %v679_v60, %v683_v48  ;;  %v689_v25 = vrot.slane %v688_v61, 4  ;;  %v747_v34 = vshll.u32 %v4825_v46, 16  ;;  %v698_v35 = vrot.slane %v696_v9, 4  ;;  %v4866_v48 = vld [vmem:[%s4679_s29 + $0x50] sm:$0x1] }
  0x30   : > { %v670_v30 = vsel %vm4770_vm4, %v665_v4, %v669_v58  ;;  %v701_v36 = vrot.slane %v699_v20, 5  ;;  %v705_v43 = vshll.u32 %v4765_v51, 16  ;;  %v711_v47 = vrot.slane %v709_v41, 4  ;;  %v4877_v57 = vld [vmem:[%s4679_s29 + $0x64] sm:$0xf] }
  0x31   : > { %v4860_v32 = vcombine.low %v660_v2, %v670_v30  ;;  %v694_v42 = vsel %vm4770_vm4, %v689_v25, %v693_v62  ;;  %v715_v9 = vshll.u32 %v4855_v29, 16  ;;  %v722_v20 = vrot.slane %v720_v63, 4  ;;  %v4883_v62 = vld [vmem:[%s4679_s29 + $0x6c] sm:$0xf]  ;;  %v4894_v25 = vld [vmem:[%s4679_s29 + $0x70] sm:$0xf] }
  0x32   : > { %v4868_v49 = vcombine.low %v684_v22, %v694_v42  ;;  %v702_v52 = vor.u32 %v701_v36, %v698_v35  ;;  %v707_v41 = vrot.slane %v705_v43, 5  ;;  %v725_v58 = vrot.slane %v723_v5, 5  ;;  %v4947_v59 = vld [vmem:[%s4679_s29 + $0x88] sm:$0xf] }
  0x33   : > { %4066 = vmatprep.mubr.msk.bf16.mxu0 %vm358_vm1, %v4860_v32  ;;  %v729_v60 = vshll.u32 %v4822_v44, 16  ;;  %v735_v61 = vrot.slane %v733_v26, 4  ;;  %v757_v2 = vshrl.u32 %v4829_v54, 16  ;;  %v739_v4 = vshll.u32 %v4866_v48, 16 }
  0x34   : > { %4067 = vmatmul.mubr.msk.bf16.gmra.mrb[4].mxu0 %vm358_vm1, %v4868_v49  ;;  %v703_v63 = vrot.slane %v702_v52, 4  ;;  %v4891_v22 = vcombine.low %v4874_v55, %v4877_v57  ;;  %v712_v5 = vor.u32 %v711_v47, %v707_v41  ;;  %v717_v30 = vrot.slane %v715_v9, 5  ;;  %v4907_v9 = vld [vmem:[%s4679_s29 + $0x5c] sm:$0x1] }
  0x35   : > { %3939 = vmatmul.mubr.msk.bf16.gmra.mrb[12].mxu1 %vm358_vm1, %v4846_v17  ;;  %v726_v26 = vor.u32 %v725_v58, %v722_v20  ;;  %v731_v35 = vrot.slane %v729_v60, 5  ;;  %v741_v42 = vrot.slane %v739_v4, 5  ;;  %v768_v43 = vshrl.u32 %v4874_v55, 16  ;;  %v4923_v17 = vld [vmem:[%s4679_s29 + $0x68] sm:$0x1] }
  0x36   : > { %6038 = vst [vmem:[#allocation12_spill] sm:$0xff] %v4891_v22  ;;  %v708_v36 = vsel %vm4770_vm4, %v703_v63, %v707_v41  ;;  %3942 = vmatprep.mubr.msk.bf16.mxu1 %vm358_vm1, %v4891_v22  ;;  %v771_v52 = vshll.u32 %v4874_v55, 16  ;;  %v713_v24 = vrot.slane %v712_v5, 4  ;;  %v4904_v47 = vcombine.low %v4883_v62, %v4894_v25 }
  0x37   : > { %v727_v23 = vrot.slane %v726_v26, 4  ;;  %v736_v3 = vor.u32 %v735_v61, %v731_v35  ;;  %v585_v20 = vshll.u32 %v4685_v7, 16  ;;  %v589_v41 = vshrl.u32 %v4685_v7, 16 }
  0x38   : > { %6039 = vst [vmem:[#allocation13_spill] sm:$0xff] %v4904_v47  ;;  %v781_v58 = vshrl.u32 %v4877_v57, 16  ;;  %v746_v60 = vrot.slane %v744_v28, 4  ;;  %v718_v63 = vsel %vm4770_vm4, %v713_v24, %v717_v30  ;;  %v749_v5 = vrot.slane %v747_v34, 5  ;;  %v4928_v30 = vld [vmem:[%s4679_s29 + $0x78] sm:$0xf] }
  0x39   : > { %v732_v61 = vsel %vm4770_vm4, %v727_v23, %v731_v35  ;;  %v737_v4 = vrot.slane %v736_v3, 4  ;;  %v4916_v26 = vcombine.low %v708_v36, %v718_v63  ;;  %v753_v11 = vshll.u32 %v4829_v54, 16  ;;  %v4931_v35 = vld [vmem:[%s4679_s29 + $0x7c] sm:$0xf] }
  0x3a   : > { %v759_v22 = vrot.slane %v757_v2, 4  ;;  %v763_v28 = vshll.u32 %v4907_v9, 16  ;;  %v750_v23 = vor.u32 %v749_v5, %v746_v60  ;;  %v770_v3 = vrot.slane %v768_v43, 4 }
  0x3b   : > { %6040 = vst [vmem:[#allocation14_spill] sm:$0xff] %v4916_v26  ;;  %v742_v24 = vsel %vm4770_vm4, %v737_v4, %v741_v42  ;;  %v773_v34 = vrot.slane %v771_v52, 5  ;;  %v6041_v36 = vshrl.u32 %v4682_v6, 16  ;;  %4070 = vmatprep.mubr.msk.bf16.mxu0 %vm358_vm1, %v4916_v26  ;;  %v777_v42 = vshll.u32 %v4877_v57, 16  ;;  %v4943_v4 = vld [vmem:[%s4679_s29 + $0x84] sm:$0xf] }
  0x3c   : > { %v4939_v2 = vcombine.low %v732_v61, %v742_v24  ;;  %v751_v43 = vrot.slane %v750_v23, 4  ;;  %v783_v60 = vrot.slane %v781_v58, 4  ;;  %v787_v5 = vshll.u32 %v4923_v17, 16 }
  0x3d   : > { %3943 = vmatmul.mubr.msk.bf16.gmra.mrb[16].mxu1 %vm358_vm1, %v4904_v47  ;;  %v4935_v63 = vrot.slane %v6041_v36, 4  ;;  %v755_v47 = vrot.slane %v753_v11, 5  ;;  %v774_v52 = vor.u32 %v773_v34, %v770_v3  ;;  %v765_v61 = vrot.slane %v763_v28, 5  ;;  %v4967_v28 = vld [vmem:[%s4679_s29 + $0x90] sm:$0xf] }
  0x3e   : > { %6042 = vst [vmem:[#allocation15_spill] sm:$0xff] %v4939_v2  ;;  %4071 = vmatmul.mubr.msk.bf16.gmra.mrb[8].mxu0 %vm358_vm1, %v4939_v2  ;;  %v779_v24 = vrot.slane %v777_v42, 5  ;;  %v4953_v11 = vcombine.low %v4928_v30, %v4931_v35  ;;  %v6044_v23 = vshll.u32 %v4682_v6, 16  ;;  %v1286_v58 = vrot.slane %v4705_v14, 5  ;;  %v4970_v42 = vld [vmem:[%s4679_s29 + $0x94] sm:$0xf] }
  0x3f   : > { %v760_v36 = vor.u32 %v759_v22, %v755_v47  ;;  %v756_v34 = vsel %vm4770_vm4, %v751_v43, %v755_v47  ;;  %v775_v0 = vrot.slane %v774_v52, 4  ;;  %v789_v16 = vrot.slane %v787_v5, 5 }
  0x40   : > { %6043 = vst [vmem:[#allocation16_spill] sm:$0xff] %v4953_v11  ;;  %v581_v3 = vrot.slane %v6044_v23, 5  ;;  %v784_v27 = vor.u32 %v783_v60, %v779_v24  ;;  %3946 = vmatprep.mubr.msk.bf16.mxu1 %vm358_vm1, %v4953_v11  ;;  %v4964_v22 = vcombine.low %v4943_v4, %v4947_v59  ;;  %v4972_v14 = vrot.slane %v585_v20, 5 }
  0x41   : > { %v761_v56 = vrot.slane %v760_v36, 4  ;;  %v591_v47 = vrot.slane %v589_v41, 4  ;;  %v1282_v43 = vrot.slane %v4727_v21, 5  ;;  %v780_v52 = vsel %vm4770_vm4, %v775_v0, %v779_v24 }
  0x42   : > { %6045 = vst [vmem:[#allocation17_spill] sm:$0xff] %v4964_v22  ;;  %v785_v36 = vrot.slane %v784_v27, 4  ;;  %v3614_v20 = vrot.slane %v4688_v8, 9  ;;  %v1279_v21 = vrot.slane %v4693_v10, 5  ;;  %v3615_v41 = vrot.slane %v4700_v12, 9 }
  0x43   : > { %v766_v5 = vsel %vm4770_vm4, %v761_v56, %v765_v61  ;;  %v1288_v0 = vrot.slane %v1286_v58, 4  ;;  %v4994_v23 = vcombine.low %v4967_v28, %v4970_v42  ;;  %v4997_v56 = vld [vmem:[%s4679_s29 + $0x9c] sm:$0xf]  ;;  %v5000_v27 = vld [vmem:[%s4679_s29 + $0xa0] sm:$0xf]  ;;  %v1289_v61 = vrot.slane %v4746_v31, 5 }
  0x44   : > { %v4990_v24 = vcombine.low %v756_v34, %v766_v5  ;;  %v790_v8 = vsel %vm4770_vm4, %v785_v36, %v789_v16  ;;  %v1280_v10 = vsel %vm4979_vm7, %v3614_v20, %v1279_v21  ;;  %v1281_v12 = vrot.slane %v1279_v21, 4  ;;  %v5022_v36 = vld [vmem:[%s4679_s29 + $0xa8] sm:$0xf]  ;;  %v5025_v20 = vld [vmem:[%s4679_s29 + $0xac] sm:$0xf] }
  0x45   : > { %3947 = vmatmul.mubr.msk.bf16.gmra.mrb[20].mxu1 %vm358_vm1, %v4964_v22  ;;  %6049 = vst [vmem:[#allocation19_spill] sm:$0xff] %v4994_v23  ;;  %v5009_v34 = vcombine.low %v780_v52, %v790_v8  ;;  %v582_v5 = vor.u32 %v581_v3, %v4935_v63  ;;  %v6001_v22 = vrot.slane %v4685_v7, 5  ;;  %v5019_v16 = vcombine.low %v4997_v56, %v5000_v27 }
  0x46   : > { %6048 = vst [vmem:[#allocation18_spill] sm:$0xff] %v4990_v24  ;;  %4074 = vmatprep.mubr.msk.bf16.mxu0 %vm358_vm1, %v4990_v24  ;;  %3950 = vmatprep.mubr.msk.bf16.mxu1 %vm358_vm1, %v4994_v23  ;;  %v1283_v31 = vsel %vm4979_vm7, %v1281_v12, %v1282_v43  ;;  %v592_v52 = vor.u32 %v591_v47, %v4972_v14  ;;  %v3616_v3 = vrot.slane %v4718_v18, 9  ;;  %v1293_v43 = vrot.slane %v4721_v19, 5 }
  0x47   : > { %6050 = vst [vmem:[#allocation20_spill] sm:$0xff] %v5009_v34  ;;  %6051 = vst [vmem:[#allocation21_spill] sm:$0xff] %v5019_v16  ;;  %4075 = vmatmul.mubr.msk.bf16.gmra.mrb[12].mxu0 %vm358_vm1, %v5009_v34  ;;  %v5030_v63 = vcombine.low %v1280_v10, %v1283_v31  ;;  %v1287_v21 = vsel %vm4979_vm7, %v3615_v41, %v1286_v58  ;;  %v1290_v8 = vsel %vm4979_vm7, %v1288_v0, %v1289_v61  ;;  %v5058_v41 = vld [vmem:[%s4679_s29 + $0xb4] sm:$0xf]  ;;  %v5075_v58 = vld [vmem:[%s4679_s29 + $0x8] sm:$0x1] }
  0x48   : > { %v1296_v12 = vrot.slane %v4788_v1, 5  ;;  %v1300_v47 = vrot.slane %v4757_v45, 5  ;;  %v1294_v18 = vsel %vm4979_vm7, %v3616_v3, %v1293_v43  ;;  %v1295_v10 = vrot.slane %v1293_v43, 4 }
  0x49   : > { %4096 = vmatprep.mubr.msk.bf16.mxu0 %vm358_vm1, %v5030_v63  ;;  %v5046_v19 = vcombine.low %v5022_v36, %v5025_v20  ;;  %v5051_v1 = vrot.slane %v6001_v22, 4  ;;  %v2323_v45 = vsel %vm407_vm0, %v4814_v38, 0  ;;  %v5062_v0 = vsel %vm407_vm0, %v4708_v15, 0  ;;  %v5072_v38 = vld [vmem:[%s4679_s29 + $0xb8] sm:$0xf] }
  0x4a   : > { %v583_v61 = vrot.slane %v582_v5, 4  ;;  %v5064_v31 = vcombine.low %v1287_v21, %v1290_v8  ;;  %v1297_v3 = vsel %vm4979_vm7, %v1295_v10, %v1296_v12  ;;  %v3617_v43 = vrot.slane %v4751_v40, 9 }
  0x4b   : > { %6052 = vst [vmem:[#allocation22_spill] sm:$0xff] %v5046_v19  ;;  %v593_v22 = vrot.slane %v592_v52, 4  ;;  %v1302_v15 = vrot.slane %v1300_v47, 4  ;;  %v1303_v5 = vrot.slane %v4803_v33, 5  ;;  %v3618_v8 = vrot.slane %v4762_v50, 9 }
  0x4c   : > { %v1307_v40 = vrot.slane %v4765_v51, 5  ;;  %v1310_v12 = vrot.slane %v4855_v29, 5  ;;  %v5088_v52 = vcombine.low %v5058_v41, %v5072_v38  ;;  %v1301_v51 = vsel %vm4979_vm7, %v3617_v43, %v1300_v47 }
  0x4d   : > { %3951 = vmatmul.mubr.msk.bf16.gmra.mrb[24].mxu1 %vm358_vm1, %v5019_v16  ;;  %v5077_v16 = vcombine.low %v1294_v18, %v1297_v3  ;;  %v595_v18 = vshll.u32 %v5075_v58, 16  ;;  %v5092_v3 = vld [vmem:[%s4656_s22 + $0x1c] sm:$0xf]  ;;  %v1314_v10 = vrot.slane %v4822_v44, 5  ;;  %v588_v50 = vsel %vm4770_vm4, %v583_v61, %v4972_v14 }
  0x4e   : > { %3954 = vmatprep.mubr.msk.bf16.mxu1 %vm358_vm1, %v5046_v19  ;;  %6054 = vst [vmem:[#allocation24_spill] sm:$0xff] %v5088_v52  ;;  %v1309_v29 = vrot.slane %v1307_v40, 4  ;;  %v1304_v19 = vsel %vm4979_vm7, %v1302_v15, %v1303_v5  ;;  %v1308_v47 = vsel %vm4979_vm7, %v3618_v8, %v1307_v40  ;;  %v1321_v43 = vrot.slane %v4829_v54, 5  ;;  %v5187_v15 = vld [vmem:[%s4679_s29 + $0x98] sm:$0x1] }
  0x4f   : > { %6053 = vst [vmem:[#allocation23_spill] sm:$0xff] %v5077_v16  ;;  %4097 = vmatmul.mubr.msk.bf16.vlgmr.msra.gmra.mrb[0].mxu0 %vm358_vm1, %v5064_v31  ;;  %v597_v33 = vrot.slane %v595_v18, 5  ;;  %v5124_v8 = vcombine.low %v1301_v51, %v1304_v19  ;;  %v3619_v54 = vrot.slane %v4811_v37, 9  ;;  %v1316_v18 = vrot.slane %v1314_v10, 4 }
  0x50   : > { %4129 = vmatpush3.bf16.msra.mxu0 %v2323_v45  ;;  %4100 = vmatprep.mubr.msk.bf16.mxu0 %vm358_vm1, %v5077_v16  ;;  %v1311_v45 = vsel %vm4979_vm7, %v1309_v29, %v1310_v12  ;;  %v1317_v29 = vrot.slane %v4866_v48, 5  ;;  %v3620_v14 = vrot.slane %v4825_v46, 9  ;;  %v1323_v44 = vrot.slane %v1321_v43, 4  ;;  %v5157_v46 = vld [vmem:[%s4679_s29 + $0x80] sm:$0x1] }
  0x51   : > { %4496 = vmatprep.subr.msk.bf16.mxu0 %vm407_vm0, %v5092_v3  ;;  %v598_v61 = vsel %vm4770_vm4, %v593_v22, %v597_v33  ;;  %6055 = vst [vmem:[#allocation25_spill] sm:$0xff] %v5124_v8  ;;  %v5127_v12 = vcombine.low %v1308_v47, %v1311_v45  ;;  %v1324_v22 = vrot.slane %v4907_v9, 5  ;;  %v1328_v19 = vrot.slane %v4877_v57, 5 }
  0x52   : > { %v3581_v40 = vcombine.low %v588_v50, %v598_v61  ;;  %v1335_v57 = vrot.slane %v4894_v25, 5  ;;  %v1315_v47 = vsel %vm4979_vm7, %v3619_v54, %v1314_v10  ;;  %v1318_v45 = vsel %vm4979_vm7, %v1316_v18, %v1317_v29  ;;  %v5165_v54 = vld [vmem:[%s4656_s22 + $0xc] sm:$0xf] }
  0x53   : > { %6056 = vst [vmem:[#allocation26_spill] sm:$0xff] %v5127_v12  ;;  %v1322_v61 = vsel %vm4979_vm7, %v3620_v14, %v1321_v43  ;;  %v1342_v9 = vrot.slane %v4931_v35, 5  ;;  %v1325_v51 = vsel %vm4979_vm7, %v1323_v44, %v1324_v22  ;;  %v3621_v48 = vrot.slane %v4874_v55, 9 }
  0x54   : > { %v1330_v50 = vrot.slane %v1328_v19, 4  ;;  %v1331_v10 = vrot.slane %v4923_v17, 5  ;;  %v3622_v14 = vrot.slane %v4883_v62, 9  ;;  %v3623_v18 = vrot.slane %v4928_v30, 9 }
  0x55   : > { %3955 = vmatmul.mubr.msk.bf16.gmra.mrb[28].mxu1 %vm358_vm1, %v5088_v52  ;;  %v1349_v44 = vrot.slane %v4947_v59, 5  ;;  %v5174_v55 = vcombine.low %v1315_v47, %v1318_v45  ;;  %v1337_v17 = vrot.slane %v1335_v57, 4  ;;  %v5183_v43 = vcombine.low %v1322_v61, %v1325_v51  ;;  %v5204_v52 = vld [vmem:[%s4679_s29 + $0xa4] sm:$0x1] }
  0x56   : > { %3960 = vmatprep.mubr.msk.bf16.mxu1 %vm358_vm1, %v3581_v40  ;;  %v5154_v40 = vld [vmem:[%s4679_s29 + $0x74] sm:$0x1]  ;;  %v1344_v33 = vrot.slane %v1342_v9, 4  ;;  %v1345_v37 = vrot.slane %v5157_v46, 5  ;;  %v1356_v47 = vrot.slane %v4970_v42, 5  ;;  %v1332_v29 = vsel %vm4979_vm7, %v1330_v50, %v1331_v10 }
  0x57   : > { %4101 = vmatmul.mubr.msk.bf16.gmra.mrb[4].mxu0 %vm358_vm1, %v5124_v8  ;;  %6057 = vst [vmem:[#allocation27_spill] sm:$0xff] %v5174_v55  ;;  %v1338_v22 = vrot.slane %v5154_v40, 5  ;;  %6058 = vst [vmem:[#allocation28_spill] sm:$0xff] %v5183_v43  ;;  %v1363_v51 = vrot.slane %v5000_v27, 5  ;;  %v1336_v61 = vsel %vm4979_vm7, %v3622_v14, %v1335_v57  ;;  %v1343_v5 = vsel %vm4979_vm7, %v3623_v18, %v1342_v9 }
  0x58   : > { %4104 = vmatprep.mubr.msk.bf16.mxu0 %vm358_vm1, %v5127_v12  ;;  %v3624_v21 = vrot.slane %v4943_v4, 9  ;;  %v1359_v57 = vrot.slane %v5187_v15, 5  ;;  %v1346_v9 = vsel %vm4979_vm7, %v1344_v33, %v1345_v37  ;;  %v1358_v10 = vrot.slane %v1356_v47, 4 }
  0x59   : > { %v3626_v14 = vrot.slane %v4997_v56, 9  ;;  %v1370_v18 = vrot.slane %v5025_v20, 5  ;;  %v1365_v45 = vrot.slane %v1363_v51, 4  ;;  %v6059_v23 = vshrl.u32 %v4883_v62, 16 }
  0x5a   : > { %v6060_v12 = vshll.u32 %v4883_v62, 16  ;;  %v1350_v33 = vsel %vm4979_vm7, %v3624_v21, %v1349_v44  ;;  %v801_v8 = vshll.u32 %v4894_v25, 16  ;;  %v5236_v16 = vcombine.low %v1343_v5, %v1346_v9 }
  0x5b   : > { %v1364_v21 = vsel %vm4979_vm7, %v3626_v14, %v1363_v51  ;;  %v1372_v5 = vrot.slane %v1370_v18, 4  ;;  %v6063_v51 = vshll.u32 %v4928_v30, 16 }
  0x5c   : > { %v797_v11 = vrot.slane %v6060_v12, 5  ;;  %v3627_v12 = vrot.slane %v5022_v36, 9 }
  0x5d   : > { %3961 = vmatmul.mubr.msk.bf16.vlgmr.msra.gmra.mrb[0].mxu1 %vm358_vm1, %v4797_v13  ;;  %v5181_v13 = vld [vmem:[%s4679_s29 + $0x8c] sm:$0x1] }
  0x5e   : > { %3964 = vmatprep.mubr.msk.bf16.mxu1 %vm358_vm1, %v4816_v39  ;;  %3993 = vmatpush3.bf16.msra.mxu1 %v5062_v0  ;;  %v1329_v0 = vsel %vm4979_vm7, %v3621_v48, %v1328_v19  ;;  %v1351_v39 = vrot.slane %v1349_v44, 4  ;;  %v1339_v19 = vsel %vm4979_vm7, %v1337_v17, %v1338_v22  ;;  %v1352_v50 = vrot.slane %v5181_v13, 5  ;;  %v5221_v22 = vld [vmem:[%s4679_s29 + $0xb0] sm:$0x1] }
  0x5f   : > { %4491 = vmatprep.subr.msk.bf16.mxu1 %vm407_vm0, %v5165_v54  ;;  %4105 = vmatmul.mubr.msk.bf16.gmra.mrb[8].mxu0 %vm358_vm1, %v5174_v55  ;;  %v3625_v48 = vrot.slane %v4967_v28, 9  ;;  %v1366_v17 = vrot.slane %v5204_v52, 5  ;;  %v794_v55 = vrot.slane %v6059_v23, 4  ;;  %v5231_v37 = vcombine.low %v1336_v61, %v1339_v19 }
  0x60   : > { %4108 = vmatprep.mubr.msk.bf16.mxu0 %vm358_vm1, %v5183_v43  ;;  %v5227_v43 = vcombine.low %v1329_v0, %v1332_v29  ;;  %v1353_v62 = vsel %vm4979_vm7, %v1351_v39, %v1352_v50  ;;  %v1360_v29 = vsel %vm4979_vm7, %v1358_v10, %v1359_v57  ;;  %v1373_v44 = vrot.slane %v5221_v22, 5 }
  0x61   : > { %v1357_v23 = vsel %vm4979_vm7, %v3625_v48, %v1356_v47  ;;  %v1367_v0 = vsel %vm4979_vm7, %v1365_v45, %v1366_v17  ;;  %v798_v61 = vor.u32 %v797_v11, %v794_v55  ;;  %v1377_v39 = vrot.slane %v5072_v38, 5  ;;  %v5269_v55 = vld [vmem:[%s4679_s29 + $0xbc] sm:$0x1] }
  0x62   : > { %v825_v47 = vshll.u32 %v4931_v35, 16  ;;  %v5254_v19 = vrot.slane %v801_v8, 5  ;;  %v6061_v50 = vshrl.u32 %v4894_v25, 16  ;;  %v6062_v57 = vshrl.u32 %v4928_v30, 16 }
  0x63   : > { %v821_v10 = vrot.slane %v6063_v51, 5  ;;  %v5264_v45 = vcombine.low %v1350_v33, %v1353_v62  ;;  %v5266_v11 = vcombine.low %v1357_v23, %v1360_v29  ;;  %v6064_v25 = vshrl.u32 %v4931_v35, 16  ;;  %v5301_v51 = vld [vmem:[%s4679_s29 + $0xc0] sm:$0xf] }
  0x64   : > { %v807_v48 = vrot.slane %v6061_v50, 4  ;;  %v818_v9 = vrot.slane %v6062_v57, 4  ;;  %v5271_v8 = vrot.slane %v825_v47, 5  ;;  %v5277_v17 = vcombine.low %v1364_v21, %v1367_v0 }
  0x65   : > { %3965 = vmatmul.mubr.msk.bf16.gmra.mrb[4].mxu1 %vm358_vm1, %v4860_v32  ;;  %v831_v14 = vrot.slane %v6064_v25, 4  ;;  %v1371_v30 = vsel %vm4979_vm7, %v3627_v12, %v1370_v18  ;;  %v811_v33 = vshll.u32 %v5154_v40, 16  ;;  %v3628_v62 = vrot.slane %v5058_v41, 9 }
  0x66   : > { %3968 = vmatprep.mubr.msk.bf16.mxu1 %vm358_vm1, %v4868_v49  ;;  %v1374_v23 = vsel %vm4979_vm7, %v1372_v5, %v1373_v44  ;;  %v799_v29 = vrot.slane %v798_v61, 4  ;;  %v1379_v47 = vrot.slane %v1377_v39, 4  ;;  %v849_v35 = vshll.u32 %v4947_v59, 16 }
  0x67   : > { %4109 = vmatmul.mubr.msk.bf16.gmra.mrb[12].mxu0 %vm358_vm1, %v5227_v43  ;;  %v808_v21 = vor.u32 %v807_v48, %v5254_v19  ;;  %v1380_v0 = vrot.slane %v5269_v55, 5  ;;  %v822_v18 = vor.u32 %v821_v10, %v818_v9  ;;  %v835_v40 = vshll.u32 %v5157_v46, 16 }
  0x68   : > { %4112 = vmatprep.mubr.msk.bf16.mxu0 %vm358_vm1, %v5231_v37  ;;  %v832_v12 = vor.u32 %v831_v14, %v5271_v8  ;;  %v6065_v5 = vshrl.u32 %v4943_v4, 16  ;;  %v6066_v61 = vshll.u32 %v4943_v4, 16  ;;  %v6067_v57 = vshrl.u32 %v4947_v59, 16 }
  0x69   : > { %v5303_v9 = vrot.slane %v849_v35, 5  ;;  %v6068_v46 = vshrl.u32 %v4967_v28, 16  ;;  %v6069_v25 = vshll.u32 %v4967_v28, 16  ;;  %v813_v4 = vrot.slane %v811_v33, 5 }
  0x6a   : > { %v842_v44 = vrot.slane %v6065_v5, 4  ;;  %v845_v50 = vrot.slane %v6066_v61, 5  ;;  %v855_v48 = vrot.slane %v6067_v57, 4  ;;  %v5310_v5 = vcombine.low %v1371_v30, %v1374_v23 }
  0x6b   : > { %v866_v10 = vrot.slane %v6068_v46, 4  ;;  %v869_v14 = vrot.slane %v6069_v25, 5  ;;  %v1378_v59 = vsel %vm4979_vm7, %v3628_v62, %v1377_v39  ;;  %v6070_v61 = vshrl.u32 %v4970_v42, 16  ;;  %v5320_v46 = vld [vmem:[%s4679_s29 + $0xc4] sm:$0xf] }
  0x6c   : > { %v804_v35 = vsel %vm4770_vm4, %v799_v29, %v5254_v19  ;;  %v823_v28 = vrot.slane %v822_v18, 4  ;;  %v1381_v30 = vsel %vm4979_vm7, %v1379_v47, %v1380_v0  ;;  %v5329_v39 = vld [vmem:[%s4679_s29 + $0xc8] sm:$0x1]  ;;  %v846_v33 = vor.u32 %v845_v50, %v842_v44 }
  0x6d   : > { %3969 = vmatmul.mubr.msk.bf16.gmra.mrb[8].mxu1 %vm358_vm1, %v4916_v26  ;;  %v879_v57 = vrot.slane %v6070_v61, 4  ;;  %v809_v26 = vrot.slane %v808_v21, 4  ;;  %v859_v62 = vshll.u32 %v5181_v13, 16  ;;  %v833_v19 = vrot.slane %v832_v12, 4 }
  0x6e   : > { %3972 = vmatprep.mubr.msk.bf16.mxu1 %vm358_vm1, %v4939_v2  ;;  %v873_v2 = vshll.u32 %v4970_v42, 16  ;;  %v3695_v42 = vrot.slane %v5301_v51, 9  ;;  %v837_v23 = vrot.slane %v835_v40, 5  ;;  %v870_v29 = vor.u32 %v869_v14, %v866_v10 }
  0x6f   : > { %4113 = vmatmul.mubr.msk.bf16.gmra.mrb[16].mxu0 %vm358_vm1, %v5236_v16  ;;  %v2107_v21 = vrot.slane %v5320_v46, 5  ;;  %v883_v47 = vshll.u32 %v5187_v15, 16  ;;  %v897_v0 = vshll.u32 %v5000_v27, 16  ;;  %v814_v13 = vsel %vm4770_vm4, %v809_v26, %v813_v4 }
  0x70   : > { %v5322_v25 = vrot.slane %v873_v2, 5  ;;  %4116 = vmatprep.mubr.msk.bf16.mxu0 %vm358_vm1, %v5264_v45  ;;  %v856_v2 = vor.u32 %v855_v48, %v5303_v9  ;;  %v5344_v44 = vcombine.low %v1378_v59, %v1381_v30  ;;  %v2110_v40 = vrot.slane %v5329_v39, 5 }
  0x71   : > { %v828_v12 = vsel %vm4770_vm4, %v823_v28, %v5271_v8  ;;  %v847_v15 = vrot.slane %v846_v33, 4  ;;  %v861_v50 = vrot.slane %v859_v62, 5  ;;  %v6071_v48 = vshrl.u32 %v4997_v56, 16 }
  0x72   : > { %v880_v18 = vor.u32 %v879_v57, %v5322_v25  ;;  %v6072_v14 = vshll.u32 %v4997_v56, 16  ;;  %v838_v26 = vsel %vm4770_vm4, %v833_v19, %v837_v23  ;;  %v857_v4 = vrot.slane %v856_v2, 4 }
  0x73   : > { %v890_v10 = vrot.slane %v6071_v48, 4  ;;  %v871_v59 = vrot.slane %v870_v29, 4  ;;  %v921_v57 = vshll.u32 %v5025_v20, 16  ;;  %v885_v8 = vrot.slane %v883_v47, 5 }
  0x74   : > { %v893_v61 = vrot.slane %v6072_v14, 5  ;;  %v881_v30 = vrot.slane %v880_v18, 4  ;;  %v5359_v28 = vrot.slane %v897_v0, 5  ;;  %v6073_v33 = vshrl.u32 %v5000_v27, 16 }
  0x75   : > { %3973 = vmatmul.mubr.msk.bf16.gmra.mrb[12].mxu1 %vm358_vm1, %v4990_v24  ;;  %v2109_v48 = vrot.slane %v2107_v21, 4  ;;  %v6074_v56 = vshrl.u32 %v5022_v36, 16  ;;  %v6075_v24 = vshll.u32 %v5022_v36, 16  ;;  %v5371_v23 = vcombine.low %v828_v12, %v838_v26 }
  0x76   : > { %3976 = vmatprep.mubr.msk.bf16.mxu1 %vm358_vm1, %v5009_v34  ;;  %v903_v62 = vrot.slane %v6073_v33, 4  ;;  %v5363_v34 = vcombine.low %v804_v35, %v814_v13  ;;  %v852_v2 = vsel %vm4770_vm4, %v847_v15, %v5303_v9  ;;  %v894_v27 = vor.u32 %v893_v61, %v890_v10 }
  0x77   : > { %v914_v14 = vrot.slane %v6074_v56, 4  ;;  %v917_v19 = vrot.slane %v6075_v24, 5  ;;  %4117 = vmatmul.mubr.msk.bf16.gmra.mrb[20].mxu0 %vm358_vm1, %v5266_v11  ;;  %v907_v35 = vshll.u32 %v5204_v52, 16  ;;  %v862_v29 = vsel %vm4770_vm4, %v857_v4, %v861_v50 }
  0x78   : > { %4120 = vmatprep.mubr.msk.bf16.mxu0 %vm358_vm1, %v5277_v17  ;;  %v923_v36 = vrot.slane %v921_v57, 5  ;;  %v6076_v24 = vshrl.u32 %v5025_v20, 16  ;;  %v6077_v47 = vrot.slane %v4685_v7, 5  ;;  %v6078_v0 = vrot.slane %v4682_v6, 9 }
  0x79   : > { %v876_v52 = vsel %vm4770_vm4, %v871_v59, %v5322_v25  ;;  %v886_v13 = vsel %vm4770_vm4, %v881_v30, %v885_v8  ;;  %v904_v12 = vor.u32 %v903_v62, %v5359_v28  ;;  %v931_v20 = vshll.u32 %v5221_v22, 16 }
  0x7a   : > { %v927_v18 = vrot.slane %v6076_v24, 4  ;;  %v5389_v9 = vsel %vm4979_vm7, %v6078_v0, %v6077_v47  ;;  %v2108_v6 = vsel %vm4979_vm7, %v3695_v42, %v2107_v21  ;;  %v2111_v7 = vsel %vm4979_vm7, %v2109_v48, %v2110_v40 }
  0x7b   : > { %v918_v15 = vor.u32 %v917_v19, %v914_v14  ;;  %v1275_v50 = vrot.slane %v5075_v58, 5  ;;  %v5407_v25 = vcombine.low %v852_v2, %v862_v29  ;;  %v895_v10 = vrot.slane %v894_v27, 4 }
  0x7c   : > { %v909_v61 = vrot.slane %v907_v35, 5  ;;  %v945_v22 = vshll.u32 %v5072_v38, 16  ;;  %v5410_v26 = vcombine.low %v876_v52, %v886_v13  ;;  %v928_v4 = vor.u32 %v927_v18, %v923_v36 }
  0x7d   : > { %3977 = vmatmul.mubr.msk.bf16.gmra.mrb[16].mxu1 %vm358_vm1, %v5363_v34  ;;  %v6079_v42 = vshrl.u32 %v5058_v41, 16  ;;  %v1276_v40 = vsel %vm4979_vm7, %v5051_v1, %v1275_v50  ;;  %v905_v58 = vrot.slane %v904_v12, 4  ;;  %v933_v59 = vrot.slane %v931_v20, 5 }
  0x7e   : > { %3980 = vmatprep.mubr.msk.bf16.mxu1 %vm358_vm1, %v5371_v23  ;;  %v6080_v57 = vshll.u32 %v5058_v41, 16  ;;  %v3629_v8 = vcombine.low %v5389_v9, %v1276_v40  ;;  %v919_v33 = vrot.slane %v918_v15, 4  ;;  %v1879_v62 = vshrl.u32 %v5301_v51, 16 }
  0x7f   : > { %v938_v21 = vrot.slane %v6079_v42, 4  ;;  %v1882_v48 = vshll.u32 %v5301_v51, 16  ;;  %v1888_v56 = vshll.u32 %v5320_v46, 16  ;;  %4121 = vmatmul.mubr.msk.bf16.gmra.mrb[24].mxu0 %vm358_vm1, %v5310_v5  ;;  %v947_v14 = vrot.slane %v945_v22, 5  ;;  %v6082_v42 = vld [vmem:[#allocation5_spill] sm:$0xff] }
  0x80   : > { %v941_v30 = vrot.slane %v6080_v57, 5  ;;  %v6081_v1 = vshrl.u32 %v5072_v38, 16  ;;  %v1892_v2 = vshrl.u32 %v5320_v46, 16  ;;  %v1898_v41 = vshll.u32 %v5329_v39, 16  ;;  %4124 = vmatprep.mubr.msk.bf16.mxu0 %vm358_vm1, %v5344_v44 }
  0x81   : > { %v929_v27 = vrot.slane %v928_v4, 4  ;;  %v1881_v35 = vrot.slane %v1879_v62, 4  ;;  %v1884_v29 = vrot.slane %v1882_v48, 5  ;;  %v1890_v24 = vrot.slane %v1888_v56, 5  ;;  %v6084_v62 = vld [vmem:[#allocation7_spill] sm:$0xff]  ;;  %v6085_v48 = vld [vmem:[#allocation8_spill] sm:$0xff] }
  0x82   : > { %v951_v19 = vrot.slane %v6081_v1, 4  ;;  %v5431_v18 = vcombine.low %v2108_v6, %v2111_v7  ;;  %v1894_v47 = vrot.slane %v1892_v2, 4  ;;  %v900_v38 = vsel %vm4770_vm4, %v895_v10, %v5359_v28  ;;  %v6088_v1 = vld [vmem:[#allocation12_spill] sm:$0xff] }
  0x83   : > { %v910_v39 = vsel %vm4770_vm4, %v905_v58, %v909_v61  ;;  %v955_v0 = vshll.u32 %v5269_v55, 16  ;;  %v1885_v9 = vor.u32 %v1884_v29, %v1881_v35  ;;  %v942_v52 = vor.u32 %v941_v30, %v938_v21  ;;  %v277_v30 = vld [vmem:[%s4656_s22 + $0x20] sm:$0xf]  ;;  %v6092_v2 = vld [vmem:[#allocation16_spill] sm:$0xff]  ;;  %v6095_v35 = vld [vmem:[#allocation17_spill] sm:$0xff] }
  0x84   : > { %v952_v13 = vor.u32 %v951_v19, %v947_v14  ;;  %v1895_v12 = vor.u32 %v1894_v47, %v1890_v24  ;;  %v1900_v20 = vrot.slane %v1898_v41, 5  ;;  %v924_v6 = vsel %vm4770_vm4, %v919_v33, %v923_v36  ;;  %v6083_v33 = vld [vmem:[#allocation6_spill] sm:$0xff]  ;;  %v6089_v19 = vld [vmem:[#allocation23_spill] sm:$0xff]  ;;  %v6098_v47 = vld [vmem:[#allocation21_spill] sm:$0xff] }
  0x85   : > { %3981 = vmatmul.mubr.msk.bf16.gmra.mrb[20].mxu1 %vm358_vm1, %v5407_v25  ;;  %v934_v7 = vsel %vm4770_vm4, %v929_v27, %v933_v59  ;;  %v1886_v28 = vrot.slane %v1885_v9, 4  ;;  %v5447_v50 = vcombine.low %v900_v38, %v910_v39  ;;  %v957_v55 = vrot.slane %v955_v0, 5  ;;  %v6093_v41 = vld [vmem:[#allocation26_spill] sm:$0xff]  ;;  %v6094_v27 = vld [vmem:[#allocation27_spill] sm:$0xff]  ;;  %v6100_v0 = vld [vmem:[#allocation24_spill] sm:$0xff] }
  0x86   : > { %3984 = vmatprep.mubr.msk.bf16.mxu1 %vm358_vm1, %v5410_v26  ;;  %v1896_v15 = vrot.slane %v1895_v12, 4  ;;  %v5453_v61 = vcombine.low %v924_v6, %v934_v7  ;;  %v943_v22 = vrot.slane %v942_v52, 4  ;;  %v953_v4 = vrot.slane %v952_v13, 4  ;;  %v6096_v29 = vld [vmem:[#allocation19_spill] sm:$0xff]  ;;  %v6099_v38 = vld [vmem:[#allocation22_spill] sm:$0xff]  ;;  %v6102_v12 = vld [vmem:[#allocation4_spill] sm:$0xff] }
  0x87   : > { %v1891_v10 = vsel %vm4770_vm4, %v1886_v28, %v1890_v24  ;;  %4125 = vmatmul.mubr.msk.bf16.gmra.mrb[28].mxu0 %vm358_vm1, %v5431_v18  ;;  %v2549_v59 = vsel %vm407_vm0, %v5092_v3, 0  ;;  %v6086_v3 = vld [vmem:[#allocation10_spill] sm:$0xff]  ;;  %v1683_v56 = vsel %vm407_vm0, %v5165_v54, 0  ;;  %v6090_v54 = vld [vmem:[#allocation25_spill] sm:$0xff]  ;;  %v6097_v24 = vld [vmem:[#allocation28_spill] sm:$0xff]  ;;  %v5528_v39 = vcombine.low %v5301_v51, %v5320_v46 }
  0x88   : > { %v1901_v36 = vsel %vm4770_vm4, %v1896_v15, %v1900_v20  ;;  %4130 = vmatprep.mubr.msk.bf16.mxu0 %vm358_vm1, %v6082_v42  ;;  %v948_v40 = vsel %vm4770_vm4, %v943_v22, %v947_v14  ;;  %v958_v58 = vsel %vm4770_vm4, %v953_v4, %v957_v55  ;;  %v4559_v14 = vld [vmem:[%s4656_s22 + $0x10] sm:$0xf]  ;;  %v5535_v9 = vld [vmem:[%s4679_s29 + $0xcc] sm:$0xf]  ;;  %v2759_v46 = vsel %vm407_vm0, %v277_v30, 0  ;;  %v6103_v20 = vld [vmem:[#allocation14_spill] sm:$0xff] }
  0x89   : > { %v5459_v21 = vcombine.low %v1891_v10, %v1901_v36  ;;  %v5471_v57 = vcombine.low %v948_v40, %v958_v58  ;;  %v5538_v52 = vld [vmem:[%s4679_s29 + $0xd0] sm:$0xf]  ;;  %v6104_v6 = vld [vmem:[#allocation15_spill] sm:$0xff]  ;;  %v6107_v7 = vld [vmem:[#allocation20_spill] sm:$0xff]  ;;  %v2519_v28 = vshrl.u32 %v5535_v9, 16  ;;  %v2522_v15 = vshll.u32 %v5535_v9, 16 }
  0x8a   : > { %v3713_v13 = vcombine.low %v5535_v9, %v5538_v52  ;;  %v6101_v51 = vld [vmem:[#allocation9_spill] sm:$0xff]  ;;  %v2532_v55 = vshrl.u32 %v5538_v52, 16  ;;  %v2528_v10 = vshll.u32 %v5538_v52, 16  ;;  %v2747_v53 = vrot.slane %v5538_v52, 5 }
  0x8b   : > { %v2521_v22 = vrot.slane %v2519_v28, 4  ;;  %v2524_v4 = vrot.slane %v2522_v15, 5  ;;  %v268_v40 = vld [vmem:[%s4679_s29 + $0xd4] sm:$0x1] }
  0x8c   : > { %v2530_v36 = vrot.slane %v2528_v10, 5 }
  0x8d   : > { %3985 = vmatmul.mubr.msk.bf16.gmra.mrb[24].mxu1 %vm358_vm1, %v5447_v50  ;;  %v2525_v58 = vor.u32 %v2524_v4, %v2521_v22 }
  0x8e   : > { %3988 = vmatprep.mubr.msk.bf16.mxu1 %vm358_vm1, %v5453_v61 }
  0x8f   : > { %4131 = vmatmul.mubr.msk.bf16.vlgmr.msra.gmra.mrb[0].mxu0 %vm358_vm1, %v6083_v33 }
  0x90   : > { %4163 = vmatpush3.bf16.msra.mxu0 %v2549_v59  ;;  %4134 = vmatprep.mubr.msk.bf16.mxu0 %vm358_vm1, %v6084_v62 }
  0x91   : > { %4497 = vmatprep.subr.msk.bf16.mxu0 %vm407_vm0, %v277_v30  ;;  %v2538_v30 = vshll.u32 %v268_v40, 16 }
  0x95   : > { %3989 = vmatmul.mubr.msk.bf16.gmra.mrb[28].mxu1 %vm358_vm1, %v5471_v57 }
  0x96   : > { %3994 = vmatprep.mubr.msk.bf16.mxu1 %vm358_vm1, %v3629_v8  ;;  %v6087_v8 = vld [vmem:[#allocation11_spill] sm:$0xff] }
  0x97   : > { %4135 = vmatmul.mubr.msk.bf16.gmra.mrb[4].mxu0 %vm358_vm1, %v6085_v48 }
  0x98   : > { %4138 = vmatprep.mubr.msk.bf16.mxu0 %vm358_vm1, %v6086_v3 }
  0x9d   : > { %3995 = vmatmul.mubr.msk.bf16.vlgmr.msra.gmra.mrb[0].mxu1 %vm358_vm1, %v5030_v63  ;;  %v6091_v63 = vld [vmem:[#allocation13_spill] sm:$0xff] }
  0x9e   : > { %3998 = vmatprep.mubr.msk.bf16.mxu1 %vm358_vm1, %v5064_v31  ;;  %4027 = vmatpush3.bf16.msra.mxu1 %v1683_v56 }
  0x9f   : > { %4493 = vmatprep.subr.msk.bf16.mxu1 %vm407_vm0, %v4559_v14  ;;  %4139 = vmatmul.mubr.msk.bf16.gmra.mrb[8].mxu0 %vm358_vm1, %v6087_v8 }
  0xa0   : > { %4142 = vmatprep.mubr.msk.bf16.mxu0 %vm358_vm1, %v6088_v1 }
  0xa5   : > { %3999 = vmatmul.mubr.msk.bf16.gmra.mrb[4].mxu1 %vm358_vm1, %v6089_v19 }
  0xa6   : > { %4002 = vmatprep.mubr.msk.bf16.mxu1 %vm358_vm1, %v6090_v54 }
  0xa7   : > { %4143 = vmatmul.mubr.msk.bf16.gmra.mrb[12].mxu0 %vm358_vm1, %v6091_v63 }
  0xa8   : > { %4146 = vmatprep.mubr.msk.bf16.mxu0 %vm358_vm1, %v6092_v2 }
  0xad   : > { %4003 = vmatmul.mubr.msk.bf16.gmra.mrb[8].mxu1 %vm358_vm1, %v6093_v41 }
  0xae   : > { %4006 = vmatprep.mubr.msk.bf16.mxu1 %vm358_vm1, %v6094_v27 }
  0xaf   : > { %4147 = vmatmul.mubr.msk.bf16.gmra.mrb[16].mxu0 %vm358_vm1, %v6095_v35 }
  0xb0   : > { %4150 = vmatprep.mubr.msk.bf16.mxu0 %vm358_vm1, %v6096_v29 }
  0xb5   : > { %4007 = vmatmul.mubr.msk.bf16.gmra.mrb[12].mxu1 %vm358_vm1, %v6097_v24 }
  0xb6   : > { %4010 = vmatprep.mubr.msk.bf16.mxu1 %vm358_vm1, %v5227_v43 }
  0xb7   : > { %4151 = vmatmul.mubr.msk.bf16.gmra.mrb[20].mxu0 %vm358_vm1, %v6098_v47 }
  0xb8   : > { %4154 = vmatprep.mubr.msk.bf16.mxu0 %vm358_vm1, %v6099_v38 }
  0xbd   : > { %4011 = vmatmul.mubr.msk.bf16.gmra.mrb[16].mxu1 %vm358_vm1, %v5231_v37 }
  0xbe   : > { %4014 = vmatprep.mubr.msk.bf16.mxu1 %vm358_vm1, %v5236_v16 }
  0xbf   : > { %4155 = vmatmul.mubr.msk.bf16.gmra.mrb[24].mxu0 %vm358_vm1, %v6100_v0 }
  0xc0   : > { %4158 = vmatprep.mubr.msk.bf16.mxu0 %vm358_vm1, %v5528_v39 }
  0xc5   : > { %4015 = vmatmul.mubr.msk.bf16.gmra.mrb[20].mxu1 %vm358_vm1, %v5264_v45 }
  0xc6   : > { %4018 = vmatprep.mubr.msk.bf16.mxu1 %vm358_vm1, %v5266_v11 }
  0xc7   : > { %4159 = vmatmul.mubr.msk.bf16.gmra.mrb[28].mxu0 %vm358_vm1, %v3713_v13 }
  0xc8   : > { %4164 = vmatprep.mubr.msk.bf16.mxu0 %vm358_vm1, %v6101_v51 }
  0xcd   : > { %4019 = vmatmul.mubr.msk.bf16.gmra.mrb[24].mxu1 %vm358_vm1, %v5277_v17 }
  0xce   : > { %4022 = vmatprep.mubr.msk.bf16.mxu1 %vm358_vm1, %v5310_v5 }
  0xcf   : > { %4165 = vmatmul.mubr.msk.bf16.vlgmr.msra.gmra.mrb[0].mxu0 %vm358_vm1, %v4860_v32  ;;  %v6105_v32 = vld [vmem:[#allocation3_spill] sm:$0xff] }
  0xd0   : > { %4197 = vmatpush3.bf16.msra.mxu0 %v2759_v46  ;;  %4168 = vmatprep.mubr.msk.bf16.mxu0 %vm358_vm1, %v4868_v49  ;;  %v6106_v49 = vld [vmem:[#allocation18_spill] sm:$0xff] }
  0xd5   : > { %4023 = vmatmul.mubr.msk.bf16.gmra.mrb[28].mxu1 %vm358_vm1, %v5344_v44 }
  0xd6   : > { %4028 = vmatprep.mubr.msk.bf16.mxu1 %vm358_vm1, %v6102_v12 }
  0xd7   : > { %4169 = vmatmul.mubr.msk.bf16.gmra.mrb[4].mxu0 %vm358_vm1, %v6103_v20 }
  0xd8   : > { %4172 = vmatprep.mubr.msk.bf16.mxu0 %vm358_vm1, %v6104_v6 }
  0xdd   : > { %4029 = vmatmul.mubr.msk.bf16.vlgmr.msra.gmra.mrb[0].mxu1 %vm358_vm1, %v6082_v42  ;;  %v2534_v42 = vrot.slane %v2532_v55, 4 }
  0xde   : > { %4032 = vmatprep.mubr.msk.bf16.mxu1 %vm358_vm1, %v6083_v33  ;;  %4231 = vmatpush3.bf16.msra.mxu1 %v6105_v32  ;;  %v2526_v33 = vrot.slane %v2525_v58, 4 }
  0xdf   : > { %4173 = vmatmul.mubr.msk.bf16.gmra.mrb[8].mxu0 %vm358_vm1, %v6106_v49  ;;  %v2535_v59 = vor.u32 %v2534_v42, %v2530_v36 }
  0xe0   : > { %4176 = vmatprep.mubr.msk.bf16.mxu0 %vm358_vm1, %v6107_v7 }
  0xe5   : > { %4033 = vmatmul.mubr.msk.bf16.gmra.mrb[4].mxu1 %vm358_vm1, %v6084_v62  ;;  %v2536_v62 = vrot.slane %v2535_v59, 4 }
  0xe6   : > { %4036 = vmatprep.mubr.msk.bf16.mxu1 %vm358_vm1, %v6085_v48  ;;  %v2540_v48 = vrot.slane %v2538_v30, 5 }
  0xe7   : > { %4177 = vmatmul.mubr.msk.bf16.gmra.mrb[12].mxu0 %vm358_vm1, %v5363_v34 }
  0xe8   : > { %4180 = vmatprep.mubr.msk.bf16.mxu0 %vm358_vm1, %v5371_v23  ;;  %v2541_v56 = vsel %vm4770_vm4, %v2536_v62, %v2540_v48 }
  0xed   : > { %4037 = vmatmul.mubr.msk.bf16.gmra.mrb[8].mxu1 %vm358_vm1, %v6086_v3  ;;  %v2531_v3 = vsel %vm4770_vm4, %v2526_v33, %v2530_v36 }
  0xee   : > { %4040 = vmatprep.mubr.msk.bf16.mxu1 %vm358_vm1, %v6087_v8  ;;  %v3730_v14 = vcombine.low %v2531_v3, %v2541_v56 }
  0xef   : > { %4181 = vmatmul.mubr.msk.bf16.gmra.mrb[16].mxu0 %vm358_vm1, %v5407_v25 }
  0xf0   : > { %4184 = vmatprep.mubr.msk.bf16.mxu0 %vm358_vm1, %v5410_v26 }
  0xf5   : > { %4041 = vmatmul.mubr.msk.bf16.gmra.mrb[12].mxu1 %vm358_vm1, %v6088_v1 }
  0xf6   : > { %4044 = vmatprep.mubr.msk.bf16.mxu1 %vm358_vm1, %v6091_v63 }
  0xf7   : > { %4185 = vmatmul.mubr.msk.bf16.gmra.mrb[20].mxu0 %vm358_vm1, %v5447_v50 }
  0xf8   : > { %4188 = vmatprep.mubr.msk.bf16.mxu0 %vm358_vm1, %v5453_v61 }
  0xfd   : > { %4045 = vmatmul.mubr.msk.bf16.gmra.mrb[16].mxu1 %vm358_vm1, %v6092_v2 }
  0xfe   : > { %4048 = vmatprep.mubr.msk.bf16.mxu1 %vm358_vm1, %v6095_v35 }
  0xff   : > { %4189 = vmatmul.mubr.msk.bf16.gmra.mrb[24].mxu0 %vm358_vm1, %v5471_v57 }
 0x100   : > { %4192 = vmatprep.mubr.msk.bf16.mxu0 %vm358_vm1, %v5459_v21 }
 0x105   : > { %4049 = vmatmul.mubr.msk.bf16.gmra.mrb[20].mxu1 %vm358_vm1, %v6096_v29 }
 0x106   : > { %4052 = vmatprep.mubr.msk.bf16.mxu1 %vm358_vm1, %v6098_v47 }
 0x107   : > { %4193 = vmatmul.mubr.msk.bf16.gmra.mrb[28].mxu0 %vm358_vm1, %v3730_v14 }
 0x108   : > { %4198 = vmatprep.mubr.msk.bf16.mxu0 %vm358_vm1, %v5064_v31  ;;  %v2750_v31 = vrot.slane %v268_v40, 5 }
 0x10d   : > { %4053 = vmatmul.mubr.msk.bf16.gmra.mrb[24].mxu1 %vm358_vm1, %v6099_v38 }
 0x10e   : > { %4056 = vmatprep.mubr.msk.bf16.mxu1 %vm358_vm1, %v6100_v0 }
 0x10f   : > { %4199 = vmatmul.mubr.msk.bf16.vlgmr.msra.gmra.mrb[0].mxu0 %vm358_vm1, %v6089_v19 }
 0x110   : > { %4202 = vmatprep.mubr.msk.bf16.mxu0 %vm358_vm1, %v6090_v54 }
 0x115   : > { %4057 = vmatmul.mubr.msk.bf16.gmra.mrb[28].mxu1 %vm358_vm1, %v5528_v39 }
 0x116   : > { %4078 = vmatprep.mubr.msk.bf16.mxu1 %vm358_vm1, %v5363_v34  ;;  %v3747_v34 = vrot.slane %v5535_v9, 9 }
 0x117   : > { %4203 = vmatmul.mubr.msk.bf16.gmra.mrb[4].mxu0 %vm358_vm1, %v6093_v41 }
 0x118   : > { %4206 = vmatprep.mubr.msk.bf16.mxu0 %vm358_vm1, %v6094_v27 }
 0x11d   : > { %4079 = vmatmul.mubr.msk.bf16.vlgmr.msra.gmra.mrb[16].mxu1 %vm358_vm1, %v5371_v23 }
 0x11e   : > { %4082 = vmatprep.mubr.msk.bf16.mxu1 %vm358_vm1, %v5407_v25 }
 0x11f   : > { %4207 = vmatmul.mubr.msk.bf16.gmra.mrb[8].mxu0 %vm358_vm1, %v6097_v24 }
 0x120   : > { %4210 = vmatprep.mubr.msk.bf16.mxu0 %vm358_vm1, %v5227_v43  ;;  %v2748_v43 = vsel %vm4979_vm7, %v3747_v34, %v2747_v53 }
 0x125   : > { %4083 = vmatmul.mubr.msk.bf16.gmra.mrb[20].mxu1 %vm358_vm1, %v5410_v26 }
 0x126   : > { %4086 = vmatprep.mubr.msk.bf16.mxu1 %vm358_vm1, %v5447_v50 }
 0x127   : > { %4211 = vmatmul.mubr.msk.bf16.gmra.mrb[12].mxu0 %vm358_vm1, %v5231_v37 }
 0x128   : > { %4214 = vmatprep.mubr.msk.bf16.mxu0 %vm358_vm1, %v5236_v16  ;;  %v2749_v16 = vrot.slane %v2747_v53, 4 }
 0x12a   : > { %v2751_v37 = vsel %vm4979_vm7, %v2749_v16, %v2750_v31 }
 0x12d   : > { %4087 = vmatmul.mubr.msk.bf16.gmra.mrb[24].mxu1 %vm358_vm1, %v5453_v61 }
 0x12e   : > { %4090 = vmatprep.mubr.msk.bf16.mxu1 %vm358_vm1, %v5471_v57 }
 0x12f   : > { %4215 = vmatmul.mubr.msk.bf16.gmra.mrb[16].mxu0 %vm358_vm1, %v5264_v45  ;;  %v3748_v45 = vcombine.low %v2748_v43, %v2751_v37 }
 0x130   : > { %4218 = vmatprep.mubr.msk.bf16.mxu0 %vm358_vm1, %v5266_v11 }
 0x135   : > { %4091 = vmatmul.mubr.msk.bf16.gmra.mrb[28].mxu1 %vm358_vm1, %v5459_v21 }
 0x137   : > { %4219 = vmatmul.mubr.msk.bf16.gmra.mrb[20].mxu0 %vm358_vm1, %v5277_v17 }
 0x138   : > { %4222 = vmatprep.mubr.msk.bf16.mxu0 %vm358_vm1, %v5310_v5 }
 0x13f   : > { %4223 = vmatmul.mubr.msk.bf16.gmra.mrb[24].mxu0 %vm358_vm1, %v5344_v44 }
 0x140   : > { %4226 = vmatprep.mubr.msk.bf16.mxu0 %vm358_vm1, %v5431_v18 }
 0x147   : > { %4227 = vmatmul.mubr.msk.bf16.gmra.mrb[28].mxu0 %vm358_vm1, %v3748_v45 }
 0x1b0   : > { %v4030_v11 = vpop.f32.mrb[0].mxu1 }
 0x1b1   : > { %v1719_v17 = vpop.f32.mrb[1].mxu1 }
 0x1b2   : > { %v4031_v5 = vpop.f32.mrb[2].mxu1 }
 0x1b3   : > { %v1722_v23 = vpop.f32.mrb[3].mxu1 }
 0x1b8   : > { %v4034_v25 = vpop.f32.mrb[4].mxu1 }
 0x1b9   : > { %v1735_v26 = vpop.f32.mrb[5].mxu1 }
 0x1ba   : > { %v4035_v50 = vpop.f32.mrb[6].mxu1 }
 0x1bb   : > { %v1738_v44 = vpop.f32.mrb[7].mxu1 }
 0x1c0   : > { %v4038_v61 = vpop.f32.mrb[8].mxu1 }
 0x1c1   : > { %v1751_v21 = vpop.f32.mrb[9].mxu1 }
 0x1c2   : > { %v4039_v18 = vpop.f32.mrb[10].mxu1 }
 0x1c3   : > { %v1754_v57 = vpop.f32.mrb[11].mxu1 }
 0x1c8   : > { %v4042_v8 = vpop.f32.mrb[12].mxu1 }
 0x1c9   : > { %v1767_v1 = vpop.f32.mrb[13].mxu1 }
 0x1ca   : > { %v4043_v19 = vpop.f32.mrb[14].mxu1 }
 0x1cb   : > { %v1770_v60 = vpop.f32.mrb[15].mxu1 }
 0x1e2   : > { %v4200_v54 = vpop.f32.mrb[0].mxu0 }
 0x1e3   : > { %v5680_v63 = vadd.f32 %v4200_v54, %v4030_v11  ;;  %v2795_v2 = vpop.f32.mrb[1].mxu0 }
 0x1e4   : > { %v5682_v41 = vadd.f32 %v2795_v2, %v1719_v17  ;;  %v4201_v27 = vpop.f32.mrb[2].mxu0 }
 0x1e5   : > { %v5684_v35 = vadd.f32 %v4201_v27, %v4031_v5  ;;  %v2798_v29 = vpop.f32.mrb[3].mxu0  ;;  %2961 = vst.msk [vmem:[#allocation2 + $0x10] sm:$0xff] (!%p3765_p8), %vm2958_vm8, %v5680_v63 }
 0x1e6   : > { %v5686_v24 = vadd.f32 %v2798_v29, %v1722_v23  ;;  %2959 = vst.msk [vmem:[#allocation2] sm:$0xff] (!%p3765_p8), %vm2958_vm8, %v5682_v41 }
 0x1e7   : > { %2962 = vst.msk [vmem:[#allocation2 + $0x18] sm:$0xff] (!%p3765_p8), %vm2958_vm8, %v5684_v35 }
 0x1e8   : > { %2960 = vst.msk [vmem:[#allocation2 + $0x8] sm:$0xff] (!%p3765_p8), %vm2958_vm8, %v5686_v24 }
 0x1ea   : > { %v4204_v47 = vpop.f32.mrb[4].mxu0 }
 0x1eb   : > { %v5688_v38 = vadd.f32 %v4204_v47, %v4034_v25  ;;  %v2811_v39 = vpop.f32.mrb[5].mxu0 }
 0x1ec   : > { %v5690_v0 = vadd.f32 %v2811_v39, %v1735_v26  ;;  %v4205_v9 = vpop.f32.mrb[6].mxu0 }
 0x1ed   : > { %v5692_v52 = vadd.f32 %v4205_v9, %v4035_v50  ;;  %v2814_v13 = vpop.f32.mrb[7].mxu0  ;;  %2965 = vst.msk [vmem:[#allocation2 + $0x30] sm:$0xff] (!%p3765_p8), %vm2958_vm8, %v5688_v38 }
 0x1ee   : > { %v5694_v46 = vadd.f32 %v2814_v13, %v1738_v44  ;;  %2963 = vst.msk [vmem:[#allocation2 + $0x20] sm:$0xff] (!%p3765_p8), %vm2958_vm8, %v5690_v0 }
 0x1ef   : > { %2966 = vst.msk [vmem:[#allocation2 + $0x38] sm:$0xff] (!%p3765_p8), %vm2958_vm8, %v5692_v52 }
 0x1f0   : > { %v4080_v51 = vpop.f32.mrb[16].mxu1  ;;  %2964 = vst.msk [vmem:[#allocation2 + $0x28] sm:$0xff] (!%p3765_p8), %vm2958_vm8, %v5694_v46 }
 0x1f1   : > { %v2009_v12 = vpop.f32.mrb[17].mxu1 }
 0x1f2   : > { %v4081_v20 = vpop.f32.mrb[18].mxu1  ;;  %v4208_v32 = vpop.f32.mrb[8].mxu0 }
 0x1f3   : > { %v2012_v6 = vpop.f32.mrb[19].mxu1  ;;  %v5696_v49 = vadd.f32 %v4208_v32, %v4038_v61  ;;  %v2827_v7 = vpop.f32.mrb[9].mxu0 }
 0x1f4   : > { %v5698_v28 = vadd.f32 %v2827_v7, %v1751_v21  ;;  %v4209_v15 = vpop.f32.mrb[10].mxu0 }
 0x1f5   : > { %v5700_v55 = vadd.f32 %v4209_v15, %v4039_v18  ;;  %v2830_v10 = vpop.f32.mrb[11].mxu0  ;;  %2969 = vst.msk [vmem:[#allocation2 + $0x50] sm:$0xff] (!%p3765_p8), %vm2958_vm8, %v5696_v49 }
 0x1f6   : > { %v5702_v4 = vadd.f32 %v2830_v10, %v1754_v57  ;;  %2967 = vst.msk [vmem:[#allocation2 + $0x40] sm:$0xff] (!%p3765_p8), %vm2958_vm8, %v5698_v28 }
 0x1f7   : > { %2970 = vst.msk [vmem:[#allocation2 + $0x58] sm:$0xff] (!%p3765_p8), %vm2958_vm8, %v5700_v55 }
 0x1f8   : > { %v4084_v22 = vpop.f32.mrb[20].mxu1  ;;  %2968 = vst.msk [vmem:[#allocation2 + $0x48] sm:$0xff] (!%p3765_p8), %vm2958_vm8, %v5702_v4 }
 0x1f9   : > { %v2025_v36 = vpop.f32.mrb[21].mxu1 }
 0x1fa   : > { %v4085_v42 = vpop.f32.mrb[22].mxu1  ;;  %v4212_v58 = vpop.f32.mrb[12].mxu0 }
 0x1fb   : > { %v2028_v40 = vpop.f32.mrb[23].mxu1  ;;  %v5704_v59 = vadd.f32 %v4212_v58, %v4042_v8  ;;  %v2843_v30 = vpop.f32.mrb[13].mxu0 }
 0x1fc   : > { %v5706_v33 = vadd.f32 %v2843_v30, %v1767_v1  ;;  %v4213_v62 = vpop.f32.mrb[14].mxu0 }
 0x1fd   : > { %v5708_v48 = vadd.f32 %v4213_v62, %v4043_v19  ;;  %v2846_v3 = vpop.f32.mrb[15].mxu0  ;;  %2973 = vst.msk [vmem:[#allocation2 + $0x70] sm:$0xff] (!%p3765_p8), %vm2958_vm8, %v5704_v59 }
 0x1fe   : > { %v5710_v14 = vadd.f32 %v2846_v3, %v1770_v60  ;;  %2971 = vst.msk [vmem:[#allocation2 + $0x60] sm:$0xff] (!%p3765_p8), %vm2958_vm8, %v5706_v33 }
 0x1ff   : > { %2974 = vst.msk [vmem:[#allocation2 + $0x78] sm:$0xff] (!%p3765_p8), %vm2958_vm8, %v5708_v48 }
 0x200   : > { %v4088_v56 = vpop.f32.mrb[24].mxu1  ;;  %2972 = vst.msk [vmem:[#allocation2 + $0x68] sm:$0xff] (!%p3765_p8), %vm2958_vm8, %v5710_v14 }
 0x201   : > { %v2041_v53 = vpop.f32.mrb[25].mxu1 }
 0x202   : > { %v4089_v34 = vpop.f32.mrb[26].mxu1  ;;  %v4216_v31 = vpop.f32.mrb[16].mxu0 }
 0x203   : > { %v2044_v16 = vpop.f32.mrb[27].mxu1  ;;  %v5712_v43 = vadd.f32 %v4216_v31, %v4080_v51  ;;  %v2859_v37 = vpop.f32.mrb[17].mxu0 }
 0x204   : > { %v5714_v45 = vadd.f32 %v2859_v37, %v2009_v12  ;;  %v4217_v11 = vpop.f32.mrb[18].mxu0 }
 0x205   : > { %v5716_v17 = vadd.f32 %v4217_v11, %v4081_v20  ;;  %v2862_v5 = vpop.f32.mrb[19].mxu0  ;;  %2977 = vst.msk [vmem:[#allocation2 + $0x90] sm:$0xff] (!%p3765_p8), %vm2958_vm8, %v5712_v43 }
 0x206   : > { %v5718_v25 = vadd.f32 %v2862_v5, %v2012_v6  ;;  %2975 = vst.msk [vmem:[#allocation2 + $0x80] sm:$0xff] (!%p3765_p8), %vm2958_vm8, %v5714_v45 }
 0x207   : > { %2978 = vst.msk [vmem:[#allocation2 + $0x98] sm:$0xff] (!%p3765_p8), %vm2958_vm8, %v5716_v17 }
 0x208   : > { %v4092_v23 = vpop.f32.mrb[28].mxu1  ;;  %2976 = vst.msk [vmem:[#allocation2 + $0x88] sm:$0xff] (!%p3765_p8), %vm2958_vm8, %v5718_v25 }
 0x209   : > { %v2057_v26 = vpop.f32.mrb[29].mxu1 }
 0x20a   : > { %v4093_v50 = vpop.f32.mrb[30].mxu1  ;;  %v4220_v61 = vpop.f32.mrb[20].mxu0 }
 0x20b   : > { %v2060_v44 = vpop.f32.mrb[31].mxu1  ;;  %v5720_v21 = vadd.f32 %v4220_v61, %v4084_v22  ;;  %v2875_v18 = vpop.f32.mrb[21].mxu0 }
 0x20c   : > { %v5722_v57 = vadd.f32 %v2875_v18, %v2025_v36  ;;  %v4221_v8 = vpop.f32.mrb[22].mxu0 }
 0x20d   : > { %v5724_v1 = vadd.f32 %v4221_v8, %v4085_v42  ;;  %v2878_v19 = vpop.f32.mrb[23].mxu0  ;;  %2981 = vst.msk [vmem:[#allocation2 + $0xb0] sm:$0xff] (!%p3765_p8), %vm2958_vm8, %v5720_v21 }
 0x20e   : > { %v5726_v60 = vadd.f32 %v2878_v19, %v2028_v40  ;;  %2979 = vst.msk [vmem:[#allocation2 + $0xa0] sm:$0xff] (!%p3765_p8), %vm2958_vm8, %v5722_v57 }
 0x20f   : > { %2982 = vst.msk [vmem:[#allocation2 + $0xb8] sm:$0xff] (!%p3765_p8), %vm2958_vm8, %v5724_v1 }
 0x210   : > { %2980 = vst.msk [vmem:[#allocation2 + $0xa8] sm:$0xff] (!%p3765_p8), %vm2958_vm8, %v5726_v60 }
 0x212   : > { %v4224_v54 = vpop.f32.mrb[24].mxu0 }
 0x213   : > { %v5728_v2 = vadd.f32 %v4224_v54, %v4088_v56  ;;  %v2891_v27 = vpop.f32.mrb[25].mxu0 }
 0x214   : > { %v5730_v29 = vadd.f32 %v2891_v27, %v2041_v53  ;;  %v4225_v47 = vpop.f32.mrb[26].mxu0 }
 0x215   : > { %v5732_v39 = vadd.f32 %v4225_v47, %v4089_v34  ;;  %v2894_v9 = vpop.f32.mrb[27].mxu0  ;;  %2985 = vst.msk [vmem:[#allocation2 + $0xd0] sm:$0xff] (!%p3765_p8), %vm2958_vm8, %v5728_v2 }
 0x216   : > { %v5734_v13 = vadd.f32 %v2894_v9, %v2044_v16  ;;  %2983 = vst.msk [vmem:[#allocation2 + $0xc0] sm:$0xff] (!%p3765_p8), %vm2958_vm8, %v5730_v29 }
 0x217   : > { %2986 = vst.msk [vmem:[#allocation2 + $0xd8] sm:$0xff] (!%p3765_p8), %vm2958_vm8, %v5732_v39 }
 0x218   : > { %2957 = sbr.rel (%p3765_p8) target bundleno = 545 (0x221), region = 32  ;;  %2984 = vst.msk [vmem:[#allocation2 + $0xc8] sm:$0xff] (!%p3765_p8), %vm2958_vm8, %v5734_v13 }
 0x21a   : > { %v4228_v51 = vpop.f32.mrb[28].mxu0 }
 0x21b   : > { %v5736_v12 = vadd.f32 %v4228_v51, %v4092_v23  ;;  %v2907_v20 = vpop.f32.mrb[29].mxu0 }
 0x21c   : > { %v5738_v6 = vadd.f32 %v2907_v20, %v2057_v26  ;;  %v4229_v32 = vpop.f32.mrb[30].mxu0 }
 0x21d   : > { %v5740_v7 = vadd.f32 %v4229_v32, %v4093_v50  ;;  %v2910_v15 = vpop.f32.mrb[31].mxu0  ;;  %2989 = vst.msk [vmem:[#allocation2 + $0xf0] sm:$0xff] (!%p3765_p8), %vm2958_vm8, %v5736_v12 }
 0x21e   : > { %v5742_v10 = vadd.f32 %v2910_v15, %v2060_v44  ;;  %2987 = vst.msk [vmem:[#allocation2 + $0xe0] sm:$0xff] (!%p3765_p8), %vm2958_vm8, %v5738_v6 }
 0x21f   : > { %2990 = vst.msk [vmem:[#allocation2 + $0xf8] sm:$0xff] %vm2958_vm8, %v5740_v7 }
 0x220   : > { %2988 = vst.msk [vmem:[#allocation2 + $0xe8] sm:$0xff] %vm2958_vm8, %v5742_v10 }
 0x221 PF: > { %p3766_p9 = scmp.eq.s32.totalorder %s4584_s9, 0 }
 0x222   : > { %v2995_v22 = vld [vmem:[#allocation2] sm:$0xff] (!%p3766_p9)  ;;  %vm3059_vm9 = vcmask (!%p3766_p9), 7168   ;;  %v2996_v36 = vld [vmem:[#allocation2 + $0x8] sm:$0xff] (!%p3766_p9)  ;;  %v2997_v42 = vld [vmem:[#allocation2 + $0x10] sm:$0xff] (!%p3766_p9) }
 0x223   : > { %2994 = sbr.rel (%p3766_p9) target bundleno = 565 (0x235), region = 36  ;;  %v3027_v40 = vadd.f32 (!%p3766_p9), %v5682_v41, %v2995_v22  ;;  %v3028_v58 = vadd.f32 (!%p3766_p9), %v5686_v24, %v2996_v36  ;;  %v3029_v30 = vadd.f32 (!%p3766_p9), %v5680_v63, %v2997_v42  ;;  %v2998_v62 = vld [vmem:[#allocation2 + $0x18] sm:$0xff] (!%p3766_p9)  ;;  %v2999_v3 = vld [vmem:[#allocation2 + $0x20] sm:$0xff] (!%p3766_p9)  ;;  %v3000_v56 = vld [vmem:[#allocation2 + $0x28] sm:$0xff] (!%p3766_p9) }
 0x224   : > { %v3030_v53 = vadd.f32 (!%p3766_p9), %v5684_v35, %v2998_v62  ;;  %v3031_v34 = vadd.f32 (!%p3766_p9), %v5690_v0, %v2999_v3  ;;  %v3032_v16 = vadd.f32 (!%p3766_p9), %v5694_v46, %v3000_v56  ;;  %v3001_v31 = vld [vmem:[#allocation2 + $0x30] sm:$0xff] (!%p3766_p9)  ;;  %v3002_v37 = vld [vmem:[#allocation2 + $0x38] sm:$0xff] (!%p3766_p9)  ;;  %v3003_v11 = vld [vmem:[#allocation2 + $0x40] sm:$0xff] (!%p3766_p9) }
 0x225   : > { %3060 = vst.msk [vmem:[#allocation2] sm:$0xff] (!%p3766_p9), %vm3059_vm9, %v3027_v40  ;;  %3061 = vst.msk [vmem:[#allocation2 + $0x8] sm:$0xff] (!%p3766_p9), %vm3059_vm9, %v3028_v58  ;;  %v3033_v63 = vadd.f32 (!%p3766_p9), %v5688_v38, %v3001_v31  ;;  %v3034_v41 = vadd.f32 (!%p3766_p9), %v5692_v52, %v3002_v37  ;;  %v3035_v24 = vadd.f32 (!%p3766_p9), %v5698_v28, %v3003_v11  ;;  %v3004_v35 = vld [vmem:[#allocation2 + $0x48] sm:$0xff] (!%p3766_p9)  ;;  %v3005_v5 = vld [vmem:[#allocation2 + $0x50] sm:$0xff] (!%p3766_p9) }
 0x226   : > { %3062 = vst.msk [vmem:[#allocation2 + $0x10] sm:$0xff] (!%p3766_p9), %vm3059_vm9, %v3029_v30  ;;  %v3006_v0 = vld [vmem:[#allocation2 + $0x58] sm:$0xff] (!%p3766_p9)  ;;  %3063 = vst.msk [vmem:[#allocation2 + $0x18] sm:$0xff] (!%p3766_p9), %vm3059_vm9, %v3030_v53  ;;  %v3036_v46 = vadd.f32 (!%p3766_p9), %v5702_v4, %v3004_v35  ;;  %v3037_v23 = vadd.f32 (!%p3766_p9), %v5696_v49, %v3005_v5  ;;  %v3007_v38 = vld [vmem:[#allocation2 + $0x60] sm:$0xff] (!%p3766_p9) }
 0x227   : > { %3064 = vst.msk [vmem:[#allocation2 + $0x20] sm:$0xff] (!%p3766_p9), %vm3059_vm9, %v3031_v34  ;;  %3065 = vst.msk [vmem:[#allocation2 + $0x28] sm:$0xff] (!%p3766_p9), %vm3059_vm9, %v3032_v16  ;;  %v3038_v26 = vadd.f32 (!%p3766_p9), %v5700_v55, %v3006_v0  ;;  %v3008_v50 = vld [vmem:[#allocation2 + $0x68] sm:$0xff] (!%p3766_p9)  ;;  %v3009_v52 = vld [vmem:[#allocation2 + $0x70] sm:$0xff] (!%p3766_p9)  ;;  %v3039_v28 = vadd.f32 (!%p3766_p9), %v5706_v33, %v3007_v38 }
 0x228   : > { %3066 = vst.msk [vmem:[#allocation2 + $0x30] sm:$0xff] (!%p3766_p9), %vm3059_vm9, %v3033_v63  ;;  %3067 = vst.msk [vmem:[#allocation2 + $0x38] sm:$0xff] (!%p3766_p9), %vm3059_vm9, %v3034_v41  ;;  %v3040_v44 = vadd.f32 (!%p3766_p9), %v5710_v14, %v3008_v50  ;;  %v3041_v61 = vadd.f32 (!%p3766_p9), %v5704_v59, %v3009_v52  ;;  %v3010_v4 = vld [vmem:[#allocation2 + $0x78] sm:$0xff] (!%p3766_p9)  ;;  %v3011_v18 = vld [vmem:[#allocation2 + $0x80] sm:$0xff] (!%p3766_p9) }
 0x229   : > { %3068 = vst.msk [vmem:[#allocation2 + $0x40] sm:$0xff] (!%p3766_p9), %vm3059_vm9, %v3035_v24  ;;  %v3012_v49 = vld [vmem:[#allocation2 + $0x88] sm:$0xff] (!%p3766_p9)  ;;  %3069 = vst.msk [vmem:[#allocation2 + $0x48] sm:$0xff] (!%p3766_p9), %vm3059_vm9, %v3036_v46  ;;  %v3042_v55 = vadd.f32 (!%p3766_p9), %v5708_v48, %v3010_v4  ;;  %v3043_v8 = vadd.f32 (!%p3766_p9), %v5714_v45, %v3011_v18  ;;  %v3013_v33 = vld [vmem:[#allocation2 + $0x90] sm:$0xff] (!%p3766_p9) }
 0x22a   : > { %3070 = vst.msk [vmem:[#allocation2 + $0x50] sm:$0xff] %vm3059_vm9, %v3037_v23  ;;  %3071 = vst.msk [vmem:[#allocation2 + $0x58] sm:$0xff] %vm3059_vm9, %v3038_v26  ;;  %v3044_v19 = vadd.f32 %v5718_v25, %v3012_v49  ;;  %v3014_v54 = vld [vmem:[#allocation2 + $0x98] sm:$0xff]  ;;  %v3015_v14 = vld [vmem:[#allocation2 + $0xa0] sm:$0xff]  ;;  %v3045_v59 = vadd.f32 %v5712_v43, %v3013_v33 }
 0x22b   : > { %3072 = vst.msk [vmem:[#allocation2 + $0x60] sm:$0xff] %vm3059_vm9, %v3039_v28  ;;  %3073 = vst.msk [vmem:[#allocation2 + $0x68] sm:$0xff] %vm3059_vm9, %v3040_v44  ;;  %v3046_v27 = vadd.f32 %v5716_v17, %v3014_v54  ;;  %v3047_v47 = vadd.f32 %v5722_v57, %v3015_v14  ;;  %v3016_v48 = vld [vmem:[#allocation2 + $0xa8] sm:$0xff]  ;;  %v3017_v9 = vld [vmem:[#allocation2 + $0xb0] sm:$0xff] }
 0x22c   : > { %3074 = vst.msk [vmem:[#allocation2 + $0x70] sm:$0xff] %vm3059_vm9, %v3041_v61  ;;  %v3018_v45 = vld [vmem:[#allocation2 + $0xb8] sm:$0xff]  ;;  %3075 = vst.msk [vmem:[#allocation2 + $0x78] sm:$0xff] %vm3059_vm9, %v3042_v55  ;;  %v3048_v25 = vadd.f32 %v5726_v60, %v3016_v48  ;;  %v3049_v51 = vadd.f32 %v5720_v21, %v3017_v9  ;;  %v3019_v43 = vld [vmem:[#allocation2 + $0xc0] sm:$0xff] }
 0x22d   : > { %3076 = vst.msk [vmem:[#allocation2 + $0x80] sm:$0xff] %vm3059_vm9, %v3043_v8  ;;  %3077 = vst.msk [vmem:[#allocation2 + $0x88] sm:$0xff] %vm3059_vm9, %v3044_v19  ;;  %v3050_v20 = vadd.f32 %v5724_v1, %v3018_v45  ;;  %v3020_v32 = vld [vmem:[#allocation2 + $0xc8] sm:$0xff]  ;;  %v3021_v17 = vld [vmem:[#allocation2 + $0xd0] sm:$0xff]  ;;  %v3051_v57 = vadd.f32 %v5730_v29, %v3019_v43 }
 0x22e   : > { %3078 = vst.msk [vmem:[#allocation2 + $0x90] sm:$0xff] %vm3059_vm9, %v3045_v59  ;;  %3079 = vst.msk [vmem:[#allocation2 + $0x98] sm:$0xff] %vm3059_vm9, %v3046_v27  ;;  %v3052_v15 = vadd.f32 %v5734_v13, %v3020_v32  ;;  %v3053_v22 = vadd.f32 %v5728_v2, %v3021_v17  ;;  %v3022_v60 = vld [vmem:[#allocation2 + $0xd8] sm:$0xff]  ;;  %v3023_v36 = vld [vmem:[#allocation2 + $0xe0] sm:$0xff] }
 0x22f   : > { %3080 = vst.msk [vmem:[#allocation2 + $0xa0] sm:$0xff] %vm3059_vm9, %v3047_v47  ;;  %v3024_v21 = vld [vmem:[#allocation2 + $0xe8] sm:$0xff]  ;;  %3081 = vst.msk [vmem:[#allocation2 + $0xa8] sm:$0xff] %vm3059_vm9, %v3048_v25  ;;  %v3054_v1 = vadd.f32 %v5732_v39, %v3022_v60  ;;  %v3055_v42 = vadd.f32 %v5738_v6, %v3023_v36  ;;  %v3025_v29 = vld [vmem:[#allocation2 + $0xf0] sm:$0xff] }
 0x230   : > { %3082 = vst.msk [vmem:[#allocation2 + $0xb0] sm:$0xff] %vm3059_vm9, %v3049_v51  ;;  %3083 = vst.msk [vmem:[#allocation2 + $0xb8] sm:$0xff] %vm3059_vm9, %v3050_v20  ;;  %v3056_v40 = vadd.f32 %v5742_v10, %v3024_v21  ;;  %v3026_v58 = vld [vmem:[#allocation2 + $0xf8] sm:$0xff]  ;;  %v3057_v2 = vadd.f32 %v5736_v12, %v3025_v29 }
 0x231   : > { %3084 = vst.msk [vmem:[#allocation2 + $0xc0] sm:$0xff] %vm3059_vm9, %v3051_v57  ;;  %3085 = vst.msk [vmem:[#allocation2 + $0xc8] sm:$0xff] %vm3059_vm9, %v3052_v15  ;;  %v3058_v13 = vadd.f32 %v5740_v7, %v3026_v58 }
 0x232   : > { %3086 = vst.msk [vmem:[#allocation2 + $0xd0] sm:$0xff] %vm3059_vm9, %v3053_v22  ;;  %3087 = vst.msk [vmem:[#allocation2 + $0xd8] sm:$0xff] %vm3059_vm9, %v3054_v1 }
 0x233   : > { %3088 = vst.msk [vmem:[#allocation2 + $0xe0] sm:$0xff] %vm3059_vm9, %v3055_v42  ;;  %3089 = vst.msk [vmem:[#allocation2 + $0xe8] sm:$0xff] %vm3059_vm9, %v3056_v40 }
 0x234   : > { %3090 = vst.msk [vmem:[#allocation2 + $0xf0] sm:$0xff] %vm3059_vm9, %v3057_v2  ;;  %3091 = vst.msk [vmem:[#allocation2 + $0xf8] sm:$0xff] %vm3059_vm9, %v3058_v13 }
 0x235 PF: > { %p3767_p10 = scmp.ne.s32.totalorder %s4584_s9, 2 }
 0x236   : > { %v4602_v10 = vmov (!%p3767_p10), 0   ;;  %v3109_v37 = vld [vmem:[#allocation2 + $0x68] sm:$0xff] (!%p3767_p10)  ;;  %v3108_v11 = vld [vmem:[#allocation2 + $0x60] sm:$0xff] (!%p3767_p10)  ;;  %v3115_v24 = vld [vmem:[#allocation2 + $0x98] sm:$0xff] (!%p3767_p10)  ;;  %v3256_v20 = vlaneseq (!%p3767_p10)  ;;  %vm3267_vm10 = vcmask (!%p3767_p10), 130112   ;;  %vm3404_vm11 = vcmask (!%p3767_p10), 1041409  }
 0x237   : > { %3095 = sbr.rel (%p3767_p10) target bundleno = 762 (0x2fa), region = 40  ;;  %v3096_v6 = vld [vmem:[#allocation2] sm:$0xff] (!%p3767_p10)  ;;  %4561 = vset.pattern.permute.xlu1 (!%p3767_p10), %v4602_v10  ;;  %4560 = vset.pattern.permute.xlu0 (!%p3767_p10), %v4602_v10  ;;  %v3097_v7 = vld [vmem:[#allocation2 + $0x8] sm:$0xff] (!%p3767_p10)  ;;  %v3114_v35 = vld [vmem:[#allocation2 + $0x90] sm:$0xff] (!%p3767_p10)  ;;  %vm3406_vm12 = vcmask (!%p3767_p10), 1042434   ;;  %vm3408_vm13 = vcmask (!%p3767_p10), 1043459  }
 0x238   : > { %v3098_v39 = vld [vmem:[#allocation2 + $0x10] sm:$0xff] (!%p3767_p10)  ;;  %3161 = vperm.xlu0 (!%p3767_p10), %4560, %v3096_v6   ;;  %v3099_v12 = vld [vmem:[#allocation2 + $0x18] sm:$0xff] (!%p3767_p10)  ;;  %v3113_v63 = vld [vmem:[#allocation2 + $0x88] sm:$0xff] (!%p3767_p10)  ;;  %v3257_v17 = vand.u32 (!%p3767_p10), 127, %v3256_v20  ;;  %v3259_v60 = vshrl.u32 (!%p3767_p10), %v3256_v20, 7  ;;  %vm3410_vm14 = vcmask (!%p3767_p10), 1044484  }
 0x239   : > { %3167 = vperm.xlu1 (!%p3767_p10), %4561, %v3098_v39   ;;  %v3101_v30 = vld [vmem:[#allocation2 + $0x28] sm:$0xff] (!%p3767_p10)  ;;  %v3100_v62 = vld [vmem:[#allocation2 + $0x20] sm:$0xff] (!%p3767_p10)  ;;  %v3119_v46 = vld [vmem:[#allocation2 + $0xb8] sm:$0xff] (!%p3767_p10)  ;;  %vm3412_vm15 = vcmask (!%p3767_p10), 1045509   ;;  %vm3414_vm0 = vcmask (!%p3767_p10), 1046534   ;;  %vm3416_vm1 = vcmask (!%p3767_p10), 1047559  }
 0x23a   : > { %v3103_v3 = vld [vmem:[#allocation2 + $0x38] sm:$0xff] (!%p3767_p10)  ;;  %v3102_v56 = vld [vmem:[#allocation2 + $0x30] sm:$0xff] (!%p3767_p10)  ;;  %v3112_v41 = vld [vmem:[#allocation2 + $0x80] sm:$0xff] (!%p3767_p10)  ;;  %v3262_v22 = vadd.s32 (!%p3767_p10), 4294967288, %v3257_v17  ;;  %v5889_v42 = vsub.s32 (!%p3767_p10), %v3257_v17, %v3259_v60  ;;  %vm3427_vm2 = vcmask (!%p3767_p10), 130048  }
 0x23b   : > { %v3105_v53 = vld [vmem:[#allocation2 + $0x48] sm:$0xff] (!%p3767_p10)  ;;  %v3104_v34 = vld [vmem:[#allocation2 + $0x40] sm:$0xff] (!%p3767_p10)  ;;  %v3118_v23 = vld [vmem:[#allocation2 + $0xb0] sm:$0xff] (!%p3767_p10) }
 0x23c   : > { %3164 = vperm.xlu0 (!%p3767_p10), %4560, %v3097_v7   ;;  %v3107_v16 = vld [vmem:[#allocation2 + $0x58] sm:$0xff] (!%p3767_p10)  ;;  %v3106_v31 = vld [vmem:[#allocation2 + $0x50] sm:$0xff] (!%p3767_p10)  ;;  %v3117_v5 = vld [vmem:[#allocation2 + $0xa8] sm:$0xff] (!%p3767_p10)  ;;  %v5887_v1 = vsub.s32 (!%p3767_p10), %v3262_v22, %v3259_v60 }
 0x23d   : > { %3170 = vperm.xlu1 (!%p3767_p10), %4561, %v3099_v12   ;;  %v3116_v0 = vld [vmem:[#allocation2 + $0xa0] sm:$0xff] (!%p3767_p10)  ;;  %v3121_v26 = vld [vmem:[#allocation2 + $0xc8] sm:$0xff] (!%p3767_p10)  ;;  %v3123_v50 = vld [vmem:[#allocation2 + $0xd8] sm:$0xff] (!%p3767_p10) }
 0x23e   : > { %v3120_v38 = vld [vmem:[#allocation2 + $0xc0] sm:$0xff]  ;;  %v3122_v52 = vld [vmem:[#allocation2 + $0xd0] sm:$0xff]  ;;  %v3125_v28 = vld [vmem:[#allocation2 + $0xe8] sm:$0xff] }
 0x23f   : > { %v3124_v44 = vld [vmem:[#allocation2 + $0xe0] sm:$0xff]  ;;  %v3111_v61 = vld [vmem:[#allocation2 + $0x78] sm:$0xff]  ;;  %v3110_v4 = vld [vmem:[#allocation2 + $0x70] sm:$0xff] }
 0x240   : > { %3173 = vperm.xlu0 %4560, %v3100_v62   ;;  %v3127_v18 = vld [vmem:[#allocation2 + $0xf8] sm:$0xff]  ;;  %v3126_v49 = vld [vmem:[#allocation2 + $0xf0] sm:$0xff] }
 0x241   : > { %3176 = vperm.xlu1 %4561, %v3101_v30  }
 0x244   : > { %3179 = vperm.xlu0 %4560, %v3102_v56  }
 0x245   : > { %3182 = vperm.xlu1 %4561, %v3103_v3  }
 0x248   : > { %3185 = vperm.xlu0 %4560, %v3104_v34  }
 0x249   : > { %3188 = vperm.xlu1 %4561, %v3105_v53  }
 0x24c   : > { %3191 = vperm.xlu0 %4560, %v3106_v31  }
 0x24d   : > { %3194 = vperm.xlu1 %4561, %v3107_v16  }
 0x250   : > { %3197 = vperm.xlu0 %4560, %v3108_v11  }
 0x251   : > { %3200 = vperm.xlu1 %4561, %v3109_v37  }
 0x254   : > { %3209 = vperm.xlu0 %4560, %v3112_v41  }
 0x255   : > { %3212 = vperm.xlu1 %4561, %v3113_v63  }
 0x258   : > { %3215 = vperm.xlu0 %4560, %v3114_v35  }
 0x259   : > { %3218 = vperm.xlu1 %4561, %v3115_v24  }
 0x25c   : > { %3221 = vperm.xlu0 %4560, %v3116_v0  }
 0x25d   : > { %3224 = vperm.xlu1 %4561, %v3117_v5  }
 0x260   : > { %3227 = vperm.xlu0 %4560, %v3118_v23  }
 0x261   : > { %3230 = vperm.xlu1 %4561, %v3119_v46  }
 0x264   : > { %3233 = vperm.xlu0 %4560, %v3120_v38  }
 0x265   : > { %3236 = vperm.xlu1 %4561, %v3121_v26  }
 0x268   : > { %3239 = vperm.xlu0 %4560, %v3122_v52  }
 0x269   : > { %3242 = vperm.xlu1 %4561, %v3123_v50  }
 0x26c   : > { %3245 = vperm.xlu0 %4560, %v3124_v44  }
 0x26d   : > { %3248 = vperm.xlu1 %4561, %v3125_v28  }
 0x270   : > { %3203 = vperm.xlu0 %4560, %v3110_v4  }
 0x271   : > { %3206 = vperm.xlu1 %4561, %v3111_v61  }
 0x274   : > { %3251 = vperm.xlu0 %4560, %v3126_v49  }
 0x275   : > { %3254 = vperm.xlu1 %4561, %v3127_v18  }
 0x2b7   : > { %v3162_v8 = vpop.permute.xlu0 %3161 }
 0x2b8   : > { %v3168_v55 = vpop.permute.xlu1 %3167  ;;  %v3261_v10 = vrot.slane %v3162_v8, %v5889_v42 }
 0x2b9   : > { %v3272_v6 = vrot.slane %v3168_v55, %v5889_v42 }
 0x2bb   : > { %v3165_v33 = vpop.permute.xlu0 %3164 }
 0x2bc   : > { %v3171_v19 = vpop.permute.xlu1 %3170  ;;  %v3266_v2 = vrot.slane %v3165_v33, %v5887_v1 }
 0x2bd   : > { %v3276_v58 = vrot.slane %v3171_v19, %v5887_v1 }
 0x2be   : > { %v3268_v56 = vsel %vm3267_vm10, %v3266_v2, %v3261_v10 }
 0x2bf   : > { %v3174_v14 = vpop.permute.xlu0 %3173  ;;  %v3277_v3 = vsel %vm3267_vm10, %v3276_v58, %v3272_v6 }
 0x2c0   : > { %v3177_v54 = vpop.permute.xlu1 %3176  ;;  %v3281_v39 = vrot.slane %v3174_v14, %v5889_v42  ;;  %v3405_v37 = vsel %vm3404_vm11, %v3277_v3, %v3268_v56 }
 0x2c1   : > { %v3285_v13 = vrot.slane %v3177_v54, %v5887_v1 }
 0x2c3   : > { %v3180_v27 = vpop.permute.xlu0 %3179  ;;  %v3286_v53 = vsel %vm3267_vm10, %v3285_v13, %v3281_v39 }
 0x2c4   : > { %v3183_v59 = vpop.permute.xlu1 %3182  ;;  %v3290_v7 = vrot.slane %v3180_v27, %v5889_v42  ;;  %v3407_v41 = vsel %vm3406_vm12, %v3286_v53, %v3405_v37 }
 0x2c5   : > { %v3294_v12 = vrot.slane %v3183_v59, %v5887_v1 }
 0x2c7   : > { %v3186_v48 = vpop.permute.xlu0 %3185  ;;  %v3295_v31 = vsel %vm3267_vm10, %v3294_v12, %v3290_v7 }
 0x2c8   : > { %v3189_v47 = vpop.permute.xlu1 %3188  ;;  %v3299_v16 = vrot.slane %v3186_v48, %v5889_v42  ;;  %v3409_v24 = vsel %vm3408_vm13, %v3295_v31, %v3407_v41 }
 0x2c9   : > { %v3303_v34 = vrot.slane %v3189_v47, %v5887_v1 }
 0x2cb   : > { %v5877_v45 = vpop.permute.xlu0 %3191  ;;  %v3304_v35 = vsel %vm3267_vm10, %v3303_v34, %v3299_v16 }
 0x2cc   : > { %v5875_v9 = vpop.permute.xlu1 %3194  ;;  %v3308_v0 = vrot.slane %v5877_v45, %v5889_v42  ;;  %v3411_v55 = vsel %vm3410_vm14, %v3304_v35, %v3409_v24 }
 0x2cd   : > { %v3312_v5 = vrot.slane %v5875_v9, %v5887_v1 }
 0x2cf   : > { %v5881_v51 = vpop.permute.xlu0 %3197  ;;  %v3313_v33 = vsel %vm3267_vm10, %v3312_v5, %v3308_v0 }
 0x2d0   : > { %v5879_v25 = vpop.permute.xlu1 %3200  ;;  %v3317_v38 = vrot.slane %v5881_v51, %v5889_v42  ;;  %v3413_v17 = vsel %vm3412_vm15, %v3313_v33, %v3411_v55 }
 0x2d1   : > { %v3321_v26 = vrot.slane %v5879_v25, %v5887_v1 }
 0x2d3   : > { %v5885_v32 = vpop.permute.xlu0 %3209  ;;  %v3322_v27 = vsel %vm3267_vm10, %v3321_v26, %v3317_v38 }
 0x2d4   : > { %v5883_v43 = vpop.permute.xlu1 %3212  ;;  %v3335_v4 = vrot.slane %v5885_v32, %v5889_v42  ;;  %v3415_v22 = vsel %vm3414_vm0, %v3322_v27, %v3413_v17 }
 0x2d5   : > { %v3339_v61 = vrot.slane %v5883_v43, %v5887_v1 }
 0x2d7   : > { %v3216_v15 = vpop.permute.xlu0 %3215  ;;  %v3340_v51 = vsel %vm3267_vm10, %v3339_v61, %v3335_v4 }
 0x2d8   : > { %v3219_v57 = vpop.permute.xlu1 %3218  ;;  %v3344_v23 = vrot.slane %v3216_v15, %v5889_v42 }
 0x2d9   : > { %v3348_v46 = vrot.slane %v3219_v57, %v5887_v1 }
 0x2db   : > { %v3222_v21 = vpop.permute.xlu0 %3221  ;;  %v3349_v54 = vsel %vm3267_vm10, %v3348_v46, %v3344_v23 }
 0x2dc   : > { %v3225_v36 = vpop.permute.xlu1 %3224  ;;  %v3353_v52 = vrot.slane %v3222_v21, %v5889_v42  ;;  %v3418_v57 = vsel %vm3404_vm11, %v3349_v54, %v3340_v51 }
 0x2dd   : > { %v3357_v50 = vrot.slane %v3225_v36, %v5887_v1 }
 0x2df   : > { %v3228_v29 = vpop.permute.xlu0 %3227  ;;  %v3358_v47 = vsel %vm3267_vm10, %v3357_v50, %v3353_v52 }
 0x2e0   : > { %v3231_v40 = vpop.permute.xlu1 %3230  ;;  %v3362_v49 = vrot.slane %v3228_v29, %v5889_v42  ;;  %v3419_v60 = vsel %vm3406_vm12, %v3358_v47, %v3418_v57 }
 0x2e1   : > { %v3366_v18 = vrot.slane %v3231_v40, %v5887_v1 }
 0x2e3   : > { %v3234_v62 = vpop.permute.xlu0 %3233  ;;  %v3367_v20 = vsel %vm3267_vm10, %v3366_v18, %v3362_v49 }
 0x2e4   : > { %v3237_v30 = vpop.permute.xlu1 %3236  ;;  %v3371_v19 = vrot.slane %v3234_v62, %v5889_v42  ;;  %v3420_v40 = vsel %vm3408_vm13, %v3367_v20, %v3419_v60 }
 0x2e5   : > { %v3375_v8 = vrot.slane %v3237_v30, %v5887_v1 }
 0x2e7   : > { %v3240_v63 = vpop.permute.xlu0 %3239  ;;  %v3376_v15 = vsel %vm3267_vm10, %v3375_v8, %v3371_v19 }
 0x2e8   : > { %v3243_v11 = vpop.permute.xlu1 %3242  ;;  %v3380_v59 = vrot.slane %v3240_v63, %v5889_v42  ;;  %v3421_v39 = vsel %vm3410_vm14, %v3376_v15, %v3420_v40 }
 0x2e9   : > { %v3384_v14 = vrot.slane %v3243_v11, %v5887_v1 }
 0x2eb   : > { %v3246_v44 = vpop.permute.xlu0 %3245  ;;  %v3385_v36 = vsel %vm3267_vm10, %v3384_v14, %v3380_v59 }
 0x2ec   : > { %v3249_v28 = vpop.permute.xlu1 %3248  ;;  %v3389_v9 = vrot.slane %v3246_v44, %v5889_v42  ;;  %v3422_v12 = vsel %vm3412_vm15, %v3385_v36, %v3421_v39 }
 0x2ed   : > { %v3393_v48 = vrot.slane %v3249_v28, %v5887_v1 }
 0x2ef   : > { %v3204_v25 = vpop.permute.xlu0 %3203  ;;  %v3394_v29 = vsel %vm3267_vm10, %v3393_v48, %v3389_v9 }
 0x2f0   : > { %v3207_v45 = vpop.permute.xlu1 %3206  ;;  %v3326_v32 = vrot.slane %v3204_v25, %v5889_v42  ;;  %v3423_v7 = vsel %vm3414_vm0, %v3394_v29, %v3422_v12 }
 0x2f1   : > { %v3330_v43 = vrot.slane %v3207_v45, %v5887_v1 }
 0x2f3   : > { %v3331_v21 = vsel %vm3267_vm10, %v3330_v43, %v3326_v32  ;;  %v3252_v13 = vpop.permute.xlu0 %3251 }
 0x2f4   : > { %v3417_v58 = vsel %vm3416_vm1, %v3331_v21, %v3415_v22  ;;  %v3255_v2 = vpop.permute.xlu1 %3254  ;;  %v3398_v10 = vrot.slane %v3252_v13, %v5889_v42 }
 0x2f5   : > { %3428 = vst.msk [vmem:[%s4661_s25] sm:$0xff] %vm3427_vm2, %v3417_v58  ;;  %v3402_v6 = vrot.slane %v3255_v2, %v5887_v1 }
 0x2f7   : > { %v3403_v30 = vsel %vm3267_vm10, %v3402_v6, %v3398_v10 }
 0x2f8   : > { %v3424_v62 = vsel %vm3416_vm1, %v3403_v30, %v3423_v7 }
 0x2f9   : > { %3429 = vst.msk [vmem:[%s4661_s25 + $0x8] sm:$0xff] %vm3427_vm2, %v3424_v62 }
 0x2fa PF: > { %s12_s13 = sadd.s32 1, %s4600_s13   ;;  %s6108_s9 = smov %s4592_s11 }
 0x2fb   : > { %p9_p11 = scmp.ge.s32.totalorder %s12_s13, 14   ;;  %s6109_s10 = smov %s4596_s12 }
 0x2fc   : > { %s6110_s11 = smov %s6113_s14  ;;  %s6111_s12 = smov %s6117_s15 }
 0x2fd   :  { %11 = sbr.rel (!%p9_p11) target bundleno = 3 (0x3), region = 73 }

</bundles_post_ra>
